<compile_context>
chip_gen: v5e
topology: v5e:2x2
jax: 0.10.0
libtpu: 0.0.40
codegen_flags: <defaults>
</compile_context>

<pallas_src>
import numpy as np

import jax
import jax.numpy as jnp
from jax import lax
from jax.experimental import pallas as pl
from jax.experimental.pallas import tpu as pltpu


def _vmem_limit(*nbytes):
    """Scoped-VMEM limit: 2x the estimated footprint, in [32 MiB, 48 MiB]."""
    need = int(sum(int(n) for n in nbytes))
    return int(min(48 * 2 ** 20, max(32 * 2 ** 20, 2 * need)))


def _pick_block_sub(n, cap):
    """Sublane-axis batch block: whole axis if small, else an 8-aligned cap."""
    if n <= cap:
        return n
    return max(8, (cap // 8) * 8)


def _pick_block_lane(n, cap):
    """Lane-axis batch block: whole axis if small, else a 128-aligned cap."""
    if n <= cap:
        return n
    return max(128, (cap // 128) * 128)


# ---------------------------------------------------------------------------
# Kernel 1: char CNN (conv1d k=3 pad=1, taps fused) + global max-pool
# ---------------------------------------------------------------------------
def char_cnn_kernel(x_ref, w_ref, b_ref, out_ref):
    # x_ref: [CBb, CL, E] bf16 ; w_ref: [E, 3*Hc] bf16 (taps concatenated)
    # b_ref: [1, Hc] f32 ; out_ref: [CBb, Hc] bf16
    CBb, CL, E = x_ref.shape
    Hc = out_ref.shape[1]

    x2 = x_ref[...].reshape(CBb * CL, E)
    y = jnp.dot(x2, w_ref[...], preferred_element_type=jnp.float32)
    y = y.reshape(CBb, CL, 3 * Hc)
    y0 = y[:, :, 0:Hc]             # tap k=0 -> contributes to out[t+1]
    y1 = y[:, :, Hc:2 * Hc]        # tap k=1 -> out[t]
    y2 = y[:, :, 2 * Hc:3 * Hc]    # tap k=2 -> out[t-1]

    # conv[t] = y0[t-1] + y1[t] + y2[t+1]  (zero halo); no VMEM scratch -
    # interior positions and the two boundary positions are combined directly
    # in the max (bias is added once after the pool: max(x)+b == max(x+b)).
    conv_mid = y1[:, 1:CL - 1, :] + y0[:, 0:CL - 2, :] + y2[:, 2:CL, :]
    conv_lo = y1[:, 0:1, :] + y2[:, 1:2, :]                   # position 0
    conv_hi = y1[:, CL - 1:CL, :] + y0[:, CL - 2:CL - 1, :]   # position CL-1
    pooled = jnp.maximum(jnp.maximum(jnp.max(conv_mid, axis=1),
                                     jnp.max(conv_lo, axis=1)),
                         jnp.max(conv_hi, axis=1))            # [CBb, Hc]
    out_ref[...] = (pooled + b_ref[...]).astype(out_ref.dtype)


def char_cnn_maxpool(char_emb_bf16, w_cat, b, *, block_cb=2048):
    CB, CL, E = char_emb_bf16.shape
    Hc = b.shape[1]
    assert CL >= 3, "char CNN kernel assumes padded char length >= 3"
    blk = _pick_block_sub(CB, block_cb)
    return pl.pallas_call(
        char_cnn_kernel,
        out_shape=jax.ShapeDtypeStruct((CB, Hc), jnp.bfloat16),
        grid_spec=pltpu.PrefetchScalarGridSpec(
            num_scalar_prefetch=0,
            grid=(pl.cdiv(CB, blk),),
            in_specs=[pl.BlockSpec((blk, CL, E), lambda i: (i, 0, 0)),
                      pl.BlockSpec((E, 3 * Hc), lambda i: (0, 0)),
                      pl.BlockSpec((1, Hc), lambda i: (0, 0))],
            out_specs=pl.BlockSpec((blk, Hc), lambda i: (i, 0)),
            scratch_shapes=[]),
        compiler_params=pltpu.CompilerParams(
            dimension_semantics=("parallel",),
            vmem_limit_bytes=_vmem_limit(blk * CL * E * 2 * 2,
                                         E * 3 * Hc * 2,
                                         blk * CL * 3 * Hc * 4 * 2,
                                         blk * Hc * 2 * 2)),
    )(char_emb_bf16, w_cat, b)


# ---------------------------------------------------------------------------
# Kernel 2: masked BiLSTM (fused input projections) + hidden2tag linear
# emitted directly in [S, T, Bb] (batch-on-lanes) layout for the CRF.
# ---------------------------------------------------------------------------
def bilstm_tag_kernel(x_ref, len_ref, wih_ref, whhf_ref, whhb_ref, bg_ref,
                      wtagt_ref, btag_ref, out_ref, xg_ref, hout_ref):
    # x_ref:     [S, Bb, Dp] bf16 time-major (Dp = Din zero-padded to lanes)
    # len_ref:   [Bb, 1] int32 lengths
    # wih_ref:   [Dp, 8H] bf16 = [Wih_f | Wih_b] ; bg_ref: [1, 8H] f32
    # whhf_ref / whhb_ref: [H, 4H] bf16 per-direction recurrent weights
    # wtagt_ref: [T, 2H] bf16 (hidden2tag weight, transposed) ; btag_ref: [T, 1]
    # out_ref:   [S, T, Bb] f32 tag scores (padded steps -> bias-only rows)
    # xg_ref:    [S, Bb, 8H] f32 scratch ; hout_ref: [S, Bb, 2H] bf16 scratch
    S, Bb, Dp = x_ref.shape
    H, G = whhf_ref.shape             # H, 4H
    G2 = 2 * G
    H2 = 2 * H

    # single fused input projection for both directions (one big MXU matmul)
    x2 = x_ref[...].reshape(S * Bb, Dp)
    xg_ref[...] = (jnp.dot(x2, wih_ref[...], preferred_element_type=jnp.float32)
                   + bg_ref[...]).reshape(S, Bb, G2)

    lengths = len_ref[...]            # [Bb, 1] int32
    whh_f = whhf_ref[...]             # bf16, hoisted out of the loop
    whh_b = whhb_ref[...]

    def sig(v):                       # EUP-only sigmoid (no VPU divide)
        return 0.5 * (jnp.tanh(0.5 * v) + 1.0)

    def cell(g, c_prev):              # PyTorch gate order: i, f, g, o
        i = sig(g[:, 0:H])
        f = sig(g[:, H:2 * H])
        gg = jnp.tanh(g[:, 2 * H:3 * H])
        o = sig(g[:, 3 * H:4 * H])
        c = f * c_prev + i * gg
        return o * jnp.tanh(c), c

    def step(t, carry):
        hf, cf, hb, cb = carry        # state lives in vregs (loop carry), f32
        rt = S - 1 - t
        m_f = t < lengths             # [Bb, 1] bool
        m_b = rt < lengths
        # per-direction recurrent matmuls (bf16 operands, no zero half)
        rec_f = jnp.dot(hf.astype(jnp.bfloat16), whh_f,
                        preferred_element_type=jnp.float32)   # [Bb, 4H]
        rec_b = jnp.dot(hb.astype(jnp.bfloat16), whh_b,
                        preferred_element_type=jnp.float32)
        g_f = xg_ref[t, :, 0:G] + rec_f
        g_b = xg_ref[rt, :, G:G2] + rec_b
        hf_new, cf_new = cell(g_f, cf)
        hb_new, cb_new = cell(g_b, cb)
        # pad_packed semantics: padded timesteps emit zeros (bf16 scratch)
        hout_ref[t, :, 0:H] = jnp.where(m_f, hf_new, 0.0).astype(jnp.bfloat16)
        hout_ref[rt, :, H:H2] = jnp.where(m_b, hb_new, 0.0).astype(jnp.bfloat16)
        # pack_padded semantics: finished sequences keep their state frozen
        hf = jnp.where(m_f, hf_new, hf)
        cf = jnp.where(m_f, cf_new, cf)
        hb = jnp.where(m_b, hb_new, hb)
        cb = jnp.where(m_b, cb_new, cb)
        return hf, cf, hb, cb

    z = jnp.zeros((Bb, H), jnp.float32)
    unroll = True if S <= 32 else 8
    lax.fori_loop(0, S, step, (z, z, z, z), unroll=unroll)

    # hidden2tag, emitted directly as [S, T, Bb] (batch on lanes): per time
    # slab compute [T,2H] x [Bb,2H]^T -> [T,Bb]; stores are lane-dense.
    wtag_t = wtagt_ref[...]           # [T, 2H] bf16
    btag = btag_ref[...]              # [T, 1] f32

    def tag_step(s, carry):
        h_s = hout_ref[s]             # [Bb, 2H] bf16
        f = lax.dot_general(wtag_t, h_s, (((1,), (1,)), ((), ())),
                            preferred_element_type=jnp.float32)   # [T, Bb]
        out_ref[s] = f + btag
        return carry

    lax.fori_loop(0, S, tag_step, 0, unroll=unroll)


def bilstm_hidden2tag(x_tm_bf16, lengths, kp, *, block_b=128):
    S, B, Dp = x_tm_bf16.shape
    H, G = kp['whh_f'].shape
    G2 = 2 * G
    H2 = 2 * H
    T = kp['wtag_t'].shape[0]
    Bb = _pick_block_lane(B, block_b)
    # TODO(synk): for very long sequences, chunk xg/hout over S (nested
    # emit_pipeline) so the S-scaled scratch fits v7x's 64 MiB VMEM; on v7x the
    # fwd/bwd directions could also be split across the two TensorCores.
    return pl.pallas_call(
        bilstm_tag_kernel,
        out_shape=jax.ShapeDtypeStruct((S, T, B), jnp.float32),
        grid_spec=pltpu.PrefetchScalarGridSpec(
            num_scalar_prefetch=0,
            grid=(pl.cdiv(B, Bb),),
            in_specs=[pl.BlockSpec((S, Bb, Dp), lambda i: (0, i, 0)),
                      pl.BlockSpec((Bb, 1), lambda i: (i, 0)),
                      pl.BlockSpec((Dp, G2), lambda i: (0, 0)),
                      pl.BlockSpec((H, G), lambda i: (0, 0)),
                      pl.BlockSpec((H, G), lambda i: (0, 0)),
                      pl.BlockSpec((1, G2), lambda i: (0, 0)),
                      pl.BlockSpec((T, H2), lambda i: (0, 0)),
                      pl.BlockSpec((T, 1), lambda i: (0, 0))],
            out_specs=pl.BlockSpec((S, T, Bb), lambda i: (0, 0, i)),
            scratch_shapes=[pltpu.VMEM((S, Bb, G2), jnp.float32),
                            pltpu.VMEM((S, Bb, H2), jnp.bfloat16)]),
        compiler_params=pltpu.CompilerParams(
            dimension_semantics=("parallel",),
            vmem_limit_bytes=_vmem_limit(
                S * Bb * Dp * 2 * 2, Dp * G2 * 2, 2 * H * G * 2, G2 * 4,
                T * H2 * 2, S * Bb * G2 * 4, S * Bb * H2 * 2,
                S * T * Bb * 4 * 2)),
    )(x_tm_bf16, lengths, kp['wih_cat'], kp['whh_f'], kp['whh_b'],
      kp['b_cat'], kp['wtag_t'], kp['btag_col'])


# ---------------------------------------------------------------------------
# Kernel 3: CRF Viterbi decode (NCRF++ semantics, START = T-2, STOP = T-1),
# fully batch-on-lanes layout.
# ---------------------------------------------------------------------------
def viterbi_kernel(feats_ref, len_ref, transt_ref, start_ref, stop_ref,
                   out_ref, bp_ref):
    # feats_ref: [S, T, Bb] f32 ; len_ref: [1, Bb] int32
    # transt_ref: [T, T] f32 with transt[to, from] = trans[from, to]
    # start_ref: [T, 1] = trans[START, :]^T ; stop_ref: [T, 1] = trans[:, STOP]
    # out_ref: [S, Bb] int32 ; bp_ref: [S, T, Bb] int32 scratch
    S, T, Bb = feats_ref.shape
    lengths = len_ref[...]                                       # [1, Bb]
    trans3 = jnp.broadcast_to(transt_ref[...][:, :, None], (T, T, Bb))  # hoisted
    iota_from = lax.broadcasted_iota(jnp.int32, (T, T, Bb), 1)   # 'from' axis
    iota_tag = lax.broadcasted_iota(jnp.int32, (T, Bb), 0)
    unroll = True if S <= 32 else 8

    partition0 = feats_ref[0] + start_ref[...]                   # [T, Bb]
    last0 = partition0 * (lengths == 1).astype(jnp.float32)

    def fwd_step(idx, carry):
        partition, last_part = carry
        # cur[to, from, b]; max / first-argmax reduce over the 'from' axis
        cur = feats_ref[idx][:, None, :] + trans3 + partition[None, :, :]
        new_part = jnp.max(cur, axis=1)                           # [T, Bb]
        bp = jnp.min(jnp.where(cur >= new_part[:, None, :], iota_from, T),
                     axis=1)                                      # first argmax
        bp = jnp.where(idx >= lengths, 0, bp).astype(jnp.int32)   # padded -> 0
        bp_ref[idx - 1] = bp
        last_part = last_part + new_part * (idx == (lengths - 1)).astype(jnp.float32)
        return new_part, last_part

    _, last_partition = lax.fori_loop(1, S, fwd_step, (partition0, last0),
                                      unroll=unroll)

    # best predecessor entering STOP (only the STOP column is needed)
    lv = last_partition + stop_ref[...]                           # [T, Bb]
    lv_max = jnp.max(lv, axis=0, keepdims=True)                   # [1, Bb]
    pointer = jnp.min(jnp.where(lv >= lv_max, iota_tag, T),
                      axis=0, keepdims=True).astype(jnp.int32)    # [1, Bb]

    out_ref[pl.ds(S - 1, 1), :] = pointer                         # decode[S-1]

    def back_step(k, ptr):
        idx = S - 2 - k
        row = bp_ref[idx]                                         # [T, Bb]
        gathered = jnp.sum(row * (iota_tag == ptr).astype(jnp.int32),
                           axis=0, keepdims=True)                 # row[ptr[b], b]
        # NCRF++ inserts the final pointer at position length-1 of back_points
        new_ptr = jnp.where(idx == (lengths - 1), pointer, gathered)
        out_ref[pl.ds(idx, 1), :] = new_ptr                       # direct row store
        return new_ptr

    lax.fori_loop(0, S - 1, back_step, pointer, unroll=unroll)


def viterbi_decode(feats_stb, trans_t, start_col, stop_col, lengths_row, *,
                   block_b=128):
    S, T, B = feats_stb.shape
    Bb = _pick_block_lane(B, block_b)
    return pl.pallas_call(
        viterbi_kernel,
        out_shape=jax.ShapeDtypeStruct((S, B), jnp.int32),
        grid_spec=pltpu.PrefetchScalarGridSpec(
            num_scalar_prefetch=0,
            grid=(pl.cdiv(B, Bb),),
            in_specs=[pl.BlockSpec((S, T, Bb), lambda i: (0, 0, i)),
                      pl.BlockSpec((1, Bb), lambda i: (0, i)),
                      pl.BlockSpec((T, T), lambda i: (0, 0)),
                      pl.BlockSpec((T, 1), lambda i: (0, 0)),
                      pl.BlockSpec((T, 1), lambda i: (0, 0))],
            out_specs=pl.BlockSpec((S, Bb), lambda i: (0, i)),
            scratch_shapes=[pltpu.VMEM((S, T, Bb), jnp.int32)]),
        compiler_params=pltpu.CompilerParams(
            dimension_semantics=("parallel",),
            vmem_limit_bytes=_vmem_limit(S * T * Bb * 4 * 2, T * T * 4,
                                         T * T * Bb * 4 * 3,
                                         S * T * Bb * 4, S * Bb * 4 * 2)),
    )(feats_stb, lengths_row, trans_t, start_col, stop_col)


# ---------------------------------------------------------------------------
# Full forward pass (glue in plain JAX: embedding gathers, reorder, concat)
# ---------------------------------------------------------------------------
@jax.jit
def cnn_lstm_crf_forward(kp, batch_word, batch_features, batch_wordlen,
                         batch_char, batch_charlen, batch_charrecover, mask):
    del batch_charlen  # reference CNN char path pools over the full char dim
    B, S = batch_word.shape
    Hc = kp['cnn_b'].shape[1]

    # --- char path: embedding lookup (glue) -> fused conv1d + max-pool ---
    char_emb = jnp.take(kp['char_emb'], batch_char, axis=0).astype(jnp.bfloat16)
    char_pool = char_cnn_maxpool(char_emb, kp['cnn_w_cat'], kp['cnn_b'])   # [CB, Hc] bf16
    char_pool = jnp.take(char_pool, batch_charrecover, axis=0)             # recover order
    char_features = char_pool.reshape(B, S, Hc)

    # --- word / feature embeddings (dropouts identity in eval), all bf16 ---
    feat_embeds = jnp.take(kp['feat_emb'], batch_features, axis=0).astype(jnp.bfloat16)
    feat_embeds = jnp.repeat(feat_embeds, S, axis=1)                        # repeat_interleave dim=1
    word_embeds = jnp.take(kp['word_emb'], batch_word, axis=0).astype(jnp.bfloat16)
    word_represent = jnp.concatenate([word_embeds, char_features, feat_embeds], axis=2)

    # --- BiLSTM + hidden2tag (time-major, length-masked, Din padded to lanes) ---
    Din = word_represent.shape[2]
    Dp = kp['wih_cat'].shape[0]
    if Dp > Din:
        word_represent = jnp.pad(word_represent, ((0, 0), (0, 0), (0, Dp - Din)))
    x_tm = jnp.transpose(word_represent, (1, 0, 2))                         # [S, B, Dp] bf16
    lstm_lens = batch_wordlen.astype(jnp.int32).reshape(B, 1)
    feats_stb = bilstm_hidden2tag(x_tm, lstm_lens, kp)                      # [S, T, B]

    # --- CRF Viterbi decode (lengths derived from the CRF mask) ---
    crf_lens = jnp.sum(mask.astype(jnp.int32), axis=1).reshape(1, B)
    decode_sb = viterbi_decode(feats_stb, kp['trans_t'], kp['start_col'],
                               kp['stop_col'], crf_lens)                    # [S, B]
    # TODO(synk): crf.neg_log_likelihood_loss (training path) not implemented.
    return jnp.transpose(decode_sb)                                         # [B, S]


# ---------------------------------------------------------------------------
# Deterministic synthetic parameter init (PyTorch layout) + kernel packing
# ---------------------------------------------------------------------------
def init_params(key, cfg):
    ks = jax.random.split(key, 16)

    def unif(k, shape, scale):
        return jax.random.uniform(k, shape, jnp.float32, -scale, scale)

    H = cfg['word_hidden_dim'] // 2
    Din = cfg['char_hidden_dim'] + cfg['word_emb_dim'] + cfg['feature_emb_dim']
    T = cfg['label_alphabet_size'] + 2
    START, STOP = T - 2, T - 1
    klstm = 1.0 / np.sqrt(H)

    trans = unif(ks[14], (T, T), 0.1)
    trans = trans.at[:, START].set(-10000.0)
    trans = trans.at[STOP, :].set(-10000.0)
    trans = trans.at[:, 0].set(-10000.0)
    trans = trans.at[0, :].set(-10000.0)

    return {
        'char_emb': unif(ks[0], (cfg['char_alphabet_size'], cfg['char_emb_dim']),
                         np.sqrt(3.0 / cfg['char_emb_dim'])),
        'word_emb': unif(ks[1], (cfg['word_alphabet_size'], cfg['word_emb_dim']),
                         np.sqrt(3.0 / cfg['word_emb_dim'])),
        'feat_emb': jax.random.normal(ks[2], (cfg['feat_alphabet_size'],
                                              cfg['feature_emb_dim']), jnp.float32),
        # conv1d weight as [kernel=3, in=E, out=Hc] (tap-major, pre-transposed)
        'cnn_w': unif(ks[3], (3, cfg['char_emb_dim'], cfg['char_hidden_dim']),
                      1.0 / np.sqrt(3 * cfg['char_emb_dim'])),
        'cnn_b': unif(ks[4], (1, cfg['char_hidden_dim']),
                      1.0 / np.sqrt(3 * cfg['char_emb_dim'])),
        # LSTM weights pre-transposed: [in, 4H] / [H, 4H]; b = b_ih + b_hh
        'wih_f': unif(ks[5], (Din, 4 * H), klstm),
        'whh_f': unif(ks[6], (H, 4 * H), klstm),
        'b_f': unif(ks[7], (1, 4 * H), klstm),
        'wih_b': unif(ks[8], (Din, 4 * H), klstm),
        'whh_b': unif(ks[9], (H, 4 * H), klstm),
        'b_b': unif(ks[10], (1, 4 * H), klstm),
        # hidden2tag Linear stored as [2H, T]
        'wtag': unif(ks[11], (cfg['word_hidden_dim'], T),
                     1.0 / np.sqrt(cfg['word_hidden_dim'])),
        'btag': unif(ks[12], (1, T), 1.0 / np.sqrt(cfg['word_hidden_dim'])),
        'trans': trans,
    }


def pack_params(p):
    """Fuse / permute the PyTorch-layout weights into the kernel-ready layout."""
    T = p['trans'].shape[0]
    START, STOP = T - 2, T - 1
    Din = p['wih_f'].shape[0]
    Dp = int(np.maximum(128, ((Din + 127) // 128) * 128))   # lane-aligned K dim
    wih_cat = jnp.concatenate([p['wih_f'], p['wih_b']], axis=1)   # [Din, 8H]
    if Dp > Din:
        wih_cat = jnp.pad(wih_cat, ((0, Dp - Din), (0, 0)))
    return {
        'char_emb': p['char_emb'],
        'word_emb': p['word_emb'],
        'feat_emb': p['feat_emb'],
        # conv taps concatenated -> one [E, 3*Hc] matmul (bf16 on the MXU)
        'cnn_w_cat': jnp.concatenate([p['cnn_w'][0], p['cnn_w'][1],
                                      p['cnn_w'][2]], axis=1).astype(jnp.bfloat16),
        'cnn_b': p['cnn_b'],
        # fwd/bwd input projections fused + zero-padded to Dp: [Dp, 8H] bf16
        'wih_cat': wih_cat.astype(jnp.bfloat16),
        'b_cat': jnp.concatenate([p['b_f'], p['b_b']], axis=1),
        # per-direction recurrent weights, bf16 (serial critical path)
        'whh_f': p['whh_f'].astype(jnp.bfloat16),
        'whh_b': p['whh_b'].astype(jnp.bfloat16),
        # hidden2tag weight transposed for the [T,2H] x [Bb,2H]^T slab matmul
        'wtag_t': jnp.transpose(p['wtag']).astype(jnp.bfloat16),    # [T, 2H]
        'btag_col': jnp.transpose(p['btag']),                       # [T, 1]
        # CRF transitions: trans_t[to, from] for the batch-on-lanes DP, plus
        # the START row / STOP column as [T, 1] columns
        'trans_t': jnp.transpose(p['trans']),
        'start_col': jnp.transpose(p['trans'][START:START + 1, :]),  # [T, 1]
        'stop_col': p['trans'][:, STOP:STOP + 1],                    # [T, 1]
    }


if __name__ == "__main__":
    cfg = dict(char_alphabet_size=30, char_emb_dim=16, char_hidden_dim=32,
               word_alphabet_size=50, word_emb_dim=32,
               feat_alphabet_size=5, feature_emb_dim=16,
               word_hidden_dim=128,        # H=64 -> 2H=128 / 4H=256 (lane dense)
               label_alphabet_size=6, dropout=0.5)

    B, S, CL = 2, 8, 16
    key = jax.random.PRNGKey(0)
    pkey, dkey = jax.random.split(key)
    params = init_params(pkey, cfg)
    kp = pack_params(params)

    kk = jax.random.split(dkey, 6)
    batch_word = jax.random.randint(kk[0], (B, S), 0, cfg['word_alphabet_size'], jnp.int32)
    batch_features = jax.random.randint(kk[1], (B, 1), 0, cfg['feat_alphabet_size'], jnp.int32)
    batch_wordlen = jnp.array([S, 5], jnp.int32)          # sorted desc; max == S (pack_padded)
    batch_char = jax.random.randint(kk[2], (B * S, CL), 0, cfg['char_alphabet_size'], jnp.int32)
    batch_charlen = jnp.full((B * S,), CL, jnp.int32)     # unused by the CNN char path
    batch_charrecover = jax.random.permutation(kk[3], B * S).astype(jnp.int32)
    mask = (jnp.arange(S)[None, :] < batch_wordlen[:, None]).astype(jnp.float32)

    tag_seq = cnn_lstm_crf_forward(kp, batch_word, batch_features, batch_wordlen,
                                   batch_char, batch_charlen, batch_charrecover, mask)
    jax.block_until_ready(tag_seq)
    assert tag_seq.shape == (B, S) and tag_seq.dtype == jnp.int32
    print("KERNEL_OK")
</pallas_src>

<mosaic_0001>
module attributes {stable_mosaic.version = 11 : i64} {
  func.func @char_cnn_kernel(%arg0: i32, %arg1: memref<16x16x16xbf16, #tpu.memory_space<vmem>>, %arg2: memref<16x96xbf16, #tpu.memory_space<vmem>>, %arg3: memref<1x32xf32, #tpu.memory_space<vmem>>, %arg4: memref<16x32xbf16, #tpu.memory_space<vmem>>) attributes {dimension_semantics = [#tpu.dimension_semantics<parallel>], iteration_bounds = array<i64: 1>, scalar_prefetch = 0 : i64, scratch_operands = 0 : i64, tpu.core_type = #tpu.core_type<tc>, window_params = [{transform_indices = @transform_0, window_bounds = array<i64: 16, 16, 16>}, {pipeline_mode = #tpu.pipeline_mode<synchronous>, transform_indices = @transform_1, window_bounds = array<i64: 16, 96>}, {pipeline_mode = #tpu.pipeline_mode<synchronous>, transform_indices = @transform_2, window_bounds = array<i64: 1, 32>}, {transform_indices = @transform_3, window_bounds = array<i64: 16, 32>}]} {
    %c0 = arith.constant 0 : index
    %c0_0 = arith.constant 0 : index
    %c0_1 = arith.constant 0 : index
    %0 = vector.load %arg1[%c0, %c0_0, %c0_1] : memref<16x16x16xbf16, #tpu.memory_space<vmem>>, vector<16x16x16xbf16>
    %1 = vector.shape_cast %0 : vector<16x16x16xbf16> to vector<256x16xbf16>
    %c0_2 = arith.constant 0 : index
    %c0_3 = arith.constant 0 : index
    %2 = vector.load %arg2[%c0_2, %c0_3] : memref<16x96xbf16, #tpu.memory_space<vmem>>, vector<16x96xbf16>
    %cst = arith.constant dense<0.000000e+00> : vector<256x96xf32>
    %3 = tpu.matmul %1, %2, %cst {dimension_numbers = #tpu.dot_dimension_numbers<[1], [0], [0], [1], [0, 0, 1, 1], [], []>} : vector<256x16xbf16>, vector<16x96xbf16>, vector<256x96xf32> -> vector<256x96xf32>
    %4 = vector.shape_cast %3 : vector<256x96xf32> to vector<16x16x96xf32>
    %5 = vector.extract_strided_slice %4 {offsets = [0, 0, 0], sizes = [16, 16, 32], strides = [1, 1, 1]} : vector<16x16x96xf32> to vector<16x16x32xf32>
    %6 = vector.extract_strided_slice %4 {offsets = [0, 0, 32], sizes = [16, 16, 32], strides = [1, 1, 1]} : vector<16x16x96xf32> to vector<16x16x32xf32>
    %7 = vector.extract_strided_slice %4 {offsets = [0, 0, 64], sizes = [16, 16, 32], strides = [1, 1, 1]} : vector<16x16x96xf32> to vector<16x16x32xf32>
    %8 = vector.extract_strided_slice %6 {offsets = [0, 1, 0], sizes = [16, 14, 32], strides = [1, 1, 1]} : vector<16x16x32xf32> to vector<16x14x32xf32>
    %9 = vector.extract_strided_slice %5 {offsets = [0, 0, 0], sizes = [16, 14, 32], strides = [1, 1, 1]} : vector<16x16x32xf32> to vector<16x14x32xf32>
    %10 = arith.addf %8, %9 : vector<16x14x32xf32>
    %11 = vector.extract_strided_slice %7 {offsets = [0, 2, 0], sizes = [16, 14, 32], strides = [1, 1, 1]} : vector<16x16x32xf32> to vector<16x14x32xf32>
    %12 = arith.addf %10, %11 : vector<16x14x32xf32>
    %13 = vector.extract_strided_slice %6 {offsets = [0, 0, 0], sizes = [16, 1, 32], strides = [1, 1, 1]} : vector<16x16x32xf32> to vector<16x1x32xf32>
    %14 = vector.extract_strided_slice %7 {offsets = [0, 1, 0], sizes = [16, 1, 32], strides = [1, 1, 1]} : vector<16x16x32xf32> to vector<16x1x32xf32>
    %15 = arith.addf %13, %14 : vector<16x1x32xf32>
    %16 = vector.extract_strided_slice %6 {offsets = [0, 15, 0], sizes = [16, 1, 32], strides = [1, 1, 1]} : vector<16x16x32xf32> to vector<16x1x32xf32>
    %17 = vector.extract_strided_slice %5 {offsets = [0, 14, 0], sizes = [16, 1, 32], strides = [1, 1, 1]} : vector<16x16x32xf32> to vector<16x1x32xf32>
    %18 = arith.addf %16, %17 : vector<16x1x32xf32>
    %cst_4 = arith.constant dense<0xFF800000> : vector<16x32xf32>
    %19 = vector.multi_reduction <maximumf>, %12, %cst_4 [1] : vector<16x14x32xf32> to vector<16x32xf32>
    %cst_5 = arith.constant dense<0xFF800000> : vector<16x32xf32>
    %20 = vector.multi_reduction <maximumf>, %15, %cst_5 [1] : vector<16x1x32xf32> to vector<16x32xf32>
    %21 = arith.maximumf %19, %20 : vector<16x32xf32>
    %cst_6 = arith.constant dense<0xFF800000> : vector<16x32xf32>
    %22 = vector.multi_reduction <maximumf>, %18, %cst_6 [1] : vector<16x1x32xf32> to vector<16x32xf32>
    %23 = arith.maximumf %21, %22 : vector<16x32xf32>
    %c0_7 = arith.constant 0 : index
    %c0_8 = arith.constant 0 : index
    %24 = vector.load %arg3[%c0_7, %c0_8] : memref<1x32xf32, #tpu.memory_space<vmem>>, vector<1x32xf32>
    %25 = vector.broadcast %24 : vector<1x32xf32> to vector<16x32xf32>
    %26 = arith.addf %23, %25 : vector<16x32xf32>
    %27 = arith.truncf %26 : vector<16x32xf32> to vector<16x32xbf16>
    %c0_9 = arith.constant 0 : index
    %c0_10 = arith.constant 0 : index
    %28 = vector.load %arg4[%c0_9, %c0_10] : memref<16x32xbf16, #tpu.memory_space<vmem>>, vector<16x32xbf16>
    tpu.vector_store %arg4[%c0_9, %c0_10], %27 {strides = array<i32>} : memref<16x32xbf16, #tpu.memory_space<vmem>>, vector<16x32xbf16>,
    return
  }
  func.func @transform_0(%arg0: i32) -> (i32, i32, i32) {
    %c0_i32 = arith.constant 0 : i32
    %c0_i32_0 = arith.constant 0 : i32
    %c0_i32_1 = arith.constant 0 : i32
    return %arg0, %c0_i32, %c0_i32_0 : i32, i32, i32
  }
  func.func @transform_1(%arg0: i32) -> (i32, i32) {
    %c0_i32 = arith.constant 0 : i32
    %c0_i32_0 = arith.constant 0 : i32
    %c0_i32_1 = arith.constant 0 : i32
    return %c0_i32, %c0_i32_0 : i32, i32
  }
  func.func @transform_2(%arg0: i32) -> (i32, i32) {
    %c0_i32 = arith.constant 0 : i32
    %c0_i32_0 = arith.constant 0 : i32
    %c0_i32_1 = arith.constant 0 : i32
    return %c0_i32, %c0_i32_0 : i32, i32
  }
  func.func @transform_3(%arg0: i32) -> (i32, i32) {
    %c0_i32 = arith.constant 0 : i32
    %c0_i32_0 = arith.constant 0 : i32
    return %arg0, %c0_i32 : i32, i32
  }
}

module attributes {stable_mosaic.version = 11 : i64} {
  func.func @viterbi_kernel(%arg0: i32, %arg1: memref<8x8x2xf32, #tpu.memory_space<vmem>>, %arg2: memref<1x2xi32, #tpu.memory_space<vmem>>, %arg3: memref<8x8xf32, #tpu.memory_space<vmem>>, %arg4: memref<8x1xf32, #tpu.memory_space<vmem>>, %arg5: memref<8x1xf32, #tpu.memory_space<vmem>>, %arg6: memref<8x2xi32, #tpu.memory_space<vmem>>, %arg7: memref<8x8x2xi32, #tpu.memory_space<vmem>>) attributes {dimension_semantics = [#tpu.dimension_semantics<parallel>], iteration_bounds = array<i64: 1>, scalar_prefetch = 0 : i64, scratch_operands = 1 : i64, tpu.core_type = #tpu.core_type<tc>, window_params = [{transform_indices = @transform_0, window_bounds = array<i64: 8, 8, 2>}, {transform_indices = @transform_1, window_bounds = array<i64: 1, 2>}, {pipeline_mode = #tpu.pipeline_mode<synchronous>, transform_indices = @transform_2, window_bounds = array<i64: 8, 8>}, {pipeline_mode = #tpu.pipeline_mode<synchronous>, transform_indices = @transform_3, window_bounds = array<i64: 8, 1>}, {pipeline_mode = #tpu.pipeline_mode<synchronous>, transform_indices = @transform_4, window_bounds = array<i64: 8, 1>}, {transform_indices = @transform_5, window_bounds = array<i64: 8, 2>}]} {
    %c0 = arith.constant 0 : index
    %c0_0 = arith.constant 0 : index
    %0 = vector.load %arg2[%c0, %c0_0] : memref<1x2xi32, #tpu.memory_space<vmem>>, vector<1x2xi32>
    %c0_1 = arith.constant 0 : index
    %c0_2 = arith.constant 0 : index
    %1 = vector.load %arg3[%c0_1, %c0_2] : memref<8x8xf32, #tpu.memory_space<vmem>>, vector<8x8xf32>
    %2 = vector.shape_cast %1 : vector<8x8xf32> to vector<8x8x1xf32>
    %3 = vector.shape_cast %2 : vector<8x8x1xf32> to vector<8x8x1xf32>
    %4 = vector.broadcast %3 : vector<8x8x1xf32> to vector<8x8x2xf32>
    %5 = tpu.iota {dimensions = array<i32: 1>} : vector<8x8x2xi32>
    %6 = tpu.iota {dimensions = array<i32: 0>} : vector<8x2xi32>
    %c0_3 = arith.constant 0 : index
    %c0_4 = arith.constant 0 : index
    %c0_5 = arith.constant 0 : index
    %7 = vector.load %arg1[%c0_3, %c0_4, %c0_5] : memref<8x8x2xf32, #tpu.memory_space<vmem>>, vector<1x8x2xf32>
    %8 = vector.shape_cast %7 : vector<1x8x2xf32> to vector<8x2xf32>
    %c0_6 = arith.constant 0 : index
    %c0_7 = arith.constant 0 : index
    %9 = vector.load %arg4[%c0_6, %c0_7] : memref<8x1xf32, #tpu.memory_space<vmem>>, vector<8x1xf32>
    %10 = vector.broadcast %9 : vector<8x1xf32> to vector<8x2xf32>
    %11 = arith.addf %8, %10 : vector<8x2xf32>
    %c1_i32 = arith.constant 1 : i32
    %12 = vector.broadcast %c1_i32 : i32 to vector<1x2xi32>
    %13 = arith.cmpi eq, %0, %12 : vector<1x2xi32>
    %14 = arith.extui %13 : vector<1x2xi1> to vector<1x2xi32>
    %15 = arith.sitofp %14 : vector<1x2xi32> to vector<1x2xf32>
    %16 = vector.broadcast %15 : vector<1x2xf32> to vector<8x2xf32>
    %17 = arith.mulf %11, %16 : vector<8x2xf32>
    %c1_i32_8 = arith.constant 1 : i32
    %18 = arith.index_cast %c1_i32_8 : i32 to index
    %c0_9 = arith.constant 0 : index
    %c0_10 = arith.constant 0 : index
    %19 = vector.load %arg1[%18, %c0_9, %c0_10] : memref<8x8x2xf32, #tpu.memory_space<vmem>>, vector<1x8x2xf32>
    %20 = vector.shape_cast %19 : vector<1x8x2xf32> to vector<8x2xf32>
    %21 = vector.shape_cast %20 : vector<8x2xf32> to vector<8x1x2xf32>
    %22 = vector.broadcast %21 : vector<8x1x2xf32> to vector<8x8x2xf32>
    %23 = arith.addf %22, %4 : vector<8x8x2xf32>
    %24 = vector.shape_cast %11 : vector<8x2xf32> to vector<1x8x2xf32>
    %25 = vector.broadcast %24 : vector<1x8x2xf32> to vector<8x8x2xf32>
    %26 = arith.addf %23, %25 : vector<8x8x2xf32>
    %cst = arith.constant dense<0xFF800000> : vector<8x2xf32>
    %27 = vector.multi_reduction <maximumf>, %26, %cst [1] : vector<8x8x2xf32> to vector<8x2xf32>
    %28 = vector.shape_cast %27 : vector<8x2xf32> to vector<8x1x2xf32>
    %29 = vector.broadcast %28 : vector<8x1x2xf32> to vector<8x8x2xf32>
    %30 = arith.cmpf oge, %26, %29 : vector<8x8x2xf32>
    %c8_i32 = arith.constant 8 : i32
    %31 = vector.broadcast %c8_i32 : i32 to vector<8x8x2xi32>
    %32 = arith.select %30, %5, %31 : vector<8x8x2xi1>, vector<8x8x2xi32>
    %cst_11 = arith.constant dense<2147483647> : vector<8x2xi32>
    %33 = vector.multi_reduction <minsi>, %32, %cst_11 [1] : vector<8x8x2xi32> to vector<8x2xi32>
    %34 = vector.broadcast %c1_i32_8 : i32 to vector<1x2xi32>
    %35 = arith.cmpi sge, %34, %0 : vector<1x2xi32>
    %c0_i32 = arith.constant 0 : i32
    %36 = vector.shape_cast %35 : vector<1x2xi1> to vector<1x2xi1>
    %37 = vector.broadcast %36 : vector<1x2xi1> to vector<8x2xi1>
    %38 = vector.broadcast %c0_i32 : i32 to vector<8x2xi32>
    %39 = arith.select %37, %38, %33 : vector<8x2xi1>, vector<8x2xi32>
    %c1_i32_12 = arith.constant 1 : i32
    %40 = arith.subi %c1_i32_8, %c1_i32_12 : i32
    %41 = arith.index_cast %40 : i32 to index
    %c0_13 = arith.constant 0 : index
    %c0_14 = arith.constant 0 : index
    %42 = vector.load %arg7[%41, %c0_13, %c0_14] : memref<8x8x2xi32, #tpu.memory_space<vmem>>, vector<1x8x2xi32>
    %43 = vector.shape_cast %42 : vector<1x8x2xi32> to vector<8x2xi32>
    %44 = vector.shape_cast %39 : vector<8x2xi32> to vector<1x8x2xi32>
    tpu.vector_store %arg7[%41, %c0_13, %c0_14], %44 {strides = array<i32>} : memref<8x8x2xi32, #tpu.memory_space<vmem>>, vector<1x8x2xi32>,
    %c1_i32_15 = arith.constant 1 : i32
    %45 = vector.broadcast %c1_i32_15 : i32 to vector<1x2xi32>
    %46 = arith.subi %0, %45 : vector<1x2xi32>
    %47 = vector.broadcast %c1_i32_8 : i32 to vector<1x2xi32>
    %48 = arith.cmpi eq, %47, %46 : vector<1x2xi32>
    %49 = arith.extui %48 : vector<1x2xi1> to vector<1x2xi32>
    %50 = arith.sitofp %49 : vector<1x2xi32> to vector<1x2xf32>
    %51 = vector.broadcast %50 : vector<1x2xf32> to vector<8x2xf32>
    %52 = arith.mulf %27, %51 : vector<8x2xf32>
    %53 = arith.addf %17, %52 : vector<8x2xf32>
    %c2_i32 = arith.constant 2 : i32
    %54 = arith.index_cast %c2_i32 : i32 to index
    %c0_16 = arith.constant 0 : index
    %c0_17 = arith.constant 0 : index
    %55 = vector.load %arg1[%54, %c0_16, %c0_17] : memref<8x8x2xf32, #tpu.memory_space<vmem>>, vector<1x8x2xf32>
    %56 = vector.shape_cast %55 : vector<1x8x2xf32> to vector<8x2xf32>
    %57 = vector.shape_cast %56 : vector<8x2xf32> to vector<8x1x2xf32>
    %58 = vector.broadcast %57 : vector<8x1x2xf32> to vector<8x8x2xf32>
    %59 = arith.addf %58, %4 : vector<8x8x2xf32>
    %60 = vector.shape_cast %27 : vector<8x2xf32> to vector<1x8x2xf32>
    %61 = vector.broadcast %60 : vector<1x8x2xf32> to vector<8x8x2xf32>
    %62 = arith.addf %59, %61 : vector<8x8x2xf32>
    %cst_18 = arith.constant dense<0xFF800000> : vector<8x2xf32>
    %63 = vector.multi_reduction <maximumf>, %62, %cst_18 [1] : vector<8x8x2xf32> to vector<8x2xf32>
    %64 = vector.shape_cast %63 : vector<8x2xf32> to vector<8x1x2xf32>
    %65 = vector.broadcast %64 : vector<8x1x2xf32> to vector<8x8x2xf32>
    %66 = arith.cmpf oge, %62, %65 : vector<8x8x2xf32>
    %c8_i32_19 = arith.constant 8 : i32
    %67 = vector.broadcast %c8_i32_19 : i32 to vector<8x8x2xi32>
    %68 = arith.select %66, %5, %67 : vector<8x8x2xi1>, vector<8x8x2xi32>
    %cst_20 = arith.constant dense<2147483647> : vector<8x2xi32>
    %69 = vector.multi_reduction <minsi>, %68, %cst_20 [1] : vector<8x8x2xi32> to vector<8x2xi32>
    %70 = vector.broadcast %c2_i32 : i32 to vector<1x2xi32>
    %71 = arith.cmpi sge, %70, %0 : vector<1x2xi32>
    %c0_i32_21 = arith.constant 0 : i32
    %72 = vector.shape_cast %71 : vector<1x2xi1> to vector<1x2xi1>
    %73 = vector.broadcast %72 : vector<1x2xi1> to vector<8x2xi1>
    %74 = vector.broadcast %c0_i32_21 : i32 to vector<8x2xi32>
    %75 = arith.select %73, %74, %69 : vector<8x2xi1>, vector<8x2xi32>
    %c1_i32_22 = arith.constant 1 : i32
    %76 = arith.subi %c2_i32, %c1_i32_22 : i32
    %77 = arith.index_cast %76 : i32 to index
    %c0_23 = arith.constant 0 : index
    %c0_24 = arith.constant 0 : index
    %78 = vector.load %arg7[%77, %c0_23, %c0_24] : memref<8x8x2xi32, #tpu.memory_space<vmem>>, vector<1x8x2xi32>
    %79 = vector.shape_cast %78 : vector<1x8x2xi32> to vector<8x2xi32>
    %80 = vector.shape_cast %75 : vector<8x2xi32> to vector<1x8x2xi32>
    tpu.vector_store %arg7[%77, %c0_23, %c0_24], %80 {strides = array<i32>} : memref<8x8x2xi32, #tpu.memory_space<vmem>>, vector<1x8x2xi32>,
    %c1_i32_25 = arith.constant 1 : i32
    %81 = vector.broadcast %c1_i32_25 : i32 to vector<1x2xi32>
    %82 = arith.subi %0, %81 : vector<1x2xi32>
    %83 = vector.broadcast %c2_i32 : i32 to vector<1x2xi32>
    %84 = arith.cmpi eq, %83, %82 : vector<1x2xi32>
    %85 = arith.extui %84 : vector<1x2xi1> to vector<1x2xi32>
    %86 = arith.sitofp %85 : vector<1x2xi32> to vector<1x2xf32>
    %87 = vector.broadcast %86 : vector<1x2xf32> to vector<8x2xf32>
    %88 = arith.mulf %63, %87 : vector<8x2xf32>
    %89 = arith.addf %53, %88 : vector<8x2xf32>
    %c3_i32 = arith.constant 3 : i32
    %90 = arith.index_cast %c3_i32 : i32 to index
    %c0_26 = arith.constant 0 : index
    %c0_27 = arith.constant 0 : index
    %91 = vector.load %arg1[%90, %c0_26, %c0_27] : memref<8x8x2xf32, #tpu.memory_space<vmem>>, vector<1x8x2xf32>
    %92 = vector.shape_cast %91 : vector<1x8x2xf32> to vector<8x2xf32>
    %93 = vector.shape_cast %92 : vector<8x2xf32> to vector<8x1x2xf32>
    %94 = vector.broadcast %93 : vector<8x1x2xf32> to vector<8x8x2xf32>
    %95 = arith.addf %94, %4 : vector<8x8x2xf32>
    %96 = vector.shape_cast %63 : vector<8x2xf32> to vector<1x8x2xf32>
    %97 = vector.broadcast %96 : vector<1x8x2xf32> to vector<8x8x2xf32>
    %98 = arith.addf %95, %97 : vector<8x8x2xf32>
    %cst_28 = arith.constant dense<0xFF800000> : vector<8x2xf32>
    %99 = vector.multi_reduction <maximumf>, %98, %cst_28 [1] : vector<8x8x2xf32> to vector<8x2xf32>
    %100 = vector.shape_cast %99 : vector<8x2xf32> to vector<8x1x2xf32>
    %101 = vector.broadcast %100 : vector<8x1x2xf32> to vector<8x8x2xf32>
    %102 = arith.cmpf oge, %98, %101 : vector<8x8x2xf32>
    %c8_i32_29 = arith.constant 8 : i32
    %103 = vector.broadcast %c8_i32_29 : i32 to vector<8x8x2xi32>
    %104 = arith.select %102, %5, %103 : vector<8x8x2xi1>, vector<8x8x2xi32>
    %cst_30 = arith.constant dense<2147483647> : vector<8x2xi32>
    %105 = vector.multi_reduction <minsi>, %104, %cst_30 [1] : vector<8x8x2xi32> to vector<8x2xi32>
    %106 = vector.broadcast %c3_i32 : i32 to vector<1x2xi32>
    %107 = arith.cmpi sge, %106, %0 : vector<1x2xi32>
    %c0_i32_31 = arith.constant 0 : i32
    %108 = vector.shape_cast %107 : vector<1x2xi1> to vector<1x2xi1>
    %109 = vector.broadcast %108 : vector<1x2xi1> to vector<8x2xi1>
    %110 = vector.broadcast %c0_i32_31 : i32 to vector<8x2xi32>
    %111 = arith.select %109, %110, %105 : vector<8x2xi1>, vector<8x2xi32>
    %c1_i32_32 = arith.constant 1 : i32
    %112 = arith.subi %c3_i32, %c1_i32_32 : i32
    %113 = arith.index_cast %112 : i32 to index
    %c0_33 = arith.constant 0 : index
    %c0_34 = arith.constant 0 : index
    %114 = vector.load %arg7[%113, %c0_33, %c0_34] : memref<8x8x2xi32, #tpu.memory_space<vmem>>, vector<1x8x2xi32>
    %115 = vector.shape_cast %114 : vector<1x8x2xi32> to vector<8x2xi32>
    %116 = vector.shape_cast %111 : vector<8x2xi32> to vector<1x8x2xi32>
    tpu.vector_store %arg7[%113, %c0_33, %c0_34], %116 {strides = array<i32>} : memref<8x8x2xi32, #tpu.memory_space<vmem>>, vector<1x8x2xi32>,
    %c1_i32_35 = arith.constant 1 : i32
    %117 = vector.broadcast %c1_i32_35 : i32 to vector<1x2xi32>
    %118 = arith.subi %0, %117 : vector<1x2xi32>
    %119 = vector.broadcast %c3_i32 : i32 to vector<1x2xi32>
    %120 = arith.cmpi eq, %119, %118 : vector<1x2xi32>
    %121 = arith.extui %120 : vector<1x2xi1> to vector<1x2xi32>
    %122 = arith.sitofp %121 : vector<1x2xi32> to vector<1x2xf32>
    %123 = vector.broadcast %122 : vector<1x2xf32> to vector<8x2xf32>
    %124 = arith.mulf %99, %123 : vector<8x2xf32>
    %125 = arith.addf %89, %124 : vector<8x2xf32>
    %c4_i32 = arith.constant 4 : i32
    %126 = arith.index_cast %c4_i32 : i32 to index
    %c0_36 = arith.constant 0 : index
    %c0_37 = arith.constant 0 : index
    %127 = vector.load %arg1[%126, %c0_36, %c0_37] : memref<8x8x2xf32, #tpu.memory_space<vmem>>, vector<1x8x2xf32>
    %128 = vector.shape_cast %127 : vector<1x8x2xf32> to vector<8x2xf32>
    %129 = vector.shape_cast %128 : vector<8x2xf32> to vector<8x1x2xf32>
    %130 = vector.broadcast %129 : vector<8x1x2xf32> to vector<8x8x2xf32>
    %131 = arith.addf %130, %4 : vector<8x8x2xf32>
    %132 = vector.shape_cast %99 : vector<8x2xf32> to vector<1x8x2xf32>
    %133 = vector.broadcast %132 : vector<1x8x2xf32> to vector<8x8x2xf32>
    %134 = arith.addf %131, %133 : vector<8x8x2xf32>
    %cst_38 = arith.constant dense<0xFF800000> : vector<8x2xf32>
    %135 = vector.multi_reduction <maximumf>, %134, %cst_38 [1] : vector<8x8x2xf32> to vector<8x2xf32>
    %136 = vector.shape_cast %135 : vector<8x2xf32> to vector<8x1x2xf32>
    %137 = vector.broadcast %136 : vector<8x1x2xf32> to vector<8x8x2xf32>
    %138 = arith.cmpf oge, %134, %137 : vector<8x8x2xf32>
    %c8_i32_39 = arith.constant 8 : i32
    %139 = vector.broadcast %c8_i32_39 : i32 to vector<8x8x2xi32>
    %140 = arith.select %138, %5, %139 : vector<8x8x2xi1>, vector<8x8x2xi32>
    %cst_40 = arith.constant dense<2147483647> : vector<8x2xi32>
    %141 = vector.multi_reduction <minsi>, %140, %cst_40 [1] : vector<8x8x2xi32> to vector<8x2xi32>
    %142 = vector.broadcast %c4_i32 : i32 to vector<1x2xi32>
    %143 = arith.cmpi sge, %142, %0 : vector<1x2xi32>
    %c0_i32_41 = arith.constant 0 : i32
    %144 = vector.shape_cast %143 : vector<1x2xi1> to vector<1x2xi1>
    %145 = vector.broadcast %144 : vector<1x2xi1> to vector<8x2xi1>
    %146 = vector.broadcast %c0_i32_41 : i32 to vector<8x2xi32>
    %147 = arith.select %145, %146, %141 : vector<8x2xi1>, vector<8x2xi32>
    %c1_i32_42 = arith.constant 1 : i32
    %148 = arith.subi %c4_i32, %c1_i32_42 : i32
    %149 = arith.index_cast %148 : i32 to index
    %c0_43 = arith.constant 0 : index
    %c0_44 = arith.constant 0 : index
    %150 = vector.load %arg7[%149, %c0_43, %c0_44] : memref<8x8x2xi32, #tpu.memory_space<vmem>>, vector<1x8x2xi32>
    %151 = vector.shape_cast %150 : vector<1x8x2xi32> to vector<8x2xi32>
    %152 = vector.shape_cast %147 : vector<8x2xi32> to vector<1x8x2xi32>
    tpu.vector_store %arg7[%149, %c0_43, %c0_44], %152 {strides = array<i32>} : memref<8x8x2xi32, #tpu.memory_space<vmem>>, vector<1x8x2xi32>,
    %c1_i32_45 = arith.constant 1 : i32
    %153 = vector.broadcast %c1_i32_45 : i32 to vector<1x2xi32>
    %154 = arith.subi %0, %153 : vector<1x2xi32>
    %155 = vector.broadcast %c4_i32 : i32 to vector<1x2xi32>
    %156 = arith.cmpi eq, %155, %154 : vector<1x2xi32>
    %157 = arith.extui %156 : vector<1x2xi1> to vector<1x2xi32>
    %158 = arith.sitofp %157 : vector<1x2xi32> to vector<1x2xf32>
    %159 = vector.broadcast %158 : vector<1x2xf32> to vector<8x2xf32>
    %160 = arith.mulf %135, %159 : vector<8x2xf32>
    %161 = arith.addf %125, %160 : vector<8x2xf32>
    %c5_i32 = arith.constant 5 : i32
    %162 = arith.index_cast %c5_i32 : i32 to index
    %c0_46 = arith.constant 0 : index
    %c0_47 = arith.constant 0 : index
    %163 = vector.load %arg1[%162, %c0_46, %c0_47] : memref<8x8x2xf32, #tpu.memory_space<vmem>>, vector<1x8x2xf32>
    %164 = vector.shape_cast %163 : vector<1x8x2xf32> to vector<8x2xf32>
    %165 = vector.shape_cast %164 : vector<8x2xf32> to vector<8x1x2xf32>
    %166 = vector.broadcast %165 : vector<8x1x2xf32> to vector<8x8x2xf32>
    %167 = arith.addf %166, %4 : vector<8x8x2xf32>
    %168 = vector.shape_cast %135 : vector<8x2xf32> to vector<1x8x2xf32>
    %169 = vector.broadcast %168 : vector<1x8x2xf32> to vector<8x8x2xf32>
    %170 = arith.addf %167, %169 : vector<8x8x2xf32>
    %cst_48 = arith.constant dense<0xFF800000> : vector<8x2xf32>
    %171 = vector.multi_reduction <maximumf>, %170, %cst_48 [1] : vector<8x8x2xf32> to vector<8x2xf32>
    %172 = vector.shape_cast %171 : vector<8x2xf32> to vector<8x1x2xf32>
    %173 = vector.broadcast %172 : vector<8x1x2xf32> to vector<8x8x2xf32>
    %174 = arith.cmpf oge, %170, %173 : vector<8x8x2xf32>
    %c8_i32_49 = arith.constant 8 : i32
    %175 = vector.broadcast %c8_i32_49 : i32 to vector<8x8x2xi32>
    %176 = arith.select %174, %5, %175 : vector<8x8x2xi1>, vector<8x8x2xi32>
    %cst_50 = arith.constant dense<2147483647> : vector<8x2xi32>
    %177 = vector.multi_reduction <minsi>, %176, %cst_50 [1] : vector<8x8x2xi32> to vector<8x2xi32>
    %178 = vector.broadcast %c5_i32 : i32 to vector<1x2xi32>
    %179 = arith.cmpi sge, %178, %0 : vector<1x2xi32>
    %c0_i32_51 = arith.constant 0 : i32
    %180 = vector.shape_cast %179 : vector<1x2xi1> to vector<1x2xi1>
    %181 = vector.broadcast %180 : vector<1x2xi1> to vector<8x2xi1>
    %182 = vector.broadcast %c0_i32_51 : i32 to vector<8x2xi32>
    %183 = arith.select %181, %182, %177 : vector<8x2xi1>, vector<8x2xi32>
    %c1_i32_52 = arith.constant 1 : i32
    %184 = arith.subi %c5_i32, %c1_i32_52 : i32
    %185 = arith.index_cast %184 : i32 to index
    %c0_53 = arith.constant 0 : index
    %c0_54 = arith.constant 0 : index
    %186 = vector.load %arg7[%185, %c0_53, %c0_54] : memref<8x8x2xi32, #tpu.memory_space<vmem>>, vector<1x8x2xi32>
    %187 = vector.shape_cast %186 : vector<1x8x2xi32> to vector<8x2xi32>
    %188 = vector.shape_cast %183 : vector<8x2xi32> to vector<1x8x2xi32>
    tpu.vector_store %arg7[%185, %c0_53, %c0_54], %188 {strides = array<i32>} : memref<8x8x2xi32, #tpu.memory_space<vmem>>, vector<1x8x2xi32>,
    %c1_i32_55 = arith.constant 1 : i32
    %189 = vector.broadcast %c1_i32_55 : i32 to vector<1x2xi32>
    %190 = arith.subi %0, %189 : vector<1x2xi32>
    %191 = vector.broadcast %c5_i32 : i32 to vector<1x2xi32>
    %192 = arith.cmpi eq, %191, %190 : vector<1x2xi32>
    %193 = arith.extui %192 : vector<1x2xi1> to vector<1x2xi32>
    %194 = arith.sitofp %193 : vector<1x2xi32> to vector<1x2xf32>
    %195 = vector.broadcast %194 : vector<1x2xf32> to vector<8x2xf32>
    %196 = arith.mulf %171, %195 : vector<8x2xf32>
    %197 = arith.addf %161, %196 : vector<8x2xf32>
    %c6_i32 = arith.constant 6 : i32
    %198 = arith.index_cast %c6_i32 : i32 to index
    %c0_56 = arith.constant 0 : index
    %c0_57 = arith.constant 0 : index
    %199 = vector.load %arg1[%198, %c0_56, %c0_57] : memref<8x8x2xf32, #tpu.memory_space<vmem>>, vector<1x8x2xf32>
    %200 = vector.shape_cast %199 : vector<1x8x2xf32> to vector<8x2xf32>
    %201 = vector.shape_cast %200 : vector<8x2xf32> to vector<8x1x2xf32>
    %202 = vector.broadcast %201 : vector<8x1x2xf32> to vector<8x8x2xf32>
    %203 = arith.addf %202, %4 : vector<8x8x2xf32>
    %204 = vector.shape_cast %171 : vector<8x2xf32> to vector<1x8x2xf32>
    %205 = vector.broadcast %204 : vector<1x8x2xf32> to vector<8x8x2xf32>
    %206 = arith.addf %203, %205 : vector<8x8x2xf32>
    %cst_58 = arith.constant dense<0xFF800000> : vector<8x2xf32>
    %207 = vector.multi_reduction <maximumf>, %206, %cst_58 [1] : vector<8x8x2xf32> to vector<8x2xf32>
    %208 = vector.shape_cast %207 : vector<8x2xf32> to vector<8x1x2xf32>
    %209 = vector.broadcast %208 : vector<8x1x2xf32> to vector<8x8x2xf32>
    %210 = arith.cmpf oge, %206, %209 : vector<8x8x2xf32>
    %c8_i32_59 = arith.constant 8 : i32
    %211 = vector.broadcast %c8_i32_59 : i32 to vector<8x8x2xi32>
    %212 = arith.select %210, %5, %211 : vector<8x8x2xi1>, vector<8x8x2xi32>
    %cst_60 = arith.constant dense<2147483647> : vector<8x2xi32>
    %213 = vector.multi_reduction <minsi>, %212, %cst_60 [1] : vector<8x8x2xi32> to vector<8x2xi32>
    %214 = vector.broadcast %c6_i32 : i32 to vector<1x2xi32>
    %215 = arith.cmpi sge, %214, %0 : vector<1x2xi32>
    %c0_i32_61 = arith.constant 0 : i32
    %216 = vector.shape_cast %215 : vector<1x2xi1> to vector<1x2xi1>
    %217 = vector.broadcast %216 : vector<1x2xi1> to vector<8x2xi1>
    %218 = vector.broadcast %c0_i32_61 : i32 to vector<8x2xi32>
    %219 = arith.select %217, %218, %213 : vector<8x2xi1>, vector<8x2xi32>
    %c1_i32_62 = arith.constant 1 : i32
    %220 = arith.subi %c6_i32, %c1_i32_62 : i32
    %221 = arith.index_cast %220 : i32 to index
    %c0_63 = arith.constant 0 : index
    %c0_64 = arith.constant 0 : index
    %222 = vector.load %arg7[%221, %c0_63, %c0_64] : memref<8x8x2xi32, #tpu.memory_space<vmem>>, vector<1x8x2xi32>
    %223 = vector.shape_cast %222 : vector<1x8x2xi32> to vector<8x2xi32>
    %224 = vector.shape_cast %219 : vector<8x2xi32> to vector<1x8x2xi32>
    tpu.vector_store %arg7[%221, %c0_63, %c0_64], %224 {strides = array<i32>} : memref<8x8x2xi32, #tpu.memory_space<vmem>>, vector<1x8x2xi32>,
    %c1_i32_65 = arith.constant 1 : i32
    %225 = vector.broadcast %c1_i32_65 : i32 to vector<1x2xi32>
    %226 = arith.subi %0, %225 : vector<1x2xi32>
    %227 = vector.broadcast %c6_i32 : i32 to vector<1x2xi32>
    %228 = arith.cmpi eq, %227, %226 : vector<1x2xi32>
    %229 = arith.extui %228 : vector<1x2xi1> to vector<1x2xi32>
    %230 = arith.sitofp %229 : vector<1x2xi32> to vector<1x2xf32>
    %231 = vector.broadcast %230 : vector<1x2xf32> to vector<8x2xf32>
    %232 = arith.mulf %207, %231 : vector<8x2xf32>
    %233 = arith.addf %197, %232 : vector<8x2xf32>
    %c7_i32 = arith.constant 7 : i32
    %234 = arith.index_cast %c7_i32 : i32 to index
    %c0_66 = arith.constant 0 : index
    %c0_67 = arith.constant 0 : index
    %235 = vector.load %arg1[%234, %c0_66, %c0_67] : memref<8x8x2xf32, #tpu.memory_space<vmem>>, vector<1x8x2xf32>
    %236 = vector.shape_cast %235 : vector<1x8x2xf32> to vector<8x2xf32>
    %237 = vector.shape_cast %236 : vector<8x2xf32> to vector<8x1x2xf32>
    %238 = vector.broadcast %237 : vector<8x1x2xf32> to vector<8x8x2xf32>
    %239 = arith.addf %238, %4 : vector<8x8x2xf32>
    %240 = vector.shape_cast %207 : vector<8x2xf32> to vector<1x8x2xf32>
    %241 = vector.broadcast %240 : vector<1x8x2xf32> to vector<8x8x2xf32>
    %242 = arith.addf %239, %241 : vector<8x8x2xf32>
    %cst_68 = arith.constant dense<0xFF800000> : vector<8x2xf32>
    %243 = vector.multi_reduction <maximumf>, %242, %cst_68 [1] : vector<8x8x2xf32> to vector<8x2xf32>
    %244 = vector.shape_cast %243 : vector<8x2xf32> to vector<8x1x2xf32>
    %245 = vector.broadcast %244 : vector<8x1x2xf32> to vector<8x8x2xf32>
    %246 = arith.cmpf oge, %242, %245 : vector<8x8x2xf32>
    %c8_i32_69 = arith.constant 8 : i32
    %247 = vector.broadcast %c8_i32_69 : i32 to vector<8x8x2xi32>
    %248 = arith.select %246, %5, %247 : vector<8x8x2xi1>, vector<8x8x2xi32>
    %cst_70 = arith.constant dense<2147483647> : vector<8x2xi32>
    %249 = vector.multi_reduction <minsi>, %248, %cst_70 [1] : vector<8x8x2xi32> to vector<8x2xi32>
    %250 = vector.broadcast %c7_i32 : i32 to vector<1x2xi32>
    %251 = arith.cmpi sge, %250, %0 : vector<1x2xi32>
    %c0_i32_71 = arith.constant 0 : i32
    %252 = vector.shape_cast %251 : vector<1x2xi1> to vector<1x2xi1>
    %253 = vector.broadcast %252 : vector<1x2xi1> to vector<8x2xi1>
    %254 = vector.broadcast %c0_i32_71 : i32 to vector<8x2xi32>
    %255 = arith.select %253, %254, %249 : vector<8x2xi1>, vector<8x2xi32>
    %c1_i32_72 = arith.constant 1 : i32
    %256 = arith.subi %c7_i32, %c1_i32_72 : i32
    %257 = arith.index_cast %256 : i32 to index
    %c0_73 = arith.constant 0 : index
    %c0_74 = arith.constant 0 : index
    %258 = vector.load %arg7[%257, %c0_73, %c0_74] : memref<8x8x2xi32, #tpu.memory_space<vmem>>, vector<1x8x2xi32>
    %259 = vector.shape_cast %258 : vector<1x8x2xi32> to vector<8x2xi32>
    %260 = vector.shape_cast %255 : vector<8x2xi32> to vector<1x8x2xi32>
    tpu.vector_store %arg7[%257, %c0_73, %c0_74], %260 {strides = array<i32>} : memref<8x8x2xi32, #tpu.memory_space<vmem>>, vector<1x8x2xi32>,
    %c1_i32_75 = arith.constant 1 : i32
    %261 = vector.broadcast %c1_i32_75 : i32 to vector<1x2xi32>
    %262 = arith.subi %0, %261 : vector<1x2xi32>
    %263 = vector.broadcast %c7_i32 : i32 to vector<1x2xi32>
    %264 = arith.cmpi eq, %263, %262 : vector<1x2xi32>
    %265 = arith.extui %264 : vector<1x2xi1> to vector<1x2xi32>
    %266 = arith.sitofp %265 : vector<1x2xi32> to vector<1x2xf32>
    %267 = vector.broadcast %266 : vector<1x2xf32> to vector<8x2xf32>
    %268 = arith.mulf %243, %267 : vector<8x2xf32>
    %269 = arith.addf %233, %268 : vector<8x2xf32>
    %c7_i32_76 = arith.constant 7 : i32
    %c0_77 = arith.constant 0 : index
    %c0_78 = arith.constant 0 : index
    %270 = vector.load %arg5[%c0_77, %c0_78] : memref<8x1xf32, #tpu.memory_space<vmem>>, vector<8x1xf32>
    %271 = vector.broadcast %270 : vector<8x1xf32> to vector<8x2xf32>
    %272 = arith.addf %269, %271 : vector<8x2xf32>
    %cst_79 = arith.constant dense<0xFF800000> : vector<2xf32>
    %273 = vector.multi_reduction <maximumf>, %272, %cst_79 [0] : vector<8x2xf32> to vector<2xf32>
    %274 = vector.shape_cast %273 : vector<2xf32> to vector<1x2xf32>
    %275 = vector.broadcast %274 : vector<1x2xf32> to vector<8x2xf32>
    %276 = arith.cmpf oge, %272, %275 : vector<8x2xf32>
    %c8_i32_80 = arith.constant 8 : i32
    %277 = vector.broadcast %c8_i32_80 : i32 to vector<8x2xi32>
    %278 = arith.select %276, %6, %277 : vector<8x2xi1>, vector<8x2xi32>
    %cst_81 = arith.constant dense<2147483647> : vector<2xi32>
    %279 = vector.multi_reduction <minsi>, %278, %cst_81 [0] : vector<8x2xi32> to vector<2xi32>
    %280 = vector.shape_cast %279 : vector<2xi32> to vector<1x2xi32>
    %c7 = arith.constant 7 : index
    %c0_82 = arith.constant 0 : index
    %281 = vector.load %arg6[%c7, %c0_82] : memref<8x2xi32, #tpu.memory_space<vmem>>, vector<1x2xi32>
    tpu.vector_store %arg6[%c7, %c0_82], %280 {strides = array<i32>} : memref<8x2xi32, #tpu.memory_space<vmem>>, vector<1x2xi32>,
    %c0_i32_83 = arith.constant 0 : i32
    %c6_i32_84 = arith.constant 6 : i32
    %282 = arith.subi %c6_i32_84, %c0_i32_83 : i32
    %283 = arith.index_cast %282 : i32 to index
    %c0_85 = arith.constant 0 : index
    %c0_86 = arith.constant 0 : index
    %284 = vector.load %arg7[%283, %c0_85, %c0_86] : memref<8x8x2xi32, #tpu.memory_space<vmem>>, vector<1x8x2xi32>
    %285 = vector.shape_cast %284 : vector<1x8x2xi32> to vector<8x2xi32>
    %286 = vector.broadcast %280 : vector<1x2xi32> to vector<8x2xi32>
    %287 = arith.cmpi eq, %6, %286 : vector<8x2xi32>
    %288 = arith.extui %287 : vector<8x2xi1> to vector<8x2xi32>
    %289 = arith.muli %285, %288 : vector<8x2xi32>
    %cst_87 = arith.constant dense<0> : vector<2xi32>
    %290 = vector.multi_reduction <add>, %289, %cst_87 [0] : vector<8x2xi32> to vector<2xi32>
    %291 = vector.shape_cast %290 : vector<2xi32> to vector<1x2xi32>
    %c1_i32_88 = arith.constant 1 : i32
    %292 = vector.broadcast %c1_i32_88 : i32 to vector<1x2xi32>
    %293 = arith.subi %0, %292 : vector<1x2xi32>
    %294 = vector.broadcast %282 : i32 to vector<1x2xi32>
    %295 = arith.cmpi eq, %294, %293 : vector<1x2xi32>
    %296 = arith.select %295, %280, %291 : vector<1x2xi1>, vector<1x2xi32>
    %297 = arith.index_cast %282 : i32 to index
    %c0_89 = arith.constant 0 : index
    %298 = vector.load %arg6[%297, %c0_89] : memref<8x2xi32, #tpu.memory_space<vmem>>, vector<1x2xi32>
    tpu.vector_store %arg6[%297, %c0_89], %296 {strides = array<i32>} : memref<8x2xi32, #tpu.memory_space<vmem>>, vector<1x2xi32>,
    %c1_i32_90 = arith.constant 1 : i32
    %c6_i32_91 = arith.constant 6 : i32
    %299 = arith.subi %c6_i32_91, %c1_i32_90 : i32
    %300 = arith.index_cast %299 : i32 to index
    %c0_92 = arith.constant 0 : index
    %c0_93 = arith.constant 0 : index
    %301 = vector.load %arg7[%300, %c0_92, %c0_93] : memref<8x8x2xi32, #tpu.memory_space<vmem>>, vector<1x8x2xi32>
    %302 = vector.shape_cast %301 : vector<1x8x2xi32> to vector<8x2xi32>
    %303 = vector.broadcast %296 : vector<1x2xi32> to vector<8x2xi32>
    %304 = arith.cmpi eq, %6, %303 : vector<8x2xi32>
    %305 = arith.extui %304 : vector<8x2xi1> to vector<8x2xi32>
    %306 = arith.muli %302, %305 : vector<8x2xi32>
    %cst_94 = arith.constant dense<0> : vector<2xi32>
    %307 = vector.multi_reduction <add>, %306, %cst_94 [0] : vector<8x2xi32> to vector<2xi32>
    %308 = vector.shape_cast %307 : vector<2xi32> to vector<1x2xi32>
    %c1_i32_95 = arith.constant 1 : i32
    %309 = vector.broadcast %c1_i32_95 : i32 to vector<1x2xi32>
    %310 = arith.subi %0, %309 : vector<1x2xi32>
    %311 = vector.broadcast %299 : i32 to vector<1x2xi32>
    %312 = arith.cmpi eq, %311, %310 : vector<1x2xi32>
    %313 = arith.select %312, %280, %308 : vector<1x2xi1>, vector<1x2xi32>
    %314 = arith.index_cast %299 : i32 to index
    %c0_96 = arith.constant 0 : index
    %315 = vector.load %arg6[%314, %c0_96] : memref<8x2xi32, #tpu.memory_space<vmem>>, vector<1x2xi32>
    tpu.vector_store %arg6[%314, %c0_96], %313 {strides = array<i32>} : memref<8x2xi32, #tpu.memory_space<vmem>>, vector<1x2xi32>,
    %c2_i32_97 = arith.constant 2 : i32
    %c6_i32_98 = arith.constant 6 : i32
    %316 = arith.subi %c6_i32_98, %c2_i32_97 : i32
    %317 = arith.index_cast %316 : i32 to index
    %c0_99 = arith.constant 0 : index
    %c0_100 = arith.constant 0 : index
    %318 = vector.load %arg7[%317, %c0_99, %c0_100] : memref<8x8x2xi32, #tpu.memory_space<vmem>>, vector<1x8x2xi32>
    %319 = vector.shape_cast %318 : vector<1x8x2xi32> to vector<8x2xi32>
    %320 = vector.broadcast %313 : vector<1x2xi32> to vector<8x2xi32>
    %321 = arith.cmpi eq, %6, %320 : vector<8x2xi32>
    %322 = arith.extui %321 : vector<8x2xi1> to vector<8x2xi32>
    %323 = arith.muli %319, %322 : vector<8x2xi32>
    %cst_101 = arith.constant dense<0> : vector<2xi32>
    %324 = vector.multi_reduction <add>, %323, %cst_101 [0] : vector<8x2xi32> to vector<2xi32>
    %325 = vector.shape_cast %324 : vector<2xi32> to vector<1x2xi32>
    %c1_i32_102 = arith.constant 1 : i32
    %326 = vector.broadcast %c1_i32_102 : i32 to vector<1x2xi32>
    %327 = arith.subi %0, %326 : vector<1x2xi32>
    %328 = vector.broadcast %316 : i32 to vector<1x2xi32>
    %329 = arith.cmpi eq, %328, %327 : vector<1x2xi32>
    %330 = arith.select %329, %280, %325 : vector<1x2xi1>, vector<1x2xi32>
    %331 = arith.index_cast %316 : i32 to index
    %c0_103 = arith.constant 0 : index
    %332 = vector.load %arg6[%331, %c0_103] : memref<8x2xi32, #tpu.memory_space<vmem>>, vector<1x2xi32>
    tpu.vector_store %arg6[%331, %c0_103], %330 {strides = array<i32>} : memref<8x2xi32, #tpu.memory_space<vmem>>, vector<1x2xi32>,
    %c3_i32_104 = arith.constant 3 : i32
    %c6_i32_105 = arith.constant 6 : i32
    %333 = arith.subi %c6_i32_105, %c3_i32_104 : i32
    %334 = arith.index_cast %333 : i32 to index
    %c0_106 = arith.constant 0 : index
    %c0_107 = arith.constant 0 : index
    %335 = vector.load %arg7[%334, %c0_106, %c0_107] : memref<8x8x2xi32, #tpu.memory_space<vmem>>, vector<1x8x2xi32>
    %336 = vector.shape_cast %335 : vector<1x8x2xi32> to vector<8x2xi32>
    %337 = vector.broadcast %330 : vector<1x2xi32> to vector<8x2xi32>
    %338 = arith.cmpi eq, %6, %337 : vector<8x2xi32>
    %339 = arith.extui %338 : vector<8x2xi1> to vector<8x2xi32>
    %340 = arith.muli %336, %339 : vector<8x2xi32>
    %cst_108 = arith.constant dense<0> : vector<2xi32>
    %341 = vector.multi_reduction <add>, %340, %cst_108 [0] : vector<8x2xi32> to vector<2xi32>
    %342 = vector.shape_cast %341 : vector<2xi32> to vector<1x2xi32>
    %c1_i32_109 = arith.constant 1 : i32
    %343 = vector.broadcast %c1_i32_109 : i32 to vector<1x2xi32>
    %344 = arith.subi %0, %343 : vector<1x2xi32>
    %345 = vector.broadcast %333 : i32 to vector<1x2xi32>
    %346 = arith.cmpi eq, %345, %344 : vector<1x2xi32>
    %347 = arith.select %346, %280, %342 : vector<1x2xi1>, vector<1x2xi32>
    %348 = arith.index_cast %333 : i32 to index
    %c0_110 = arith.constant 0 : index
    %349 = vector.load %arg6[%348, %c0_110] : memref<8x2xi32, #tpu.memory_space<vmem>>, vector<1x2xi32>
    tpu.vector_store %arg6[%348, %c0_110], %347 {strides = array<i32>} : memref<8x2xi32, #tpu.memory_space<vmem>>, vector<1x2xi32>,
    %c4_i32_111 = arith.constant 4 : i32
    %c6_i32_112 = arith.constant 6 : i32
    %350 = arith.subi %c6_i32_112, %c4_i32_111 : i32
    %351 = arith.index_cast %350 : i32 to index
    %c0_113 = arith.constant 0 : index
    %c0_114 = arith.constant 0 : index
    %352 = vector.load %arg7[%351, %c0_113, %c0_114] : memref<8x8x2xi32, #tpu.memory_space<vmem>>, vector<1x8x2xi32>
    %353 = vector.shape_cast %352 : vector<1x8x2xi32> to vector<8x2xi32>
    %354 = vector.broadcast %347 : vector<1x2xi32> to vector<8x2xi32>
    %355 = arith.cmpi eq, %6, %354 : vector<8x2xi32>
    %356 = arith.extui %355 : vector<8x2xi1> to vector<8x2xi32>
    %357 = arith.muli %353, %356 : vector<8x2xi32>
    %cst_115 = arith.constant dense<0> : vector<2xi32>
    %358 = vector.multi_reduction <add>, %357, %cst_115 [0] : vector<8x2xi32> to vector<2xi32>
    %359 = vector.shape_cast %358 : vector<2xi32> to vector<1x2xi32>
    %c1_i32_116 = arith.constant 1 : i32
    %360 = vector.broadcast %c1_i32_116 : i32 to vector<1x2xi32>
    %361 = arith.subi %0, %360 : vector<1x2xi32>
    %362 = vector.broadcast %350 : i32 to vector<1x2xi32>
    %363 = arith.cmpi eq, %362, %361 : vector<1x2xi32>
    %364 = arith.select %363, %280, %359 : vector<1x2xi1>, vector<1x2xi32>
    %365 = arith.index_cast %350 : i32 to index
    %c0_117 = arith.constant 0 : index
    %366 = vector.load %arg6[%365, %c0_117] : memref<8x2xi32, #tpu.memory_space<vmem>>, vector<1x2xi32>
    tpu.vector_store %arg6[%365, %c0_117], %364 {strides = array<i32>} : memref<8x2xi32, #tpu.memory_space<vmem>>, vector<1x2xi32>,
    %c5_i32_118 = arith.constant 5 : i32
    %c6_i32_119 = arith.constant 6 : i32
    %367 = arith.subi %c6_i32_119, %c5_i32_118 : i32
    %368 = arith.index_cast %367 : i32 to index
    %c0_120 = arith.constant 0 : index
    %c0_121 = arith.constant 0 : index
    %369 = vector.load %arg7[%368, %c0_120, %c0_121] : memref<8x8x2xi32, #tpu.memory_space<vmem>>, vector<1x8x2xi32>
    %370 = vector.shape_cast %369 : vector<1x8x2xi32> to vector<8x2xi32>
    %371 = vector.broadcast %364 : vector<1x2xi32> to vector<8x2xi32>
    %372 = arith.cmpi eq, %6, %371 : vector<8x2xi32>
    %373 = arith.extui %372 : vector<8x2xi1> to vector<8x2xi32>
    %374 = arith.muli %370, %373 : vector<8x2xi32>
    %cst_122 = arith.constant dense<0> : vector<2xi32>
    %375 = vector.multi_reduction <add>, %374, %cst_122 [0] : vector<8x2xi32> to vector<2xi32>
    %376 = vector.shape_cast %375 : vector<2xi32> to vector<1x2xi32>
    %c1_i32_123 = arith.constant 1 : i32
    %377 = vector.broadcast %c1_i32_123 : i32 to vector<1x2xi32>
    %378 = arith.subi %0, %377 : vector<1x2xi32>
    %379 = vector.broadcast %367 : i32 to vector<1x2xi32>
    %380 = arith.cmpi eq, %379, %378 : vector<1x2xi32>
    %381 = arith.select %380, %280, %376 : vector<1x2xi1>, vector<1x2xi32>
    %382 = arith.index_cast %367 : i32 to index
    %c0_124 = arith.constant 0 : index
    %383 = vector.load %arg6[%382, %c0_124] : memref<8x2xi32, #tpu.memory_space<vmem>>, vector<1x2xi32>
    tpu.vector_store %arg6[%382, %c0_124], %381 {strides = array<i32>} : memref<8x2xi32, #tpu.memory_space<vmem>>, vector<1x2xi32>,
    %c6_i32_125 = arith.constant 6 : i32
    %c6_i32_126 = arith.constant 6 : i32
    %384 = arith.subi %c6_i32_126, %c6_i32_125 : i32
    %385 = arith.index_cast %384 : i32 to index
    %c0_127 = arith.constant 0 : index
    %c0_128 = arith.constant 0 : index
    %386 = vector.load %arg7[%385, %c0_127, %c0_128] : memref<8x8x2xi32, #tpu.memory_space<vmem>>, vector<1x8x2xi32>
    %387 = vector.shape_cast %386 : vector<1x8x2xi32> to vector<8x2xi32>
    %388 = vector.broadcast %381 : vector<1x2xi32> to vector<8x2xi32>
    %389 = arith.cmpi eq, %6, %388 : vector<8x2xi32>
    %390 = arith.extui %389 : vector<8x2xi1> to vector<8x2xi32>
    %391 = arith.muli %387, %390 : vector<8x2xi32>
    %cst_129 = arith.constant dense<0> : vector<2xi32>
    %392 = vector.multi_reduction <add>, %391, %cst_129 [0] : vector<8x2xi32> to vector<2xi32>
    %393 = vector.shape_cast %392 : vector<2xi32> to vector<1x2xi32>
    %c1_i32_130 = arith.constant 1 : i32
    %394 = vector.broadcast %c1_i32_130 : i32 to vector<1x2xi32>
    %395 = arith.subi %0, %394 : vector<1x2xi32>
    %396 = vector.broadcast %384 : i32 to vector<1x2xi32>
    %397 = arith.cmpi eq, %396, %395 : vector<1x2xi32>
    %398 = arith.select %397, %280, %393 : vector<1x2xi1>, vector<1x2xi32>
    %399 = arith.index_cast %384 : i32 to index
    %c0_131 = arith.constant 0 : index
    %400 = vector.load %arg6[%399, %c0_131] : memref<8x2xi32, #tpu.memory_space<vmem>>, vector<1x2xi32>
    tpu.vector_store %arg6[%399, %c0_131], %398 {strides = array<i32>} : memref<8x2xi32, #tpu.memory_space<vmem>>, vector<1x2xi32>,
    %c7_i32_132 = arith.constant 7 : i32
    return
  }
  func.func @transform_0(%arg0: i32) -> (i32, i32, i32) {
    %c0_i32 = arith.constant 0 : i32
    %c0_i32_0 = arith.constant 0 : i32
    %c0_i32_1 = arith.constant 0 : i32
    return %c0_i32, %c0_i32_0, %arg0 : i32, i32, i32
  }
  func.func @transform_1(%arg0: i32) -> (i32, i32) {
    %c0_i32 = arith.constant 0 : i32
    %c0_i32_0 = arith.constant 0 : i32
    return %c0_i32, %arg0 : i32, i32
  }
  func.func @transform_2(%arg0: i32) -> (i32, i32) {
    %c0_i32 = arith.constant 0 : i32
    %c0_i32_0 = arith.constant 0 : i32
    %c0_i32_1 = arith.constant 0 : i32
    return %c0_i32, %c0_i32_0 : i32, i32
  }
  func.func @transform_3(%arg0: i32) -> (i32, i32) {
    %c0_i32 = arith.constant 0 : i32
    %c0_i32_0 = arith.constant 0 : i32
    %c0_i32_1 = arith.constant 0 : i32
    return %c0_i32, %c0_i32_0 : i32, i32
  }
  func.func @transform_4(%arg0: i32) -> (i32, i32) {
    %c0_i32 = arith.constant 0 : i32
    %c0_i32_0 = arith.constant 0 : i32
    %c0_i32_1 = arith.constant 0 : i32
    return %c0_i32, %c0_i32_0 : i32, i32
  }
  func.func @transform_5(%arg0: i32) -> (i32, i32) {
    %c0_i32 = arith.constant 0 : i32
    %c0_i32_0 = arith.constant 0 : i32
    return %c0_i32, %arg0 : i32, i32
  }
}

module attributes {stable_mosaic.version = 11 : i64} {
  func.func @bilstm_tag_kernel(%arg0: i32, %arg1: memref<8x2x128xbf16, #tpu.memory_space<vmem>>, %arg2: memref<2x1xi32, #tpu.memory_space<vmem>>, %arg3: memref<128x512xbf16, #tpu.memory_space<vmem>>, %arg4: memref<64x256xbf16, #tpu.memory_space<vmem>>, %arg5: memref<64x256xbf16, #tpu.memory_space<vmem>>, %arg6: memref<1x512xf32, #tpu.memory_space<vmem>>, %arg7: memref<8x128xbf16, #tpu.memory_space<vmem>>, %arg8: memref<8x1xf32, #tpu.memory_space<vmem>>, %arg9: memref<8x8x2xf32, #tpu.memory_space<vmem>>, %arg10: memref<8x2x512xf32, #tpu.memory_space<vmem>>, %arg11: memref<8x2x128xbf16, #tpu.memory_space<vmem>>) attributes {dimension_semantics = [#tpu.dimension_semantics<parallel>], iteration_bounds = array<i64: 1>, scalar_prefetch = 0 : i64, scratch_operands = 2 : i64, tpu.core_type = #tpu.core_type<tc>, window_params = [{transform_indices = @transform_0, window_bounds = array<i64: 8, 2, 128>}, {transform_indices = @transform_1, window_bounds = array<i64: 2, 1>}, {pipeline_mode = #tpu.pipeline_mode<synchronous>, transform_indices = @transform_2, window_bounds = array<i64: 128, 512>}, {pipeline_mode = #tpu.pipeline_mode<synchronous>, transform_indices = @transform_3, window_bounds = array<i64: 64, 256>}, {pipeline_mode = #tpu.pipeline_mode<synchronous>, transform_indices = @transform_4, window_bounds = array<i64: 64, 256>}, {pipeline_mode = #tpu.pipeline_mode<synchronous>, transform_indices = @transform_5, window_bounds = array<i64: 1, 512>}, {pipeline_mode = #tpu.pipeline_mode<synchronous>, transform_indices = @transform_6, window_bounds = array<i64: 8, 128>}, {pipeline_mode = #tpu.pipeline_mode<synchronous>, transform_indices = @transform_7, window_bounds = array<i64: 8, 1>}, {transform_indices = @transform_8, window_bounds = array<i64: 8, 8, 2>}]} {
    %c0 = arith.constant 0 : index
    %c0_0 = arith.constant 0 : index
    %c0_1 = arith.constant 0 : index
    %0 = vector.load %arg1[%c0, %c0_0, %c0_1] : memref<8x2x128xbf16, #tpu.memory_space<vmem>>, vector<8x2x128xbf16>
    %1 = vector.shape_cast %0 : vector<8x2x128xbf16> to vector<16x128xbf16>
    %c0_2 = arith.constant 0 : index
    %c0_3 = arith.constant 0 : index
    %2 = vector.load %arg3[%c0_2, %c0_3] : memref<128x512xbf16, #tpu.memory_space<vmem>>, vector<128x512xbf16>
    %cst = arith.constant dense<0.000000e+00> : vector<16x512xf32>
    %3 = tpu.matmul %1, %2, %cst {dimension_numbers = #tpu.dot_dimension_numbers<[1], [0], [0], [1], [0, 0, 1, 1], [], []>} : vector<16x128xbf16>, vector<128x512xbf16>, vector<16x512xf32> -> vector<16x512xf32>
    %c0_4 = arith.constant 0 : index
    %c0_5 = arith.constant 0 : index
    %4 = vector.load %arg6[%c0_4, %c0_5] : memref<1x512xf32, #tpu.memory_space<vmem>>, vector<1x512xf32>
    %5 = vector.broadcast %4 : vector<1x512xf32> to vector<16x512xf32>
    %6 = arith.addf %3, %5 : vector<16x512xf32>
    %7 = vector.shape_cast %6 : vector<16x512xf32> to vector<8x2x512xf32>
    %c0_6 = arith.constant 0 : index
    %c0_7 = arith.constant 0 : index
    %c0_8 = arith.constant 0 : index
    %8 = vector.load %arg10[%c0_6, %c0_7, %c0_8] : memref<8x2x512xf32, #tpu.memory_space<vmem>>, vector<8x2x512xf32>
    tpu.vector_store %arg10[%c0_6, %c0_7, %c0_8], %7 {strides = array<i32>} : memref<8x2x512xf32, #tpu.memory_space<vmem>>, vector<8x2x512xf32>,
    %c0_9 = arith.constant 0 : index
    %c0_10 = arith.constant 0 : index
    %9 = vector.load %arg2[%c0_9, %c0_10] : memref<2x1xi32, #tpu.memory_space<vmem>>, vector<2x1xi32>
    %c0_11 = arith.constant 0 : index
    %c0_12 = arith.constant 0 : index
    %10 = vector.load %arg4[%c0_11, %c0_12] : memref<64x256xbf16, #tpu.memory_space<vmem>>, vector<64x256xbf16>
    %c0_13 = arith.constant 0 : index
    %c0_14 = arith.constant 0 : index
    %11 = vector.load %arg5[%c0_13, %c0_14] : memref<64x256xbf16, #tpu.memory_space<vmem>>, vector<64x256xbf16>
    %cst_15 = arith.constant 0.000000e+00 : f32
    %12 = vector.broadcast %cst_15 : f32 to vector<2x64xf32>
    %c0_i32 = arith.constant 0 : i32
    %c7_i32 = arith.constant 7 : i32
    %13 = arith.subi %c7_i32, %c0_i32 : i32
    %14 = vector.broadcast %c0_i32 : i32 to vector<2x1xi32>
    %15 = arith.cmpi slt, %14, %9 : vector<2x1xi32>
    %16 = vector.broadcast %13 : i32 to vector<2x1xi32>
    %17 = arith.cmpi slt, %16, %9 : vector<2x1xi32>
    %18 = arith.truncf %12 : vector<2x64xf32> to vector<2x64xbf16>
    %cst_16 = arith.constant dense<0.000000e+00> : vector<2x256xf32>
    %19 = tpu.matmul %18, %10, %cst_16 {dimension_numbers = #tpu.dot_dimension_numbers<[1], [0], [0], [1], [0, 0, 1, 1], [], []>} : vector<2x64xbf16>, vector<64x256xbf16>, vector<2x256xf32> -> vector<2x256xf32>
    %20 = arith.truncf %12 : vector<2x64xf32> to vector<2x64xbf16>
    %cst_17 = arith.constant dense<0.000000e+00> : vector<2x256xf32>
    %21 = tpu.matmul %20, %11, %cst_17 {dimension_numbers = #tpu.dot_dimension_numbers<[1], [0], [0], [1], [0, 0, 1, 1], [], []>} : vector<2x64xbf16>, vector<64x256xbf16>, vector<2x256xf32> -> vector<2x256xf32>
    %22 = arith.index_cast %c0_i32 : i32 to index
    %c0_18 = arith.constant 0 : index
    %c0_19 = arith.constant 0 : index
    %23 = vector.load %arg10[%22, %c0_18, %c0_19] : memref<8x2x512xf32, #tpu.memory_space<vmem>>, vector<1x2x256xf32>
    %24 = vector.shape_cast %23 : vector<1x2x256xf32> to vector<2x256xf32>
    %25 = arith.addf %24, %19 : vector<2x256xf32>
    %26 = arith.index_cast %13 : i32 to index
    %c0_20 = arith.constant 0 : index
    %c256 = arith.constant 256 : index
    %27 = vector.load %arg10[%26, %c0_20, %c256] : memref<8x2x512xf32, #tpu.memory_space<vmem>>, vector<1x2x256xf32>
    %28 = vector.shape_cast %27 : vector<1x2x256xf32> to vector<2x256xf32>
    %29 = arith.addf %28, %21 : vector<2x256xf32>
    %30 = vector.extract_strided_slice %25 {offsets = [0, 0], sizes = [2, 64], strides = [1, 1]} : vector<2x256xf32> to vector<2x64xf32>
    %cst_21 = arith.constant 5.000000e-01 : f32
    %31 = vector.broadcast %cst_21 : f32 to vector<2x64xf32>
    %32 = arith.mulf %31, %30 : vector<2x64xf32>
    %33 = math.tanh %32 : vector<2x64xf32>
    %cst_22 = arith.constant 1.000000e+00 : f32
    %34 = vector.broadcast %cst_22 : f32 to vector<2x64xf32>
    %35 = arith.addf %33, %34 : vector<2x64xf32>
    %cst_23 = arith.constant 5.000000e-01 : f32
    %36 = vector.broadcast %cst_23 : f32 to vector<2x64xf32>
    %37 = arith.mulf %36, %35 : vector<2x64xf32>
    %38 = vector.extract_strided_slice %25 {offsets = [0, 64], sizes = [2, 64], strides = [1, 1]} : vector<2x256xf32> to vector<2x64xf32>
    %cst_24 = arith.constant 5.000000e-01 : f32
    %39 = vector.broadcast %cst_24 : f32 to vector<2x64xf32>
    %40 = arith.mulf %39, %38 : vector<2x64xf32>
    %41 = math.tanh %40 : vector<2x64xf32>
    %cst_25 = arith.constant 1.000000e+00 : f32
    %42 = vector.broadcast %cst_25 : f32 to vector<2x64xf32>
    %43 = arith.addf %41, %42 : vector<2x64xf32>
    %cst_26 = arith.constant 5.000000e-01 : f32
    %44 = vector.broadcast %cst_26 : f32 to vector<2x64xf32>
    %45 = arith.mulf %44, %43 : vector<2x64xf32>
    %46 = vector.extract_strided_slice %25 {offsets = [0, 128], sizes = [2, 64], strides = [1, 1]} : vector<2x256xf32> to vector<2x64xf32>
    %47 = math.tanh %46 : vector<2x64xf32>
    %48 = vector.extract_strided_slice %25 {offsets = [0, 192], sizes = [2, 64], strides = [1, 1]} : vector<2x256xf32> to vector<2x64xf32>
    %cst_27 = arith.constant 5.000000e-01 : f32
    %49 = vector.broadcast %cst_27 : f32 to vector<2x64xf32>
    %50 = arith.mulf %49, %48 : vector<2x64xf32>
    %51 = math.tanh %50 : vector<2x64xf32>
    %cst_28 = arith.constant 1.000000e+00 : f32
    %52 = vector.broadcast %cst_28 : f32 to vector<2x64xf32>
    %53 = arith.addf %51, %52 : vector<2x64xf32>
    %cst_29 = arith.constant 5.000000e-01 : f32
    %54 = vector.broadcast %cst_29 : f32 to vector<2x64xf32>
    %55 = arith.mulf %54, %53 : vector<2x64xf32>
    %56 = arith.mulf %45, %12 : vector<2x64xf32>
    %57 = arith.mulf %37, %47 : vector<2x64xf32>
    %58 = arith.addf %56, %57 : vector<2x64xf32>
    %59 = math.tanh %58 : vector<2x64xf32>
    %60 = arith.mulf %55, %59 : vector<2x64xf32>
    %61 = vector.extract_strided_slice %29 {offsets = [0, 0], sizes = [2, 64], strides = [1, 1]} : vector<2x256xf32> to vector<2x64xf32>
    %cst_30 = arith.constant 5.000000e-01 : f32
    %62 = vector.broadcast %cst_30 : f32 to vector<2x64xf32>
    %63 = arith.mulf %62, %61 : vector<2x64xf32>
    %64 = math.tanh %63 : vector<2x64xf32>
    %cst_31 = arith.constant 1.000000e+00 : f32
    %65 = vector.broadcast %cst_31 : f32 to vector<2x64xf32>
    %66 = arith.addf %64, %65 : vector<2x64xf32>
    %cst_32 = arith.constant 5.000000e-01 : f32
    %67 = vector.broadcast %cst_32 : f32 to vector<2x64xf32>
    %68 = arith.mulf %67, %66 : vector<2x64xf32>
    %69 = vector.extract_strided_slice %29 {offsets = [0, 64], sizes = [2, 64], strides = [1, 1]} : vector<2x256xf32> to vector<2x64xf32>
    %cst_33 = arith.constant 5.000000e-01 : f32
    %70 = vector.broadcast %cst_33 : f32 to vector<2x64xf32>
    %71 = arith.mulf %70, %69 : vector<2x64xf32>
    %72 = math.tanh %71 : vector<2x64xf32>
    %cst_34 = arith.constant 1.000000e+00 : f32
    %73 = vector.broadcast %cst_34 : f32 to vector<2x64xf32>
    %74 = arith.addf %72, %73 : vector<2x64xf32>
    %cst_35 = arith.constant 5.000000e-01 : f32
    %75 = vector.broadcast %cst_35 : f32 to vector<2x64xf32>
    %76 = arith.mulf %75, %74 : vector<2x64xf32>
    %77 = vector.extract_strided_slice %29 {offsets = [0, 128], sizes = [2, 64], strides = [1, 1]} : vector<2x256xf32> to vector<2x64xf32>
    %78 = math.tanh %77 : vector<2x64xf32>
    %79 = vector.extract_strided_slice %29 {offsets = [0, 192], sizes = [2, 64], strides = [1, 1]} : vector<2x256xf32> to vector<2x64xf32>
    %cst_36 = arith.constant 5.000000e-01 : f32
    %80 = vector.broadcast %cst_36 : f32 to vector<2x64xf32>
    %81 = arith.mulf %80, %79 : vector<2x64xf32>
    %82 = math.tanh %81 : vector<2x64xf32>
    %cst_37 = arith.constant 1.000000e+00 : f32
    %83 = vector.broadcast %cst_37 : f32 to vector<2x64xf32>
    %84 = arith.addf %82, %83 : vector<2x64xf32>
    %cst_38 = arith.constant 5.000000e-01 : f32
    %85 = vector.broadcast %cst_38 : f32 to vector<2x64xf32>
    %86 = arith.mulf %85, %84 : vector<2x64xf32>
    %87 = arith.mulf %76, %12 : vector<2x64xf32>
    %88 = arith.mulf %68, %78 : vector<2x64xf32>
    %89 = arith.addf %87, %88 : vector<2x64xf32>
    %90 = math.tanh %89 : vector<2x64xf32>
    %91 = arith.mulf %86, %90 : vector<2x64xf32>
    %cst_39 = arith.constant 0.000000e+00 : f32
    %92 = vector.shape_cast %15 : vector<2x1xi1> to vector<2x1xi1>
    %93 = vector.broadcast %92 : vector<2x1xi1> to vector<2x64xi1>
    %94 = vector.broadcast %cst_39 : f32 to vector<2x64xf32>
    %95 = arith.select %93, %60, %94 : vector<2x64xi1>, vector<2x64xf32>
    %96 = arith.truncf %95 : vector<2x64xf32> to vector<2x64xbf16>
    %97 = arith.index_cast %c0_i32 : i32 to index
    %c0_40 = arith.constant 0 : index
    %c0_41 = arith.constant 0 : index
    %98 = vector.load %arg11[%97, %c0_40, %c0_41] : memref<8x2x128xbf16, #tpu.memory_space<vmem>>, vector<1x2x64xbf16>
    %99 = vector.shape_cast %98 : vector<1x2x64xbf16> to vector<2x64xbf16>
    %100 = vector.shape_cast %96 : vector<2x64xbf16> to vector<1x2x64xbf16>
    tpu.vector_store %arg11[%97, %c0_40, %c0_41], %100 {strides = array<i32>} : memref<8x2x128xbf16, #tpu.memory_space<vmem>>, vector<1x2x64xbf16>,
    %cst_42 = arith.constant 0.000000e+00 : f32
    %101 = vector.shape_cast %17 : vector<2x1xi1> to vector<2x1xi1>
    %102 = vector.broadcast %101 : vector<2x1xi1> to vector<2x64xi1>
    %103 = vector.broadcast %cst_42 : f32 to vector<2x64xf32>
    %104 = arith.select %102, %91, %103 : vector<2x64xi1>, vector<2x64xf32>
    %105 = arith.truncf %104 : vector<2x64xf32> to vector<2x64xbf16>
    %106 = arith.index_cast %13 : i32 to index
    %c0_43 = arith.constant 0 : index
    %c64 = arith.constant 64 : index
    %107 = vector.load %arg11[%106, %c0_43, %c64] : memref<8x2x128xbf16, #tpu.memory_space<vmem>>, vector<1x2x64xbf16>
    %108 = vector.shape_cast %107 : vector<1x2x64xbf16> to vector<2x64xbf16>
    %109 = vector.shape_cast %105 : vector<2x64xbf16> to vector<1x2x64xbf16>
    tpu.vector_store %arg11[%106, %c0_43, %c64], %109 {strides = array<i32>} : memref<8x2x128xbf16, #tpu.memory_space<vmem>>, vector<1x2x64xbf16>,
    %110 = vector.shape_cast %15 : vector<2x1xi1> to vector<2x1xi1>
    %111 = vector.broadcast %110 : vector<2x1xi1> to vector<2x64xi1>
    %112 = arith.select %111, %60, %12 : vector<2x64xi1>, vector<2x64xf32>
    %113 = vector.shape_cast %15 : vector<2x1xi1> to vector<2x1xi1>
    %114 = vector.broadcast %113 : vector<2x1xi1> to vector<2x64xi1>
    %115 = arith.select %114, %58, %12 : vector<2x64xi1>, vector<2x64xf32>
    %116 = vector.shape_cast %17 : vector<2x1xi1> to vector<2x1xi1>
    %117 = vector.broadcast %116 : vector<2x1xi1> to vector<2x64xi1>
    %118 = arith.select %117, %91, %12 : vector<2x64xi1>, vector<2x64xf32>
    %119 = vector.shape_cast %17 : vector<2x1xi1> to vector<2x1xi1>
    %120 = vector.broadcast %119 : vector<2x1xi1> to vector<2x64xi1>
    %121 = arith.select %120, %89, %12 : vector<2x64xi1>, vector<2x64xf32>
    %c1_i32 = arith.constant 1 : i32
    %c7_i32_44 = arith.constant 7 : i32
    %122 = arith.subi %c7_i32_44, %c1_i32 : i32
    %123 = vector.broadcast %c1_i32 : i32 to vector<2x1xi32>
    %124 = arith.cmpi slt, %123, %9 : vector<2x1xi32>
    %125 = vector.broadcast %122 : i32 to vector<2x1xi32>
    %126 = arith.cmpi slt, %125, %9 : vector<2x1xi32>
    %127 = arith.truncf %112 : vector<2x64xf32> to vector<2x64xbf16>
    %cst_45 = arith.constant dense<0.000000e+00> : vector<2x256xf32>
    %128 = tpu.matmul %127, %10, %cst_45 {dimension_numbers = #tpu.dot_dimension_numbers<[1], [0], [0], [1], [0, 0, 1, 1], [], []>} : vector<2x64xbf16>, vector<64x256xbf16>, vector<2x256xf32> -> vector<2x256xf32>
    %129 = arith.truncf %118 : vector<2x64xf32> to vector<2x64xbf16>
    %cst_46 = arith.constant dense<0.000000e+00> : vector<2x256xf32>
    %130 = tpu.matmul %129, %11, %cst_46 {dimension_numbers = #tpu.dot_dimension_numbers<[1], [0], [0], [1], [0, 0, 1, 1], [], []>} : vector<2x64xbf16>, vector<64x256xbf16>, vector<2x256xf32> -> vector<2x256xf32>
    %131 = arith.index_cast %c1_i32 : i32 to index
    %c0_47 = arith.constant 0 : index
    %c0_48 = arith.constant 0 : index
    %132 = vector.load %arg10[%131, %c0_47, %c0_48] : memref<8x2x512xf32, #tpu.memory_space<vmem>>, vector<1x2x256xf32>
    %133 = vector.shape_cast %132 : vector<1x2x256xf32> to vector<2x256xf32>
    %134 = arith.addf %133, %128 : vector<2x256xf32>
    %135 = arith.index_cast %122 : i32 to index
    %c0_49 = arith.constant 0 : index
    %c256_50 = arith.constant 256 : index
    %136 = vector.load %arg10[%135, %c0_49, %c256_50] : memref<8x2x512xf32, #tpu.memory_space<vmem>>, vector<1x2x256xf32>
    %137 = vector.shape_cast %136 : vector<1x2x256xf32> to vector<2x256xf32>
    %138 = arith.addf %137, %130 : vector<2x256xf32>
    %139 = vector.extract_strided_slice %134 {offsets = [0, 0], sizes = [2, 64], strides = [1, 1]} : vector<2x256xf32> to vector<2x64xf32>
    %cst_51 = arith.constant 5.000000e-01 : f32
    %140 = vector.broadcast %cst_51 : f32 to vector<2x64xf32>
    %141 = arith.mulf %140, %139 : vector<2x64xf32>
    %142 = math.tanh %141 : vector<2x64xf32>
    %cst_52 = arith.constant 1.000000e+00 : f32
    %143 = vector.broadcast %cst_52 : f32 to vector<2x64xf32>
    %144 = arith.addf %142, %143 : vector<2x64xf32>
    %cst_53 = arith.constant 5.000000e-01 : f32
    %145 = vector.broadcast %cst_53 : f32 to vector<2x64xf32>
    %146 = arith.mulf %145, %144 : vector<2x64xf32>
    %147 = vector.extract_strided_slice %134 {offsets = [0, 64], sizes = [2, 64], strides = [1, 1]} : vector<2x256xf32> to vector<2x64xf32>
    %cst_54 = arith.constant 5.000000e-01 : f32
    %148 = vector.broadcast %cst_54 : f32 to vector<2x64xf32>
    %149 = arith.mulf %148, %147 : vector<2x64xf32>
    %150 = math.tanh %149 : vector<2x64xf32>
    %cst_55 = arith.constant 1.000000e+00 : f32
    %151 = vector.broadcast %cst_55 : f32 to vector<2x64xf32>
    %152 = arith.addf %150, %151 : vector<2x64xf32>
    %cst_56 = arith.constant 5.000000e-01 : f32
    %153 = vector.broadcast %cst_56 : f32 to vector<2x64xf32>
    %154 = arith.mulf %153, %152 : vector<2x64xf32>
    %155 = vector.extract_strided_slice %134 {offsets = [0, 128], sizes = [2, 64], strides = [1, 1]} : vector<2x256xf32> to vector<2x64xf32>
    %156 = math.tanh %155 : vector<2x64xf32>
    %157 = vector.extract_strided_slice %134 {offsets = [0, 192], sizes = [2, 64], strides = [1, 1]} : vector<2x256xf32> to vector<2x64xf32>
    %cst_57 = arith.constant 5.000000e-01 : f32
    %158 = vector.broadcast %cst_57 : f32 to vector<2x64xf32>
    %159 = arith.mulf %158, %157 : vector<2x64xf32>
    %160 = math.tanh %159 : vector<2x64xf32>
    %cst_58 = arith.constant 1.000000e+00 : f32
    %161 = vector.broadcast %cst_58 : f32 to vector<2x64xf32>
    %162 = arith.addf %160, %161 : vector<2x64xf32>
    %cst_59 = arith.constant 5.000000e-01 : f32
    %163 = vector.broadcast %cst_59 : f32 to vector<2x64xf32>
    %164 = arith.mulf %163, %162 : vector<2x64xf32>
    %165 = arith.mulf %154, %115 : vector<2x64xf32>
    %166 = arith.mulf %146, %156 : vector<2x64xf32>
    %167 = arith.addf %165, %166 : vector<2x64xf32>
    %168 = math.tanh %167 : vector<2x64xf32>
    %169 = arith.mulf %164, %168 : vector<2x64xf32>
    %170 = vector.extract_strided_slice %138 {offsets = [0, 0], sizes = [2, 64], strides = [1, 1]} : vector<2x256xf32> to vector<2x64xf32>
    %cst_60 = arith.constant 5.000000e-01 : f32
    %171 = vector.broadcast %cst_60 : f32 to vector<2x64xf32>
    %172 = arith.mulf %171, %170 : vector<2x64xf32>
    %173 = math.tanh %172 : vector<2x64xf32>
    %cst_61 = arith.constant 1.000000e+00 : f32
    %174 = vector.broadcast %cst_61 : f32 to vector<2x64xf32>
    %175 = arith.addf %173, %174 : vector<2x64xf32>
    %cst_62 = arith.constant 5.000000e-01 : f32
    %176 = vector.broadcast %cst_62 : f32 to vector<2x64xf32>
    %177 = arith.mulf %176, %175 : vector<2x64xf32>
    %178 = vector.extract_strided_slice %138 {offsets = [0, 64], sizes = [2, 64], strides = [1, 1]} : vector<2x256xf32> to vector<2x64xf32>
    %cst_63 = arith.constant 5.000000e-01 : f32
    %179 = vector.broadcast %cst_63 : f32 to vector<2x64xf32>
    %180 = arith.mulf %179, %178 : vector<2x64xf32>
    %181 = math.tanh %180 : vector<2x64xf32>
    %cst_64 = arith.constant 1.000000e+00 : f32
    %182 = vector.broadcast %cst_64 : f32 to vector<2x64xf32>
    %183 = arith.addf %181, %182 : vector<2x64xf32>
    %cst_65 = arith.constant 5.000000e-01 : f32
    %184 = vector.broadcast %cst_65 : f32 to vector<2x64xf32>
    %185 = arith.mulf %184, %183 : vector<2x64xf32>
    %186 = vector.extract_strided_slice %138 {offsets = [0, 128], sizes = [2, 64], strides = [1, 1]} : vector<2x256xf32> to vector<2x64xf32>
    %187 = math.tanh %186 : vector<2x64xf32>
    %188 = vector.extract_strided_slice %138 {offsets = [0, 192], sizes = [2, 64], strides = [1, 1]} : vector<2x256xf32> to vector<2x64xf32>
    %cst_66 = arith.constant 5.000000e-01 : f32
    %189 = vector.broadcast %cst_66 : f32 to vector<2x64xf32>
    %190 = arith.mulf %189, %188 : vector<2x64xf32>
    %191 = math.tanh %190 : vector<2x64xf32>
    %cst_67 = arith.constant 1.000000e+00 : f32
    %192 = vector.broadcast %cst_67 : f32 to vector<2x64xf32>
    %193 = arith.addf %191, %192 : vector<2x64xf32>
    %cst_68 = arith.constant 5.000000e-01 : f32
    %194 = vector.broadcast %cst_68 : f32 to vector<2x64xf32>
    %195 = arith.mulf %194, %193 : vector<2x64xf32>
    %196 = arith.mulf %185, %121 : vector<2x64xf32>
    %197 = arith.mulf %177, %187 : vector<2x64xf32>
    %198 = arith.addf %196, %197 : vector<2x64xf32>
    %199 = math.tanh %198 : vector<2x64xf32>
    %200 = arith.mulf %195, %199 : vector<2x64xf32>
    %cst_69 = arith.constant 0.000000e+00 : f32
    %201 = vector.shape_cast %124 : vector<2x1xi1> to vector<2x1xi1>
    %202 = vector.broadcast %201 : vector<2x1xi1> to vector<2x64xi1>
    %203 = vector.broadcast %cst_69 : f32 to vector<2x64xf32>
    %204 = arith.select %202, %169, %203 : vector<2x64xi1>, vector<2x64xf32>
    %205 = arith.truncf %204 : vector<2x64xf32> to vector<2x64xbf16>
    %206 = arith.index_cast %c1_i32 : i32 to index
    %c0_70 = arith.constant 0 : index
    %c0_71 = arith.constant 0 : index
    %207 = vector.load %arg11[%206, %c0_70, %c0_71] : memref<8x2x128xbf16, #tpu.memory_space<vmem>>, vector<1x2x64xbf16>
    %208 = vector.shape_cast %207 : vector<1x2x64xbf16> to vector<2x64xbf16>
    %209 = vector.shape_cast %205 : vector<2x64xbf16> to vector<1x2x64xbf16>
    tpu.vector_store %arg11[%206, %c0_70, %c0_71], %209 {strides = array<i32>} : memref<8x2x128xbf16, #tpu.memory_space<vmem>>, vector<1x2x64xbf16>,
    %cst_72 = arith.constant 0.000000e+00 : f32
    %210 = vector.shape_cast %126 : vector<2x1xi1> to vector<2x1xi1>
    %211 = vector.broadcast %210 : vector<2x1xi1> to vector<2x64xi1>
    %212 = vector.broadcast %cst_72 : f32 to vector<2x64xf32>
    %213 = arith.select %211, %200, %212 : vector<2x64xi1>, vector<2x64xf32>
    %214 = arith.truncf %213 : vector<2x64xf32> to vector<2x64xbf16>
    %215 = arith.index_cast %122 : i32 to index
    %c0_73 = arith.constant 0 : index
    %c64_74 = arith.constant 64 : index
    %216 = vector.load %arg11[%215, %c0_73, %c64_74] : memref<8x2x128xbf16, #tpu.memory_space<vmem>>, vector<1x2x64xbf16>
    %217 = vector.shape_cast %216 : vector<1x2x64xbf16> to vector<2x64xbf16>
    %218 = vector.shape_cast %214 : vector<2x64xbf16> to vector<1x2x64xbf16>
    tpu.vector_store %arg11[%215, %c0_73, %c64_74], %218 {strides = array<i32>} : memref<8x2x128xbf16, #tpu.memory_space<vmem>>, vector<1x2x64xbf16>,
    %219 = vector.shape_cast %124 : vector<2x1xi1> to vector<2x1xi1>
    %220 = vector.broadcast %219 : vector<2x1xi1> to vector<2x64xi1>
    %221 = arith.select %220, %169, %112 : vector<2x64xi1>, vector<2x64xf32>
    %222 = vector.shape_cast %124 : vector<2x1xi1> to vector<2x1xi1>
    %223 = vector.broadcast %222 : vector<2x1xi1> to vector<2x64xi1>
    %224 = arith.select %223, %167, %115 : vector<2x64xi1>, vector<2x64xf32>
    %225 = vector.shape_cast %126 : vector<2x1xi1> to vector<2x1xi1>
    %226 = vector.broadcast %225 : vector<2x1xi1> to vector<2x64xi1>
    %227 = arith.select %226, %200, %118 : vector<2x64xi1>, vector<2x64xf32>
    %228 = vector.shape_cast %126 : vector<2x1xi1> to vector<2x1xi1>
    %229 = vector.broadcast %228 : vector<2x1xi1> to vector<2x64xi1>
    %230 = arith.select %229, %198, %121 : vector<2x64xi1>, vector<2x64xf32>
    %c2_i32 = arith.constant 2 : i32
    %c7_i32_75 = arith.constant 7 : i32
    %231 = arith.subi %c7_i32_75, %c2_i32 : i32
    %232 = vector.broadcast %c2_i32 : i32 to vector<2x1xi32>
    %233 = arith.cmpi slt, %232, %9 : vector<2x1xi32>
    %234 = vector.broadcast %231 : i32 to vector<2x1xi32>
    %235 = arith.cmpi slt, %234, %9 : vector<2x1xi32>
    %236 = arith.truncf %221 : vector<2x64xf32> to vector<2x64xbf16>
    %cst_76 = arith.constant dense<0.000000e+00> : vector<2x256xf32>
    %237 = tpu.matmul %236, %10, %cst_76 {dimension_numbers = #tpu.dot_dimension_numbers<[1], [0], [0], [1], [0, 0, 1, 1], [], []>} : vector<2x64xbf16>, vector<64x256xbf16>, vector<2x256xf32> -> vector<2x256xf32>
    %238 = arith.truncf %227 : vector<2x64xf32> to vector<2x64xbf16>
    %cst_77 = arith.constant dense<0.000000e+00> : vector<2x256xf32>
    %239 = tpu.matmul %238, %11, %cst_77 {dimension_numbers = #tpu.dot_dimension_numbers<[1], [0], [0], [1], [0, 0, 1, 1], [], []>} : vector<2x64xbf16>, vector<64x256xbf16>, vector<2x256xf32> -> vector<2x256xf32>
    %240 = arith.index_cast %c2_i32 : i32 to index
    %c0_78 = arith.constant 0 : index
    %c0_79 = arith.constant 0 : index
    %241 = vector.load %arg10[%240, %c0_78, %c0_79] : memref<8x2x512xf32, #tpu.memory_space<vmem>>, vector<1x2x256xf32>
    %242 = vector.shape_cast %241 : vector<1x2x256xf32> to vector<2x256xf32>
    %243 = arith.addf %242, %237 : vector<2x256xf32>
    %244 = arith.index_cast %231 : i32 to index
    %c0_80 = arith.constant 0 : index
    %c256_81 = arith.constant 256 : index
    %245 = vector.load %arg10[%244, %c0_80, %c256_81] : memref<8x2x512xf32, #tpu.memory_space<vmem>>, vector<1x2x256xf32>
    %246 = vector.shape_cast %245 : vector<1x2x256xf32> to vector<2x256xf32>
    %247 = arith.addf %246, %239 : vector<2x256xf32>
    %248 = vector.extract_strided_slice %243 {offsets = [0, 0], sizes = [2, 64], strides = [1, 1]} : vector<2x256xf32> to vector<2x64xf32>
    %cst_82 = arith.constant 5.000000e-01 : f32
    %249 = vector.broadcast %cst_82 : f32 to vector<2x64xf32>
    %250 = arith.mulf %249, %248 : vector<2x64xf32>
    %251 = math.tanh %250 : vector<2x64xf32>
    %cst_83 = arith.constant 1.000000e+00 : f32
    %252 = vector.broadcast %cst_83 : f32 to vector<2x64xf32>
    %253 = arith.addf %251, %252 : vector<2x64xf32>
    %cst_84 = arith.constant 5.000000e-01 : f32
    %254 = vector.broadcast %cst_84 : f32 to vector<2x64xf32>
    %255 = arith.mulf %254, %253 : vector<2x64xf32>
    %256 = vector.extract_strided_slice %243 {offsets = [0, 64], sizes = [2, 64], strides = [1, 1]} : vector<2x256xf32> to vector<2x64xf32>
    %cst_85 = arith.constant 5.000000e-01 : f32
    %257 = vector.broadcast %cst_85 : f32 to vector<2x64xf32>
    %258 = arith.mulf %257, %256 : vector<2x64xf32>
    %259 = math.tanh %258 : vector<2x64xf32>
    %cst_86 = arith.constant 1.000000e+00 : f32
    %260 = vector.broadcast %cst_86 : f32 to vector<2x64xf32>
    %261 = arith.addf %259, %260 : vector<2x64xf32>
    %cst_87 = arith.constant 5.000000e-01 : f32
    %262 = vector.broadcast %cst_87 : f32 to vector<2x64xf32>
    %263 = arith.mulf %262, %261 : vector<2x64xf32>
    %264 = vector.extract_strided_slice %243 {offsets = [0, 128], sizes = [2, 64], strides = [1, 1]} : vector<2x256xf32> to vector<2x64xf32>
    %265 = math.tanh %264 : vector<2x64xf32>
    %266 = vector.extract_strided_slice %243 {offsets = [0, 192], sizes = [2, 64], strides = [1, 1]} : vector<2x256xf32> to vector<2x64xf32>
    %cst_88 = arith.constant 5.000000e-01 : f32
    %267 = vector.broadcast %cst_88 : f32 to vector<2x64xf32>
    %268 = arith.mulf %267, %266 : vector<2x64xf32>
    %269 = math.tanh %268 : vector<2x64xf32>
    %cst_89 = arith.constant 1.000000e+00 : f32
    %270 = vector.broadcast %cst_89 : f32 to vector<2x64xf32>
    %271 = arith.addf %269, %270 : vector<2x64xf32>
    %cst_90 = arith.constant 5.000000e-01 : f32
    %272 = vector.broadcast %cst_90 : f32 to vector<2x64xf32>
    %273 = arith.mulf %272, %271 : vector<2x64xf32>
    %274 = arith.mulf %263, %224 : vector<2x64xf32>
    %275 = arith.mulf %255, %265 : vector<2x64xf32>
    %276 = arith.addf %274, %275 : vector<2x64xf32>
    %277 = math.tanh %276 : vector<2x64xf32>
    %278 = arith.mulf %273, %277 : vector<2x64xf32>
    %279 = vector.extract_strided_slice %247 {offsets = [0, 0], sizes = [2, 64], strides = [1, 1]} : vector<2x256xf32> to vector<2x64xf32>
    %cst_91 = arith.constant 5.000000e-01 : f32
    %280 = vector.broadcast %cst_91 : f32 to vector<2x64xf32>
    %281 = arith.mulf %280, %279 : vector<2x64xf32>
    %282 = math.tanh %281 : vector<2x64xf32>
    %cst_92 = arith.constant 1.000000e+00 : f32
    %283 = vector.broadcast %cst_92 : f32 to vector<2x64xf32>
    %284 = arith.addf %282, %283 : vector<2x64xf32>
    %cst_93 = arith.constant 5.000000e-01 : f32
    %285 = vector.broadcast %cst_93 : f32 to vector<2x64xf32>
    %286 = arith.mulf %285, %284 : vector<2x64xf32>
    %287 = vector.extract_strided_slice %247 {offsets = [0, 64], sizes = [2, 64], strides = [1, 1]} : vector<2x256xf32> to vector<2x64xf32>
    %cst_94 = arith.constant 5.000000e-01 : f32
    %288 = vector.broadcast %cst_94 : f32 to vector<2x64xf32>
    %289 = arith.mulf %288, %287 : vector<2x64xf32>
    %290 = math.tanh %289 : vector<2x64xf32>
    %cst_95 = arith.constant 1.000000e+00 : f32
    %291 = vector.broadcast %cst_95 : f32 to vector<2x64xf32>
    %292 = arith.addf %290, %291 : vector<2x64xf32>
    %cst_96 = arith.constant 5.000000e-01 : f32
    %293 = vector.broadcast %cst_96 : f32 to vector<2x64xf32>
    %294 = arith.mulf %293, %292 : vector<2x64xf32>
    %295 = vector.extract_strided_slice %247 {offsets = [0, 128], sizes = [2, 64], strides = [1, 1]} : vector<2x256xf32> to vector<2x64xf32>
    %296 = math.tanh %295 : vector<2x64xf32>
    %297 = vector.extract_strided_slice %247 {offsets = [0, 192], sizes = [2, 64], strides = [1, 1]} : vector<2x256xf32> to vector<2x64xf32>
    %cst_97 = arith.constant 5.000000e-01 : f32
    %298 = vector.broadcast %cst_97 : f32 to vector<2x64xf32>
    %299 = arith.mulf %298, %297 : vector<2x64xf32>
    %300 = math.tanh %299 : vector<2x64xf32>
    %cst_98 = arith.constant 1.000000e+00 : f32
    %301 = vector.broadcast %cst_98 : f32 to vector<2x64xf32>
    %302 = arith.addf %300, %301 : vector<2x64xf32>
    %cst_99 = arith.constant 5.000000e-01 : f32
    %303 = vector.broadcast %cst_99 : f32 to vector<2x64xf32>
    %304 = arith.mulf %303, %302 : vector<2x64xf32>
    %305 = arith.mulf %294, %230 : vector<2x64xf32>
    %306 = arith.mulf %286, %296 : vector<2x64xf32>
    %307 = arith.addf %305, %306 : vector<2x64xf32>
    %308 = math.tanh %307 : vector<2x64xf32>
    %309 = arith.mulf %304, %308 : vector<2x64xf32>
    %cst_100 = arith.constant 0.000000e+00 : f32
    %310 = vector.shape_cast %233 : vector<2x1xi1> to vector<2x1xi1>
    %311 = vector.broadcast %310 : vector<2x1xi1> to vector<2x64xi1>
    %312 = vector.broadcast %cst_100 : f32 to vector<2x64xf32>
    %313 = arith.select %311, %278, %312 : vector<2x64xi1>, vector<2x64xf32>
    %314 = arith.truncf %313 : vector<2x64xf32> to vector<2x64xbf16>
    %315 = arith.index_cast %c2_i32 : i32 to index
    %c0_101 = arith.constant 0 : index
    %c0_102 = arith.constant 0 : index
    %316 = vector.load %arg11[%315, %c0_101, %c0_102] : memref<8x2x128xbf16, #tpu.memory_space<vmem>>, vector<1x2x64xbf16>
    %317 = vector.shape_cast %316 : vector<1x2x64xbf16> to vector<2x64xbf16>
    %318 = vector.shape_cast %314 : vector<2x64xbf16> to vector<1x2x64xbf16>
    tpu.vector_store %arg11[%315, %c0_101, %c0_102], %318 {strides = array<i32>} : memref<8x2x128xbf16, #tpu.memory_space<vmem>>, vector<1x2x64xbf16>,
    %cst_103 = arith.constant 0.000000e+00 : f32
    %319 = vector.shape_cast %235 : vector<2x1xi1> to vector<2x1xi1>
    %320 = vector.broadcast %319 : vector<2x1xi1> to vector<2x64xi1>
    %321 = vector.broadcast %cst_103 : f32 to vector<2x64xf32>
    %322 = arith.select %320, %309, %321 : vector<2x64xi1>, vector<2x64xf32>
    %323 = arith.truncf %322 : vector<2x64xf32> to vector<2x64xbf16>
    %324 = arith.index_cast %231 : i32 to index
    %c0_104 = arith.constant 0 : index
    %c64_105 = arith.constant 64 : index
    %325 = vector.load %arg11[%324, %c0_104, %c64_105] : memref<8x2x128xbf16, #tpu.memory_space<vmem>>, vector<1x2x64xbf16>
    %326 = vector.shape_cast %325 : vector<1x2x64xbf16> to vector<2x64xbf16>
    %327 = vector.shape_cast %323 : vector<2x64xbf16> to vector<1x2x64xbf16>
    tpu.vector_store %arg11[%324, %c0_104, %c64_105], %327 {strides = array<i32>} : memref<8x2x128xbf16, #tpu.memory_space<vmem>>, vector<1x2x64xbf16>,
    %328 = vector.shape_cast %233 : vector<2x1xi1> to vector<2x1xi1>
    %329 = vector.broadcast %328 : vector<2x1xi1> to vector<2x64xi1>
    %330 = arith.select %329, %278, %221 : vector<2x64xi1>, vector<2x64xf32>
    %331 = vector.shape_cast %233 : vector<2x1xi1> to vector<2x1xi1>
    %332 = vector.broadcast %331 : vector<2x1xi1> to vector<2x64xi1>
    %333 = arith.select %332, %276, %224 : vector<2x64xi1>, vector<2x64xf32>
    %334 = vector.shape_cast %235 : vector<2x1xi1> to vector<2x1xi1>
    %335 = vector.broadcast %334 : vector<2x1xi1> to vector<2x64xi1>
    %336 = arith.select %335, %309, %227 : vector<2x64xi1>, vector<2x64xf32>
    %337 = vector.shape_cast %235 : vector<2x1xi1> to vector<2x1xi1>
    %338 = vector.broadcast %337 : vector<2x1xi1> to vector<2x64xi1>
    %339 = arith.select %338, %307, %230 : vector<2x64xi1>, vector<2x64xf32>
    %c3_i32 = arith.constant 3 : i32
    %c7_i32_106 = arith.constant 7 : i32
    %340 = arith.subi %c7_i32_106, %c3_i32 : i32
    %341 = vector.broadcast %c3_i32 : i32 to vector<2x1xi32>
    %342 = arith.cmpi slt, %341, %9 : vector<2x1xi32>
    %343 = vector.broadcast %340 : i32 to vector<2x1xi32>
    %344 = arith.cmpi slt, %343, %9 : vector<2x1xi32>
    %345 = arith.truncf %330 : vector<2x64xf32> to vector<2x64xbf16>
    %cst_107 = arith.constant dense<0.000000e+00> : vector<2x256xf32>
    %346 = tpu.matmul %345, %10, %cst_107 {dimension_numbers = #tpu.dot_dimension_numbers<[1], [0], [0], [1], [0, 0, 1, 1], [], []>} : vector<2x64xbf16>, vector<64x256xbf16>, vector<2x256xf32> -> vector<2x256xf32>
    %347 = arith.truncf %336 : vector<2x64xf32> to vector<2x64xbf16>
    %cst_108 = arith.constant dense<0.000000e+00> : vector<2x256xf32>
    %348 = tpu.matmul %347, %11, %cst_108 {dimension_numbers = #tpu.dot_dimension_numbers<[1], [0], [0], [1], [0, 0, 1, 1], [], []>} : vector<2x64xbf16>, vector<64x256xbf16>, vector<2x256xf32> -> vector<2x256xf32>
    %349 = arith.index_cast %c3_i32 : i32 to index
    %c0_109 = arith.constant 0 : index
    %c0_110 = arith.constant 0 : index
    %350 = vector.load %arg10[%349, %c0_109, %c0_110] : memref<8x2x512xf32, #tpu.memory_space<vmem>>, vector<1x2x256xf32>
    %351 = vector.shape_cast %350 : vector<1x2x256xf32> to vector<2x256xf32>
    %352 = arith.addf %351, %346 : vector<2x256xf32>
    %353 = arith.index_cast %340 : i32 to index
    %c0_111 = arith.constant 0 : index
    %c256_112 = arith.constant 256 : index
    %354 = vector.load %arg10[%353, %c0_111, %c256_112] : memref<8x2x512xf32, #tpu.memory_space<vmem>>, vector<1x2x256xf32>
    %355 = vector.shape_cast %354 : vector<1x2x256xf32> to vector<2x256xf32>
    %356 = arith.addf %355, %348 : vector<2x256xf32>
    %357 = vector.extract_strided_slice %352 {offsets = [0, 0], sizes = [2, 64], strides = [1, 1]} : vector<2x256xf32> to vector<2x64xf32>
    %cst_113 = arith.constant 5.000000e-01 : f32
    %358 = vector.broadcast %cst_113 : f32 to vector<2x64xf32>
    %359 = arith.mulf %358, %357 : vector<2x64xf32>
    %360 = math.tanh %359 : vector<2x64xf32>
    %cst_114 = arith.constant 1.000000e+00 : f32
    %361 = vector.broadcast %cst_114 : f32 to vector<2x64xf32>
    %362 = arith.addf %360, %361 : vector<2x64xf32>
    %cst_115 = arith.constant 5.000000e-01 : f32
    %363 = vector.broadcast %cst_115 : f32 to vector<2x64xf32>
    %364 = arith.mulf %363, %362 : vector<2x64xf32>
    %365 = vector.extract_strided_slice %352 {offsets = [0, 64], sizes = [2, 64], strides = [1, 1]} : vector<2x256xf32> to vector<2x64xf32>
    %cst_116 = arith.constant 5.000000e-01 : f32
    %366 = vector.broadcast %cst_116 : f32 to vector<2x64xf32>
    %367 = arith.mulf %366, %365 : vector<2x64xf32>
    %368 = math.tanh %367 : vector<2x64xf32>
    %cst_117 = arith.constant 1.000000e+00 : f32
    %369 = vector.broadcast %cst_117 : f32 to vector<2x64xf32>
    %370 = arith.addf %368, %369 : vector<2x64xf32>
    %cst_118 = arith.constant 5.000000e-01 : f32
    %371 = vector.broadcast %cst_118 : f32 to vector<2x64xf32>
    %372 = arith.mulf %371, %370 : vector<2x64xf32>
    %373 = vector.extract_strided_slice %352 {offsets = [0, 128], sizes = [2, 64], strides = [1, 1]} : vector<2x256xf32> to vector<2x64xf32>
    %374 = math.tanh %373 : vector<2x64xf32>
    %375 = vector.extract_strided_slice %352 {offsets = [0, 192], sizes = [2, 64], strides = [1, 1]} : vector<2x256xf32> to vector<2x64xf32>
    %cst_119 = arith.constant 5.000000e-01 : f32
    %376 = vector.broadcast %cst_119 : f32 to vector<2x64xf32>
    %377 = arith.mulf %376, %375 : vector<2x64xf32>
    %378 = math.tanh %377 : vector<2x64xf32>
    %cst_120 = arith.constant 1.000000e+00 : f32
    %379 = vector.broadcast %cst_120 : f32 to vector<2x64xf32>
    %380 = arith.addf %378, %379 : vector<2x64xf32>
    %cst_121 = arith.constant 5.000000e-01 : f32
    %381 = vector.broadcast %cst_121 : f32 to vector<2x64xf32>
    %382 = arith.mulf %381, %380 : vector<2x64xf32>
    %383 = arith.mulf %372, %333 : vector<2x64xf32>
    %384 = arith.mulf %364, %374 : vector<2x64xf32>
    %385 = arith.addf %383, %384 : vector<2x64xf32>
    %386 = math.tanh %385 : vector<2x64xf32>
    %387 = arith.mulf %382, %386 : vector<2x64xf32>
    %388 = vector.extract_strided_slice %356 {offsets = [0, 0], sizes = [2, 64], strides = [1, 1]} : vector<2x256xf32> to vector<2x64xf32>
    %cst_122 = arith.constant 5.000000e-01 : f32
    %389 = vector.broadcast %cst_122 : f32 to vector<2x64xf32>
    %390 = arith.mulf %389, %388 : vector<2x64xf32>
    %391 = math.tanh %390 : vector<2x64xf32>
    %cst_123 = arith.constant 1.000000e+00 : f32
    %392 = vector.broadcast %cst_123 : f32 to vector<2x64xf32>
    %393 = arith.addf %391, %392 : vector<2x64xf32>
    %cst_124 = arith.constant 5.000000e-01 : f32
    %394 = vector.broadcast %cst_124 : f32 to vector<2x64xf32>
    %395 = arith.mulf %394, %393 : vector<2x64xf32>
    %396 = vector.extract_strided_slice %356 {offsets = [0, 64], sizes = [2, 64], strides = [1, 1]} : vector<2x256xf32> to vector<2x64xf32>
    %cst_125 = arith.constant 5.000000e-01 : f32
    %397 = vector.broadcast %cst_125 : f32 to vector<2x64xf32>
    %398 = arith.mulf %397, %396 : vector<2x64xf32>
    %399 = math.tanh %398 : vector<2x64xf32>
    %cst_126 = arith.constant 1.000000e+00 : f32
    %400 = vector.broadcast %cst_126 : f32 to vector<2x64xf32>
    %401 = arith.addf %399, %400 : vector<2x64xf32>
    %cst_127 = arith.constant 5.000000e-01 : f32
    %402 = vector.broadcast %cst_127 : f32 to vector<2x64xf32>
    %403 = arith.mulf %402, %401 : vector<2x64xf32>
    %404 = vector.extract_strided_slice %356 {offsets = [0, 128], sizes = [2, 64], strides = [1, 1]} : vector<2x256xf32> to vector<2x64xf32>
    %405 = math.tanh %404 : vector<2x64xf32>
    %406 = vector.extract_strided_slice %356 {offsets = [0, 192], sizes = [2, 64], strides = [1, 1]} : vector<2x256xf32> to vector<2x64xf32>
    %cst_128 = arith.constant 5.000000e-01 : f32
    %407 = vector.broadcast %cst_128 : f32 to vector<2x64xf32>
    %408 = arith.mulf %407, %406 : vector<2x64xf32>
    %409 = math.tanh %408 : vector<2x64xf32>
    %cst_129 = arith.constant 1.000000e+00 : f32
    %410 = vector.broadcast %cst_129 : f32 to vector<2x64xf32>
    %411 = arith.addf %409, %410 : vector<2x64xf32>
    %cst_130 = arith.constant 5.000000e-01 : f32
    %412 = vector.broadcast %cst_130 : f32 to vector<2x64xf32>
    %413 = arith.mulf %412, %411 : vector<2x64xf32>
    %414 = arith.mulf %403, %339 : vector<2x64xf32>
    %415 = arith.mulf %395, %405 : vector<2x64xf32>
    %416 = arith.addf %414, %415 : vector<2x64xf32>
    %417 = math.tanh %416 : vector<2x64xf32>
    %418 = arith.mulf %413, %417 : vector<2x64xf32>
    %cst_131 = arith.constant 0.000000e+00 : f32
    %419 = vector.shape_cast %342 : vector<2x1xi1> to vector<2x1xi1>
    %420 = vector.broadcast %419 : vector<2x1xi1> to vector<2x64xi1>
    %421 = vector.broadcast %cst_131 : f32 to vector<2x64xf32>
    %422 = arith.select %420, %387, %421 : vector<2x64xi1>, vector<2x64xf32>
    %423 = arith.truncf %422 : vector<2x64xf32> to vector<2x64xbf16>
    %424 = arith.index_cast %c3_i32 : i32 to index
    %c0_132 = arith.constant 0 : index
    %c0_133 = arith.constant 0 : index
    %425 = vector.load %arg11[%424, %c0_132, %c0_133] : memref<8x2x128xbf16, #tpu.memory_space<vmem>>, vector<1x2x64xbf16>
    %426 = vector.shape_cast %425 : vector<1x2x64xbf16> to vector<2x64xbf16>
    %427 = vector.shape_cast %423 : vector<2x64xbf16> to vector<1x2x64xbf16>
    tpu.vector_store %arg11[%424, %c0_132, %c0_133], %427 {strides = array<i32>} : memref<8x2x128xbf16, #tpu.memory_space<vmem>>, vector<1x2x64xbf16>,
    %cst_134 = arith.constant 0.000000e+00 : f32
    %428 = vector.shape_cast %344 : vector<2x1xi1> to vector<2x1xi1>
    %429 = vector.broadcast %428 : vector<2x1xi1> to vector<2x64xi1>
    %430 = vector.broadcast %cst_134 : f32 to vector<2x64xf32>
    %431 = arith.select %429, %418, %430 : vector<2x64xi1>, vector<2x64xf32>
    %432 = arith.truncf %431 : vector<2x64xf32> to vector<2x64xbf16>
    %433 = arith.index_cast %340 : i32 to index
    %c0_135 = arith.constant 0 : index
    %c64_136 = arith.constant 64 : index
    %434 = vector.load %arg11[%433, %c0_135, %c64_136] : memref<8x2x128xbf16, #tpu.memory_space<vmem>>, vector<1x2x64xbf16>
    %435 = vector.shape_cast %434 : vector<1x2x64xbf16> to vector<2x64xbf16>
    %436 = vector.shape_cast %432 : vector<2x64xbf16> to vector<1x2x64xbf16>
    tpu.vector_store %arg11[%433, %c0_135, %c64_136], %436 {strides = array<i32>} : memref<8x2x128xbf16, #tpu.memory_space<vmem>>, vector<1x2x64xbf16>,
    %437 = vector.shape_cast %342 : vector<2x1xi1> to vector<2x1xi1>
    %438 = vector.broadcast %437 : vector<2x1xi1> to vector<2x64xi1>
    %439 = arith.select %438, %387, %330 : vector<2x64xi1>, vector<2x64xf32>
    %440 = vector.shape_cast %342 : vector<2x1xi1> to vector<2x1xi1>
    %441 = vector.broadcast %440 : vector<2x1xi1> to vector<2x64xi1>
    %442 = arith.select %441, %385, %333 : vector<2x64xi1>, vector<2x64xf32>
    %443 = vector.shape_cast %344 : vector<2x1xi1> to vector<2x1xi1>
    %444 = vector.broadcast %443 : vector<2x1xi1> to vector<2x64xi1>
    %445 = arith.select %444, %418, %336 : vector<2x64xi1>, vector<2x64xf32>
    %446 = vector.shape_cast %344 : vector<2x1xi1> to vector<2x1xi1>
    %447 = vector.broadcast %446 : vector<2x1xi1> to vector<2x64xi1>
    %448 = arith.select %447, %416, %339 : vector<2x64xi1>, vector<2x64xf32>
    %c4_i32 = arith.constant 4 : i32
    %c7_i32_137 = arith.constant 7 : i32
    %449 = arith.subi %c7_i32_137, %c4_i32 : i32
    %450 = vector.broadcast %c4_i32 : i32 to vector<2x1xi32>
    %451 = arith.cmpi slt, %450, %9 : vector<2x1xi32>
    %452 = vector.broadcast %449 : i32 to vector<2x1xi32>
    %453 = arith.cmpi slt, %452, %9 : vector<2x1xi32>
    %454 = arith.truncf %439 : vector<2x64xf32> to vector<2x64xbf16>
    %cst_138 = arith.constant dense<0.000000e+00> : vector<2x256xf32>
    %455 = tpu.matmul %454, %10, %cst_138 {dimension_numbers = #tpu.dot_dimension_numbers<[1], [0], [0], [1], [0, 0, 1, 1], [], []>} : vector<2x64xbf16>, vector<64x256xbf16>, vector<2x256xf32> -> vector<2x256xf32>
    %456 = arith.truncf %445 : vector<2x64xf32> to vector<2x64xbf16>
    %cst_139 = arith.constant dense<0.000000e+00> : vector<2x256xf32>
    %457 = tpu.matmul %456, %11, %cst_139 {dimension_numbers = #tpu.dot_dimension_numbers<[1], [0], [0], [1], [0, 0, 1, 1], [], []>} : vector<2x64xbf16>, vector<64x256xbf16>, vector<2x256xf32> -> vector<2x256xf32>
    %458 = arith.index_cast %c4_i32 : i32 to index
    %c0_140 = arith.constant 0 : index
    %c0_141 = arith.constant 0 : index
    %459 = vector.load %arg10[%458, %c0_140, %c0_141] : memref<8x2x512xf32, #tpu.memory_space<vmem>>, vector<1x2x256xf32>
    %460 = vector.shape_cast %459 : vector<1x2x256xf32> to vector<2x256xf32>
    %461 = arith.addf %460, %455 : vector<2x256xf32>
    %462 = arith.index_cast %449 : i32 to index
    %c0_142 = arith.constant 0 : index
    %c256_143 = arith.constant 256 : index
    %463 = vector.load %arg10[%462, %c0_142, %c256_143] : memref<8x2x512xf32, #tpu.memory_space<vmem>>, vector<1x2x256xf32>
    %464 = vector.shape_cast %463 : vector<1x2x256xf32> to vector<2x256xf32>
    %465 = arith.addf %464, %457 : vector<2x256xf32>
    %466 = vector.extract_strided_slice %461 {offsets = [0, 0], sizes = [2, 64], strides = [1, 1]} : vector<2x256xf32> to vector<2x64xf32>
    %cst_144 = arith.constant 5.000000e-01 : f32
    %467 = vector.broadcast %cst_144 : f32 to vector<2x64xf32>
    %468 = arith.mulf %467, %466 : vector<2x64xf32>
    %469 = math.tanh %468 : vector<2x64xf32>
    %cst_145 = arith.constant 1.000000e+00 : f32
    %470 = vector.broadcast %cst_145 : f32 to vector<2x64xf32>
    %471 = arith.addf %469, %470 : vector<2x64xf32>
    %cst_146 = arith.constant 5.000000e-01 : f32
    %472 = vector.broadcast %cst_146 : f32 to vector<2x64xf32>
    %473 = arith.mulf %472, %471 : vector<2x64xf32>
    %474 = vector.extract_strided_slice %461 {offsets = [0, 64], sizes = [2, 64], strides = [1, 1]} : vector<2x256xf32> to vector<2x64xf32>
    %cst_147 = arith.constant 5.000000e-01 : f32
    %475 = vector.broadcast %cst_147 : f32 to vector<2x64xf32>
    %476 = arith.mulf %475, %474 : vector<2x64xf32>
    %477 = math.tanh %476 : vector<2x64xf32>
    %cst_148 = arith.constant 1.000000e+00 : f32
    %478 = vector.broadcast %cst_148 : f32 to vector<2x64xf32>
    %479 = arith.addf %477, %478 : vector<2x64xf32>
    %cst_149 = arith.constant 5.000000e-01 : f32
    %480 = vector.broadcast %cst_149 : f32 to vector<2x64xf32>
    %481 = arith.mulf %480, %479 : vector<2x64xf32>
    %482 = vector.extract_strided_slice %461 {offsets = [0, 128], sizes = [2, 64], strides = [1, 1]} : vector<2x256xf32> to vector<2x64xf32>
    %483 = math.tanh %482 : vector<2x64xf32>
    %484 = vector.extract_strided_slice %461 {offsets = [0, 192], sizes = [2, 64], strides = [1, 1]} : vector<2x256xf32> to vector<2x64xf32>
    %cst_150 = arith.constant 5.000000e-01 : f32
    %485 = vector.broadcast %cst_150 : f32 to vector<2x64xf32>
    %486 = arith.mulf %485, %484 : vector<2x64xf32>
    %487 = math.tanh %486 : vector<2x64xf32>
    %cst_151 = arith.constant 1.000000e+00 : f32
    %488 = vector.broadcast %cst_151 : f32 to vector<2x64xf32>
    %489 = arith.addf %487, %488 : vector<2x64xf32>
    %cst_152 = arith.constant 5.000000e-01 : f32
    %490 = vector.broadcast %cst_152 : f32 to vector<2x64xf32>
    %491 = arith.mulf %490, %489 : vector<2x64xf32>
    %492 = arith.mulf %481, %442 : vector<2x64xf32>
    %493 = arith.mulf %473, %483 : vector<2x64xf32>
    %494 = arith.addf %492, %493 : vector<2x64xf32>
    %495 = math.tanh %494 : vector<2x64xf32>
    %496 = arith.mulf %491, %495 : vector<2x64xf32>
    %497 = vector.extract_strided_slice %465 {offsets = [0, 0], sizes = [2, 64], strides = [1, 1]} : vector<2x256xf32> to vector<2x64xf32>
    %cst_153 = arith.constant 5.000000e-01 : f32
    %498 = vector.broadcast %cst_153 : f32 to vector<2x64xf32>
    %499 = arith.mulf %498, %497 : vector<2x64xf32>
    %500 = math.tanh %499 : vector<2x64xf32>
    %cst_154 = arith.constant 1.000000e+00 : f32
    %501 = vector.broadcast %cst_154 : f32 to vector<2x64xf32>
    %502 = arith.addf %500, %501 : vector<2x64xf32>
    %cst_155 = arith.constant 5.000000e-01 : f32
    %503 = vector.broadcast %cst_155 : f32 to vector<2x64xf32>
    %504 = arith.mulf %503, %502 : vector<2x64xf32>
    %505 = vector.extract_strided_slice %465 {offsets = [0, 64], sizes = [2, 64], strides = [1, 1]} : vector<2x256xf32> to vector<2x64xf32>
    %cst_156 = arith.constant 5.000000e-01 : f32
    %506 = vector.broadcast %cst_156 : f32 to vector<2x64xf32>
    %507 = arith.mulf %506, %505 : vector<2x64xf32>
    %508 = math.tanh %507 : vector<2x64xf32>
    %cst_157 = arith.constant 1.000000e+00 : f32
    %509 = vector.broadcast %cst_157 : f32 to vector<2x64xf32>
    %510 = arith.addf %508, %509 : vector<2x64xf32>
    %cst_158 = arith.constant 5.000000e-01 : f32
    %511 = vector.broadcast %cst_158 : f32 to vector<2x64xf32>
    %512 = arith.mulf %511, %510 : vector<2x64xf32>
    %513 = vector.extract_strided_slice %465 {offsets = [0, 128], sizes = [2, 64], strides = [1, 1]} : vector<2x256xf32> to vector<2x64xf32>
    %514 = math.tanh %513 : vector<2x64xf32>
    %515 = vector.extract_strided_slice %465 {offsets = [0, 192], sizes = [2, 64], strides = [1, 1]} : vector<2x256xf32> to vector<2x64xf32>
    %cst_159 = arith.constant 5.000000e-01 : f32
    %516 = vector.broadcast %cst_159 : f32 to vector<2x64xf32>
    %517 = arith.mulf %516, %515 : vector<2x64xf32>
    %518 = math.tanh %517 : vector<2x64xf32>
    %cst_160 = arith.constant 1.000000e+00 : f32
    %519 = vector.broadcast %cst_160 : f32 to vector<2x64xf32>
    %520 = arith.addf %518, %519 : vector<2x64xf32>
    %cst_161 = arith.constant 5.000000e-01 : f32
    %521 = vector.broadcast %cst_161 : f32 to vector<2x64xf32>
    %522 = arith.mulf %521, %520 : vector<2x64xf32>
    %523 = arith.mulf %512, %448 : vector<2x64xf32>
    %524 = arith.mulf %504, %514 : vector<2x64xf32>
    %525 = arith.addf %523, %524 : vector<2x64xf32>
    %526 = math.tanh %525 : vector<2x64xf32>
    %527 = arith.mulf %522, %526 : vector<2x64xf32>
    %cst_162 = arith.constant 0.000000e+00 : f32
    %528 = vector.shape_cast %451 : vector<2x1xi1> to vector<2x1xi1>
    %529 = vector.broadcast %528 : vector<2x1xi1> to vector<2x64xi1>
    %530 = vector.broadcast %cst_162 : f32 to vector<2x64xf32>
    %531 = arith.select %529, %496, %530 : vector<2x64xi1>, vector<2x64xf32>
    %532 = arith.truncf %531 : vector<2x64xf32> to vector<2x64xbf16>
    %533 = arith.index_cast %c4_i32 : i32 to index
    %c0_163 = arith.constant 0 : index
    %c0_164 = arith.constant 0 : index
    %534 = vector.load %arg11[%533, %c0_163, %c0_164] : memref<8x2x128xbf16, #tpu.memory_space<vmem>>, vector<1x2x64xbf16>
    %535 = vector.shape_cast %534 : vector<1x2x64xbf16> to vector<2x64xbf16>
    %536 = vector.shape_cast %532 : vector<2x64xbf16> to vector<1x2x64xbf16>
    tpu.vector_store %arg11[%533, %c0_163, %c0_164], %536 {strides = array<i32>} : memref<8x2x128xbf16, #tpu.memory_space<vmem>>, vector<1x2x64xbf16>,
    %cst_165 = arith.constant 0.000000e+00 : f32
    %537 = vector.shape_cast %453 : vector<2x1xi1> to vector<2x1xi1>
    %538 = vector.broadcast %537 : vector<2x1xi1> to vector<2x64xi1>
    %539 = vector.broadcast %cst_165 : f32 to vector<2x64xf32>
    %540 = arith.select %538, %527, %539 : vector<2x64xi1>, vector<2x64xf32>
    %541 = arith.truncf %540 : vector<2x64xf32> to vector<2x64xbf16>
    %542 = arith.index_cast %449 : i32 to index
    %c0_166 = arith.constant 0 : index
    %c64_167 = arith.constant 64 : index
    %543 = vector.load %arg11[%542, %c0_166, %c64_167] : memref<8x2x128xbf16, #tpu.memory_space<vmem>>, vector<1x2x64xbf16>
    %544 = vector.shape_cast %543 : vector<1x2x64xbf16> to vector<2x64xbf16>
    %545 = vector.shape_cast %541 : vector<2x64xbf16> to vector<1x2x64xbf16>
    tpu.vector_store %arg11[%542, %c0_166, %c64_167], %545 {strides = array<i32>} : memref<8x2x128xbf16, #tpu.memory_space<vmem>>, vector<1x2x64xbf16>,
    %546 = vector.shape_cast %451 : vector<2x1xi1> to vector<2x1xi1>
    %547 = vector.broadcast %546 : vector<2x1xi1> to vector<2x64xi1>
    %548 = arith.select %547, %496, %439 : vector<2x64xi1>, vector<2x64xf32>
    %549 = vector.shape_cast %451 : vector<2x1xi1> to vector<2x1xi1>
    %550 = vector.broadcast %549 : vector<2x1xi1> to vector<2x64xi1>
    %551 = arith.select %550, %494, %442 : vector<2x64xi1>, vector<2x64xf32>
    %552 = vector.shape_cast %453 : vector<2x1xi1> to vector<2x1xi1>
    %553 = vector.broadcast %552 : vector<2x1xi1> to vector<2x64xi1>
    %554 = arith.select %553, %527, %445 : vector<2x64xi1>, vector<2x64xf32>
    %555 = vector.shape_cast %453 : vector<2x1xi1> to vector<2x1xi1>
    %556 = vector.broadcast %555 : vector<2x1xi1> to vector<2x64xi1>
    %557 = arith.select %556, %525, %448 : vector<2x64xi1>, vector<2x64xf32>
    %c5_i32 = arith.constant 5 : i32
    %c7_i32_168 = arith.constant 7 : i32
    %558 = arith.subi %c7_i32_168, %c5_i32 : i32
    %559 = vector.broadcast %c5_i32 : i32 to vector<2x1xi32>
    %560 = arith.cmpi slt, %559, %9 : vector<2x1xi32>
    %561 = vector.broadcast %558 : i32 to vector<2x1xi32>
    %562 = arith.cmpi slt, %561, %9 : vector<2x1xi32>
    %563 = arith.truncf %548 : vector<2x64xf32> to vector<2x64xbf16>
    %cst_169 = arith.constant dense<0.000000e+00> : vector<2x256xf32>
    %564 = tpu.matmul %563, %10, %cst_169 {dimension_numbers = #tpu.dot_dimension_numbers<[1], [0], [0], [1], [0, 0, 1, 1], [], []>} : vector<2x64xbf16>, vector<64x256xbf16>, vector<2x256xf32> -> vector<2x256xf32>
    %565 = arith.truncf %554 : vector<2x64xf32> to vector<2x64xbf16>
    %cst_170 = arith.constant dense<0.000000e+00> : vector<2x256xf32>
    %566 = tpu.matmul %565, %11, %cst_170 {dimension_numbers = #tpu.dot_dimension_numbers<[1], [0], [0], [1], [0, 0, 1, 1], [], []>} : vector<2x64xbf16>, vector<64x256xbf16>, vector<2x256xf32> -> vector<2x256xf32>
    %567 = arith.index_cast %c5_i32 : i32 to index
    %c0_171 = arith.constant 0 : index
    %c0_172 = arith.constant 0 : index
    %568 = vector.load %arg10[%567, %c0_171, %c0_172] : memref<8x2x512xf32, #tpu.memory_space<vmem>>, vector<1x2x256xf32>
    %569 = vector.shape_cast %568 : vector<1x2x256xf32> to vector<2x256xf32>
    %570 = arith.addf %569, %564 : vector<2x256xf32>
    %571 = arith.index_cast %558 : i32 to index
    %c0_173 = arith.constant 0 : index
    %c256_174 = arith.constant 256 : index
    %572 = vector.load %arg10[%571, %c0_173, %c256_174] : memref<8x2x512xf32, #tpu.memory_space<vmem>>, vector<1x2x256xf32>
    %573 = vector.shape_cast %572 : vector<1x2x256xf32> to vector<2x256xf32>
    %574 = arith.addf %573, %566 : vector<2x256xf32>
    %575 = vector.extract_strided_slice %570 {offsets = [0, 0], sizes = [2, 64], strides = [1, 1]} : vector<2x256xf32> to vector<2x64xf32>
    %cst_175 = arith.constant 5.000000e-01 : f32
    %576 = vector.broadcast %cst_175 : f32 to vector<2x64xf32>
    %577 = arith.mulf %576, %575 : vector<2x64xf32>
    %578 = math.tanh %577 : vector<2x64xf32>
    %cst_176 = arith.constant 1.000000e+00 : f32
    %579 = vector.broadcast %cst_176 : f32 to vector<2x64xf32>
    %580 = arith.addf %578, %579 : vector<2x64xf32>
    %cst_177 = arith.constant 5.000000e-01 : f32
    %581 = vector.broadcast %cst_177 : f32 to vector<2x64xf32>
    %582 = arith.mulf %581, %580 : vector<2x64xf32>
    %583 = vector.extract_strided_slice %570 {offsets = [0, 64], sizes = [2, 64], strides = [1, 1]} : vector<2x256xf32> to vector<2x64xf32>
    %cst_178 = arith.constant 5.000000e-01 : f32
    %584 = vector.broadcast %cst_178 : f32 to vector<2x64xf32>
    %585 = arith.mulf %584, %583 : vector<2x64xf32>
    %586 = math.tanh %585 : vector<2x64xf32>
    %cst_179 = arith.constant 1.000000e+00 : f32
    %587 = vector.broadcast %cst_179 : f32 to vector<2x64xf32>
    %588 = arith.addf %586, %587 : vector<2x64xf32>
    %cst_180 = arith.constant 5.000000e-01 : f32
    %589 = vector.broadcast %cst_180 : f32 to vector<2x64xf32>
    %590 = arith.mulf %589, %588 : vector<2x64xf32>
    %591 = vector.extract_strided_slice %570 {offsets = [0, 128], sizes = [2, 64], strides = [1, 1]} : vector<2x256xf32> to vector<2x64xf32>
    %592 = math.tanh %591 : vector<2x64xf32>
    %593 = vector.extract_strided_slice %570 {offsets = [0, 192], sizes = [2, 64], strides = [1, 1]} : vector<2x256xf32> to vector<2x64xf32>
    %cst_181 = arith.constant 5.000000e-01 : f32
    %594 = vector.broadcast %cst_181 : f32 to vector<2x64xf32>
    %595 = arith.mulf %594, %593 : vector<2x64xf32>
    %596 = math.tanh %595 : vector<2x64xf32>
    %cst_182 = arith.constant 1.000000e+00 : f32
    %597 = vector.broadcast %cst_182 : f32 to vector<2x64xf32>
    %598 = arith.addf %596, %597 : vector<2x64xf32>
    %cst_183 = arith.constant 5.000000e-01 : f32
    %599 = vector.broadcast %cst_183 : f32 to vector<2x64xf32>
    %600 = arith.mulf %599, %598 : vector<2x64xf32>
    %601 = arith.mulf %590, %551 : vector<2x64xf32>
    %602 = arith.mulf %582, %592 : vector<2x64xf32>
    %603 = arith.addf %601, %602 : vector<2x64xf32>
    %604 = math.tanh %603 : vector<2x64xf32>
    %605 = arith.mulf %600, %604 : vector<2x64xf32>
    %606 = vector.extract_strided_slice %574 {offsets = [0, 0], sizes = [2, 64], strides = [1, 1]} : vector<2x256xf32> to vector<2x64xf32>
    %cst_184 = arith.constant 5.000000e-01 : f32
    %607 = vector.broadcast %cst_184 : f32 to vector<2x64xf32>
    %608 = arith.mulf %607, %606 : vector<2x64xf32>
    %609 = math.tanh %608 : vector<2x64xf32>
    %cst_185 = arith.constant 1.000000e+00 : f32
    %610 = vector.broadcast %cst_185 : f32 to vector<2x64xf32>
    %611 = arith.addf %609, %610 : vector<2x64xf32>
    %cst_186 = arith.constant 5.000000e-01 : f32
    %612 = vector.broadcast %cst_186 : f32 to vector<2x64xf32>
    %613 = arith.mulf %612, %611 : vector<2x64xf32>
    %614 = vector.extract_strided_slice %574 {offsets = [0, 64], sizes = [2, 64], strides = [1, 1]} : vector<2x256xf32> to vector<2x64xf32>
    %cst_187 = arith.constant 5.000000e-01 : f32
    %615 = vector.broadcast %cst_187 : f32 to vector<2x64xf32>
    %616 = arith.mulf %615, %614 : vector<2x64xf32>
    %617 = math.tanh %616 : vector<2x64xf32>
    %cst_188 = arith.constant 1.000000e+00 : f32
    %618 = vector.broadcast %cst_188 : f32 to vector<2x64xf32>
    %619 = arith.addf %617, %618 : vector<2x64xf32>
    %cst_189 = arith.constant 5.000000e-01 : f32
    %620 = vector.broadcast %cst_189 : f32 to vector<2x64xf32>
    %621 = arith.mulf %620, %619 : vector<2x64xf32>
    %622 = vector.extract_strided_slice %574 {offsets = [0, 128], sizes = [2, 64], strides = [1, 1]} : vector<2x256xf32> to vector<2x64xf32>
    %623 = math.tanh %622 : vector<2x64xf32>
    %624 = vector.extract_strided_slice %574 {offsets = [0, 192], sizes = [2, 64], strides = [1, 1]} : vector<2x256xf32> to vector<2x64xf32>
    %cst_190 = arith.constant 5.000000e-01 : f32
    %625 = vector.broadcast %cst_190 : f32 to vector<2x64xf32>
    %626 = arith.mulf %625, %624 : vector<2x64xf32>
    %627 = math.tanh %626 : vector<2x64xf32>
    %cst_191 = arith.constant 1.000000e+00 : f32
    %628 = vector.broadcast %cst_191 : f32 to vector<2x64xf32>
    %629 = arith.addf %627, %628 : vector<2x64xf32>
    %cst_192 = arith.constant 5.000000e-01 : f32
    %630 = vector.broadcast %cst_192 : f32 to vector<2x64xf32>
    %631 = arith.mulf %630, %629 : vector<2x64xf32>
    %632 = arith.mulf %621, %557 : vector<2x64xf32>
    %633 = arith.mulf %613, %623 : vector<2x64xf32>
    %634 = arith.addf %632, %633 : vector<2x64xf32>
    %635 = math.tanh %634 : vector<2x64xf32>
    %636 = arith.mulf %631, %635 : vector<2x64xf32>
    %cst_193 = arith.constant 0.000000e+00 : f32
    %637 = vector.shape_cast %560 : vector<2x1xi1> to vector<2x1xi1>
    %638 = vector.broadcast %637 : vector<2x1xi1> to vector<2x64xi1>
    %639 = vector.broadcast %cst_193 : f32 to vector<2x64xf32>
    %640 = arith.select %638, %605, %639 : vector<2x64xi1>, vector<2x64xf32>
    %641 = arith.truncf %640 : vector<2x64xf32> to vector<2x64xbf16>
    %642 = arith.index_cast %c5_i32 : i32 to index
    %c0_194 = arith.constant 0 : index
    %c0_195 = arith.constant 0 : index
    %643 = vector.load %arg11[%642, %c0_194, %c0_195] : memref<8x2x128xbf16, #tpu.memory_space<vmem>>, vector<1x2x64xbf16>
    %644 = vector.shape_cast %643 : vector<1x2x64xbf16> to vector<2x64xbf16>
    %645 = vector.shape_cast %641 : vector<2x64xbf16> to vector<1x2x64xbf16>
    tpu.vector_store %arg11[%642, %c0_194, %c0_195], %645 {strides = array<i32>} : memref<8x2x128xbf16, #tpu.memory_space<vmem>>, vector<1x2x64xbf16>,
    %cst_196 = arith.constant 0.000000e+00 : f32
    %646 = vector.shape_cast %562 : vector<2x1xi1> to vector<2x1xi1>
    %647 = vector.broadcast %646 : vector<2x1xi1> to vector<2x64xi1>
    %648 = vector.broadcast %cst_196 : f32 to vector<2x64xf32>
    %649 = arith.select %647, %636, %648 : vector<2x64xi1>, vector<2x64xf32>
    %650 = arith.truncf %649 : vector<2x64xf32> to vector<2x64xbf16>
    %651 = arith.index_cast %558 : i32 to index
    %c0_197 = arith.constant 0 : index
    %c64_198 = arith.constant 64 : index
    %652 = vector.load %arg11[%651, %c0_197, %c64_198] : memref<8x2x128xbf16, #tpu.memory_space<vmem>>, vector<1x2x64xbf16>
    %653 = vector.shape_cast %652 : vector<1x2x64xbf16> to vector<2x64xbf16>
    %654 = vector.shape_cast %650 : vector<2x64xbf16> to vector<1x2x64xbf16>
    tpu.vector_store %arg11[%651, %c0_197, %c64_198], %654 {strides = array<i32>} : memref<8x2x128xbf16, #tpu.memory_space<vmem>>, vector<1x2x64xbf16>,
    %655 = vector.shape_cast %560 : vector<2x1xi1> to vector<2x1xi1>
    %656 = vector.broadcast %655 : vector<2x1xi1> to vector<2x64xi1>
    %657 = arith.select %656, %605, %548 : vector<2x64xi1>, vector<2x64xf32>
    %658 = vector.shape_cast %560 : vector<2x1xi1> to vector<2x1xi1>
    %659 = vector.broadcast %658 : vector<2x1xi1> to vector<2x64xi1>
    %660 = arith.select %659, %603, %551 : vector<2x64xi1>, vector<2x64xf32>
    %661 = vector.shape_cast %562 : vector<2x1xi1> to vector<2x1xi1>
    %662 = vector.broadcast %661 : vector<2x1xi1> to vector<2x64xi1>
    %663 = arith.select %662, %636, %554 : vector<2x64xi1>, vector<2x64xf32>
    %664 = vector.shape_cast %562 : vector<2x1xi1> to vector<2x1xi1>
    %665 = vector.broadcast %664 : vector<2x1xi1> to vector<2x64xi1>
    %666 = arith.select %665, %634, %557 : vector<2x64xi1>, vector<2x64xf32>
    %c6_i32 = arith.constant 6 : i32
    %c7_i32_199 = arith.constant 7 : i32
    %667 = arith.subi %c7_i32_199, %c6_i32 : i32
    %668 = vector.broadcast %c6_i32 : i32 to vector<2x1xi32>
    %669 = arith.cmpi slt, %668, %9 : vector<2x1xi32>
    %670 = vector.broadcast %667 : i32 to vector<2x1xi32>
    %671 = arith.cmpi slt, %670, %9 : vector<2x1xi32>
    %672 = arith.truncf %657 : vector<2x64xf32> to vector<2x64xbf16>
    %cst_200 = arith.constant dense<0.000000e+00> : vector<2x256xf32>
    %673 = tpu.matmul %672, %10, %cst_200 {dimension_numbers = #tpu.dot_dimension_numbers<[1], [0], [0], [1], [0, 0, 1, 1], [], []>} : vector<2x64xbf16>, vector<64x256xbf16>, vector<2x256xf32> -> vector<2x256xf32>
    %674 = arith.truncf %663 : vector<2x64xf32> to vector<2x64xbf16>
    %cst_201 = arith.constant dense<0.000000e+00> : vector<2x256xf32>
    %675 = tpu.matmul %674, %11, %cst_201 {dimension_numbers = #tpu.dot_dimension_numbers<[1], [0], [0], [1], [0, 0, 1, 1], [], []>} : vector<2x64xbf16>, vector<64x256xbf16>, vector<2x256xf32> -> vector<2x256xf32>
    %676 = arith.index_cast %c6_i32 : i32 to index
    %c0_202 = arith.constant 0 : index
    %c0_203 = arith.constant 0 : index
    %677 = vector.load %arg10[%676, %c0_202, %c0_203] : memref<8x2x512xf32, #tpu.memory_space<vmem>>, vector<1x2x256xf32>
    %678 = vector.shape_cast %677 : vector<1x2x256xf32> to vector<2x256xf32>
    %679 = arith.addf %678, %673 : vector<2x256xf32>
    %680 = arith.index_cast %667 : i32 to index
    %c0_204 = arith.constant 0 : index
    %c256_205 = arith.constant 256 : index
    %681 = vector.load %arg10[%680, %c0_204, %c256_205] : memref<8x2x512xf32, #tpu.memory_space<vmem>>, vector<1x2x256xf32>
    %682 = vector.shape_cast %681 : vector<1x2x256xf32> to vector<2x256xf32>
    %683 = arith.addf %682, %675 : vector<2x256xf32>
    %684 = vector.extract_strided_slice %679 {offsets = [0, 0], sizes = [2, 64], strides = [1, 1]} : vector<2x256xf32> to vector<2x64xf32>
    %cst_206 = arith.constant 5.000000e-01 : f32
    %685 = vector.broadcast %cst_206 : f32 to vector<2x64xf32>
    %686 = arith.mulf %685, %684 : vector<2x64xf32>
    %687 = math.tanh %686 : vector<2x64xf32>
    %cst_207 = arith.constant 1.000000e+00 : f32
    %688 = vector.broadcast %cst_207 : f32 to vector<2x64xf32>
    %689 = arith.addf %687, %688 : vector<2x64xf32>
    %cst_208 = arith.constant 5.000000e-01 : f32
    %690 = vector.broadcast %cst_208 : f32 to vector<2x64xf32>
    %691 = arith.mulf %690, %689 : vector<2x64xf32>
    %692 = vector.extract_strided_slice %679 {offsets = [0, 64], sizes = [2, 64], strides = [1, 1]} : vector<2x256xf32> to vector<2x64xf32>
    %cst_209 = arith.constant 5.000000e-01 : f32
    %693 = vector.broadcast %cst_209 : f32 to vector<2x64xf32>
    %694 = arith.mulf %693, %692 : vector<2x64xf32>
    %695 = math.tanh %694 : vector<2x64xf32>
    %cst_210 = arith.constant 1.000000e+00 : f32
    %696 = vector.broadcast %cst_210 : f32 to vector<2x64xf32>
    %697 = arith.addf %695, %696 : vector<2x64xf32>
    %cst_211 = arith.constant 5.000000e-01 : f32
    %698 = vector.broadcast %cst_211 : f32 to vector<2x64xf32>
    %699 = arith.mulf %698, %697 : vector<2x64xf32>
    %700 = vector.extract_strided_slice %679 {offsets = [0, 128], sizes = [2, 64], strides = [1, 1]} : vector<2x256xf32> to vector<2x64xf32>
    %701 = math.tanh %700 : vector<2x64xf32>
    %702 = vector.extract_strided_slice %679 {offsets = [0, 192], sizes = [2, 64], strides = [1, 1]} : vector<2x256xf32> to vector<2x64xf32>
    %cst_212 = arith.constant 5.000000e-01 : f32
    %703 = vector.broadcast %cst_212 : f32 to vector<2x64xf32>
    %704 = arith.mulf %703, %702 : vector<2x64xf32>
    %705 = math.tanh %704 : vector<2x64xf32>
    %cst_213 = arith.constant 1.000000e+00 : f32
    %706 = vector.broadcast %cst_213 : f32 to vector<2x64xf32>
    %707 = arith.addf %705, %706 : vector<2x64xf32>
    %cst_214 = arith.constant 5.000000e-01 : f32
    %708 = vector.broadcast %cst_214 : f32 to vector<2x64xf32>
    %709 = arith.mulf %708, %707 : vector<2x64xf32>
    %710 = arith.mulf %699, %660 : vector<2x64xf32>
    %711 = arith.mulf %691, %701 : vector<2x64xf32>
    %712 = arith.addf %710, %711 : vector<2x64xf32>
    %713 = math.tanh %712 : vector<2x64xf32>
    %714 = arith.mulf %709, %713 : vector<2x64xf32>
    %715 = vector.extract_strided_slice %683 {offsets = [0, 0], sizes = [2, 64], strides = [1, 1]} : vector<2x256xf32> to vector<2x64xf32>
    %cst_215 = arith.constant 5.000000e-01 : f32
    %716 = vector.broadcast %cst_215 : f32 to vector<2x64xf32>
    %717 = arith.mulf %716, %715 : vector<2x64xf32>
    %718 = math.tanh %717 : vector<2x64xf32>
    %cst_216 = arith.constant 1.000000e+00 : f32
    %719 = vector.broadcast %cst_216 : f32 to vector<2x64xf32>
    %720 = arith.addf %718, %719 : vector<2x64xf32>
    %cst_217 = arith.constant 5.000000e-01 : f32
    %721 = vector.broadcast %cst_217 : f32 to vector<2x64xf32>
    %722 = arith.mulf %721, %720 : vector<2x64xf32>
    %723 = vector.extract_strided_slice %683 {offsets = [0, 64], sizes = [2, 64], strides = [1, 1]} : vector<2x256xf32> to vector<2x64xf32>
    %cst_218 = arith.constant 5.000000e-01 : f32
    %724 = vector.broadcast %cst_218 : f32 to vector<2x64xf32>
    %725 = arith.mulf %724, %723 : vector<2x64xf32>
    %726 = math.tanh %725 : vector<2x64xf32>
    %cst_219 = arith.constant 1.000000e+00 : f32
    %727 = vector.broadcast %cst_219 : f32 to vector<2x64xf32>
    %728 = arith.addf %726, %727 : vector<2x64xf32>
    %cst_220 = arith.constant 5.000000e-01 : f32
    %729 = vector.broadcast %cst_220 : f32 to vector<2x64xf32>
    %730 = arith.mulf %729, %728 : vector<2x64xf32>
    %731 = vector.extract_strided_slice %683 {offsets = [0, 128], sizes = [2, 64], strides = [1, 1]} : vector<2x256xf32> to vector<2x64xf32>
    %732 = math.tanh %731 : vector<2x64xf32>
    %733 = vector.extract_strided_slice %683 {offsets = [0, 192], sizes = [2, 64], strides = [1, 1]} : vector<2x256xf32> to vector<2x64xf32>
    %cst_221 = arith.constant 5.000000e-01 : f32
    %734 = vector.broadcast %cst_221 : f32 to vector<2x64xf32>
    %735 = arith.mulf %734, %733 : vector<2x64xf32>
    %736 = math.tanh %735 : vector<2x64xf32>
    %cst_222 = arith.constant 1.000000e+00 : f32
    %737 = vector.broadcast %cst_222 : f32 to vector<2x64xf32>
    %738 = arith.addf %736, %737 : vector<2x64xf32>
    %cst_223 = arith.constant 5.000000e-01 : f32
    %739 = vector.broadcast %cst_223 : f32 to vector<2x64xf32>
    %740 = arith.mulf %739, %738 : vector<2x64xf32>
    %741 = arith.mulf %730, %666 : vector<2x64xf32>
    %742 = arith.mulf %722, %732 : vector<2x64xf32>
    %743 = arith.addf %741, %742 : vector<2x64xf32>
    %744 = math.tanh %743 : vector<2x64xf32>
    %745 = arith.mulf %740, %744 : vector<2x64xf32>
    %cst_224 = arith.constant 0.000000e+00 : f32
    %746 = vector.shape_cast %669 : vector<2x1xi1> to vector<2x1xi1>
    %747 = vector.broadcast %746 : vector<2x1xi1> to vector<2x64xi1>
    %748 = vector.broadcast %cst_224 : f32 to vector<2x64xf32>
    %749 = arith.select %747, %714, %748 : vector<2x64xi1>, vector<2x64xf32>
    %750 = arith.truncf %749 : vector<2x64xf32> to vector<2x64xbf16>
    %751 = arith.index_cast %c6_i32 : i32 to index
    %c0_225 = arith.constant 0 : index
    %c0_226 = arith.constant 0 : index
    %752 = vector.load %arg11[%751, %c0_225, %c0_226] : memref<8x2x128xbf16, #tpu.memory_space<vmem>>, vector<1x2x64xbf16>
    %753 = vector.shape_cast %752 : vector<1x2x64xbf16> to vector<2x64xbf16>
    %754 = vector.shape_cast %750 : vector<2x64xbf16> to vector<1x2x64xbf16>
    tpu.vector_store %arg11[%751, %c0_225, %c0_226], %754 {strides = array<i32>} : memref<8x2x128xbf16, #tpu.memory_space<vmem>>, vector<1x2x64xbf16>,
    %cst_227 = arith.constant 0.000000e+00 : f32
    %755 = vector.shape_cast %671 : vector<2x1xi1> to vector<2x1xi1>
    %756 = vector.broadcast %755 : vector<2x1xi1> to vector<2x64xi1>
    %757 = vector.broadcast %cst_227 : f32 to vector<2x64xf32>
    %758 = arith.select %756, %745, %757 : vector<2x64xi1>, vector<2x64xf32>
    %759 = arith.truncf %758 : vector<2x64xf32> to vector<2x64xbf16>
    %760 = arith.index_cast %667 : i32 to index
    %c0_228 = arith.constant 0 : index
    %c64_229 = arith.constant 64 : index
    %761 = vector.load %arg11[%760, %c0_228, %c64_229] : memref<8x2x128xbf16, #tpu.memory_space<vmem>>, vector<1x2x64xbf16>
    %762 = vector.shape_cast %761 : vector<1x2x64xbf16> to vector<2x64xbf16>
    %763 = vector.shape_cast %759 : vector<2x64xbf16> to vector<1x2x64xbf16>
    tpu.vector_store %arg11[%760, %c0_228, %c64_229], %763 {strides = array<i32>} : memref<8x2x128xbf16, #tpu.memory_space<vmem>>, vector<1x2x64xbf16>,
    %764 = vector.shape_cast %669 : vector<2x1xi1> to vector<2x1xi1>
    %765 = vector.broadcast %764 : vector<2x1xi1> to vector<2x64xi1>
    %766 = arith.select %765, %714, %657 : vector<2x64xi1>, vector<2x64xf32>
    %767 = vector.shape_cast %669 : vector<2x1xi1> to vector<2x1xi1>
    %768 = vector.broadcast %767 : vector<2x1xi1> to vector<2x64xi1>
    %769 = arith.select %768, %712, %660 : vector<2x64xi1>, vector<2x64xf32>
    %770 = vector.shape_cast %671 : vector<2x1xi1> to vector<2x1xi1>
    %771 = vector.broadcast %770 : vector<2x1xi1> to vector<2x64xi1>
    %772 = arith.select %771, %745, %663 : vector<2x64xi1>, vector<2x64xf32>
    %773 = vector.shape_cast %671 : vector<2x1xi1> to vector<2x1xi1>
    %774 = vector.broadcast %773 : vector<2x1xi1> to vector<2x64xi1>
    %775 = arith.select %774, %743, %666 : vector<2x64xi1>, vector<2x64xf32>
    %c7_i32_230 = arith.constant 7 : i32
    %c7_i32_231 = arith.constant 7 : i32
    %776 = arith.subi %c7_i32_231, %c7_i32_230 : i32
    %777 = vector.broadcast %c7_i32_230 : i32 to vector<2x1xi32>
    %778 = arith.cmpi slt, %777, %9 : vector<2x1xi32>
    %779 = vector.broadcast %776 : i32 to vector<2x1xi32>
    %780 = arith.cmpi slt, %779, %9 : vector<2x1xi32>
    %781 = arith.truncf %766 : vector<2x64xf32> to vector<2x64xbf16>
    %cst_232 = arith.constant dense<0.000000e+00> : vector<2x256xf32>
    %782 = tpu.matmul %781, %10, %cst_232 {dimension_numbers = #tpu.dot_dimension_numbers<[1], [0], [0], [1], [0, 0, 1, 1], [], []>} : vector<2x64xbf16>, vector<64x256xbf16>, vector<2x256xf32> -> vector<2x256xf32>
    %783 = arith.truncf %772 : vector<2x64xf32> to vector<2x64xbf16>
    %cst_233 = arith.constant dense<0.000000e+00> : vector<2x256xf32>
    %784 = tpu.matmul %783, %11, %cst_233 {dimension_numbers = #tpu.dot_dimension_numbers<[1], [0], [0], [1], [0, 0, 1, 1], [], []>} : vector<2x64xbf16>, vector<64x256xbf16>, vector<2x256xf32> -> vector<2x256xf32>
    %785 = arith.index_cast %c7_i32_230 : i32 to index
    %c0_234 = arith.constant 0 : index
    %c0_235 = arith.constant 0 : index
    %786 = vector.load %arg10[%785, %c0_234, %c0_235] : memref<8x2x512xf32, #tpu.memory_space<vmem>>, vector<1x2x256xf32>
    %787 = vector.shape_cast %786 : vector<1x2x256xf32> to vector<2x256xf32>
    %788 = arith.addf %787, %782 : vector<2x256xf32>
    %789 = arith.index_cast %776 : i32 to index
    %c0_236 = arith.constant 0 : index
    %c256_237 = arith.constant 256 : index
    %790 = vector.load %arg10[%789, %c0_236, %c256_237] : memref<8x2x512xf32, #tpu.memory_space<vmem>>, vector<1x2x256xf32>
    %791 = vector.shape_cast %790 : vector<1x2x256xf32> to vector<2x256xf32>
    %792 = arith.addf %791, %784 : vector<2x256xf32>
    %793 = vector.extract_strided_slice %788 {offsets = [0, 0], sizes = [2, 64], strides = [1, 1]} : vector<2x256xf32> to vector<2x64xf32>
    %cst_238 = arith.constant 5.000000e-01 : f32
    %794 = vector.broadcast %cst_238 : f32 to vector<2x64xf32>
    %795 = arith.mulf %794, %793 : vector<2x64xf32>
    %796 = math.tanh %795 : vector<2x64xf32>
    %cst_239 = arith.constant 1.000000e+00 : f32
    %797 = vector.broadcast %cst_239 : f32 to vector<2x64xf32>
    %798 = arith.addf %796, %797 : vector<2x64xf32>
    %cst_240 = arith.constant 5.000000e-01 : f32
    %799 = vector.broadcast %cst_240 : f32 to vector<2x64xf32>
    %800 = arith.mulf %799, %798 : vector<2x64xf32>
    %801 = vector.extract_strided_slice %788 {offsets = [0, 64], sizes = [2, 64], strides = [1, 1]} : vector<2x256xf32> to vector<2x64xf32>
    %cst_241 = arith.constant 5.000000e-01 : f32
    %802 = vector.broadcast %cst_241 : f32 to vector<2x64xf32>
    %803 = arith.mulf %802, %801 : vector<2x64xf32>
    %804 = math.tanh %803 : vector<2x64xf32>
    %cst_242 = arith.constant 1.000000e+00 : f32
    %805 = vector.broadcast %cst_242 : f32 to vector<2x64xf32>
    %806 = arith.addf %804, %805 : vector<2x64xf32>
    %cst_243 = arith.constant 5.000000e-01 : f32
    %807 = vector.broadcast %cst_243 : f32 to vector<2x64xf32>
    %808 = arith.mulf %807, %806 : vector<2x64xf32>
    %809 = vector.extract_strided_slice %788 {offsets = [0, 128], sizes = [2, 64], strides = [1, 1]} : vector<2x256xf32> to vector<2x64xf32>
    %810 = math.tanh %809 : vector<2x64xf32>
    %811 = vector.extract_strided_slice %788 {offsets = [0, 192], sizes = [2, 64], strides = [1, 1]} : vector<2x256xf32> to vector<2x64xf32>
    %cst_244 = arith.constant 5.000000e-01 : f32
    %812 = vector.broadcast %cst_244 : f32 to vector<2x64xf32>
    %813 = arith.mulf %812, %811 : vector<2x64xf32>
    %814 = math.tanh %813 : vector<2x64xf32>
    %cst_245 = arith.constant 1.000000e+00 : f32
    %815 = vector.broadcast %cst_245 : f32 to vector<2x64xf32>
    %816 = arith.addf %814, %815 : vector<2x64xf32>
    %cst_246 = arith.constant 5.000000e-01 : f32
    %817 = vector.broadcast %cst_246 : f32 to vector<2x64xf32>
    %818 = arith.mulf %817, %816 : vector<2x64xf32>
    %819 = arith.mulf %808, %769 : vector<2x64xf32>
    %820 = arith.mulf %800, %810 : vector<2x64xf32>
    %821 = arith.addf %819, %820 : vector<2x64xf32>
    %822 = math.tanh %821 : vector<2x64xf32>
    %823 = arith.mulf %818, %822 : vector<2x64xf32>
    %824 = vector.extract_strided_slice %792 {offsets = [0, 0], sizes = [2, 64], strides = [1, 1]} : vector<2x256xf32> to vector<2x64xf32>
    %cst_247 = arith.constant 5.000000e-01 : f32
    %825 = vector.broadcast %cst_247 : f32 to vector<2x64xf32>
    %826 = arith.mulf %825, %824 : vector<2x64xf32>
    %827 = math.tanh %826 : vector<2x64xf32>
    %cst_248 = arith.constant 1.000000e+00 : f32
    %828 = vector.broadcast %cst_248 : f32 to vector<2x64xf32>
    %829 = arith.addf %827, %828 : vector<2x64xf32>
    %cst_249 = arith.constant 5.000000e-01 : f32
    %830 = vector.broadcast %cst_249 : f32 to vector<2x64xf32>
    %831 = arith.mulf %830, %829 : vector<2x64xf32>
    %832 = vector.extract_strided_slice %792 {offsets = [0, 64], sizes = [2, 64], strides = [1, 1]} : vector<2x256xf32> to vector<2x64xf32>
    %cst_250 = arith.constant 5.000000e-01 : f32
    %833 = vector.broadcast %cst_250 : f32 to vector<2x64xf32>
    %834 = arith.mulf %833, %832 : vector<2x64xf32>
    %835 = math.tanh %834 : vector<2x64xf32>
    %cst_251 = arith.constant 1.000000e+00 : f32
    %836 = vector.broadcast %cst_251 : f32 to vector<2x64xf32>
    %837 = arith.addf %835, %836 : vector<2x64xf32>
    %cst_252 = arith.constant 5.000000e-01 : f32
    %838 = vector.broadcast %cst_252 : f32 to vector<2x64xf32>
    %839 = arith.mulf %838, %837 : vector<2x64xf32>
    %840 = vector.extract_strided_slice %792 {offsets = [0, 128], sizes = [2, 64], strides = [1, 1]} : vector<2x256xf32> to vector<2x64xf32>
    %841 = math.tanh %840 : vector<2x64xf32>
    %842 = vector.extract_strided_slice %792 {offsets = [0, 192], sizes = [2, 64], strides = [1, 1]} : vector<2x256xf32> to vector<2x64xf32>
    %cst_253 = arith.constant 5.000000e-01 : f32
    %843 = vector.broadcast %cst_253 : f32 to vector<2x64xf32>
    %844 = arith.mulf %843, %842 : vector<2x64xf32>
    %845 = math.tanh %844 : vector<2x64xf32>
    %cst_254 = arith.constant 1.000000e+00 : f32
    %846 = vector.broadcast %cst_254 : f32 to vector<2x64xf32>
    %847 = arith.addf %845, %846 : vector<2x64xf32>
    %cst_255 = arith.constant 5.000000e-01 : f32
    %848 = vector.broadcast %cst_255 : f32 to vector<2x64xf32>
    %849 = arith.mulf %848, %847 : vector<2x64xf32>
    %850 = arith.mulf %839, %775 : vector<2x64xf32>
    %851 = arith.mulf %831, %841 : vector<2x64xf32>
    %852 = arith.addf %850, %851 : vector<2x64xf32>
    %853 = math.tanh %852 : vector<2x64xf32>
    %854 = arith.mulf %849, %853 : vector<2x64xf32>
    %cst_256 = arith.constant 0.000000e+00 : f32
    %855 = vector.shape_cast %778 : vector<2x1xi1> to vector<2x1xi1>
    %856 = vector.broadcast %855 : vector<2x1xi1> to vector<2x64xi1>
    %857 = vector.broadcast %cst_256 : f32 to vector<2x64xf32>
    %858 = arith.select %856, %823, %857 : vector<2x64xi1>, vector<2x64xf32>
    %859 = arith.truncf %858 : vector<2x64xf32> to vector<2x64xbf16>
    %860 = arith.index_cast %c7_i32_230 : i32 to index
    %c0_257 = arith.constant 0 : index
    %c0_258 = arith.constant 0 : index
    %861 = vector.load %arg11[%860, %c0_257, %c0_258] : memref<8x2x128xbf16, #tpu.memory_space<vmem>>, vector<1x2x64xbf16>
    %862 = vector.shape_cast %861 : vector<1x2x64xbf16> to vector<2x64xbf16>
    %863 = vector.shape_cast %859 : vector<2x64xbf16> to vector<1x2x64xbf16>
    tpu.vector_store %arg11[%860, %c0_257, %c0_258], %863 {strides = array<i32>} : memref<8x2x128xbf16, #tpu.memory_space<vmem>>, vector<1x2x64xbf16>,
    %cst_259 = arith.constant 0.000000e+00 : f32
    %864 = vector.shape_cast %780 : vector<2x1xi1> to vector<2x1xi1>
    %865 = vector.broadcast %864 : vector<2x1xi1> to vector<2x64xi1>
    %866 = vector.broadcast %cst_259 : f32 to vector<2x64xf32>
    %867 = arith.select %865, %854, %866 : vector<2x64xi1>, vector<2x64xf32>
    %868 = arith.truncf %867 : vector<2x64xf32> to vector<2x64xbf16>
    %869 = arith.index_cast %776 : i32 to index
    %c0_260 = arith.constant 0 : index
    %c64_261 = arith.constant 64 : index
    %870 = vector.load %arg11[%869, %c0_260, %c64_261] : memref<8x2x128xbf16, #tpu.memory_space<vmem>>, vector<1x2x64xbf16>
    %871 = vector.shape_cast %870 : vector<1x2x64xbf16> to vector<2x64xbf16>
    %872 = vector.shape_cast %868 : vector<2x64xbf16> to vector<1x2x64xbf16>
    tpu.vector_store %arg11[%869, %c0_260, %c64_261], %872 {strides = array<i32>} : memref<8x2x128xbf16, #tpu.memory_space<vmem>>, vector<1x2x64xbf16>,
    %873 = vector.shape_cast %778 : vector<2x1xi1> to vector<2x1xi1>
    %874 = vector.broadcast %873 : vector<2x1xi1> to vector<2x64xi1>
    %875 = arith.select %874, %823, %766 : vector<2x64xi1>, vector<2x64xf32>
    %876 = vector.shape_cast %778 : vector<2x1xi1> to vector<2x1xi1>
    %877 = vector.broadcast %876 : vector<2x1xi1> to vector<2x64xi1>
    %878 = arith.select %877, %821, %769 : vector<2x64xi1>, vector<2x64xf32>
    %879 = vector.shape_cast %780 : vector<2x1xi1> to vector<2x1xi1>
    %880 = vector.broadcast %879 : vector<2x1xi1> to vector<2x64xi1>
    %881 = arith.select %880, %854, %772 : vector<2x64xi1>, vector<2x64xf32>
    %882 = vector.shape_cast %780 : vector<2x1xi1> to vector<2x1xi1>
    %883 = vector.broadcast %882 : vector<2x1xi1> to vector<2x64xi1>
    %884 = arith.select %883, %852, %775 : vector<2x64xi1>, vector<2x64xf32>
    %c8_i32 = arith.constant 8 : i32
    %c0_262 = arith.constant 0 : index
    %c0_263 = arith.constant 0 : index
    %885 = vector.load %arg7[%c0_262, %c0_263] : memref<8x128xbf16, #tpu.memory_space<vmem>>, vector<8x128xbf16>
    %c0_264 = arith.constant 0 : index
    %c0_265 = arith.constant 0 : index
    %886 = vector.load %arg8[%c0_264, %c0_265] : memref<8x1xf32, #tpu.memory_space<vmem>>, vector<8x1xf32>
    %c0_i32_266 = arith.constant 0 : i32
    %887 = arith.index_cast %c0_i32_266 : i32 to index
    %c0_267 = arith.constant 0 : index
    %c0_268 = arith.constant 0 : index
    %888 = vector.load %arg11[%887, %c0_267, %c0_268] : memref<8x2x128xbf16, #tpu.memory_space<vmem>>, vector<1x2x128xbf16>
    %889 = vector.shape_cast %888 : vector<1x2x128xbf16> to vector<2x128xbf16>
    %cst_269 = arith.constant dense<0.000000e+00> : vector<8x2xf32>
    %890 = tpu.matmul %885, %889, %cst_269 {dimension_numbers = #tpu.dot_dimension_numbers<[1], [1], [0], [0], [0, 0, 1, 0], [], []>} : vector<8x128xbf16>, vector<2x128xbf16>, vector<8x2xf32> -> vector<8x2xf32>
    %891 = vector.broadcast %886 : vector<8x1xf32> to vector<8x2xf32>
    %892 = arith.addf %890, %891 : vector<8x2xf32>
    %893 = arith.index_cast %c0_i32_266 : i32 to index
    %c0_270 = arith.constant 0 : index
    %c0_271 = arith.constant 0 : index
    %894 = vector.load %arg9[%893, %c0_270, %c0_271] : memref<8x8x2xf32, #tpu.memory_space<vmem>>, vector<1x8x2xf32>
    %895 = vector.shape_cast %894 : vector<1x8x2xf32> to vector<8x2xf32>
    %896 = vector.shape_cast %892 : vector<8x2xf32> to vector<1x8x2xf32>
    tpu.vector_store %arg9[%893, %c0_270, %c0_271], %896 {strides = array<i32>} : memref<8x8x2xf32, #tpu.memory_space<vmem>>, vector<1x8x2xf32>,
    %c1_i32_272 = arith.constant 1 : i32
    %897 = arith.index_cast %c1_i32_272 : i32 to index
    %c0_273 = arith.constant 0 : index
    %c0_274 = arith.constant 0 : index
    %898 = vector.load %arg11[%897, %c0_273, %c0_274] : memref<8x2x128xbf16, #tpu.memory_space<vmem>>, vector<1x2x128xbf16>
    %899 = vector.shape_cast %898 : vector<1x2x128xbf16> to vector<2x128xbf16>
    %cst_275 = arith.constant dense<0.000000e+00> : vector<8x2xf32>
    %900 = tpu.matmul %885, %899, %cst_275 {dimension_numbers = #tpu.dot_dimension_numbers<[1], [1], [0], [0], [0, 0, 1, 0], [], []>} : vector<8x128xbf16>, vector<2x128xbf16>, vector<8x2xf32> -> vector<8x2xf32>
    %901 = vector.broadcast %886 : vector<8x1xf32> to vector<8x2xf32>
    %902 = arith.addf %900, %901 : vector<8x2xf32>
    %903 = arith.index_cast %c1_i32_272 : i32 to index
    %c0_276 = arith.constant 0 : index
    %c0_277 = arith.constant 0 : index
    %904 = vector.load %arg9[%903, %c0_276, %c0_277] : memref<8x8x2xf32, #tpu.memory_space<vmem>>, vector<1x8x2xf32>
    %905 = vector.shape_cast %904 : vector<1x8x2xf32> to vector<8x2xf32>
    %906 = vector.shape_cast %902 : vector<8x2xf32> to vector<1x8x2xf32>
    tpu.vector_store %arg9[%903, %c0_276, %c0_277], %906 {strides = array<i32>} : memref<8x8x2xf32, #tpu.memory_space<vmem>>, vector<1x8x2xf32>,
    %c2_i32_278 = arith.constant 2 : i32
    %907 = arith.index_cast %c2_i32_278 : i32 to index
    %c0_279 = arith.constant 0 : index
    %c0_280 = arith.constant 0 : index
    %908 = vector.load %arg11[%907, %c0_279, %c0_280] : memref<8x2x128xbf16, #tpu.memory_space<vmem>>, vector<1x2x128xbf16>
    %909 = vector.shape_cast %908 : vector<1x2x128xbf16> to vector<2x128xbf16>
    %cst_281 = arith.constant dense<0.000000e+00> : vector<8x2xf32>
    %910 = tpu.matmul %885, %909, %cst_281 {dimension_numbers = #tpu.dot_dimension_numbers<[1], [1], [0], [0], [0, 0, 1, 0], [], []>} : vector<8x128xbf16>, vector<2x128xbf16>, vector<8x2xf32> -> vector<8x2xf32>
    %911 = vector.broadcast %886 : vector<8x1xf32> to vector<8x2xf32>
    %912 = arith.addf %910, %911 : vector<8x2xf32>
    %913 = arith.index_cast %c2_i32_278 : i32 to index
    %c0_282 = arith.constant 0 : index
    %c0_283 = arith.constant 0 : index
    %914 = vector.load %arg9[%913, %c0_282, %c0_283] : memref<8x8x2xf32, #tpu.memory_space<vmem>>, vector<1x8x2xf32>
    %915 = vector.shape_cast %914 : vector<1x8x2xf32> to vector<8x2xf32>
    %916 = vector.shape_cast %912 : vector<8x2xf32> to vector<1x8x2xf32>
    tpu.vector_store %arg9[%913, %c0_282, %c0_283], %916 {strides = array<i32>} : memref<8x8x2xf32, #tpu.memory_space<vmem>>, vector<1x8x2xf32>,
    %c3_i32_284 = arith.constant 3 : i32
    %917 = arith.index_cast %c3_i32_284 : i32 to index
    %c0_285 = arith.constant 0 : index
    %c0_286 = arith.constant 0 : index
    %918 = vector.load %arg11[%917, %c0_285, %c0_286] : memref<8x2x128xbf16, #tpu.memory_space<vmem>>, vector<1x2x128xbf16>
    %919 = vector.shape_cast %918 : vector<1x2x128xbf16> to vector<2x128xbf16>
    %cst_287 = arith.constant dense<0.000000e+00> : vector<8x2xf32>
    %920 = tpu.matmul %885, %919, %cst_287 {dimension_numbers = #tpu.dot_dimension_numbers<[1], [1], [0], [0], [0, 0, 1, 0], [], []>} : vector<8x128xbf16>, vector<2x128xbf16>, vector<8x2xf32> -> vector<8x2xf32>
    %921 = vector.broadcast %886 : vector<8x1xf32> to vector<8x2xf32>
    %922 = arith.addf %920, %921 : vector<8x2xf32>
    %923 = arith.index_cast %c3_i32_284 : i32 to index
    %c0_288 = arith.constant 0 : index
    %c0_289 = arith.constant 0 : index
    %924 = vector.load %arg9[%923, %c0_288, %c0_289] : memref<8x8x2xf32, #tpu.memory_space<vmem>>, vector<1x8x2xf32>
    %925 = vector.shape_cast %924 : vector<1x8x2xf32> to vector<8x2xf32>
    %926 = vector.shape_cast %922 : vector<8x2xf32> to vector<1x8x2xf32>
    tpu.vector_store %arg9[%923, %c0_288, %c0_289], %926 {strides = array<i32>} : memref<8x8x2xf32, #tpu.memory_space<vmem>>, vector<1x8x2xf32>,
    %c4_i32_290 = arith.constant 4 : i32
    %927 = arith.index_cast %c4_i32_290 : i32 to index
    %c0_291 = arith.constant 0 : index
    %c0_292 = arith.constant 0 : index
    %928 = vector.load %arg11[%927, %c0_291, %c0_292] : memref<8x2x128xbf16, #tpu.memory_space<vmem>>, vector<1x2x128xbf16>
    %929 = vector.shape_cast %928 : vector<1x2x128xbf16> to vector<2x128xbf16>
    %cst_293 = arith.constant dense<0.000000e+00> : vector<8x2xf32>
    %930 = tpu.matmul %885, %929, %cst_293 {dimension_numbers = #tpu.dot_dimension_numbers<[1], [1], [0], [0], [0, 0, 1, 0], [], []>} : vector<8x128xbf16>, vector<2x128xbf16>, vector<8x2xf32> -> vector<8x2xf32>
    %931 = vector.broadcast %886 : vector<8x1xf32> to vector<8x2xf32>
    %932 = arith.addf %930, %931 : vector<8x2xf32>
    %933 = arith.index_cast %c4_i32_290 : i32 to index
    %c0_294 = arith.constant 0 : index
    %c0_295 = arith.constant 0 : index
    %934 = vector.load %arg9[%933, %c0_294, %c0_295] : memref<8x8x2xf32, #tpu.memory_space<vmem>>, vector<1x8x2xf32>
    %935 = vector.shape_cast %934 : vector<1x8x2xf32> to vector<8x2xf32>
    %936 = vector.shape_cast %932 : vector<8x2xf32> to vector<1x8x2xf32>
    tpu.vector_store %arg9[%933, %c0_294, %c0_295], %936 {strides = array<i32>} : memref<8x8x2xf32, #tpu.memory_space<vmem>>, vector<1x8x2xf32>,
    %c5_i32_296 = arith.constant 5 : i32
    %937 = arith.index_cast %c5_i32_296 : i32 to index
    %c0_297 = arith.constant 0 : index
    %c0_298 = arith.constant 0 : index
    %938 = vector.load %arg11[%937, %c0_297, %c0_298] : memref<8x2x128xbf16, #tpu.memory_space<vmem>>, vector<1x2x128xbf16>
    %939 = vector.shape_cast %938 : vector<1x2x128xbf16> to vector<2x128xbf16>
    %cst_299 = arith.constant dense<0.000000e+00> : vector<8x2xf32>
    %940 = tpu.matmul %885, %939, %cst_299 {dimension_numbers = #tpu.dot_dimension_numbers<[1], [1], [0], [0], [0, 0, 1, 0], [], []>} : vector<8x128xbf16>, vector<2x128xbf16>, vector<8x2xf32> -> vector<8x2xf32>
    %941 = vector.broadcast %886 : vector<8x1xf32> to vector<8x2xf32>
    %942 = arith.addf %940, %941 : vector<8x2xf32>
    %943 = arith.index_cast %c5_i32_296 : i32 to index
    %c0_300 = arith.constant 0 : index
    %c0_301 = arith.constant 0 : index
    %944 = vector.load %arg9[%943, %c0_300, %c0_301] : memref<8x8x2xf32, #tpu.memory_space<vmem>>, vector<1x8x2xf32>
    %945 = vector.shape_cast %944 : vector<1x8x2xf32> to vector<8x2xf32>
    %946 = vector.shape_cast %942 : vector<8x2xf32> to vector<1x8x2xf32>
    tpu.vector_store %arg9[%943, %c0_300, %c0_301], %946 {strides = array<i32>} : memref<8x8x2xf32, #tpu.memory_space<vmem>>, vector<1x8x2xf32>,
    %c6_i32_302 = arith.constant 6 : i32
    %947 = arith.index_cast %c6_i32_302 : i32 to index
    %c0_303 = arith.constant 0 : index
    %c0_304 = arith.constant 0 : index
    %948 = vector.load %arg11[%947, %c0_303, %c0_304] : memref<8x2x128xbf16, #tpu.memory_space<vmem>>, vector<1x2x128xbf16>
    %949 = vector.shape_cast %948 : vector<1x2x128xbf16> to vector<2x128xbf16>
    %cst_305 = arith.constant dense<0.000000e+00> : vector<8x2xf32>
    %950 = tpu.matmul %885, %949, %cst_305 {dimension_numbers = #tpu.dot_dimension_numbers<[1], [1], [0], [0], [0, 0, 1, 0], [], []>} : vector<8x128xbf16>, vector<2x128xbf16>, vector<8x2xf32> -> vector<8x2xf32>
    %951 = vector.broadcast %886 : vector<8x1xf32> to vector<8x2xf32>
    %952 = arith.addf %950, %951 : vector<8x2xf32>
    %953 = arith.index_cast %c6_i32_302 : i32 to index
    %c0_306 = arith.constant 0 : index
    %c0_307 = arith.constant 0 : index
    %954 = vector.load %arg9[%953, %c0_306, %c0_307] : memref<8x8x2xf32, #tpu.memory_space<vmem>>, vector<1x8x2xf32>
    %955 = vector.shape_cast %954 : vector<1x8x2xf32> to vector<8x2xf32>
    %956 = vector.shape_cast %952 : vector<8x2xf32> to vector<1x8x2xf32>
    tpu.vector_store %arg9[%953, %c0_306, %c0_307], %956 {strides = array<i32>} : memref<8x8x2xf32, #tpu.memory_space<vmem>>, vector<1x8x2xf32>,
    %c7_i32_308 = arith.constant 7 : i32
    %957 = arith.index_cast %c7_i32_308 : i32 to index
    %c0_309 = arith.constant 0 : index
    %c0_310 = arith.constant 0 : index
    %958 = vector.load %arg11[%957, %c0_309, %c0_310] : memref<8x2x128xbf16, #tpu.memory_space<vmem>>, vector<1x2x128xbf16>
    %959 = vector.shape_cast %958 : vector<1x2x128xbf16> to vector<2x128xbf16>
    %cst_311 = arith.constant dense<0.000000e+00> : vector<8x2xf32>
    %960 = tpu.matmul %885, %959, %cst_311 {dimension_numbers = #tpu.dot_dimension_numbers<[1], [1], [0], [0], [0, 0, 1, 0], [], []>} : vector<8x128xbf16>, vector<2x128xbf16>, vector<8x2xf32> -> vector<8x2xf32>
    %961 = vector.broadcast %886 : vector<8x1xf32> to vector<8x2xf32>
    %962 = arith.addf %960, %961 : vector<8x2xf32>
    %963 = arith.index_cast %c7_i32_308 : i32 to index
    %c0_312 = arith.constant 0 : index
    %c0_313 = arith.constant 0 : index
    %964 = vector.load %arg9[%963, %c0_312, %c0_313] : memref<8x8x2xf32, #tpu.memory_space<vmem>>, vector<1x8x2xf32>
    %965 = vector.shape_cast %964 : vector<1x8x2xf32> to vector<8x2xf32>
    %966 = vector.shape_cast %962 : vector<8x2xf32> to vector<1x8x2xf32>
    tpu.vector_store %arg9[%963, %c0_312, %c0_313], %966 {strides = array<i32>} : memref<8x8x2xf32, #tpu.memory_space<vmem>>, vector<1x8x2xf32>,
    %c8_i32_314 = arith.constant 8 : i32
    return
  }
  func.func @transform_0(%arg0: i32) -> (i32, i32, i32) {
    %c0_i32 = arith.constant 0 : i32
    %c0_i32_0 = arith.constant 0 : i32
    %c0_i32_1 = arith.constant 0 : i32
    return %c0_i32, %arg0, %c0_i32_0 : i32, i32, i32
  }
  func.func @transform_1(%arg0: i32) -> (i32, i32) {
    %c0_i32 = arith.constant 0 : i32
    %c0_i32_0 = arith.constant 0 : i32
    return %arg0, %c0_i32 : i32, i32
  }
  func.func @transform_2(%arg0: i32) -> (i32, i32) {
    %c0_i32 = arith.constant 0 : i32
    %c0_i32_0 = arith.constant 0 : i32
    %c0_i32_1 = arith.constant 0 : i32
    return %c0_i32, %c0_i32_0 : i32, i32
  }
  func.func @transform_3(%arg0: i32) -> (i32, i32) {
    %c0_i32 = arith.constant 0 : i32
    %c0_i32_0 = arith.constant 0 : i32
    %c0_i32_1 = arith.constant 0 : i32
    return %c0_i32, %c0_i32_0 : i32, i32
  }
  func.func @transform_4(%arg0: i32) -> (i32, i32) {
    %c0_i32 = arith.constant 0 : i32
    %c0_i32_0 = arith.constant 0 : i32
    %c0_i32_1 = arith.constant 0 : i32
    return %c0_i32, %c0_i32_0 : i32, i32
  }
  func.func @transform_5(%arg0: i32) -> (i32, i32) {
    %c0_i32 = arith.constant 0 : i32
    %c0_i32_0 = arith.constant 0 : i32
    %c0_i32_1 = arith.constant 0 : i32
    return %c0_i32, %c0_i32_0 : i32, i32
  }
  func.func @transform_6(%arg0: i32) -> (i32, i32) {
    %c0_i32 = arith.constant 0 : i32
    %c0_i32_0 = arith.constant 0 : i32
    %c0_i32_1 = arith.constant 0 : i32
    return %c0_i32, %c0_i32_0 : i32, i32
  }
  func.func @transform_7(%arg0: i32) -> (i32, i32) {
    %c0_i32 = arith.constant 0 : i32
    %c0_i32_0 = arith.constant 0 : i32
    %c0_i32_1 = arith.constant 0 : i32
    return %c0_i32, %c0_i32_0 : i32, i32
  }
  func.func @transform_8(%arg0: i32) -> (i32, i32, i32) {
    %c0_i32 = arith.constant 0 : i32
    %c0_i32_0 = arith.constant 0 : i32
    %c0_i32_1 = arith.constant 0 : i32
    return %c0_i32, %c0_i32_0, %arg0 : i32, i32, i32
  }
}

</mosaic_0001>

<bundles_post_ra>
// kernel: cnn_lstm_crf_forward.3
= control target key start
LH: loop header
LB: loop body
LE: loop exit
PB: predicated region body
PF: predicated region fallthrough
CT: control target
= control target key end

     0   :  { %vm135_vm0 = vcmask 130048   ;;  %s1240_s18 = smov 32   ;;  %s1241_s19 = smov 96   ;;  %vm482_vm1 = vcmask 1046528   ;;  %vm305_vm2 = vcmask 1040384   ;;  %vm787_vm3 = vcmask 523521   ;;  %s1954_s1 = inlined_call_operand.vmem [shape: bf16[16,96], index: 1, kind: input, shape index: {}]   ;;  %s1955_s0 = inlined_call_operand.vmem [shape: bf16[16,16,16], index: 0, kind: input, shape index: {}]   ;;  %s1956_s2 = inlined_call_operand.vmem [shape: f32[1,32], index: 2, kind: input, shape index: {}]   ;;  %s1957_s3 = inlined_call_operand.vmem [shape: bf16[16,32], index: 3, kind: output, shape index: {}]  }
   0x1   :  { %v1233_v0 = vld [vmem:[%s1954_s1] sm:$0xff]  ;;  %v1218_v5 = vld [vmem:[%s1955_s0 + $0x8] sm:$0xff]  ;;  %v1223_v9 = vld [vmem:[%s1955_s0 + $0x30] sm:$0xff]  ;;  %vm789_vm4 = vcmask 522496   ;;  %vm1084_vm5 = vcmask 1041409   ;;  %vm1087_vm6 = vcmask 1042434  }
   0x2   :  { %v1217_v1 = vld [vmem:[%s1955_s0] sm:$0xff]  ;;  %191 = vmatpush.bf16.msra.mxu0 %v1233_v0  ;;  %1234 = vmatpush.bf16.msra.mxu1 %v1233_v0  ;;  %v1222_v6 = vld [vmem:[%s1955_s0 + $0x28] sm:$0xff]  ;;  %v1219_v10 = vld [vmem:[%s1955_s0 + $0x10] sm:$0xff]  ;;  %vm1090_vm7 = vcmask 1043459   ;;  %vm1093_vm8 = vcmask 1044484   ;;  %vm1096_vm9 = vcmask 1045509  }
   0x3   :  { %v1221_v2 = vld [vmem:[%s1955_s0 + $0x20] sm:$0xff]  ;;  %1236 = vmatpush.bf16.msra.mxu3 %v1233_v0  ;;  %1235 = vmatpush.bf16.msra.mxu2 %v1233_v0  ;;  %v1226_v7 = vld [vmem:[%s1955_s0 + $0x48] sm:$0xff]  ;;  %v1231_v11 = vld [vmem:[%s1955_s0 + $0x70] sm:$0xff]  ;;  %vm1099_vm10 = vcmask 1046534   ;;  %vm1102_vm11 = vcmask 1047559   ;;  %vm1126_vm12 = vcmask 257024  }
   0x4   :  { %v1229_v3 = vld [vmem:[%s1955_s0 + $0x60] sm:$0xff]  ;;  %v1230_v8 = vld [vmem:[%s1955_s0 + $0x68] sm:$0xff]  ;;  %v1227_v12 = vld [vmem:[%s1955_s0 + $0x50] sm:$0xff] }
   0x5   :  { %v1225_v4 = vld [vmem:[%s1955_s0 + $0x40] sm:$0xff]  ;;  %1201 = vmatmul.msk.bf16.vlgmr.msra.gmra.mxu0 %vm135_vm0, %v1217_v1  ;;  %1205 = vmatmul.msk.bf16.vlgmr.msra.gmra.mxu1 %vm135_vm0, %v1221_v2  ;;  %v1220_v13 = vld [vmem:[%s1955_s0 + $0x18] sm:$0xff] }
   0x6   :  { %1213 = vmatmul.msk.bf16.vlgmr.msra.gmra.mxu3 %vm135_vm0, %v1229_v3  ;;  %1209 = vmatmul.msk.bf16.vlgmr.msra.gmra.mxu2 %vm135_vm0, %v1225_v4  ;;  %v1232_v14 = vld [vmem:[%s1955_s0 + $0x78] sm:$0xff] }
   0x7   :  { %v1228_v15 = vld [vmem:[%s1955_s0 + $0x58] sm:$0xff] }
   0x8   :  { %v1224_v16 = vld [vmem:[%s1955_s0 + $0x38] sm:$0xff] }
  0x15   :  { %1202 = vmatmul.msk.bf16.gmra.mxu0 %vm135_vm0, %v1218_v5  ;;  %1206 = vmatmul.msk.bf16.gmra.mxu1 %vm135_vm0, %v1222_v6 }
  0x16   :  { %1210 = vmatmul.msk.bf16.gmra.mxu2 %vm135_vm0, %v1226_v7  ;;  %1214 = vmatmul.msk.bf16.gmra.mxu3 %vm135_vm0, %v1230_v8 }
  0x25   :  { %1207 = vmatmul.msk.bf16.gmra.mxu1 %vm135_vm0, %v1223_v9  ;;  %1203 = vmatmul.msk.bf16.gmra.mxu0 %vm135_vm0, %v1219_v10 }
  0x26   :  { %1215 = vmatmul.msk.bf16.gmra.mxu3 %vm135_vm0, %v1231_v11  ;;  %1211 = vmatmul.msk.bf16.gmra.mxu2 %vm135_vm0, %v1227_v12 }
  0x35   :  { %1204 = vmatmul.msk.bf16.gmra.mxu0 %vm135_vm0, %v1220_v13  ;;  %1208 = vmatmul.msk.bf16.gmra.mxu1 %vm135_vm0, %v1224_v16 }
  0x36   :  { %1216 = vmatmul.msk.bf16.gmra.mxu3 %vm135_vm0, %v1232_v14  ;;  %1212 = vmatmul.msk.bf16.gmra.mxu2 %vm135_vm0, %v1228_v15 }
  0x82   :  { %v1329_v17 = vpop.f32.mrf.mxu0  ;;  %v1331_v18 = vpop.f32.mrf.mxu1 }
  0x83   :  { %v318_v19 = vrot.slane %v1331_v18, 7  ;;  %v483_v20 = vrot.slane %v1329_v17, 1  ;;  %v306_v21 = vrot.slane %v1329_v17, 7  ;;  %v1972_v28 = vrot.slane %v1331_v18, 1 }
  0x85   :  { %370 = vrot.lane.b32.xlu2 %v318_v19, %s1240_s18  ;;  %659 = vrot.lane.b32.xlu1 %v483_v20, %s1241_s19 }
  0x86   :  { %354 = vrot.lane.b32.xlu0 %v306_v21, %s1240_s18 }
  0x89   :  { %v1339_v22 = vpop.f32.mrf.mxu3  ;;  %v1341_v23 = vpop.f32.mrf.mxu2 }
  0x8a   :  { %v507_v24 = vrot.slane %v1341_v23, 1  ;;  %v330_v25 = vrot.slane %v1341_v23, 7  ;;  %v342_v26 = vrot.slane %v1339_v22, 7  ;;  %v1346_v27 = vpop.f32.mrf.mxu1  ;;  %v1353_v30 = vpop.f32.mrf.mxu0  ;;  %v1966_v48 = vrot.slane %v1339_v22, 1 }
  0x8b   :  { %v496_v29 = vrot.slane %v1346_v27, 1  ;;  %v484_v32 = vrot.slane %v1353_v30, 1  ;;  %v1973_v34 = vrot.slane %v1353_v30, 7  ;;  %v1967_v41 = vrot.slane %v1346_v27, 7 }
  0x8d   :  { %675 = vrot.lane.b32.xlu2 %v507_v24, %s1241_s19  ;;  %386 = vrot.lane.b32.xlu1 %v330_v25, %s1240_s18  ;;  %v497_v31 = vsel %vm482_vm1, %v1972_v28, %v496_v29  ;;  %v485_v36 = vsel %vm482_vm1, %v483_v20, %v484_v32  ;;  %v308_v38 = vsel %vm305_vm2, %v306_v21, %v1973_v34 }
  0x8e   :  { %402 = vrot.lane.b32.xlu0 %v342_v26, %s1240_s18  ;;  %v320_v44 = vsel %vm305_vm2, %v318_v19, %v1967_v41 }
  0x91   :  { %v1362_v33 = vpop.f32.mrf.mxu2  ;;  %v1367_v37 = vpop.f32.mrf.mxu3 }
  0x92   :  { %v508_v35 = vrot.slane %v1362_v33, 1  ;;  %v1968_v39 = vrot.slane %v1367_v37, 7  ;;  %v1971_v40 = vrot.slane %v1362_v33, 7  ;;  %v1390_v45 = vpop.f32.mrf.mxu0  ;;  %v520_v46 = vrot.slane %v1367_v37, 1  ;;  %v1398_v50 = vpop.f32.mrf.mxu1 }
  0x93   :  { %v309_v47 = vrot.slane %v1390_v45, 7  ;;  %v486_v51 = vrot.slane %v1390_v45, 1  ;;  %v321_v52 = vrot.slane %v1398_v50, 7  ;;  %v1963_v1 = vrot.slane %v1398_v50, 1 }
  0x94   :  { %v344_v42 = vsel %vm305_vm2, %v342_v26, %v1968_v39  ;;  %v332_v43 = vsel %vm305_vm2, %v330_v25, %v1971_v40  ;;  %v521_v49 = vsel %vm482_vm1, %v1966_v48, %v520_v46  ;;  %v509_v53 = vsel %vm482_vm1, %v507_v24, %v508_v35 }
  0x95   :  { %549 = vrot.lane.b32.xlu2 %v496_v29, %s1241_s19  ;;  %547 = vrot.lane.b32.xlu1 %v497_v31, %s1241_s19 }
  0x96   :  { %533 = vrot.lane.b32.xlu0 %v484_v32, %s1241_s19 }
  0x99   :  { %v1411_v55 = vpop.f32.mrf.mxu3  ;;  %v1413_v56 = vpop.f32.mrf.mxu2 }
  0x9a   :  { %v1409_v54 = vpop.f32.mrf.mxu1  ;;  %1988 = vst [vmem:[#allocation2_spill] sm:$0xff] %v1411_v55  ;;  %v345_v57 = vrot.slane %v1411_v55, 7  ;;  %v333_v59 = vrot.slane %v1413_v56, 7  ;;  %v1421_v60 = vpop.f32.mrf.mxu0  ;;  %v510_v63 = vrot.slane %v1413_v56, 1  ;;  %v1964_v15 = vrot.slane %v1411_v55, 1 }
  0x9b   :  { %v499_v58 = vrot.slane %v1409_v54, 1  ;;  %v487_v61 = vrot.slane %v1421_v60, 1  ;;  %v310_v62 = vrot.slane %v1421_v60, 7  ;;  %v1965_v0 = vrot.slane %v1409_v54, 7 }
  0x9d   :  { %565 = vrot.lane.b32.xlu1 %v508_v35, %s1241_s19  ;;  %531 = vrot.lane.b32.xlu2 %v485_v36, %s1241_s19  ;;  %v323_v2 = vsel %vm305_vm2, %v321_v52, %v1965_v0  ;;  %v311_v3 = vsel %vm305_vm2, %v309_v47, %v310_v62  ;;  %v500_v4 = vsel %vm482_vm1, %v1963_v1, %v499_v58 }
  0x9e   :  { %356 = vrot.lane.b32.xlu0 %v308_v38, %s1240_s18  ;;  %v488_v9 = vsel %vm482_vm1, %v486_v51, %v487_v61 }
  0xa1   :  { %v1441_v5 = vpop.f32.mrf.mxu3  ;;  %v1443_v6 = vpop.f32.mrf.mxu2 }
  0xa2   :  { %v523_v7 = vrot.slane %v1441_v5, 1  ;;  %v511_v8 = vrot.slane %v1443_v6, 1  ;;  %v334_v10 = vrot.slane %v1443_v6, 7  ;;  %v1960_v11 = vrot.slane %v1441_v5, 7  ;;  %v1461_v16 = vpop.f32.mrf.mxu1  ;;  %v1475_v26 = vpop.f32.mrf.mxu0 }
  0xa3   :  { %1989 = vst [vmem:[#allocation3_spill] sm:$0xff] %v1461_v16  ;;  %v324_v19 = vrot.slane %v1461_v16, 7  ;;  %v312_v31 = vrot.slane %v1475_v26, 7  ;;  %v489_v32 = vrot.slane %v1475_v26, 1 }
  0xa4   :  { %v335_v12 = vsel %vm305_vm2, %v333_v59, %v334_v10  ;;  %v347_v13 = vsel %vm305_vm2, %v345_v57, %v1960_v11  ;;  %v512_v20 = vsel %vm482_vm1, %v510_v63, %v511_v8  ;;  %v524_v21 = vsel %vm482_vm1, %v1964_v15, %v523_v7 }
  0xa5   :  { %404 = vrot.lane.b32.xlu1 %v344_v42, %s1240_s18  ;;  %388 = vrot.lane.b32.xlu2 %v332_v43, %s1240_s18 }
  0xa6   :  { %372 = vrot.lane.b32.xlu0 %v320_v44, %s1240_s18 }
  0xa9   :  { %v1471_v24 = vpop.f32.mrf.mxu3  ;;  %v1485_v35 = vpop.f32.mrf.mxu2 }
  0xaa   :  { %v348_v29 = vrot.slane %v1471_v24, 7  ;;  %v1489_v38 = vpop.f32.mrf.mxu1  ;;  %v513_v42 = vrot.slane %v1485_v35, 1  ;;  %v336_v43 = vrot.slane %v1485_v35, 7 }
  0xab   :  { %v502_v44 = vrot.slane %v1489_v38, 1 }
  0xad   :  { %579 = vrot.lane.b32.xlu2 %v521_v49, %s1241_s19  ;;  %358 = vrot.lane.b32.xlu1 %v309_v47, %s1240_s18 }
  0xae   :  { %581 = vrot.lane.b32.xlu0 %v520_v46, %s1241_s19  ;;  %v1496_v46 = vpop.f32.mrf.mxu0 }
  0xb5   :  { %661 = vrot.lane.b32.xlu2 %v486_v51, %s1241_s19  ;;  %374 = vrot.lane.b32.xlu1 %v321_v52, %s1240_s18 }
  0xb6   :  { %563 = vrot.lane.b32.xlu0 %v509_v53, %s1241_s19  ;;  %v490_v53 = vrot.slane %v1496_v46, 1 }
  0xbd   :  { %406 = vrot.lane.b32.xlu2 %v345_v57, %s1240_s18  ;;  %553 = vrot.lane.b32.xlu1 %v499_v58, %s1241_s19  ;;  %v313_v58 = vrot.slane %v1496_v46, 7 }
  0xbe   :  { %390 = vrot.lane.b32.xlu0 %v333_v59, %s1240_s18  ;;  %v491_v59 = vsel %vm482_vm1, %v489_v32, %v490_v53 }
  0xc5   :  { %537 = vrot.lane.b32.xlu2 %v487_v61, %s1241_s19  ;;  %725 = vrot.lane.b32.xlu1 %v310_v62, %s1240_s18 }
  0xc6   :  { %677 = vrot.lane.b32.xlu0 %v510_v63, %s1241_s19  ;;  %v1958_v63 = vrot.slane %v1489_v38, 7 }
  0xcd   :  { %376 = vrot.lane.b32.xlu2 %v323_v2, %s1240_s18  ;;  %360 = vrot.lane.b32.xlu1 %v311_v3, %s1240_s18  ;;  %v1511_v3 = vpop.f32.mrf.mxu2 }
  0xce   :  { %551 = vrot.lane.b32.xlu0 %v500_v4, %s1241_s19  ;;  %v326_v4 = vsel %vm305_vm2, %v324_v19, %v1958_v63 }
  0xd5   :  { %585 = vrot.lane.b32.xlu2 %v523_v7, %s1241_s19  ;;  %535 = vrot.lane.b32.xlu1 %v488_v9, %s1241_s19  ;;  %v337_v7 = vrot.slane %v1511_v3, 7 }
  0xd6   :  { %569 = vrot.lane.b32.xlu0 %v511_v8, %s1241_s19  ;;  %v314_v8 = vsel %vm305_vm2, %v312_v31, %v313_v58 }
  0xdd   :  { %741 = vrot.lane.b32.xlu2 %v334_v10, %s1240_s18  ;;  %392 = vrot.lane.b32.xlu1 %v335_v12, %s1240_s18 }
  0xde   :  { %408 = vrot.lane.b32.xlu0 %v347_v13, %s1240_s18 }
  0xdf   :  { %v371_v14 = vpop.permute.xlu2 %370 }
  0xe0   :  { %v458_v9 = vadd.f32 %v371_v14, %v1331_v18  ;;  %v338_v14 = vsel %vm305_vm2, %v336_v43, %v337_v7 }
  0xe5   :  { %567 = vrot.lane.b32.xlu2 %v512_v20, %s1241_s19  ;;  %583 = vrot.lane.b32.xlu1 %v524_v21, %s1241_s19  ;;  %v1961_v20 = vrot.slane %v1461_v16, 1  ;;  %v1524_v21 = vpop.f32.mrf.mxu3 }
  0xe6   :  { %378 = vrot.lane.b32.xlu0 %v324_v19, %s1240_s18  ;;  %1990 = vst [vmem:[#allocation4_spill] sm:$0xff] %v1524_v21 }
  0xe7   :  { %v1473_v25 = vpop.permute.xlu2 %675 }
  0xed   :  { %410 = vrot.lane.b32.xlu1 %v348_v29, %s1240_s18  ;;  %362 = vrot.lane.b32.xlu2 %v312_v31, %s1240_s18  ;;  %v526_v31 = vrot.slane %v1524_v21, 1 }
  0xee   :  { %663 = vrot.lane.b32.xlu0 %v489_v32, %s1241_s19 }
  0xef   :  { %v1487_v36 = vpop.permute.xlu2 %549 }
  0xf5   :  { %679 = vrot.lane.b32.xlu1 %v513_v42, %s1241_s19  ;;  %394 = vrot.lane.b32.xlu2 %v336_v43, %s1240_s18 }
  0xf6   :  { %557 = vrot.lane.b32.xlu0 %v502_v44, %s1241_s19 }
  0xf7   :  { %v1499_v47 = vpop.permute.xlu1 %659  ;;  %v532_v49 = vpop.permute.xlu2 %531 }
  0xf8   :  { %v355_v51 = vpop.permute.xlu0 %354 }
  0xf9   :  { %v450_v52 = vadd.f32 %v355_v51, %v1329_v17  ;;  %v503_v51 = vsel %vm482_vm1, %v1961_v20, %v502_v44  ;;  %v1962_v44 = vrot.slane %v1471_v24, 1 }
  0xfb   :  { %v627_v57 = vadd.f32 %v532_v49, %v450_v52 }
  0xfd   :  { %541 = vrot.lane.b32.xlu1 %v490_v53, %s1241_s19  ;;  %727 = vrot.lane.b32.xlu2 %v313_v58, %s1240_s18 }
  0xfe   :  { %539 = vrot.lane.b32.xlu0 %v491_v59, %s1241_s19  ;;  %v514_v59 = vrot.slane %v1511_v3, 1 }
  0xff   :  { %v1508_v61 = vpop.permute.xlu1 %386  ;;  %v389_v62 = vpop.permute.xlu2 %388 }
 0x100   :  { %v403_v2 = vpop.permute.xlu0 %402  ;;  %v467_v52 = vadd.f32 %v389_v62, %v1362_v33  ;;  %v788_v62 = vsel %vm787_vm3, %v627_v57, -inf  ;;  %v1554_v57 = vpop.f32.mrf.mxu0 }
 0x101   :  { %v474_v10 = vadd.f32 %v403_v2, %v1339_v22 }
 0x105   :  { %380 = vrot.lane.b32.xlu1 %v326_v4, %s1240_s18  ;;  %364 = vrot.lane.b32.xlu2 %v314_v8, %s1240_s18 }
 0x106   :  { %743 = vrot.lane.b32.xlu0 %v337_v7, %s1240_s18  ;;  %v515_v7 = vsel %vm482_vm1, %v513_v42, %v514_v59  ;;  %v1959_v42 = vrot.slane %v1524_v21, 7 }
 0x107   :  { %v548_v12 = vpop.permute.xlu1 %547  ;;  %v580_v13 = vpop.permute.xlu2 %579 }
 0x108   :  { %v635_v19 = vadd.f32 %v548_v12, %v458_v9  ;;  %v534_v32 = vpop.permute.xlu0 %533  ;;  %v651_v49 = vadd.f32 %v580_v13, %v474_v10  ;;  %v527_v10 = vsel %vm482_vm1, %v1962_v44, %v526_v31 }
 0x10d   :  { %589 = vrot.lane.b32.xlu1 %v526_v31, %s1241_s19  ;;  %555 = vrot.lane.b32.xlu2 %v503_v51, %s1241_s19  ;;  %v315_v31 = vrot.slane %v1554_v57, 7 }
 0x10e   :  { %396 = vrot.lane.b32.xlu0 %v338_v14, %s1240_s18 }
 0x10f   :  { %v566_v53 = vpop.permute.xlu1 %565  ;;  %v1535_v58 = vpop.permute.xlu2 %661 }
 0x110   :  { %v1538_v2 = vadd.f32 %v566_v53, %v467_v52  ;;  %v357_v4 = vpop.permute.xlu0 %356  ;;  %v492_v53 = vrot.slane %v1554_v57, 1 }
 0x111   :  { %v451_v8 = vadd.f32 %v357_v4, %v1353_v30 }
 0x113   :  { %v628_v43 = vadd.f32 %v534_v32, %v451_v8 }
 0x115   :  { %v790_v9 = vsel %vm789_vm4, %v628_v43, -inf  ;;  %571 = vrot.lane.b32.xlu1 %v515_v7, %s1241_s19  ;;  %573 = vrot.lane.b32.xlu2 %v514_v59, %s1241_s19  ;;  %v350_v43 = vsel %vm305_vm2, %v348_v29, %v1959_v42  ;;  %v1565_v7 = vpop.f32.mrf.mxu1 }
 0x116   :  { %v791_v12 = vmax.f32 %v788_v62, %v790_v9  ;;  %587 = vrot.lane.b32.xlu0 %v527_v10, %s1241_s19  ;;  %1991 = vst [vmem:[#allocation5_spill] sm:$0xff] %v1565_v7  ;;  %v825_v62 = vsel %vm787_vm3, %v635_v19, -inf  ;;  %v1576_v10 = vpop.f32.mrf.mxu2  ;;  %v327_v63 = vrot.slane %v1565_v7, 7 }
 0x117   :  { %v405_v13 = vpop.permute.xlu1 %404  ;;  %v1551_v32 = vpop.permute.xlu2 %406 }
 0x118   :  { %v792_v51 = vrot.slane %v791_v12, 4  ;;  %v373_v14 = vpop.permute.xlu0 %372  ;;  %v475_v29 = vadd.f32 %v405_v13, %v1367_v37 }
 0x119   :  { %v459_v52 = vadd.f32 %v373_v14, %v1346_v27 }
 0x11a   :  { %v793_v4 = vmax.f32 %v791_v12, %v792_v51 }
 0x11b   :  { %v636_v59 = vadd.f32 %v1487_v36, %v459_v52 }
 0x11c   :  { %v794_v8 = vrot.slane %v793_v4, 2 }
 0x11d   :  { %v826_v9 = vsel %vm789_vm4, %v636_v59, -inf  ;;  %412 = vrot.lane.b32.xlu2 %v350_v43, %s1240_s18  ;;  %665 = vrot.lane.b32.xlu1 %v492_v53, %s1241_s19  ;;  %v1583_v59 = vpop.f32.mrf.mxu3 }
 0x11e   :  { %v1573_v36 = vmax.f32 %v825_v62, %v826_v9  ;;  %366 = vrot.lane.b32.xlu0 %v315_v31, %s1240_s18  ;;  %v795_v12 = vmax.f32 %v793_v4, %v794_v8  ;;  %1992 = vst [vmem:[#allocation6_spill] sm:$0xff] %v1583_v59  ;;  %v339_v62 = vrot.slane %v1576_v10, 7  ;;  %v1589_v9 = vadd.f32 %v1499_v47, %v1329_v17  ;;  %v1607_v17 = vpop.f32.mrf.mxu1  ;;  %v1634_v39 = vpop.f32.mrf.mxu2 }
 0x11f   :  { %v1579_v51 = vpop.permute.xlu1 %358  ;;  %v1581_v19 = vpop.permute.xlu2 %537  ;;  %v1975_v4 = vrot.slane %v1583_v59, 7  ;;  %v897_v8 = vsel %vm787_vm3, %v651_v49, -inf  ;;  %1995 = vst [vmem:[#allocation9_spill] sm:$0xff] %v1607_v17  ;;  %v466_v47 = vadd.f32 %v1508_v61, %v1341_v23  ;;  %v1969_v48 = vrot.slane %v1607_v17, 7 }
 0x120   :  { %v582_v14 = vpop.permute.xlu0 %581  ;;  %v796_v52 = vrot.slane %v795_v12, 1  ;;  %1993 = vst [vmem:[#allocation7_spill] sm:$0xff] %v1589_v9 }
 0x121   :  { %v652_v43 = vadd.f32 %v582_v14, %v475_v29  ;;  %v1600_v14 = vpop.f32.mrf.mxu0  ;;  %v862_v29 = vsel %vm789_vm4, %v1538_v2, -inf }
 0x122   :  { %v1592_v13 = vmax.f32 %v795_v12, %v796_v52  ;;  %v1974_v12 = vrot.slane %v1600_v14, 7  ;;  %v493_v44 = vrot.slane %v1600_v14, 1 }
 0x123   :  { %v898_v42 = vsel %vm789_vm4, %v652_v43, -inf }
 0x124   :  { %1994 = vst [vmem:[#allocation8_spill] sm:$0xff] %v1592_v13  ;;  %v1596_v11 = vmax.f32 %v897_v8, %v898_v42  ;;  %v505_v8 = vrot.slane %v1607_v17, 1  ;;  %v317_v61 = vsel %vm305_vm2, %v315_v31, %v1974_v12 }
 0x125   :  { %382 = vrot.lane.b32.xlu2 %v327_v63, %s1240_s18  ;;  %398 = vrot.lane.b32.xlu1 %v339_v62, %s1240_s18 }
 0x126   :  { %414 = vrot.lane.b32.xlu0 %v1975_v4, %s1240_s18 }
 0x127   :  { %v375_v49 = vpop.permute.xlu1 %374  ;;  %v377_v42 = vpop.permute.xlu2 %376 }
 0x128   :  { %v564_v52 = vpop.permute.xlu0 %563 }
 0x129   :  { %v643_v43 = vadd.f32 %v564_v52, %v466_v47  ;;  %v461_v47 = vadd.f32 %v377_v42, %v1409_v54 }
 0x12b   :  { %v861_v20 = vsel %vm787_vm3, %v643_v43, -inf  ;;  %v1970_v43 = vrot.slane %v1565_v7, 1 }
 0x12c   :  { %v863_v1 = vmax.f32 %v861_v20, %v862_v29 }
 0x12d   :  { %561 = vrot.lane.b32.xlu2 %v505_v8, %s1241_s19  ;;  %368 = vrot.lane.b32.xlu1 %v317_v61, %s1240_s18  ;;  %v494_v61 = vsel %vm482_vm1, %v492_v53, %v493_v44  ;;  %v506_v42 = vsel %vm482_vm1, %v1970_v43, %v505_v8  ;;  %v1646_v53 = vadd.f32 %v1473_v25, %v1341_v23  ;;  %v340_v8 = vrot.slane %v1634_v39, 7 }
 0x12e   :  { %v864_v15 = vrot.slane %v863_v1, 4  ;;  %545 = vrot.lane.b32.xlu0 %v493_v44, %s1241_s19 }
 0x12f   :  { %v554_v52 = vpop.permute.xlu1 %553  ;;  %v1624_v2 = vpop.permute.xlu2 %585  ;;  %1996 = vst [vmem:[#allocation10_spill] sm:$0xff] %v1646_v53 }
 0x130   :  { %v865_v0 = vmax.f32 %v863_v1, %v864_v15  ;;  %v391_v20 = vpop.permute.xlu0 %390  ;;  %v638_v29 = vadd.f32 %v554_v52, %v461_v47  ;;  %v329_v1 = vsel %vm305_vm2, %v327_v63, %v1969_v48  ;;  %v1653_v63 = vpop.f32.mrf.mxu3 }
 0x131   :  { %1998 = vst [vmem:[#allocation12_spill] sm:$0xff] %v1653_v63  ;;  %v468_v23 = vadd.f32 %v391_v20, %v1413_v56  ;;  %v352_v48 = vrot.slane %v1653_v63, 7 }
 0x132   :  { %v866_v31 = vrot.slane %v865_v0, 2  ;;  %v835_v20 = vsel %vm789_vm4, %v638_v29, -inf }
 0x134   :  { %v867_v41 = vmax.f32 %v865_v0, %v866_v31  ;;  %v1976_v31 = vrot.slane %v1583_v59, 1 }
 0x135   :  { %543 = vrot.lane.b32.xlu2 %v494_v61, %s1241_s19  ;;  %559 = vrot.lane.b32.xlu1 %v506_v42, %s1241_s19  ;;  %v517_v61 = vrot.slane %v1634_v39, 1  ;;  %v529_v42 = vrot.slane %v1653_v63, 1 }
 0x136   :  { %384 = vrot.lane.b32.xlu0 %v329_v1, %s1240_s18  ;;  %v868_v0 = vrot.slane %v867_v41, 1  ;;  %v341_v1 = vsel %vm305_vm2, %v339_v62, %v340_v8 }
 0x137   :  { %v1642_v15 = vpop.permute.xlu2 %741  ;;  %v726_v44 = vpop.permute.xlu1 %725  ;;  %v530_v4 = vsel %vm482_vm1, %v1976_v31, %v529_v42  ;;  %v2002_v31 = vrot.slane %v1331_v18, 1 }
 0x138   :  { %v1649_v47 = vpop.permute.xlu0 %677  ;;  %v1651_v52 = vmax.f32 %v867_v41, %v868_v0  ;;  %v460_v41 = vadd.f32 %v375_v49, %v1398_v50 }
 0x13a   :  { %1997 = vst [vmem:[#allocation11_spill] sm:$0xff] %v1651_v52 }
 0x13d   :  { %400 = vrot.lane.b32.xlu2 %v341_v1, %s1240_s18  ;;  %577 = vrot.lane.b32.xlu1 %v517_v61, %s1241_s19  ;;  %v516_v1 = vrot.slane %v1576_v10, 1 }
 0x13e   :  { %593 = vrot.lane.b32.xlu0 %v529_v42, %s1241_s19 }
 0x13f   :  { %v568_v25 = vpop.permute.xlu2 %567  ;;  %v361_v0 = vpop.permute.xlu1 %360 }
 0x140   :  { %v552_v43 = vpop.permute.xlu0 %551  ;;  %v645_v40 = vadd.f32 %v568_v25, %v468_v23  ;;  %v453_v62 = vadd.f32 %v361_v0, %v1421_v60  ;;  %v1999_v23 = vrot.slane %v1583_v59, 7 }
 0x141   :  { %v637_v28 = vadd.f32 %v552_v43, %v460_v41  ;;  %v518_v43 = vsel %vm482_vm1, %v516_v1, %v517_v61 }
 0x142   :  { %v630_v34 = vadd.f32 %v1581_v19, %v453_v62  ;;  %v353_v25 = vsel %vm305_vm2, %v1999_v23, %v352_v48 }
 0x143   :  { %v834_v12 = vsel %vm787_vm3, %v637_v28, -inf  ;;  %v452_v28 = vadd.f32 %v1579_v51, %v1390_v45  ;;  %v2001_v51 = vrot.slane %v1353_v30, 7 }
 0x144   :  { %v1672_v49 = vmax.f32 %v834_v12, %v835_v20  ;;  %v799_v41 = vsel %vm789_vm4, %v630_v34, -inf }
 0x145   :  { %591 = vrot.lane.b32.xlu2 %v530_v4, %s1241_s19  ;;  %416 = vrot.lane.b32.xlu1 %v353_v25, %s1240_s18  ;;  %v2000_v4 = vrot.slane %v1600_v14, 7 }
 0x146   :  { %575 = vrot.lane.b32.xlu0 %v518_v43, %s1241_s19 }
 0x147   :  { %v536_v19 = vpop.permute.xlu1 %535  ;;  %v1688_v12 = vpop.permute.xlu2 %362 }
 0x148   :  { %v570_v29 = vpop.permute.xlu0 %569  ;;  %v629_v42 = vadd.f32 %v536_v19, %v452_v28 }
 0x14a   :  { %v798_v0 = vsel %vm787_vm3, %v629_v42, -inf }
 0x14b   :  { %v800_v62 = vmax.f32 %v798_v0, %v799_v41 }
 0x14d   :  { %v801_v61 = vrot.slane %v800_v62, 4  ;;  %729 = vrot.lane.b32.xlu2 %v2000_v4, %s1240_s18  ;;  %723 = vrot.lane.b32.xlu1 %v2001_v51, %s1240_s18  ;;  %v870_v4 = vsel %vm787_vm3, %v645_v40, -inf  ;;  %v708_v40 = vadd.f32 %v1535_v58, %v1390_v45  ;;  %v2005_v58 = vrot.slane %v1367_v37, 7 }
 0x14e   :  { %681 = vrot.lane.b32.xlu0 %v516_v1, %s1241_s19  ;;  %v772_v1 = vadd.f32 %v726_v44, %v1421_v60 }
 0x14f   :  { %v802_v20 = vmax.f32 %v800_v62, %v801_v61  ;;  %v393_v23 = vpop.permute.xlu1 %392  ;;  %v1699_v25 = vpop.permute.xlu2 %394 }
 0x150   :  { %v409_v43 = vpop.permute.xlu0 %408  ;;  %v469_v34 = vadd.f32 %v393_v23, %v1443_v6 }
 0x151   :  { %v803_v28 = vrot.slane %v802_v20, 2  ;;  %v477_v19 = vadd.f32 %v409_v43, %v1441_v5 }
 0x152   :  { %v646_v42 = vadd.f32 %v570_v29, %v469_v34  ;;  %v476_v29 = vadd.f32 %v1551_v32, %v1411_v55 }
 0x153   :  { %v804_v41 = vmax.f32 %v802_v20, %v803_v28  ;;  %v654_v0 = vadd.f32 %v1624_v2, %v477_v19  ;;  %v2003_v2 = vrot.slane %v1362_v33, 7 }
 0x154   :  { %v871_v51 = vsel %vm789_vm4, %v646_v42, -inf }
 0x155   :  { %v805_v62 = vrot.slane %v804_v41, 1  ;;  %v872_v61 = vmax.f32 %v870_v4, %v871_v51  ;;  %667 = vrot.lane.b32.xlu2 %v2002_v31, %s1241_s19  ;;  %745 = vrot.lane.b32.xlu1 %v340_v8, %s1240_s18  ;;  %v966_v31 = vrot.slane %v772_v1, 7  ;;  %v907_v19 = vsel %vm789_vm4, %v654_v0, -inf }
 0x156   :  { %739 = vrot.lane.b32.xlu0 %v2003_v2, %s1240_s18  ;;  %v2007_v1 = vrot.slane %v1339_v22, 1  ;;  %v780_v0 = vadd.f32 %v1642_v15, %v1443_v6  ;;  %v2010_v6 = vrot.slane %v1411_v55, 1 }
 0x157   :  { %v806_v20 = vmax.f32 %v804_v41, %v805_v62  ;;  %v873_v60 = vrot.slane %v872_v61, 4  ;;  %v584_v44 = vpop.permute.xlu1 %583  ;;  %v1718_v23 = vpop.permute.xlu2 %727  ;;  %v2006_v41 = vrot.slane %v1346_v27, 7 }
 0x158   :  { %v379_v43 = vpop.permute.xlu0 %378  ;;  %v653_v34 = vadd.f32 %v584_v44, %v476_v29 }
 0x159   :  { %v934_v28 = vmax.f32 %v806_v20, %v708_v40  ;;  %v874_v8 = vmax.f32 %v872_v61, %v873_v60  ;;  %v716_v40 = vadd.f32 %v1649_v47, %v1413_v56  ;;  %v974_v60 = vrot.slane %v780_v0, 7 }
 0x15a   :  { %v906_v32 = vsel %vm787_vm3, %v653_v34, -inf  ;;  %v462_v15 = vadd.f32 %v379_v43, %v1461_v16  ;;  %v2014_v43 = vrot.slane %v1441_v5, 7 }
 0x15b   :  { %v1722_v42 = vmax.f32 %v934_v28, %v966_v31  ;;  %v875_v4 = vrot.slane %v874_v8, 2  ;;  %v1724_v51 = vmax.f32 %v906_v32, %v907_v19  ;;  %v2009_v31 = vrot.slane %v1409_v54, 7 }
 0x15c   :  { %v2011_v28 = vrot.slane %v1398_v50, 1  ;;  %v2012_v32 = vrot.slane %v1471_v24, 1 }
 0x15d   :  { %2004 = vst [vmem:[#allocation13_spill] sm:$0xff] %v1722_v42  ;;  %v876_v45 = vmax.f32 %v874_v8, %v875_v4  ;;  %747 = vrot.lane.b32.xlu2 %v2005_v58, %s1240_s18  ;;  %731 = vrot.lane.b32.xlu1 %v2006_v41, %s1240_s18  ;;  %v2013_v4 = vrot.slane %v1461_v16, 1  ;;  %v454_v58 = vadd.f32 %v1688_v12, %v1475_v26  ;;  %v2017_v12 = vrot.slane %v1489_v38, 7 }
 0x15e   :  { %683 = vrot.lane.b32.xlu0 %v2007_v1, %s1241_s19 }
 0x15f   :  { %v877_v62 = vrot.slane %v876_v45, 1  ;;  %v1737_v61 = vpop.permute.xlu1 %410  ;;  %v365_v29 = vpop.permute.xlu2 %364 }
 0x160   :  { %v664_v2 = vpop.permute.xlu0 %663 }
 0x161   :  { %v878_v20 = vmax.f32 %v876_v45, %v877_v62  ;;  %v455_v45 = vadd.f32 %v365_v29, %v1496_v46  ;;  %v2015_v29 = vrot.slane %v1565_v7, 1 }
 0x163   :  { %v942_v44 = vmax.f32 %v878_v20, %v716_v40 }
 0x165   :  { %v1741_v34 = vmax.f32 %v942_v44, %v974_v60  ;;  %733 = vrot.lane.b32.xlu2 %v2009_v31, %s1240_s18  ;;  %685 = vrot.lane.b32.xlu1 %v2010_v6, %s1241_s19  ;;  %v2016_v31 = vrot.slane %v1524_v21, 7 }
 0x166   :  { %669 = vrot.lane.b32.xlu0 %v2011_v28, %s1241_s19 }
 0x167   :  { %2008 = vst [vmem:[#allocation14_spill] sm:$0xff] %v1741_v34  ;;  %v1753_v56 = vpop.permute.xlu1 %679  ;;  %v556_v47 = vpop.permute.xlu2 %555 }
 0x168   :  { %v558_v8 = vpop.permute.xlu0 %557  ;;  %v639_v19 = vadd.f32 %v556_v47, %v462_v15 }
 0x16d   :  { %687 = vrot.lane.b32.xlu2 %v2012_v32, %s1241_s19  ;;  %671 = vrot.lane.b32.xlu1 %v2013_v4, %s1241_s19 }
 0x16e   :  { %749 = vrot.lane.b32.xlu0 %v2014_v43, %s1240_s18 }
 0x16f   :  { %v542_v41 = vpop.permute.xlu1 %541  ;;  %v574_v1 = vpop.permute.xlu2 %573 }
 0x170   :  { %v632_v0 = vadd.f32 %v542_v41, %v455_v45  ;;  %v540_v62 = vpop.permute.xlu0 %539 }
 0x171   :  { %v631_v40 = vadd.f32 %v540_v62, %v454_v58  ;;  %v843_v58 = vsel %vm787_vm3, %v639_v19, -inf  ;;  %v2019_v19 = vrot.slane %v1583_v59, 1 }
 0x172   :  { %v808_v20 = vsel %vm789_vm4, %v632_v0, -inf }
 0x173   :  { %v807_v60 = vsel %vm787_vm3, %v631_v40, -inf  ;;  %v2018_v40 = vrot.slane %v1607_v17, 7 }
 0x174   :  { %v809_v44 = vmax.f32 %v807_v60, %v808_v20  ;;  %v773_v20 = vadd.f32 %v1718_v23, %v1496_v46  ;;  %v1239_v46 = vld [vmem:[%s1956_s2] ss:$0 sm:$0xff] }
 0x175   :  { %673 = vrot.lane.b32.xlu2 %v2015_v29, %s1241_s19  ;;  %751 = vrot.lane.b32.xlu1 %v2016_v31, %s1240_s18  ;;  %v709_v29 = vadd.f32 %v664_v2, %v1475_v26  ;;  %v478_v26 = vadd.f32 %v1737_v61, %v1471_v24 }
 0x176   :  { %v810_v6 = vrot.slane %v809_v44, 4  ;;  %735 = vrot.lane.b32.xlu0 %v2017_v12, %s1240_s18 }
 0x177   :  { %v381_v15 = vpop.permute.xlu1 %380  ;;  %v413_v28 = vpop.permute.xlu2 %412 }
 0x178   :  { %v811_v47 = vmax.f32 %v809_v44, %v810_v6  ;;  %v463_v32 = vadd.f32 %v381_v15, %v1489_v38  ;;  %v744_v4 = vpop.permute.xlu0 %743 }
 0x17a   :  { %v812_v45 = vrot.slane %v811_v47, 2  ;;  %v640_v43 = vadd.f32 %v558_v8, %v463_v32  ;;  %v479_v8 = vadd.f32 %v413_v28, %v1524_v21 }
 0x17c   :  { %v813_v41 = vmax.f32 %v811_v47, %v812_v45  ;;  %v844_v0 = vsel %vm789_vm4, %v640_v43, -inf  ;;  %v967_v47 = vrot.slane %v773_v20, 7  ;;  %v470_v45 = vadd.f32 %v1699_v25, %v1485_v35 }
 0x17d   :  { %v1781_v62 = vmax.f32 %v843_v58, %v844_v0  ;;  %753 = vrot.lane.b32.xlu2 %v352_v48, %s1240_s18  ;;  %737 = vrot.lane.b32.xlu1 %v2018_v40, %s1240_s18 }
 0x17e   :  { %v814_v60 = vrot.slane %v813_v41, 1  ;;  %689 = vrot.lane.b32.xlu0 %v2019_v19, %s1241_s19 }
 0x17f   :  { %v590_v44 = vpop.permute.xlu1 %589  ;;  %v383_v15 = vpop.permute.xlu2 %382 }
 0x180   :  { %v815_v31 = vmax.f32 %v813_v41, %v814_v60  ;;  %v656_v6 = vadd.f32 %v590_v44, %v479_v8  ;;  %v397_v48 = vpop.permute.xlu0 %396 }
 0x181   :  { %v471_v12 = vadd.f32 %v397_v48, %v1511_v3 }
 0x182   :  { %v935_v32 = vmax.f32 %v815_v31, %v709_v29 }
 0x183   :  { %v648_v23 = vadd.f32 %v574_v1, %v471_v12  ;;  %v916_v1 = vsel %vm789_vm4, %v656_v6, -inf  ;;  %v781_v12 = vadd.f32 %v744_v4, %v1511_v3 }
 0x184   :  { %v1800_v28 = vmax.f32 %v935_v32, %v967_v47 }
 0x185   :  { %v880_v40 = vsel %vm789_vm4, %v648_v23, -inf }
 0x186   :  { %2020 = vst [vmem:[#allocation15_spill] sm:$0xff] %v1800_v28  ;;  %1016 = vrot.lane.b32.xlu0 %v1239_v46, %s1240_s18  ;;  %v717_v46 = vadd.f32 %v1753_v56, %v1485_v35 }
 0x187   :  { %v572_v2 = vpop.permute.xlu1 %571  ;;  %v562_v8 = vpop.permute.xlu2 %561 }
 0x188   :  { %v647_v43 = vadd.f32 %v572_v2, %v470_v45  ;;  %v588_v58 = vpop.permute.xlu0 %587 }
 0x189   :  { %v655_v41 = vadd.f32 %v588_v58, %v478_v26  ;;  %v975_v26 = vrot.slane %v781_v12, 7 }
 0x18a   :  { %v879_v0 = vsel %vm787_vm3, %v647_v43, -inf }
 0x18b   :  { %v881_v20 = vmax.f32 %v879_v0, %v880_v40  ;;  %v915_v60 = vsel %vm787_vm3, %v655_v41, -inf }
 0x18c   :  { %v1811_v25 = vmax.f32 %v915_v60, %v916_v1  ;;  %v464_v60 = vadd.f32 %v383_v15, %v1565_v7 }
 0x18d   :  { %v882_v19 = vrot.slane %v881_v20, 4 }
 0x18f   :  { %v883_v44 = vmax.f32 %v881_v20, %v882_v19  ;;  %v666_v29 = vpop.permute.xlu1 %665  ;;  %v544_v32 = vpop.permute.xlu2 %543 }
 0x190   :  { %v367_v61 = vpop.permute.xlu0 %366  ;;  %v1827_v15 = vadd.f32 %v666_v29, %v1554_v57 }
 0x191   :  { %v884_v31 = vrot.slane %v883_v44, 2  ;;  %v456_v58 = vadd.f32 %v367_v61, %v1554_v57 }
 0x193   :  { %v885_v48 = vmax.f32 %v883_v44, %v884_v31  ;;  %v633_v40 = vadd.f32 %v544_v32, %v456_v58 }
 0x195   :  { %v886_v47 = vrot.slane %v885_v48, 1  ;;  %v816_v20 = vsel %vm787_vm3, %v633_v40, -inf }
 0x197   :  { %v887_v6 = vmax.f32 %v885_v48, %v886_v47  ;;  %v399_v23 = vpop.permute.xlu1 %398  ;;  %v401_v41 = vpop.permute.xlu2 %400 }
 0x198   :  { %v415_v45 = vpop.permute.xlu0 %414  ;;  %v472_v29 = vadd.f32 %v399_v23, %v1576_v10 }
 0x199   :  { %v943_v2 = vmax.f32 %v887_v6, %v717_v46 }
 0x19b   :  { %v1816_v43 = vmax.f32 %v943_v2, %v975_v26 }
 0x19d   :  { %2021 = vst [vmem:[#allocation16_spill] sm:$0xff] %v1816_v43 }
 0x19f   :  { %v369_v0 = vpop.permute.xlu1 %368  ;;  %v592_v48 = vpop.permute.xlu2 %591 }
 0x1a0   :  { %v546_v1 = vpop.permute.xlu0 %545  ;;  %v457_v3 = vadd.f32 %v369_v0, %v1600_v14 }
 0x1a2   :  { %v634_v4 = vadd.f32 %v546_v1, %v457_v3 }
 0x1a4   :  { %v817_v35 = vsel %vm789_vm4, %v634_v4, -inf }
 0x1a5   :  { %v818_v56 = vmax.f32 %v816_v20, %v817_v35 }
 0x1a7   :  { %v819_v19 = vrot.slane %v818_v56, 4  ;;  %v560_v44 = vpop.permute.xlu1 %559  ;;  %v1831_v4 = vpop.permute.xlu2 %729 }
 0x1a8   :  { %v385_v31 = vpop.permute.xlu0 %384  ;;  %v641_v47 = vadd.f32 %v560_v44, %v464_v60 }
 0x1a9   :  { %v820_v12 = vmax.f32 %v818_v56, %v819_v19  ;;  %v465_v61 = vadd.f32 %v385_v31, %v1607_v17 }
 0x1aa   :  { %v852_v2 = vsel %vm787_vm3, %v641_v47, -inf }
 0x1ab   :  { %v821_v32 = vrot.slane %v820_v12, 2  ;;  %v642_v46 = vadd.f32 %v562_v8, %v465_v61  ;;  %v473_v61 = vadd.f32 %v401_v41, %v1634_v39  ;;  %v828_v41 = vrot.slane %v1573_v36, 4 }
 0x1ad   :  { %v822_v6 = vmax.f32 %v820_v12, %v821_v32  ;;  %v853_v26 = vsel %vm789_vm4, %v642_v46, -inf }
 0x1ae   :  { %v854_v58 = vmax.f32 %v852_v2, %v853_v26 }
 0x1af   :  { %v823_v0 = vrot.slane %v822_v6, 1  ;;  %v578_v40 = vpop.permute.xlu1 %577  ;;  %v1835_v56 = vpop.permute.xlu2 %667 }
 0x1b0   :  { %v594_v1 = vpop.permute.xlu0 %593  ;;  %v650_v32 = vadd.f32 %v578_v40, %v473_v61  ;;  %v900_v40 = vrot.slane %v1596_v11, 4 }
 0x1b1   :  { %v1829_v3 = vmax.f32 %v822_v6, %v823_v0  ;;  %v480_v6 = vadd.f32 %v415_v45, %v1583_v59 }
 0x1b2   :  { %v889_v23 = vsel %vm789_vm4, %v650_v32, -inf }
 0x1b3   :  { %v657_v28 = vadd.f32 %v592_v48, %v480_v6  ;;  %v829_v6 = vmax.f32 %v1573_v36, %v828_v41 }
 0x1b5   :  { %v924_v45 = vsel %vm787_vm3, %v657_v28, -inf  ;;  %v830_v9 = vrot.slane %v829_v6, 2 }
 0x1b7   :  { %v417_v8 = vpop.permute.xlu1 %416  ;;  %v1841_v44 = vpop.permute.xlu2 %747 }
 0x1b8   :  { %v576_v35 = vpop.permute.xlu0 %575  ;;  %v481_v12 = vadd.f32 %v417_v8, %v1653_v63 }
 0x1b9   :  { %v649_v47 = vadd.f32 %v576_v35, %v472_v29  ;;  %v837_v35 = vrot.slane %v1672_v49, 4  ;;  %v846_v29 = vrot.slane %v1781_v62, 4 }
 0x1ba   :  { %v658_v26 = vadd.f32 %v594_v1, %v481_v12  ;;  %v909_v1 = vrot.slane %v1724_v51, 4  ;;  %v918_v12 = vrot.slane %v1811_v25, 4 }
 0x1bb   :  { %v888_v0 = vsel %vm787_vm3, %v649_v47, -inf  ;;  %v847_v43 = vmax.f32 %v1781_v62, %v846_v29 }
 0x1bc   :  { %v890_v42 = vmax.f32 %v888_v0, %v889_v23  ;;  %v925_v8 = vsel %vm789_vm4, %v658_v26, -inf  ;;  %v901_v26 = vmax.f32 %v1596_v11, %v900_v40  ;;  %v855_v0 = vrot.slane %v854_v58, 4 }
 0x1bd   :  { %v926_v48 = vmax.f32 %v924_v45, %v925_v8  ;;  %v838_v23 = vmax.f32 %v1672_v49, %v837_v35  ;;  %v910_v28 = vmax.f32 %v1724_v51, %v909_v1  ;;  %v919_v34 = vmax.f32 %v1811_v25, %v918_v12 }
 0x1be   :  { %v891_v47 = vrot.slane %v890_v42, 4  ;;  %v902_v52 = vrot.slane %v901_v26, 2  ;;  %v856_v17 = vmax.f32 %v854_v58, %v855_v0  ;;  %v848_v11 = vrot.slane %v847_v43, 2 }
 0x1bf   :  { %v1837_v60 = vpop.permute.xlu1 %723  ;;  %v1856_v20 = vpop.permute.xlu2 %733  ;;  %v927_v53 = vrot.slane %v926_v48, 4  ;;  %v839_v13 = vrot.slane %v838_v23, 2  ;;  %v911_v16 = vrot.slane %v910_v28, 2  ;;  %v920_v36 = vrot.slane %v919_v34, 2 }
 0x1c0   :  { %v1839_v19 = vpop.permute.xlu0 %681  ;;  %v892_v45 = vmax.f32 %v890_v42, %v891_v47  ;;  %v857_v51 = vrot.slane %v856_v17, 2  ;;  %v831_v1 = vmax.f32 %v829_v6, %v830_v9  ;;  %v903_v62 = vmax.f32 %v901_v26, %v902_v52 }
 0x1c1   :  { %v928_v41 = vmax.f32 %v926_v48, %v927_v53  ;;  %v840_v29 = vmax.f32 %v838_v23, %v839_v13  ;;  %v921_v25 = vmax.f32 %v919_v34, %v920_v36  ;;  %v912_v12 = vmax.f32 %v910_v28, %v911_v16 }
 0x1c2   :  { %v893_v49 = vrot.slane %v892_v45, 2  ;;  %v849_v63 = vmax.f32 %v847_v43, %v848_v11  ;;  %v832_v58 = vrot.slane %v831_v1, 1  ;;  %v904_v0 = vrot.slane %v903_v62, 1 }
 0x1c3   :  { %v929_v42 = vrot.slane %v928_v41, 2  ;;  %v774_v53 = vadd.f32 %v1831_v4, %v1600_v14  ;;  %v841_v48 = vrot.slane %v840_v29, 1  ;;  %v913_v55 = vrot.slane %v912_v12, 1 }
 0x1c4   :  { %v894_v47 = vmax.f32 %v892_v45, %v893_v49  ;;  %v850_v7 = vrot.slane %v849_v63, 1  ;;  %v711_v13 = vadd.f32 %v1835_v56, %v1331_v18  ;;  %v833_v34 = vmax.f32 %v831_v1, %v832_v58 }
 0x1c5   :  { %v930_v9 = vmax.f32 %v928_v41, %v929_v42  ;;  %v783_v43 = vadd.f32 %v1841_v44, %v1367_v37  ;;  %v905_v6 = vmax.f32 %v903_v62, %v904_v0  ;;  %v968_v26 = vrot.slane %v774_v53, 7 }
 0x1c6   :  { %v895_v16 = vrot.slane %v894_v47, 1  ;;  %v776_v14 = vadd.f32 %v1856_v20, %v1409_v54  ;;  %v771_v4 = vadd.f32 %v1837_v60, %v1353_v30  ;;  %v842_v23 = vmax.f32 %v840_v29, %v841_v48 }
 0x1c7   :  { %v1843_v31 = vpop.permute.xlu1 %745  ;;  %v688_v8 = vpop.permute.xlu2 %687  ;;  %v914_v45 = vmax.f32 %v912_v12, %v913_v55  ;;  %v851_v36 = vmax.f32 %v849_v63, %v850_v7  ;;  %v931_v18 = vrot.slane %v930_v9, 1  ;;  %v2024_v56 = vmax.f32 %v1829_v3, %v1827_v15 }
 0x1c8   :  { %v1845_v57 = vpop.permute.xlu0 %739  ;;  %v937_v37 = vmax.f32 %v833_v34, %v711_v13  ;;  %v896_v44 = vmax.f32 %v894_v47, %v895_v16  ;;  %v782_v11 = vadd.f32 %v1843_v31, %v1634_v39  ;;  %v977_v49 = vrot.slane %v783_v43, 7  ;;  %v2034_v47 = vld [vmem:[#allocation7_spill] sm:$0xff]  ;;  %v2036_v16 = vld [vmem:[#allocation9_spill] sm:$0xff]  ;;  %v2038_v43 = vld [vmem:[#allocation10_spill] sm:$0xff] }
 0x1c9   :  { %v1892_v41 = vmax.f32 %v2024_v56, %v968_v26  ;;  %v718_v54 = vadd.f32 %v1839_v19, %v1576_v10  ;;  %v779_v30 = vadd.f32 %v1845_v57, %v1362_v33  ;;  %v970_v7 = vrot.slane %v776_v14, 7  ;;  %v2037_v34 = vld [vmem:[#allocation11_spill] sm:$0xff] }
 0x1ca   :  { %v965_v63 = vrot.slane %v771_v4, 7  ;;  %v721_v20 = vadd.f32 %v688_v8, %v1471_v24  ;;  %v932_v19 = vmax.f32 %v930_v9, %v931_v18  ;;  %v976_v31 = vrot.slane %v782_v11, 7  ;;  %v2029_v8 = vld [vmem:[#allocation6_spill] sm:$0xff] }
 0x1cb   :  { %v944_v33 = vmax.f32 %v896_v44, %v718_v54 }
 0x1cd   :  { %v1008_v26 = vmax.f32 %v944_v33, %v976_v31 }
 0x1cf   :  { %v1850_v46 = vpop.permute.xlu1 %731  ;;  %v674_v59 = vpop.permute.xlu2 %673 }
 0x1d0   :  { %v1853_v2 = vpop.permute.xlu0 %683  ;;  %v775_v3 = vadd.f32 %v1850_v46, %v1346_v27  ;;  %v2027_v27 = vld [vmem:[#allocation2_spill] sm:$0xff] }
 0x1d1   :  { %v719_v15 = vadd.f32 %v1853_v2, %v1339_v22  ;;  %v973_v22 = vrot.slane %v779_v30, 7  ;;  %v2026_v2 = vld [vmem:[#allocation5_spill] sm:$0xff] }
 0x1d2   :  { %v714_v1 = vadd.f32 %v674_v59, %v2026_v2  ;;  %v969_v29 = vrot.slane %v775_v3, 7 }
 0x1d4   :  { %v1001_v56 = vmax.f32 %v937_v37, %v969_v29 }
 0x1d7   :  { %v1867_v61 = vpop.permute.xlu1 %685  ;;  %v754_v60 = vpop.permute.xlu2 %753 }
 0x1d8   :  { %2022 = vst [vmem:[#allocation17_spill] sm:$0xff] %v1867_v61  ;;  %v1869_v32 = vpop.permute.xlu0 %669  ;;  %v858_v61 = vmax.f32 %v856_v17, %v857_v51 }
 0x1d9   :  { %v712_v39 = vadd.f32 %v1869_v32, %v1398_v50  ;;  %v945_v32 = vmax.f32 %v905_v6, %v719_v15  ;;  %v2039_v6 = vmax.f32 %v2037_v34, %v2038_v43 }
 0x1da   :  { %v859_v17 = vrot.slane %v858_v61, 1 }
 0x1db   :  { %v938_v53 = vmax.f32 %v842_v23, %v712_v39  ;;  %v1009_v18 = vmax.f32 %v945_v32, %v977_v49  ;;  %v2040_v39 = vld [vmem:[#allocation14_spill] sm:$0xff] }
 0x1dc   :  { %v1900_v55 = vmax.f32 %v858_v61, %v859_v17  ;;  %v2025_v61 = vld [vmem:[#allocation4_spill] sm:$0xff]  ;;  %v1005_v17 = vmax.f32 %v2039_v6, %v973_v22 }
 0x1de   :  { %v940_v14 = vmax.f32 %v1900_v55, %v714_v1 }
 0x1df   :  { %v1877_v40 = vpop.permute.xlu1 %671  ;;  %v2028_v46 = vld [vmem:[#allocation17_spill] sm:$0xff] }
 0x1e0   :  { %2023 = vst [vmem:[#allocation18_spill] sm:$0xff] %v1877_v40  ;;  %v750_v35 = vpop.permute.xlu0 %749  ;;  %v922_v40 = vrot.slane %v921_v25, 1  ;;  %v720_v24 = vadd.f32 %v2028_v46, %v2027_v27 }
 0x1e1   :  { %v784_v10 = vadd.f32 %v750_v35, %v1441_v5  ;;  %v2030_v5 = vld [vmem:[#allocation12_spill] sm:$0xff] }
 0x1e2   :  { %v923_v28 = vmax.f32 %v921_v25, %v922_v40  ;;  %v786_v35 = vadd.f32 %v754_v60, %v2030_v5  ;;  %v2031_v25 = vld [vmem:[#allocation3_spill] sm:$0xff]  ;;  %v946_v4 = vmax.f32 %v914_v45, %v720_v24 }
 0x1e3   :  { %v978_v59 = vrot.slane %v784_v10, 7  ;;  %v2041_v10 = vld [vmem:[#allocation16_spill] sm:$0xff] }
 0x1e4   :  { %v947_v0 = vmax.f32 %v923_v28, %v721_v20  ;;  %v980_v44 = vrot.slane %v786_v35, 7  ;;  %v1002_v28 = vmax.f32 %v938_v53, %v970_v7  ;;  %v2043_v53 = vld [vmem:[#allocation15_spill] sm:$0xff] }
 0x1e5   :  { %v1010_v23 = vmax.f32 %v946_v4, %v978_v59 }
 0x1e7   :  { %v752_v21 = vpop.permute.xlu1 %751  ;;  %v2032_v12 = vld [vmem:[#allocation18_spill] sm:$0xff] }
 0x1e8   :  { %v736_v52 = vpop.permute.xlu0 %735  ;;  %v785_v40 = vadd.f32 %v752_v21, %v2025_v61  ;;  %v713_v42 = vadd.f32 %v2032_v12, %v2031_v25 }
 0x1e9   :  { %v777_v57 = vadd.f32 %v736_v52, %v1489_v38  ;;  %v2033_v38 = vld [vmem:[#allocation8_spill] sm:$0xff] }
 0x1ea   :  { %v2035_v21 = vmax.f32 %v2033_v38, %v2034_v47  ;;  %v979_v9 = vrot.slane %v785_v40, 7  ;;  %v939_v11 = vmax.f32 %v851_v36, %v713_v42 }
 0x1eb   :  { %v971_v48 = vrot.slane %v777_v57, 7 }
 0x1ec   :  { %v997_v58 = vmax.f32 %v2035_v21, %v965_v63  ;;  %v1011_v30 = vmax.f32 %v947_v0, %v979_v9  ;;  %v2042_v21 = vld [vmem:[#allocation13_spill] sm:$0xff] }
 0x1ed   :  { %v1003_v54 = vmax.f32 %v939_v11, %v971_v48 }
 0x1ef   :  { %v738_v50 = vpop.permute.xlu1 %737 }
 0x1f0   :  { %v690_v51 = vpop.permute.xlu0 %689  ;;  %v778_v52 = vadd.f32 %v738_v50, %v2036_v16 }
 0x1f1   :  { %v722_v62 = vadd.f32 %v690_v51, %v2029_v8 }
 0x1f2   :  { %v972_v15 = vrot.slane %v778_v52, 7 }
 0x1f3   :  { %v948_v13 = vmax.f32 %v932_v19, %v722_v62 }
 0x1f4   :  { %v1004_v2 = vmax.f32 %v940_v14, %v972_v15 }
 0x1f5   :  { %v1012_v63 = vmax.f32 %v948_v13, %v980_v44 }
 0x1f8   :  { %v1017_v3 = vpop.permute.xlu0 %1016 }
 0x1f9   :  { %v1027_v20 = vadd.f32 %v1017_v3, %v1005_v17  ;;  %v1028_v60 = vadd.f32 %v1017_v3, %v2040_v39  ;;  %v1029_v55 = vadd.f32 %v1017_v3, %v2041_v10  ;;  %v1030_v45 = vadd.f32 %v1017_v3, %v1008_v26 }
 0x1fa   :  { %v1031_v37 = vadd.f32 %v1017_v3, %v1009_v18  ;;  %v1032_v49 = vadd.f32 %v1017_v3, %v1010_v23  ;;  %v1033_v36 = vadd.f32 %v1017_v3, %v1011_v30  ;;  %v1034_v7 = vadd.f32 %v1017_v3, %v1012_v63 }
 0x1fb   :  { %v1043_v19 = vpack.c.bf16 %v1027_v20, %v1027_v20  ;;  %v1044_v33 = vpack.c.bf16 %v1028_v60, %v1028_v60  ;;  %v1045_v31 = vpack.c.bf16 %v1029_v55, %v1029_v55  ;;  %v1046_v57 = vpack.c.bf16 %v1030_v45, %v1030_v45 }
 0x1fc   :  { %v1047_v61 = vpack.c.bf16 %v1031_v37, %v1031_v37  ;;  %v1048_v40 = vpack.c.bf16 %v1032_v49, %v1032_v49  ;;  %v1049_v51 = vpack.c.bf16 %v1033_v36, %v1033_v36  ;;  %v1050_v22 = vpack.c.bf16 %v1034_v7, %v1034_v7 }
 0x1fd   :  { %v1076_v1 = vunpack.c.l.b16 %v1044_v33  ;;  %v1077_v27 = vunpack.c.l.b16 %v1045_v31  ;;  %v1078_v46 = vunpack.c.l.b16 %v1046_v57  ;;  %v1075_v24 = vunpack.c.l.b16 %v1043_v19 }
 0x1fe   :  { %v1079_v8 = vunpack.c.l.b16 %v1047_v61  ;;  %v1080_v62 = vunpack.c.l.b16 %v1048_v40  ;;  %v1081_v50 = vunpack.c.l.b16 %v1049_v51  ;;  %v1082_v32 = vunpack.c.l.b16 %v1050_v22 }
 0x1ff   :  { %v1104_v29 = vrot.slane %v1076_v1, 7  ;;  %v1106_v5 = vrot.slane %v1077_v27, 6  ;;  %v1019_v35 = vadd.f32 %v1017_v3, %v997_v58  ;;  %v1108_v25 = vrot.slane %v1078_v46, 5 }
 0x200   :  { %v1110_v12 = vrot.slane %v1079_v8, 4  ;;  %v1112_v42 = vrot.slane %v1080_v62, 3  ;;  %v1114_v38 = vrot.slane %v1081_v50, 2  ;;  %v1020_v0 = vadd.f32 %v1017_v3, %v2042_v21 }
 0x201   :  { %v1105_v47 = vsel %vm1084_vm5, %v1104_v29, %v1075_v24  ;;  %v1021_v59 = vadd.f32 %v1017_v3, %v2043_v53  ;;  %v1022_v48 = vadd.f32 %v1017_v3, %v1892_v41  ;;  %v1023_v13 = vadd.f32 %v1017_v3, %v1001_v56 }
 0x202   :  { %v1107_v9 = vsel %vm1087_vm6, %v1106_v5, %v1105_v47  ;;  %v1024_v16 = vadd.f32 %v1017_v3, %v1002_v28  ;;  %v1025_v52 = vadd.f32 %v1017_v3, %v1003_v54  ;;  %v1026_v58 = vadd.f32 %v1017_v3, %v1004_v2 }
 0x203   :  { %v1109_v34 = vsel %vm1090_vm7, %v1108_v25, %v1107_v9  ;;  %v1035_v43 = vpack.c.bf16 %v1019_v35, %v1019_v35  ;;  %v1036_v6 = vpack.c.bf16 %v1020_v0, %v1020_v0  ;;  %v1037_v26 = vpack.c.bf16 %v1021_v59, %v1021_v59 }
 0x204   :  { %v1111_v17 = vsel %vm1093_vm8, %v1110_v12, %v1109_v34  ;;  %v1038_v14 = vpack.c.bf16 %v1022_v48, %v1022_v48  ;;  %v1039_v4 = vpack.c.bf16 %v1023_v13, %v1023_v13  ;;  %v1116_v44 = vrot.slane %v1082_v32, 1 }
 0x205   :  { %v1113_v18 = vsel %vm1096_vm9, %v1112_v42, %v1111_v17  ;;  %v1040_v11 = vpack.c.bf16 %v1024_v16, %v1024_v16  ;;  %v1041_v41 = vpack.c.bf16 %v1025_v52, %v1025_v52  ;;  %v1042_v56 = vpack.c.bf16 %v1026_v58, %v1026_v58 }
 0x206   :  { %v1115_v23 = vsel %vm1099_vm10, %v1114_v38, %v1113_v18  ;;  %v1068_v28 = vunpack.c.l.b16 %v1036_v6  ;;  %v1069_v54 = vunpack.c.l.b16 %v1037_v26  ;;  %v1070_v63 = vunpack.c.l.b16 %v1038_v14 }
 0x207   :  { %v1117_v30 = vsel %vm1102_vm11, %v1116_v44, %v1115_v23  ;;  %v1071_v15 = vunpack.c.l.b16 %v1039_v4  ;;  %v1067_v20 = vunpack.c.l.b16 %v1035_v43  ;;  %v1072_v39 = vunpack.c.l.b16 %v1040_v11 }
 0x208   :  { %v1119_v3 = vpack.c.b16 %v1117_v30, %v1117_v30  ;;  %v1083_v60 = vrot.slane %v1068_v28, 7  ;;  %v1073_v10 = vunpack.c.l.b16 %v1041_v41  ;;  %v1086_v55 = vrot.slane %v1069_v54, 6 }
 0x209   :  { %v1074_v45 = vunpack.c.l.b16 %v1042_v56  ;;  %v1089_v49 = vrot.slane %v1070_v63, 5  ;;  %v1092_v7 = vrot.slane %v1071_v15, 4  ;;  %v1095_v33 = vrot.slane %v1072_v39, 3 }
 0x20a   :  { %1122 = vrot.lane.b32.xlu2 %v1119_v3, %s1241_s19  ;;  %v1085_v37 = vsel %vm1084_vm5, %v1083_v60, %v1067_v20  ;;  %v1098_v57 = vrot.slane %v1073_v10, 2 }
 0x20b   :  { %v1088_v36 = vsel %vm1087_vm6, %v1086_v55, %v1085_v37  ;;  %v1101_v40 = vrot.slane %v1074_v45, 1 }
 0x20c   :  { %v1091_v19 = vsel %vm1090_vm7, %v1089_v49, %v1088_v36 }
 0x20d   :  { %v1094_v31 = vsel %vm1093_vm8, %v1092_v7, %v1091_v19 }
 0x20e   :  { %v1097_v61 = vsel %vm1096_vm9, %v1095_v33, %v1094_v31 }
 0x20f   :  { %v1100_v51 = vsel %vm1099_vm10, %v1098_v57, %v1097_v61 }
 0x210   :  { %v1103_v22 = vsel %vm1102_vm11, %v1101_v40, %v1100_v51 }
 0x211   :  { %v1118_v2 = vpack.c.b16 %v1103_v22, %v1103_v22 }
 0x213   :  { %1120 = vrot.lane.b32.xlu1 %v1118_v2, %s1241_s19 }
 0x264   :  { %v1123_v1 = vpop.permute.xlu2 %1122 }
 0x265   :  { %1128 = vst.msk [vmem:[%s1957_s3 + $0x4] sm:$0xf] %vm1126_vm12, %v1123_v1 }
 0x285   :  { %v1121_v27 = vpop.permute.xlu1 %1120 }
 0x286   :  { %1127 = vst.msk [vmem:[%s1957_s3] sm:$0xf] %vm1126_vm12, %v1121_v27 }

// kernel: cnn_lstm_crf_forward.5
= control target key start
LH: loop header
LB: loop body
LE: loop exit
PB: predicated region body
PF: predicated region fallthrough
CT: control target
= control target key end

     0   :  { %v23_v0 = vlaneseq  ;;  %v2076_v1 = vmov 0   ;;  %vm137_vm0 = vcmask 15360   ;;  %v3466_v50 = vmov 0.0   ;;  %s3460_s3 = inlined_call_operand.vmem [shape: f32[8,1], index: 3, kind: input, shape index: {}]   ;;  %s3461_s2 = inlined_call_operand.vmem [shape: f32[8,8], index: 2, kind: input, shape index: {}]   ;;  %s3462_s0 = inlined_call_operand.vmem [shape: f32[8,8,2], index: 0, kind: input, shape index: {}]   ;;  %s3463_s4 = inlined_call_operand.vmem [shape: f32[8,1], index: 4, kind: input, shape index: {}]   ;;  %s3464_s1 = inlined_call_operand.vmem [shape: s32[1,2], index: 1, kind: input, shape index: {}]   ;;  %s3465_s5 = inlined_call_operand.vmem [shape: s32[8,2], index: 5, kind: output, shape index: {}]  }
   0x1   :  { %2069 = vset.pattern.permute.xlu1 %v2076_v1  ;;  %v81_v2 = vld [vmem:[%s3460_s3] sm:$0xff]  ;;  %v2126_v14 = vld [vmem:[%s3462_s0 + $0x8] sm:$0xff] }
   0x2   :  { %84 = vperm.xlu1 %2069, %v81_v2   ;;  %v2112_v3 = vshrl.u32 %v23_v0, 7  ;;  %v21_v4 = vld [vmem:[%s3461_s2] sm:$0xff]  ;;  %v100_v15 = vrot.slane %v2126_v14, 3  ;;  %v101_v16 = vrot.slane %v2126_v14, 4  ;;  %v104_v19 = vrot.slane %v2126_v14, 7 }
   0x3   :  { %v43_v5 = vperm.slane %v21_v4, 3  ;;  %v22_v6 = vperm.slane %v21_v4, 0  ;;  %v36_v7 = vperm.slane %v21_v4, 2  ;;  %v50_v8 = vperm.slane %v21_v4, 4  ;;  %v1921_v18 = vld [vmem:[%s3463_s4] sm:$0xff] }
   0x4   :  { %2072 = vset.pattern.permute.xlu2 %v2112_v3  ;;  %2070 = vset.pattern.permute.xlu0 %v2112_v3  ;;  %v29_v9 = vperm.slane %v21_v4, 1  ;;  %v64_v10 = vperm.slane %v21_v4, 6  ;;  %v71_v11 = vperm.slane %v21_v4, 7  ;;  %v57_v12 = vperm.slane %v21_v4, 5  ;;  %v80_v22 = vld [vmem:[%s3462_s0] sm:$0xff] }
   0x5   :  { %v108_v20 = vperm.slane %v100_v15, 0  ;;  %v109_v21 = vperm.slane %v101_v16, 0  ;;  %v112_v23 = vperm.slane %v104_v19, 0  ;;  %v2154_v35 = vld [vmem:[%s3464_s1] sm:$0x1]  ;;  %v105_v38 = vperm.slane %v2126_v14, 0 }
   0x6   :  { %vm88_vm1 = vcmp.eq.s32.totalorder %v2154_v35, 1  ;;  %v99_v43 = vrot.slane %v2126_v14, 2  ;;  %v98_v48 = vrot.slane %v2126_v14, 1  ;;  %v103_v55 = vrot.slane %v2126_v14, 6 }
   0x7   :  { %v2165_v51 = vsel %vm88_vm1, 1.0, %v3466_v50  ;;  %v2172_v58 = vadd.s32 4294967295, %v2154_v35 }
   0x8   :  { %v107_v56 = vperm.slane %v99_v43, 0  ;;  %v92_v62 = vperm.slane %v2165_v51, 0  ;;  %v106_v63 = vperm.slane %v98_v48, 0 }
   0x9   :  { %vm3468_vm2 = vcmp.eq.s32.totalorder %v2172_v58, 1 }
   0xa   :  { %2071 = vset.pattern.permute.xlu1 %v2112_v3 }
   0xc   :  { %48 = vperm.xlu2 %2072, %v43_v5   ;;  %27 = vperm.xlu0 %2070, %v22_v6  }
  0x12   :  { %41 = vperm.xlu1 %2071, %v36_v7  }
  0x14   :  { %55 = vperm.xlu2 %2072, %v50_v8   ;;  %34 = vperm.xlu0 %2070, %v29_v9   ;;  %v102_v8 = vrot.slane %v2126_v14, 5  ;;  %v111_v9 = vperm.slane %v103_v55, 0 }
  0x1a   :  { %69 = vperm.xlu1 %2071, %v64_v10  }
  0x1c   :  { %76 = vperm.xlu2 %2072, %v71_v11   ;;  %62 = vperm.xlu0 %2070, %v57_v12  }
  0x24   :  { %2073 = vset.pattern.permute.xlu0 %v2076_v1 }
  0x25   :  { %1924 = vperm.xlu0 %2073, %v1921_v18  }
  0x66   :  { %v2121_v13 = vpop.permute.xlu2 %48 }
  0x67   :  { %v124_v24 = vadd.f32 %v108_v20, %v2121_v13 }
  0x6e   :  { %v2130_v17 = vpop.permute.xlu2 %55 }
  0x6f   :  { %v125_v25 = vadd.f32 %v109_v21, %v2130_v17 }
  0x74   :  { %v85_v26 = vpop.permute.xlu1 %84 }
  0x75   :  { %v2141_v27 = vadd.f32 %v85_v26, %v80_v22 }
  0x76   :  { %v2143_v28 = vpop.permute.xlu2 %76 }
  0x77   :  { %v128_v29 = vadd.f32 %v112_v23, %v2143_v28  ;;  %v132_v30 = vadd.f32 %v124_v24, %v2141_v27  ;;  %v133_v31 = vadd.f32 %v125_v25, %v2141_v27 }
  0x79   :  { %v136_v32 = vadd.f32 %v128_v29, %v2141_v27  ;;  %v159_v33 = vsel %vm137_vm0, %v132_v30, -inf  ;;  %v166_v34 = vsel %vm137_vm0, %v133_v31, -inf }
  0x7a   :  { %v160_v36 = vrot.slane %v159_v33, 4  ;;  %v167_v37 = vrot.slane %v166_v34, 4 }
  0x7b   :  { %v187_v39 = vsel %vm137_vm0, %v136_v32, -inf }
  0x7c   :  { %v161_v40 = vmax.f32 %v159_v33, %v160_v36  ;;  %v168_v41 = vmax.f32 %v166_v34, %v167_v37  ;;  %v188_v42 = vrot.slane %v187_v39, 4  ;;  %v110_v34 = vperm.slane %v102_v8, 0 }
  0x7d   :  { %v2054_v36 = vsel %vm3468_vm2, 1.0, %v3466_v50 }
  0x7e   :  { %v2160_v44 = vpop.permute.xlu0 %27  ;;  %v162_v45 = vrot.slane %v161_v40, 2  ;;  %v169_v46 = vrot.slane %v168_v41, 2  ;;  %v189_v47 = vmax.f32 %v187_v39, %v188_v42 }
  0x7f   :  { %v121_v49 = vadd.f32 %v105_v38, %v2160_v44 }
  0x80   :  { %v163_v52 = vmax.f32 %v161_v40, %v162_v45  ;;  %v170_v53 = vmax.f32 %v168_v41, %v169_v46  ;;  %v190_v54 = vrot.slane %v189_v47, 2 }
  0x81   :  { %v2169_v57 = vadd.f32 %v121_v49, %v2141_v27 }
  0x82   :  { %v164_v59 = vrot.slane %v163_v52, 1  ;;  %v171_v60 = vrot.slane %v170_v53, 1  ;;  %v191_v61 = vmax.f32 %v189_v47, %v190_v54 }
  0x83   :  { %v138_v0 = vsel %vm137_vm0, %v2169_v57, -inf }
  0x84   :  { %v2177_v2 = vpop.permute.xlu1 %41  ;;  %v139_v4 = vrot.slane %v138_v0, 4  ;;  %v2179_v5 = vmax.f32 %v163_v52, %v164_v59  ;;  %v2181_v6 = vmax.f32 %v170_v53, %v171_v60  ;;  %v192_v7 = vrot.slane %v191_v61, 1 }
  0x85   :  { %v123_v10 = vadd.f32 %v107_v56, %v2177_v2 }
  0x86   :  { %v2186_v11 = vpop.permute.xlu0 %34  ;;  %v140_v12 = vmax.f32 %v138_v0, %v139_v4  ;;  %v2188_v15 = vmax.f32 %v191_v61, %v192_v7  ;;  %vm197_vm3 = vcmp.ge.f32.partialorder %v132_v30, %v2179_v5  ;;  %vm198_vm4 = vcmp.ge.f32.partialorder %v133_v31, %v2181_v6 }
  0x87   :  { %v122_v16 = vadd.f32 %v106_v63, %v2186_v11  ;;  %v2194_v18 = vadd.f32 %v123_v10, %v2141_v27  ;;  %v205_v14 = vsel %vm197_vm3, %v2112_v3, 8  ;;  %v206_v19 = vsel %vm198_vm4, %v2112_v3, 8 }
  0x88   :  { %v141_v20 = vrot.slane %v140_v12, 2  ;;  %vm201_vm5 = vcmp.ge.f32.partialorder %v136_v32, %v2188_v15  ;;  %v240_v21 = vsel %vm137_vm0, %v205_v14, 2147483647  ;;  %v250_v22 = vsel %vm137_vm0, %v206_v19, 2147483647 }
  0x89   :  { %v2202_v23 = vadd.f32 %v122_v16, %v2141_v27  ;;  %v152_v24 = vsel %vm137_vm0, %v2194_v18, -inf  ;;  %v209_v25 = vsel %vm201_vm5, %v2112_v3, 8  ;;  %v241_v26 = vrot.slane %v240_v21, 4 }
  0x8a   :  { %v142_v29 = vmax.f32 %v140_v12, %v141_v20  ;;  %v153_v30 = vrot.slane %v152_v24, 4  ;;  %v251_v31 = vrot.slane %v250_v22, 4  ;;  %v280_v33 = vsel %vm137_vm0, %v209_v25, 2147483647 }
  0x8b   :  { %v145_v32 = vsel %vm137_vm0, %v2202_v23, -inf  ;;  %vm242_vm6 = vcmp.lt.s32.totalorder %v240_v21, %v241_v26  ;;  %v281_v45 = vrot.slane %v280_v33, 4 }
  0x8c   :  { %v2213_v37 = vpop.permute.xlu1 %69  ;;  %v143_v38 = vrot.slane %v142_v29, 1  ;;  %v146_v39 = vrot.slane %v145_v32, 4  ;;  %v154_v40 = vmax.f32 %v152_v24, %v153_v30  ;;  %v243_v41 = vsel %vm242_vm6, %v240_v21, %v241_v26 }
  0x8d   :  { %v127_v42 = vadd.f32 %v111_v9, %v2213_v37  ;;  %v244_v43 = vrot.slane %v243_v41, 2  ;;  %vm252_vm7 = vcmp.lt.s32.totalorder %v250_v22, %v251_v31  ;;  %vm282_vm10 = vcmp.lt.s32.totalorder %v280_v33, %v281_v45 }
  0x8e   :  { %v2216_v46 = vpop.permute.xlu0 %62  ;;  %v2218_v47 = vmax.f32 %v142_v29, %v143_v38  ;;  %v147_v48 = vmax.f32 %v145_v32, %v146_v39  ;;  %v155_v49 = vrot.slane %v154_v40, 2  ;;  %v253_v52 = vsel %vm252_vm7, %v250_v22, %v251_v31 }
  0x8f   :  { %v126_v53 = vadd.f32 %v110_v34, %v2216_v46  ;;  %v2222_v54 = vadd.f32 %v127_v42, %v2141_v27  ;;  %vm245_vm8 = vcmp.lt.s32.totalorder %v243_v41, %v244_v43  ;;  %v254_v55 = vrot.slane %v253_v52, 2 }
  0x90   :  { %v148_v56 = vrot.slane %v147_v48, 2  ;;  %v156_v59 = vmax.f32 %v154_v40, %v155_v49  ;;  %vm194_vm9 = vcmp.ge.f32.partialorder %v2169_v57, %v2218_v47  ;;  %v246_v60 = vsel %vm245_vm8, %v243_v41, %v244_v43 }
  0x91   :  { %v2227_v61 = vadd.f32 %v126_v53, %v2141_v27  ;;  %v180_v63 = vsel %vm137_vm0, %v2222_v54, -inf  ;;  %v202_v0 = vsel %vm194_vm9, %v2112_v3, 8  ;;  %v247_v57 = vrot.slane %v246_v60, 1 }
  0x92   :  { %v149_v4 = vmax.f32 %v147_v48, %v148_v56  ;;  %v157_v7 = vrot.slane %v156_v59, 1  ;;  %v181_v8 = vrot.slane %v180_v63, 4  ;;  %v210_v9 = vsel %vm137_vm0, %v202_v0, 2147483647 }
  0x93   :  { %v173_v10 = vsel %vm137_vm0, %v2227_v61, -inf  ;;  %v211_v12 = vrot.slane %v210_v9, 4  ;;  %vm255_vm11 = vcmp.lt.s32.totalorder %v253_v52, %v254_v55  ;;  %v283_v22 = vsel %vm282_vm10, %v280_v33, %v281_v45 }
  0x94   :  { %v150_v16 = vrot.slane %v149_v4, 1  ;;  %v2235_v14 = vmax.f32 %v156_v59, %v157_v7  ;;  %v174_v19 = vrot.slane %v173_v10, 4  ;;  %v182_v20 = vmax.f32 %v180_v63, %v181_v8 }
  0x95   :  { %vm212_vm12 = vcmp.lt.s32.totalorder %v210_v9, %v211_v12  ;;  %v2237_v21 = vsel %vm255_vm11, %v253_v52, %v254_v55  ;;  %v2239_v24 = vperm.slane %v2054_v36, 0  ;;  %vm2246_vm14 = vcmp.lt.s32.totalorder %v246_v60, %v247_v57 }
  0x96   :  { %v2241_v25 = vmax.f32 %v149_v4, %v150_v16  ;;  %v175_v26 = vmax.f32 %v173_v10, %v174_v19  ;;  %v183_v29 = vrot.slane %v182_v20, 2  ;;  %vm196_vm13 = vcmp.ge.f32.partialorder %v2194_v18, %v2235_v14 }
  0x97   :  { %v204_v30 = vsel %vm196_vm13, %v2112_v3, 8  ;;  %v213_v31 = vsel %vm212_vm12, %v210_v9, %v211_v12  ;;  %v284_v32 = vrot.slane %v283_v22, 2  ;;  %v257_v18 = vrot.slane %v2237_v21, 1 }
  0x98   :  { %v176_v38 = vrot.slane %v175_v26, 2  ;;  %v184_v39 = vmax.f32 %v182_v20, %v183_v29  ;;  %vm195_vm15 = vcmp.ge.f32.partialorder %v2202_v23, %v2241_v25  ;;  %v214_v33 = vrot.slane %v213_v31, 2 }
  0x99   :  { %v203_v36 = vsel %vm195_vm15, %v2112_v3, 8  ;;  %v230_v40 = vsel %vm137_vm0, %v204_v30, 2147483647  ;;  %vm285_vm1 = vcmp.lt.s32.totalorder %v283_v22, %v284_v32  ;;  %v2259_v45 = vmul.f32 %v92_v62, %v2141_v27 }
  0x9a   :  { %v177_v41 = vmax.f32 %v175_v26, %v176_v38  ;;  %v185_v42 = vrot.slane %v184_v39, 1  ;;  %vm215_vm3 = vcmp.lt.s32.totalorder %v213_v31, %v214_v33  ;;  %v220_v43 = vsel %vm137_vm0, %v203_v36, 2147483647 }
  0x9b   :  { %v216_v48 = vsel %vm215_vm3, %v213_v31, %v214_v33  ;;  %v221_v23 = vrot.slane %v220_v43, 4  ;;  %v231_v49 = vrot.slane %v230_v40, 4  ;;  %v286_v56 = vsel %vm285_vm1, %v283_v22, %v284_v32 }
  0x9c   :  { %v178_v52 = vrot.slane %v177_v41, 1  ;;  %v2261_v53 = vmax.f32 %v184_v39, %v185_v42  ;;  %v217_v55 = vrot.slane %v216_v48, 1  ;;  %v249_v59 = vsel %vm2246_vm14, %v246_v60, %v247_v57 }
  0x9d   :  { %vm222_vm4 = vcmp.lt.s32.totalorder %v220_v43, %v221_v23  ;;  %vm232_vm5 = vcmp.lt.s32.totalorder %v230_v40, %v231_v49  ;;  %v287_v63 = vrot.slane %v286_v56, 1  ;;  %vm2270_vm7 = vcmp.lt.s32.totalorder %v2237_v21, %v257_v18 }
  0x9e   :  { %v2265_v0 = vmax.f32 %v177_v41, %v178_v52  ;;  %vm200_vm6 = vcmp.ge.f32.partialorder %v2222_v54, %v2261_v53  ;;  %v223_v27 = vsel %vm222_vm4, %v220_v43, %v221_v23  ;;  %vm294_vm8 = vcmask 1041409  }
  0x9f   :  { %v208_v62 = vsel %vm200_vm6, %v2112_v3, 8  ;;  %v224_v4 = vrot.slane %v223_v27, 2  ;;  %v233_v7 = vsel %vm232_vm5, %v230_v40, %v231_v49  ;;  %vm290_vm9 = vcmp.le.s32.totalorder %v2154_v35, 1 }
  0xa0   :  { %vm296_vm10 = vcmask 1042434   ;;  %vm199_vm11 = vcmp.ge.f32.partialorder %v2227_v61, %v2265_v0  ;;  %vm2278_vm12 = vcmp.lt.s32.totalorder %v216_v48, %v217_v55  ;;  %v234_v54 = vrot.slane %v233_v7, 2 }
  0xa1   :  { %v270_v8 = vsel %vm137_vm0, %v208_v62, 2147483647  ;;  %vm298_vm13 = vcmask 1043459   ;;  %v207_v9 = vsel %vm199_vm11, %v2112_v3, 8  ;;  %vm225_vm14 = vcmp.lt.s32.totalorder %v223_v27, %v224_v4 }
  0xa2   :  { %v271_v10 = vrot.slane %v270_v8, 4  ;;  %vm2284_vm15 = vcmp.lt.s32.totalorder %v286_v56, %v287_v63  ;;  %v226_v57 = vsel %vm225_vm14, %v223_v27, %v224_v4  ;;  %vm235_vm1 = vcmp.lt.s32.totalorder %v233_v7, %v234_v54 }
  0xa3   :  { %v260_v61 = vsel %vm137_vm0, %v207_v9, 2147483647  ;;  %v291_v16 = vsel %vm290_vm9, 1, %v2076_v1  ;;  %v227_v19 = vrot.slane %v226_v57, 1  ;;  %v236_v20 = vsel %vm235_vm1, %v233_v7, %v234_v54  ;;  %v2055_v9 = vld [vmem:[%s3462_s0 + $0x10] sm:$0xff] }
  0xa4   :  { %v261_v22 = vrot.slane %v260_v61, 4  ;;  %vm272_vm3 = vcmp.lt.s32.totalorder %v270_v8, %v271_v10  ;;  %vm300_vm4 = vcmask 1044484   ;;  %v219_v26 = vsel %vm2278_vm12, %v216_v48, %v217_v55 }
  0xa5   :  { %v237_v29 = vrot.slane %v236_v20, 1  ;;  %v259_v30 = vsel %vm2270_vm7, %v2237_v21, %v257_v18  ;;  %v273_v31 = vsel %vm272_vm3, %v270_v8, %v271_v10  ;;  %vm228_vm5 = vcmp.lt.s32.totalorder %v226_v57, %v227_v19 }
  0xa6   :  { %vm262_vm6 = vcmp.lt.s32.totalorder %v260_v61, %v261_v22  ;;  %v274_v34 = vrot.slane %v273_v31, 2  ;;  %v289_v32 = vsel %vm2284_vm15, %v286_v56, %v287_v63  ;;  %v229_v38 = vsel %vm228_vm5, %v226_v57, %v227_v19 }
  0xa7   :  { %vm238_vm9 = vcmp.lt.s32.totalorder %v236_v20, %v237_v29  ;;  %v263_v39 = vsel %vm262_vm6, %v260_v61, %v261_v22  ;;  %v292_v33 = vperm.slane %v291_v16, 0  ;;  %vm302_vm11 = vcmask 1045509  }
  0xa8   :  { %v239_v36 = vsel %vm238_vm9, %v236_v20, %v237_v29  ;;  %v264_v40 = vrot.slane %v263_v39, 2  ;;  %vm275_vm12 = vcmp.lt.s32.totalorder %v273_v31, %v274_v34  ;;  %v295_v41 = vsel %vm294_vm8, %v229_v38, %v219_v26 }
  0xa9   :  { %vm3470_vm14 = vcmask 1046534   ;;  %v276_v42 = vsel %vm275_vm12, %v273_v31, %v274_v34  ;;  %v297_v21 = vsel %vm296_vm10, %v239_v36, %v295_v41  ;;  %vm3469_vm7 = vcmask 1047559  }
  0xaa   :  { %v318_v18 = vmul.f32 %v2239_v24, %v2241_v25  ;;  %vm265_vm1 = vcmp.lt.s32.totalorder %v263_v39, %v264_v40  ;;  %v277_v43 = vrot.slane %v276_v42, 1  ;;  %v299_v48 = vsel %vm298_vm13, %v249_v59, %v297_v21 }
  0xab   :  { %v319_v23 = vmul.f32 %v2239_v24, %v2235_v14  ;;  %v266_v49 = vsel %vm265_vm1, %v263_v39, %v264_v40  ;;  %vm2304_vm15 = vcmp.eq.s32.totalorder %v292_v33, 1  ;;  %v320_v55 = vmul.f32 %v2239_v24, %v2179_v5 }
  0xac   :  { %v321_v56 = vmul.f32 %v2239_v24, %v2181_v6  ;;  %v267_v63 = vrot.slane %v266_v49, 1  ;;  %vm278_vm3 = vcmp.lt.s32.totalorder %v276_v42, %v277_v43  ;;  %v322_v27 = vmul.f32 %v2239_v24, %v2265_v0 }
  0xad   :  { %v323_v59 = vmul.f32 %v2239_v24, %v2261_v53  ;;  %v279_v51 = vsel %vm278_vm3, %v276_v42, %v277_v43  ;;  %v301_v62 = vsel %vm300_vm4, %v259_v30, %v299_v48  ;;  %v317_v4 = vmul.f32 %v2239_v24, %v2218_v47 }
  0xae   :  { %v333_v7 = vrot.slane %v318_v18, 7  ;;  %vm268_vm5 = vcmp.lt.s32.totalorder %v266_v49, %v267_v63  ;;  %v324_v60 = vmul.f32 %v2239_v24, %v2188_v15  ;;  %v335_v54 = vrot.slane %v319_v23, 6 }
  0xaf   :  { %v337_v8 = vrot.slane %v320_v55, 5  ;;  %v269_v10 = vsel %vm268_vm5, %v266_v49, %v267_v63  ;;  %v339_v57 = vrot.slane %v321_v56, 4  ;;  %v341_v61 = vrot.slane %v322_v27, 3  ;;  %v2343_v63 = vld [vmem:[%s3462_s0 + $0x18] sm:$0xff] }
  0xb0   :  { %v334_v12 = vsel %vm294_vm8, %v333_v7, %v317_v4  ;;  %v303_v16 = vsel %vm302_vm11, %v269_v10, %v301_v62  ;;  %v343_v20 = vrot.slane %v323_v59, 2  ;;  %v352_v22 = vrot.slane %v2055_v9, 1 }
  0xb1   :  { %v336_v19 = vsel %vm296_vm10, %v335_v54, %v334_v12  ;;  %v305_v26 = vsel %vm3470_vm14, %v279_v51, %v303_v16  ;;  %v353_v29 = vrot.slane %v2055_v9, 2  ;;  %v354_v30 = vrot.slane %v2055_v9, 3 }
  0xb2   :  { %v338_v24 = vsel %vm298_vm13, %v337_v8, %v336_v19  ;;  %v307_v31 = vsel %vm3469_vm7, %v289_v32, %v305_v26  ;;  %v345_v38 = vrot.slane %v324_v60, 1  ;;  %v355_v39 = vrot.slane %v2055_v9, 4 }
  0xb3   :  { %v340_v34 = vsel %vm300_vm4, %v339_v57, %v338_v24  ;;  %v308_v33 = vsel %vm2304_vm15, 0, %v307_v31  ;;  %v356_v40 = vrot.slane %v2055_v9, 5  ;;  %v357_v41 = vrot.slane %v2055_v9, 6 }
  0xb4   :  { %v342_v36 = vsel %vm302_vm11, %v341_v61, %v340_v34  ;;  %309 = vst.msk [vmem:[#allocation2] sm:$0xff] %vm137_vm0, %v308_v33  ;;  %v358_v21 = vrot.slane %v2055_v9, 7  ;;  %v359_v18 = vperm.slane %v2055_v9, 0  ;;  %v360_v43 = vperm.slane %v352_v22, 0 }
  0xb5   :  { %v344_v42 = vsel %vm3470_vm14, %v343_v20, %v342_v36  ;;  %v361_v48 = vperm.slane %v353_v29, 0  ;;  %v362_v23 = vperm.slane %v354_v30, 0  ;;  %v363_v52 = vperm.slane %v355_v39, 0 }
  0xb6   :  { %v346_v32 = vsel %vm3469_vm7, %v345_v38, %v344_v42  ;;  %v364_v55 = vperm.slane %v356_v40, 0  ;;  %v365_v56 = vperm.slane %v357_v41, 0  ;;  %v366_v27 = vperm.slane %v358_v21, 0 }
  0xb7   :  { %v2338_v49 = vadd.f32 %v346_v32, %v2259_v45  ;;  %v375_v59 = vadd.f32 %v359_v18, %v2160_v44  ;;  %v376_v51 = vadd.f32 %v360_v43, %v2186_v11  ;;  %v391_v62 = vsel %vm294_vm8, %v2241_v25, %v2218_v47 }
  0xb8   :  { %v377_v45 = vadd.f32 %v361_v48, %v2177_v2  ;;  %v378_v4 = vadd.f32 %v362_v23, %v2121_v13  ;;  %v392_v7 = vsel %vm296_vm10, %v2235_v14, %v391_v62  ;;  %v614_v60 = vrot.slane %v2343_v63, 1 }
  0xb9   :  { %v393_v54 = vsel %vm298_vm13, %v2179_v5, %v392_v7  ;;  %v615_v8 = vrot.slane %v2343_v63, 2  ;;  %v616_v9 = vrot.slane %v2343_v63, 3  ;;  %v617_v10 = vrot.slane %v2343_v63, 4 }
  0xba   :  { %v379_v47 = vadd.f32 %v363_v52, %v2130_v17  ;;  %v380_v25 = vadd.f32 %v364_v55, %v2216_v46  ;;  %v381_v12 = vadd.f32 %v365_v56, %v2213_v37  ;;  %v394_v14 = vsel %vm300_vm4, %v2181_v6, %v393_v54 }
  0xbb   :  { %v382_v57 = vadd.f32 %v366_v27, %v2143_v28  ;;  %v395_v5 = vsel %vm302_vm11, %v2265_v0, %v394_v14  ;;  %v618_v61 = vrot.slane %v2343_v63, 5  ;;  %v619_v16 = vrot.slane %v2343_v63, 6 }
  0xbc   :  { %v396_v19 = vsel %vm3470_vm14, %v2261_v53, %v395_v5  ;;  %v2374_v26 = vperm.slane %v614_v60, 0  ;;  %v2378_v24 = vperm.slane %v615_v8, 0  ;;  %v2380_v29 = vperm.slane %v616_v9, 0 }
  0xbd   :  { %v397_v6 = vsel %vm3469_vm7, %v2188_v15, %v396_v19  ;;  %v2382_v0 = vperm.slane %v617_v10, 0  ;;  %vm559_vm7 = vcmp.le.s32.totalorder %v2154_v35, 2 }
  0xbe   :  { %v2384_v30 = vadd.f32 %v397_v6, %v375_v59  ;;  %v2386_v31 = vadd.f32 %v397_v6, %v376_v51  ;;  %v2388_v53 = vadd.f32 %v397_v6, %v377_v45  ;;  %v2390_v34 = vadd.f32 %v397_v6, %v378_v4 }
  0xbf   :  { %v2392_v38 = vadd.f32 %v397_v6, %v379_v47  ;;  %v2394_v39 = vadd.f32 %v397_v6, %v380_v25  ;;  %v2396_v33 = vadd.f32 %v397_v6, %v381_v12  ;;  %v2398_v15 = vadd.f32 %v397_v6, %v382_v57 }
  0xc0   :  { %v407_v36 = vsel %vm137_vm0, %v2384_v30, -inf  ;;  %v414_v40 = vsel %vm137_vm0, %v2386_v31, -inf  ;;  %v421_v41 = vsel %vm137_vm0, %v2388_v53, -inf  ;;  %v428_v42 = vsel %vm137_vm0, %v2390_v34, -inf }
  0xc1   :  { %v408_v21 = vrot.slane %v407_v36, 4  ;;  %v415_v18 = vrot.slane %v414_v40, 4  ;;  %v422_v43 = vrot.slane %v421_v41, 4  ;;  %v429_v32 = vrot.slane %v428_v42, 4 }
  0xc2   :  { %v435_v48 = vsel %vm137_vm0, %v2392_v38, -inf  ;;  %v442_v23 = vsel %vm137_vm0, %v2394_v39, -inf  ;;  %v449_v52 = vsel %vm137_vm0, %v2396_v33, -inf  ;;  %v456_v55 = vsel %vm137_vm0, %v2398_v15, -inf }
  0xc3   :  { %v409_v56 = vmax.f32 %v407_v36, %v408_v21  ;;  %v416_v27 = vmax.f32 %v414_v40, %v415_v18  ;;  %v423_v59 = vmax.f32 %v421_v41, %v422_v43  ;;  %v430_v51 = vmax.f32 %v428_v42, %v429_v32 }
  0xc4   :  { %v436_v62 = vrot.slane %v435_v48, 4  ;;  %v443_v45 = vrot.slane %v442_v23, 4  ;;  %v450_v4 = vrot.slane %v449_v52, 4  ;;  %v457_v7 = vrot.slane %v456_v55, 4 }
  0xc5   :  { %v410_v60 = vrot.slane %v409_v56, 2  ;;  %v417_v54 = vrot.slane %v416_v27, 2  ;;  %v424_v8 = vrot.slane %v423_v59, 2  ;;  %v431_v9 = vrot.slane %v430_v51, 2 }
  0xc6   :  { %v437_v10 = vmax.f32 %v435_v48, %v436_v62  ;;  %v444_v47 = vmax.f32 %v442_v23, %v443_v45  ;;  %v451_v25 = vmax.f32 %v449_v52, %v450_v4  ;;  %v458_v12 = vmax.f32 %v456_v55, %v457_v7 }
  0xc7   :  { %v411_v14 = vmax.f32 %v409_v56, %v410_v60  ;;  %v418_v57 = vmax.f32 %v416_v27, %v417_v54  ;;  %v425_v5 = vmax.f32 %v423_v59, %v424_v8  ;;  %v432_v19 = vmax.f32 %v430_v51, %v431_v9 }
  0xc8   :  { %v438_v6 = vrot.slane %v437_v10, 2  ;;  %v445_v36 = vrot.slane %v444_v47, 2  ;;  %v452_v40 = vrot.slane %v451_v25, 2  ;;  %v459_v41 = vrot.slane %v458_v12, 2 }
  0xc9   :  { %v412_v42 = vrot.slane %v411_v14, 1  ;;  %v419_v21 = vrot.slane %v418_v57, 1  ;;  %v426_v18 = vrot.slane %v425_v5, 1  ;;  %v433_v43 = vrot.slane %v432_v19, 1 }
  0xca   :  { %v439_v32 = vmax.f32 %v437_v10, %v438_v6  ;;  %v446_v22 = vmax.f32 %v444_v47, %v445_v36  ;;  %v453_v20 = vmax.f32 %v451_v25, %v452_v40  ;;  %v460_v50 = vmax.f32 %v458_v12, %v459_v41 }
  0xcb   :  { %v2416_v48 = vmax.f32 %v411_v14, %v412_v42  ;;  %v2418_v23 = vmax.f32 %v418_v57, %v419_v21  ;;  %v2420_v52 = vmax.f32 %v425_v5, %v426_v18  ;;  %v2422_v55 = vmax.f32 %v432_v19, %v433_v43 }
  0xcc   :  { %v440_v56 = vrot.slane %v439_v32, 1  ;;  %v447_v27 = vrot.slane %v446_v22, 1  ;;  %v454_v59 = vrot.slane %v453_v20, 1  ;;  %v461_v51 = vrot.slane %v460_v50, 1 }
  0xcd   :  { %vm463_vm6 = vcmp.ge.f32.partialorder %v2384_v30, %v2416_v48  ;;  %vm464_vm9 = vcmp.ge.f32.partialorder %v2386_v31, %v2418_v23  ;;  %vm465_vm12 = vcmp.ge.f32.partialorder %v2388_v53, %v2420_v52  ;;  %vm466_vm1 = vcmp.ge.f32.partialorder %v2390_v34, %v2422_v55 }
  0xce   :  { %v2432_v62 = vmax.f32 %v439_v32, %v440_v56  ;;  %v2434_v45 = vmax.f32 %v446_v22, %v447_v27  ;;  %v2436_v4 = vmax.f32 %v453_v20, %v454_v59  ;;  %v2438_v7 = vmax.f32 %v460_v50, %v461_v51 }
  0xcf   :  { %v471_v60 = vsel %vm463_vm6, %v2112_v3, 8  ;;  %v472_v30 = vsel %vm464_vm9, %v2112_v3, 8  ;;  %v473_v31 = vsel %vm465_vm12, %v2112_v3, 8  ;;  %v2445_v53 = vperm.slane %v618_v61, 0 }
  0xd0   :  { %vm467_vm15 = vcmp.ge.f32.partialorder %v2392_v38, %v2432_v62  ;;  %vm468_vm3 = vcmp.ge.f32.partialorder %v2394_v39, %v2434_v45  ;;  %vm469_vm5 = vcmp.ge.f32.partialorder %v2396_v33, %v2436_v4  ;;  %v474_v50 = vsel %vm466_vm1, %v2112_v3, 8 }
  0xd1   :  { %vm470_vm6 = vcmp.ge.f32.partialorder %v2398_v15, %v2438_v7  ;;  %v475_v20 = vsel %vm467_vm15, %v2112_v3, 8  ;;  %v476_v22 = vsel %vm468_vm3, %v2112_v3, 8  ;;  %v477_v61 = vsel %vm469_vm5, %v2112_v3, 8 }
  0xd2   :  { %v479_v34 = vsel %vm137_vm0, %v471_v60, 2147483647  ;;  %v489_v38 = vsel %vm137_vm0, %v472_v30, 2147483647  ;;  %v499_v39 = vsel %vm137_vm0, %v473_v31, 2147483647 }
  0xd3   :  { %v480_v54 = vrot.slane %v479_v34, 4  ;;  %v490_v8 = vrot.slane %v489_v38, 4  ;;  %v500_v33 = vrot.slane %v499_v39, 4  ;;  %v509_v9 = vsel %vm137_vm0, %v474_v50, 2147483647 }
  0xd4   :  { %v478_v10 = vsel %vm470_vm6, %v2112_v3, 8  ;;  %v510_v15 = vrot.slane %v509_v9, 4  ;;  %v519_v47 = vsel %vm137_vm0, %v475_v20, 2147483647  ;;  %v529_v25 = vsel %vm137_vm0, %v476_v22, 2147483647 }
  0xd5   :  { %vm481_vm9 = vcmp.lt.s32.totalorder %v479_v34, %v480_v54  ;;  %vm491_vm12 = vcmp.lt.s32.totalorder %v489_v38, %v490_v8  ;;  %vm501_vm1 = vcmp.lt.s32.totalorder %v499_v39, %v500_v33  ;;  %v520_v12 = vrot.slane %v519_v47, 4 }
  0xd6   :  { %v482_v14 = vsel %vm481_vm9, %v479_v34, %v480_v54  ;;  %v492_v57 = vsel %vm491_vm12, %v489_v38, %v490_v8  ;;  %v502_v5 = vsel %vm501_vm1, %v499_v39, %v500_v33  ;;  %vm511_vm15 = vcmp.lt.s32.totalorder %v509_v9, %v510_v15 }
  0xd7   :  { %v483_v19 = vrot.slane %v482_v14, 2  ;;  %v493_v6 = vrot.slane %v492_v57, 2  ;;  %v503_v36 = vrot.slane %v502_v5, 2  ;;  %v512_v40 = vsel %vm511_vm15, %v509_v9, %v510_v15 }
  0xd8   :  { %v513_v41 = vrot.slane %v512_v40, 2  ;;  %vm521_vm3 = vcmp.lt.s32.totalorder %v519_v47, %v520_v12  ;;  %v530_v42 = vrot.slane %v529_v25, 4  ;;  %v539_v21 = vsel %vm137_vm0, %v477_v61, 2147483647 }
  0xd9   :  { %vm484_vm5 = vcmp.lt.s32.totalorder %v482_v14, %v483_v19  ;;  %vm494_vm6 = vcmp.lt.s32.totalorder %v492_v57, %v493_v6  ;;  %vm504_vm2 = vcmp.lt.s32.totalorder %v502_v5, %v503_v36  ;;  %v522_v18 = vsel %vm521_vm3, %v519_v47, %v520_v12 }
  0xda   :  { %v485_v43 = vsel %vm484_vm5, %v482_v14, %v483_v19  ;;  %v495_v32 = vsel %vm494_vm6, %v492_v57, %v493_v6  ;;  %v505_v56 = vsel %vm504_vm2, %v502_v5, %v503_v36  ;;  %vm514_vm9 = vcmp.lt.s32.totalorder %v512_v40, %v513_v41 }
  0xdb   :  { %v486_v27 = vrot.slane %v485_v43, 1  ;;  %v496_v59 = vrot.slane %v495_v32, 1  ;;  %v506_v51 = vrot.slane %v505_v56, 1  ;;  %v515_v60 = vsel %vm514_vm9, %v512_v40, %v513_v41 }
  0xdc   :  { %v516_v30 = vrot.slane %v515_v60, 1  ;;  %v523_v31 = vrot.slane %v522_v18, 2  ;;  %vm531_vm12 = vcmp.lt.s32.totalorder %v529_v25, %v530_v42  ;;  %v540_v50 = vrot.slane %v539_v21, 4 }
  0xdd   :  { %vm487_vm1 = vcmp.lt.s32.totalorder %v485_v43, %v486_v27  ;;  %vm497_vm15 = vcmp.lt.s32.totalorder %v495_v32, %v496_v59  ;;  %v532_v20 = vsel %vm531_vm12, %v529_v25, %v530_v42  ;;  %vm507_vm3 = vcmp.lt.s32.totalorder %v505_v56, %v506_v51 }
  0xde   :  { %v488_v22 = vsel %vm487_vm1, %v485_v43, %v486_v27  ;;  %v498_v61 = vsel %vm497_vm15, %v495_v32, %v496_v59  ;;  %v2470_v34 = vperm.slane %v619_v16, 0  ;;  %vm2472_vm2 = vcmp.lt.s32.totalorder %v515_v60, %v516_v30 }
  0xdf   :  { %vm524_vm5 = vcmp.lt.s32.totalorder %v522_v18, %v523_v31  ;;  %v533_v39 = vrot.slane %v532_v20, 2  ;;  %vm541_vm6 = vcmp.lt.s32.totalorder %v539_v21, %v540_v50  ;;  %v549_v33 = vsel %vm137_vm0, %v478_v10, 2147483647 }
  0xe0   :  { %v525_v54 = vsel %vm524_vm5, %v522_v18, %v523_v31  ;;  %v542_v8 = vsel %vm541_vm6, %v539_v21, %v540_v50  ;;  %v560_v35 = vsel %vm559_vm7, 1, %v2076_v1  ;;  %v550_v47 = vrot.slane %v549_v33, 4 }
  0xe1   :  { %v526_v9 = vrot.slane %v525_v54, 1  ;;  %vm534_vm9 = vcmp.lt.s32.totalorder %v532_v20, %v533_v39  ;;  %v543_v15 = vrot.slane %v542_v8, 2  ;;  %v508_v25 = vsel %vm507_vm3, %v505_v56, %v506_v51 }
  0xe2   :  { %v535_v16 = vsel %vm534_vm9, %v532_v20, %v533_v39  ;;  %v563_v12 = vsel %vm294_vm8, %v498_v61, %v488_v22  ;;  %vm3471_vm12 = vcmp.eq.s32.totalorder %v2172_v58, 2  ;;  %vm551_vm14 = vcmp.lt.s32.totalorder %v549_v33, %v550_v47 }
  0xe3   :  { %vm527_vm1 = vcmp.lt.s32.totalorder %v525_v54, %v526_v9  ;;  %v536_v14 = vrot.slane %v535_v16, 1  ;;  %vm544_vm15 = vcmp.lt.s32.totalorder %v542_v8, %v543_v15  ;;  %v518_v57 = vsel %vm2472_vm2, %v515_v60, %v516_v30 }
  0xe4   :  { %v545_v10 = vsel %vm544_vm15, %v542_v8, %v543_v15  ;;  %v552_v5 = vsel %vm551_vm14, %v549_v33, %v550_v47  ;;  %v561_v19 = vperm.slane %v560_v35, 0  ;;  %v564_v40 = vsel %vm296_vm10, %v508_v25, %v563_v12 }
  0xe5   :  { %vm537_vm7 = vcmp.lt.s32.totalorder %v535_v16, %v536_v14  ;;  %v546_v6 = vrot.slane %v545_v10, 1  ;;  %v553_v36 = vrot.slane %v552_v5, 2  ;;  %v528_v41 = vsel %vm527_vm1, %v525_v54, %v526_v9 }
  0xe6   :  { %v538_v42 = vsel %vm537_vm7, %v535_v16, %v536_v14  ;;  %v565_v21 = vsel %vm298_vm13, %v518_v57, %v564_v40  ;;  %v3488_v18 = vmov 0.0   ;;  %v3489_v51 = vrot.slane %v2343_v63, 7 }
  0xe7   :  { %v2056_v43 = vsel %vm3471_vm12, 1.0, %v3488_v18  ;;  %vm547_vm3 = vcmp.lt.s32.totalorder %v545_v10, %v546_v6  ;;  %vm554_vm5 = vcmp.lt.s32.totalorder %v552_v5, %v553_v36  ;;  %v566_v32 = vsel %vm300_vm4, %v528_v41, %v565_v21 }
  0xe8   :  { %v577_v56 = vperm.slane %v2056_v43, 0  ;;  %v555_v27 = vsel %vm554_vm5, %v552_v5, %v553_v36  ;;  %v567_v59 = vsel %vm302_vm11, %v538_v42, %v566_v32  ;;  %v628_v60 = vperm.slane %v3489_v51, 0 }
  0xe9   :  { %v3490_v30 = vperm.slane %v2343_v63, 0  ;;  %v548_v50 = vsel %vm547_vm3, %v545_v10, %v546_v6  ;;  %v556_v20 = vrot.slane %v555_v27, 1  ;;  %vm2494_vm14 = vcmp.eq.s32.totalorder %v561_v19, 1 }
  0xea   :  { %v580_v61 = vmul.f32 %v577_v56, %v2418_v23  ;;  %vm3493_vm2 = vcmask 1046534   ;;  %v581_v39 = vmul.f32 %v577_v56, %v2420_v52  ;;  %v582_v54 = vmul.f32 %v577_v56, %v2422_v55 }
  0xeb   :  { %v637_v31 = vadd.f32 %v3490_v30, %v2160_v44  ;;  %v568_v38 = vsel %vm3493_vm2, %v548_v50, %v567_v59  ;;  %v583_v8 = vmul.f32 %v577_v56, %v2432_v62  ;;  %vm557_vm6 = vcmp.lt.s32.totalorder %v555_v27, %v556_v20  ;;  %vm3495_vm1 = vmmov %vm3493_vm2 }
  0xec   :  { %v579_v63 = vmul.f32 %v577_v56, %v2416_v48  ;;  %v584_v33 = vmul.f32 %v577_v56, %v2434_v45  ;;  %v595_v35 = vrot.slane %v580_v61, 7  ;;  %v558_v9 = vsel %vm557_vm6, %v555_v27, %v556_v20  ;;  %vm3497_vm7 = vmmov %vm3495_vm1 }
  0xed   :  { %v585_v15 = vmul.f32 %v577_v56, %v2436_v4  ;;  %v597_v47 = vrot.slane %v581_v39, 6  ;;  %v638_v25 = vadd.f32 %v2374_v26, %v2186_v11  ;;  %vm3494_vm9 = vcmask 1047559  }
  0xee   :  { %v569_v16 = vsel %vm3494_vm9, %v558_v9, %v568_v38  ;;  %v586_v12 = vmul.f32 %v577_v56, %v2438_v7  ;;  %v596_v14 = vsel %vm294_vm8, %v595_v35, %v579_v63  ;;  %v599_v57 = vrot.slane %v582_v54, 5  ;;  %vm3496_vm15 = vmmov %vm3494_vm9 }
  0xef   :  { %v570_v10 = vsel %vm2494_vm14, 0, %v569_v16  ;;  %v598_v5 = vsel %vm296_vm10, %v597_v47, %v596_v14  ;;  %v601_v19 = vrot.slane %v583_v8, 4  ;;  %v639_v6 = vadd.f32 %v2378_v24, %v2177_v2  ;;  %vm3498_vm3 = vmmov %vm3494_vm9 }
  0xf0   :  { %572 = vst.msk [vmem:[#allocation2 + $0x8] sm:$0xff] %vm137_vm0, %v570_v10  ;;  %v600_v26 = vsel %vm298_vm13, %v599_v57, %v598_v5  ;;  %v603_v36 = vrot.slane %v584_v33, 3  ;;  %v640_v40 = vadd.f32 %v2380_v29, %v2121_v13  ;;  %v653_v41 = vsel %vm294_vm8, %v2418_v23, %v2416_v48  ;;  %v2536_v48 = vld [vmem:[%s3462_s0 + $0x20] sm:$0xff] }
  0xf1   :  { %v602_v42 = vsel %vm300_vm4, %v601_v19, %v600_v26  ;;  %v605_v21 = vrot.slane %v585_v15, 2  ;;  %v641_v43 = vadd.f32 %v2382_v0, %v2130_v17  ;;  %v654_v24 = vsel %vm296_vm10, %v2420_v52, %v653_v41 }
  0xf2   :  { %v604_v32 = vsel %vm302_vm11, %v603_v36, %v602_v42  ;;  %v607_v56 = vrot.slane %v586_v12, 1  ;;  %v642_v27 = vadd.f32 %v2445_v53, %v2216_v46  ;;  %v655_v29 = vsel %vm298_vm13, %v2422_v55, %v654_v24 }
  0xf3   :  { %v606_v23 = vsel %vm3495_vm1, %v605_v21, %v604_v32  ;;  %v643_v0 = vadd.f32 %v2470_v34, %v2213_v37  ;;  %v644_v52 = vadd.f32 %v628_v60, %v2143_v28  ;;  %v656_v59 = vsel %vm300_vm4, %v2432_v62, %v655_v29 }
  0xf4   :  { %v608_v53 = vsel %vm3496_vm15, %v607_v56, %v606_v23  ;;  %v657_v55 = vsel %vm302_vm11, %v2434_v45, %v656_v59  ;;  %v876_v51 = vrot.slane %v2536_v48, 1  ;;  %v877_v30 = vrot.slane %v2536_v48, 2 }
  0xf5   :  { %v2550_v50 = vadd.f32 %v608_v53, %v2338_v49  ;;  %v658_v34 = vsel %vm3497_vm7, %v2436_v4, %v657_v55  ;;  %v878_v60 = vrot.slane %v2536_v48, 3  ;;  %v879_v20 = vrot.slane %v2536_v48, 4 }
  0xf6   :  { %v659_v62 = vsel %vm3498_vm3, %v2438_v7, %v658_v34  ;;  %v880_v22 = vrot.slane %v2536_v48, 5  ;;  %v881_v45 = vrot.slane %v2536_v48, 6 }
  0xf7   :  { %v2561_v38 = vadd.f32 %v659_v62, %v637_v31  ;;  %v2563_v49 = vadd.f32 %v659_v62, %v638_v25  ;;  %v2565_v39 = vadd.f32 %v659_v62, %v639_v6  ;;  %v2567_v4 = vadd.f32 %v659_v62, %v640_v40 }
  0xf8   :  { %v2569_v54 = vadd.f32 %v659_v62, %v641_v43  ;;  %v2571_v8 = vadd.f32 %v659_v62, %v642_v27  ;;  %v2573_v63 = vadd.f32 %v659_v62, %v643_v0  ;;  %v2575_v7 = vadd.f32 %v659_v62, %v644_v52 }
  0xf9   :  { %v669_v33 = vsel %vm137_vm0, %v2561_v38, -inf  ;;  %v676_v31 = vsel %vm137_vm0, %v2563_v49, -inf  ;;  %v683_v35 = vsel %vm137_vm0, %v2565_v39, -inf  ;;  %v690_v9 = vsel %vm137_vm0, %v2567_v4, -inf }
  0xfa   :  { %v670_v15 = vrot.slane %v669_v33, 4  ;;  %v677_v47 = vrot.slane %v676_v31, 4  ;;  %v684_v25 = vrot.slane %v683_v35, 4  ;;  %v691_v16 = vrot.slane %v690_v9, 4 }
  0xfb   :  { %v697_v12 = vsel %vm137_vm0, %v2569_v54, -inf  ;;  %v704_v14 = vsel %vm137_vm0, %v2571_v8, -inf  ;;  %v711_v57 = vsel %vm137_vm0, %v2573_v63, -inf  ;;  %v718_v10 = vsel %vm137_vm0, %v2575_v7, -inf }
  0xfc   :  { %v671_v5 = vmax.f32 %v669_v33, %v670_v15  ;;  %v678_v19 = vmax.f32 %v676_v31, %v677_v47  ;;  %v685_v6 = vmax.f32 %v683_v35, %v684_v25  ;;  %v692_v26 = vmax.f32 %v690_v9, %v691_v16 }
  0xfd   :  { %v698_v36 = vrot.slane %v697_v12, 4  ;;  %v705_v40 = vrot.slane %v704_v14, 4  ;;  %v712_v41 = vrot.slane %v711_v57, 4  ;;  %v719_v42 = vrot.slane %v718_v10, 4 }
  0xfe   :  { %v672_v21 = vrot.slane %v671_v5, 2  ;;  %v679_v43 = vrot.slane %v678_v19, 2  ;;  %v686_v24 = vrot.slane %v685_v6, 2  ;;  %v693_v32 = vrot.slane %v692_v26, 2 }
  0xff   :  { %v699_v56 = vmax.f32 %v697_v12, %v698_v36  ;;  %v706_v27 = vmax.f32 %v704_v14, %v705_v40  ;;  %v713_v29 = vmax.f32 %v711_v57, %v712_v41  ;;  %v720_v23 = vmax.f32 %v718_v10, %v719_v42 }
 0x100   :  { %v673_v0 = vmax.f32 %v671_v5, %v672_v21  ;;  %v680_v52 = vmax.f32 %v678_v19, %v679_v43  ;;  %v687_v59 = vmax.f32 %v685_v6, %v686_v24  ;;  %v694_v53 = vmax.f32 %v692_v26, %v693_v32 }
 0x101   :  { %v700_v55 = vrot.slane %v699_v56, 2  ;;  %v707_v34 = vrot.slane %v706_v27, 2  ;;  %v714_v62 = vrot.slane %v713_v29, 2  ;;  %v721_v33 = vrot.slane %v720_v23, 2 }
 0x102   :  { %v674_v31 = vrot.slane %v673_v0, 1  ;;  %v681_v35 = vrot.slane %v680_v52, 1  ;;  %v688_v9 = vrot.slane %v687_v59, 1  ;;  %v695_v15 = vrot.slane %v694_v53, 1 }
 0x103   :  { %v701_v47 = vmax.f32 %v699_v56, %v700_v55  ;;  %v708_v25 = vmax.f32 %v706_v27, %v707_v34  ;;  %v715_v16 = vmax.f32 %v713_v29, %v714_v62  ;;  %v722_v61 = vmax.f32 %v720_v23, %v721_v33 }
 0x104   :  { %v2593_v12 = vmax.f32 %v673_v0, %v674_v31  ;;  %v2595_v14 = vmax.f32 %v680_v52, %v681_v35  ;;  %v2597_v57 = vmax.f32 %v687_v59, %v688_v9  ;;  %v2599_v10 = vmax.f32 %v694_v53, %v695_v15 }
 0x105   :  { %v702_v5 = vrot.slane %v701_v47, 1  ;;  %v709_v19 = vrot.slane %v708_v25, 1  ;;  %v716_v6 = vrot.slane %v715_v16, 1  ;;  %v723_v26 = vrot.slane %v722_v61, 1 }
 0x106   :  { %vm725_vm5 = vcmp.ge.f32.partialorder %v2561_v38, %v2593_v12  ;;  %vm726_vm14 = vcmp.ge.f32.partialorder %v2563_v49, %v2595_v14  ;;  %vm727_vm2 = vcmp.ge.f32.partialorder %v2565_v39, %v2597_v57  ;;  %vm728_vm6 = vcmp.ge.f32.partialorder %v2567_v4, %v2599_v10 }
 0x107   :  { %v2609_v36 = vmax.f32 %v701_v47, %v702_v5  ;;  %v2611_v40 = vmax.f32 %v708_v25, %v709_v19  ;;  %v2613_v41 = vmax.f32 %v715_v16, %v716_v6  ;;  %v2615_v42 = vmax.f32 %v722_v61, %v723_v26 }
 0x108   :  { %v733_v21 = vsel %vm725_vm5, %v2112_v3, 8  ;;  %v734_v38 = vsel %vm726_vm14, %v2112_v3, 8  ;;  %v735_v49 = vsel %vm727_vm2, %v2112_v3, 8  ;;  %v883_v43 = vperm.slane %v2536_v48, 0 }
 0x109   :  { %vm729_vm9 = vcmp.ge.f32.partialorder %v2569_v54, %v2609_v36  ;;  %vm730_vm1 = vcmp.ge.f32.partialorder %v2571_v8, %v2611_v40  ;;  %vm731_vm15 = vcmp.ge.f32.partialorder %v2573_v63, %v2613_v41  ;;  %v736_v61 = vsel %vm728_vm6, %v2112_v3, 8 }
 0x10a   :  { %vm732_vm7 = vcmp.ge.f32.partialorder %v2575_v7, %v2615_v42  ;;  %v737_v39 = vsel %vm729_vm9, %v2112_v3, 8  ;;  %v738_v4 = vsel %vm730_vm1, %v2112_v3, 8  ;;  %v739_v24 = vsel %vm731_vm15, %v2112_v3, 8 }
 0x10b   :  { %v741_v32 = vsel %vm137_vm0, %v733_v21, 2147483647  ;;  %v751_v54 = vsel %vm137_vm0, %v734_v38, 2147483647  ;;  %v761_v8 = vsel %vm137_vm0, %v735_v49, 2147483647 }
 0x10c   :  { %v742_v56 = vrot.slane %v741_v32, 4  ;;  %v752_v27 = vrot.slane %v751_v54, 4  ;;  %v762_v63 = vrot.slane %v761_v8, 4  ;;  %v771_v29 = vsel %vm137_vm0, %v736_v61, 2147483647 }
 0x10d   :  { %v740_v23 = vsel %vm732_vm7, %v2112_v3, 8  ;;  %v772_v7 = vrot.slane %v771_v29, 4  ;;  %v781_v0 = vsel %vm137_vm0, %v737_v39, 2147483647  ;;  %v791_v52 = vsel %vm137_vm0, %v738_v4, 2147483647 }
 0x10e   :  { %vm743_vm3 = vcmp.lt.s32.totalorder %v741_v32, %v742_v56  ;;  %vm753_vm5 = vcmp.lt.s32.totalorder %v751_v54, %v752_v27  ;;  %vm763_vm14 = vcmp.lt.s32.totalorder %v761_v8, %v762_v63  ;;  %v782_v59 = vrot.slane %v781_v0, 4 }
 0x10f   :  { %v744_v53 = vsel %vm743_vm3, %v741_v32, %v742_v56  ;;  %v754_v55 = vsel %vm753_vm5, %v751_v54, %v752_v27  ;;  %v764_v34 = vsel %vm763_vm14, %v761_v8, %v762_v63  ;;  %vm773_vm2 = vcmp.lt.s32.totalorder %v771_v29, %v772_v7 }
 0x110   :  { %v745_v62 = vrot.slane %v744_v53, 2  ;;  %v755_v33 = vrot.slane %v754_v55, 2  ;;  %v765_v31 = vrot.slane %v764_v34, 2  ;;  %v774_v35 = vsel %vm773_vm2, %v771_v29, %v772_v7 }
 0x111   :  { %v775_v9 = vrot.slane %v774_v35, 2  ;;  %vm783_vm6 = vcmp.lt.s32.totalorder %v781_v0, %v782_v59  ;;  %v792_v15 = vrot.slane %v791_v52, 4  ;;  %v801_v47 = vsel %vm137_vm0, %v739_v24, 2147483647  ;;  %v2644_v24 = vld [vmem:[%s3464_s1] sm:$0x1] }
 0x112   :  { %vm746_vm9 = vcmp.lt.s32.totalorder %v744_v53, %v745_v62  ;;  %vm756_vm1 = vcmp.lt.s32.totalorder %v754_v55, %v755_v33  ;;  %vm766_vm15 = vcmp.lt.s32.totalorder %v764_v34, %v765_v31  ;;  %v784_v25 = vsel %vm783_vm6, %v781_v0, %v782_v59 }
 0x113   :  { %v747_v16 = vsel %vm746_vm9, %v744_v53, %v745_v62  ;;  %v757_v5 = vsel %vm756_vm1, %v754_v55, %v755_v33  ;;  %v767_v19 = vsel %vm766_vm15, %v764_v34, %v765_v31  ;;  %vm776_vm7 = vcmp.lt.s32.totalorder %v774_v35, %v775_v9 }
 0x114   :  { %v748_v6 = vrot.slane %v747_v16, 1  ;;  %v758_v26 = vrot.slane %v757_v5, 1  ;;  %v768_v21 = vrot.slane %v767_v19, 1  ;;  %v777_v38 = vsel %vm776_vm7, %v774_v35, %v775_v9 }
 0x115   :  { %v778_v49 = vrot.slane %v777_v38, 1  ;;  %v785_v61 = vrot.slane %v784_v25, 2  ;;  %vm793_vm3 = vcmp.lt.s32.totalorder %v791_v52, %v792_v15  ;;  %v802_v39 = vrot.slane %v801_v47, 4 }
 0x116   :  { %vm749_vm5 = vcmp.lt.s32.totalorder %v747_v16, %v748_v6  ;;  %vm759_vm14 = vcmp.lt.s32.totalorder %v757_v5, %v758_v26  ;;  %v794_v4 = vsel %vm793_vm3, %v791_v52, %v792_v15  ;;  %vm821_vm2 = vcmp.le.s32.totalorder %v2644_v24, 3 }
 0x117   :  { %v750_v32 = vsel %vm749_vm5, %v747_v16, %v748_v6  ;;  %v760_v54 = vsel %vm759_vm14, %v757_v5, %v758_v26  ;;  %vm769_vm6 = vcmp.lt.s32.totalorder %v767_v19, %v768_v21  ;;  %v2649_v8 = vperm.slane %v876_v51, 0 }
 0x118   :  { %vm2651_vm9 = vcmp.lt.s32.totalorder %v777_v38, %v778_v49  ;;  %vm786_vm1 = vcmp.lt.s32.totalorder %v784_v25, %v785_v61  ;;  %v795_v27 = vrot.slane %v794_v4, 2  ;;  %vm803_vm15 = vcmp.lt.s32.totalorder %v801_v47, %v802_v39 }
 0x119   :  { %v787_v63 = vsel %vm786_vm1, %v784_v25, %v785_v61  ;;  %v804_v29 = vsel %vm803_vm15, %v801_v47, %v802_v39  ;;  %v811_v7 = vsel %vm137_vm0, %v740_v23, 2147483647  ;;  %v822_v0 = vsel %vm821_vm2, 1, %v2076_v1 }
 0x11a   :  { %v788_v52 = vrot.slane %v787_v63, 1  ;;  %vm796_vm7 = vcmp.lt.s32.totalorder %v794_v4, %v795_v27  ;;  %v805_v59 = vrot.slane %v804_v29, 2  ;;  %v812_v53 = vrot.slane %v811_v7, 4 }
 0x11b   :  { %v770_v55 = vsel %vm769_vm6, %v767_v19, %v768_v21  ;;  %v797_v51 = vsel %vm796_vm7, %v794_v4, %v795_v27  ;;  %v825_v34 = vsel %vm294_vm8, %v760_v54, %v750_v32  ;;  %vm3472_vm3 = vcmp.eq.s32.totalorder %v2172_v58, 3 }
 0x11c   :  { %vm789_vm5 = vcmp.lt.s32.totalorder %v787_v63, %v788_v52  ;;  %v798_v62 = vrot.slane %v797_v51, 1  ;;  %vm806_vm14 = vcmp.lt.s32.totalorder %v804_v29, %v805_v59  ;;  %vm813_vm12 = vcmp.lt.s32.totalorder %v811_v7, %v812_v53 }
 0x11d   :  { %v780_v33 = vsel %vm2651_vm9, %v777_v38, %v778_v49  ;;  %v807_v23 = vsel %vm806_vm14, %v804_v29, %v805_v59  ;;  %v814_v31 = vsel %vm813_vm12, %v811_v7, %v812_v53  ;;  %v823_v35 = vperm.slane %v822_v0, 0 }
 0x11e   :  { %vm799_vm2 = vcmp.lt.s32.totalorder %v797_v51, %v798_v62  ;;  %v808_v9 = vrot.slane %v807_v23, 1  ;;  %v815_v15 = vrot.slane %v814_v31, 2  ;;  %v826_v47 = vsel %vm296_vm10, %v770_v55, %v825_v34 }
 0x11f   :  { %v790_v25 = vsel %vm789_vm5, %v787_v63, %v788_v52  ;;  %v800_v16 = vsel %vm799_vm2, %v797_v51, %v798_v62  ;;  %v827_v5 = vsel %vm298_vm13, %v780_v33, %v826_v47  ;;  %v2058_v19 = vsel %vm3472_vm3, 1.0, %v3488_v18 }
 0x120   :  { %vm809_vm6 = vcmp.lt.s32.totalorder %v807_v23, %v808_v9  ;;  %vm816_vm1 = vcmp.lt.s32.totalorder %v814_v31, %v815_v15  ;;  %v828_v6 = vsel %vm300_vm4, %v790_v25, %v827_v5  ;;  %v839_v26 = vperm.slane %v2058_v19, 0 }
 0x121   :  { %v817_v21 = vsel %vm816_vm1, %v814_v31, %v815_v15  ;;  %v829_v38 = vsel %vm302_vm11, %v800_v16, %v828_v6  ;;  %v885_v49 = vperm.slane %v877_v30, 0  ;;  %v886_v61 = vperm.slane %v878_v60, 0 }
 0x122   :  { %v810_v39 = vsel %vm809_vm6, %v807_v23, %v808_v9  ;;  %v818_v4 = vrot.slane %v817_v21, 1  ;;  %vm2672_vm12 = vcmp.eq.s32.totalorder %v823_v35, 1  ;;  %v842_v54 = vmul.f32 %v839_v26, %v2595_v14 }
 0x123   :  { %vm3503_vm9 = vcmask 1046534   ;;  %v843_v27 = vmul.f32 %v839_v26, %v2597_v57  ;;  %v844_v63 = vmul.f32 %v839_v26, %v2599_v10  ;;  %v845_v29 = vmul.f32 %v839_v26, %v2609_v36 }
 0x124   :  { %v830_v56 = vsel %vm3503_vm9, %v810_v39, %v829_v38  ;;  %vm819_vm15 = vcmp.lt.s32.totalorder %v817_v21, %v818_v4  ;;  %v841_v30 = vmul.f32 %v839_v26, %v2593_v12  ;;  %v846_v60 = vmul.f32 %v839_v26, %v2611_v40  ;;  %vm3506_vm5 = vmmov %vm3503_vm9 }
 0x125   :  { %v857_v7 = vrot.slane %v842_v54, 7  ;;  %v820_v0 = vsel %vm819_vm15, %v817_v21, %v818_v4  ;;  %v847_v52 = vmul.f32 %v839_v26, %v2613_v41  ;;  %v859_v59 = vrot.slane %v843_v27, 6  ;;  %vm3508_vm2 = vmmov %vm3506_vm5 }
 0x126   :  { %v887_v53 = vperm.slane %v879_v20, 0  ;;  %vm3504_vm7 = vcmask 1047559   ;;  %v848_v51 = vmul.f32 %v839_v26, %v2615_v42  ;;  %v861_v62 = vrot.slane %v844_v63, 5 }
 0x127   :  { %v831_v55 = vsel %vm3504_vm7, %v820_v0, %v830_v56  ;;  %v858_v34 = vsel %vm294_vm8, %v857_v7, %v841_v30  ;;  %v863_v31 = vrot.slane %v845_v29, 4  ;;  %v888_v35 = vperm.slane %v880_v22, 0  ;;  %vm3507_vm14 = vmmov %vm3504_vm7 }
 0x128   :  { %v832_v33 = vsel %vm2672_vm12, 0, %v831_v55  ;;  %v860_v23 = vsel %vm296_vm10, %v859_v59, %v858_v34  ;;  %v865_v9 = vrot.slane %v846_v60, 3  ;;  %v889_v15 = vperm.slane %v881_v45, 0  ;;  %vm3509_vm6 = vmmov %vm3504_vm7 }
 0x129   :  { %834 = vst.msk [vmem:[#allocation2 + $0x10] sm:$0xff] %vm137_vm0, %v832_v33  ;;  %v862_v20 = vsel %vm298_vm13, %v861_v62, %v860_v23  ;;  %v3505_v47 = vrot.slane %v2536_v48, 7  ;;  %v867_v5 = vrot.slane %v847_v52, 2  ;;  %v899_v19 = vadd.f32 %v883_v43, %v2160_v44 }
 0x12a   :  { %v864_v16 = vsel %vm300_vm4, %v863_v31, %v862_v20  ;;  %v915_v22 = vsel %vm294_vm8, %v2595_v14, %v2593_v12  ;;  %v869_v26 = vrot.slane %v848_v51, 1  ;;  %v900_v45 = vadd.f32 %v2649_v8, %v2186_v11  ;;  %v2720_v12 = vld [vmem:[%s3462_s0 + $0x28] sm:$0xff] }
 0x12b   :  { %v890_v25 = vperm.slane %v3505_v47, 0  ;;  %v866_v6 = vsel %vm302_vm11, %v865_v9, %v864_v16  ;;  %v916_v21 = vsel %vm296_vm10, %v2597_v57, %v915_v22  ;;  %v901_v39 = vadd.f32 %v885_v49, %v2177_v2 }
 0x12c   :  { %v868_v38 = vsel %vm3506_vm5, %v867_v5, %v866_v6  ;;  %v902_v48 = vadd.f32 %v886_v61, %v2121_v13  ;;  %v917_v43 = vsel %vm298_vm13, %v2599_v10, %v916_v21  ;;  %v903_v8 = vadd.f32 %v887_v53, %v2130_v17 }
 0x12d   :  { %v870_v14 = vsel %vm3507_vm14, %v869_v26, %v868_v38  ;;  %v904_v57 = vadd.f32 %v888_v35, %v2216_v46  ;;  %v918_v4 = vsel %vm300_vm4, %v2609_v36, %v917_v43  ;;  %v905_v61 = vadd.f32 %v889_v15, %v2213_v37 }
 0x12e   :  { %v2728_v49 = vadd.f32 %v870_v14, %v2550_v50  ;;  %v906_v10 = vadd.f32 %v890_v25, %v2143_v28  ;;  %v919_v32 = vsel %vm302_vm11, %v2611_v40, %v918_v4  ;;  %v1138_v56 = vrot.slane %v2720_v12, 1 }
 0x12f   :  { %v920_v54 = vsel %vm3508_vm2, %v2613_v41, %v919_v32  ;;  %v1139_v27 = vrot.slane %v2720_v12, 2  ;;  %v1140_v63 = vrot.slane %v2720_v12, 3  ;;  %v1141_v36 = vrot.slane %v2720_v12, 4 }
 0x130   :  { %v921_v50 = vsel %vm3509_vm6, %v2615_v42, %v920_v54  ;;  %v1142_v29 = vrot.slane %v2720_v12, 5 }
 0x131   :  { %v2744_v60 = vadd.f32 %v921_v50, %v899_v19  ;;  %v2746_v40 = vadd.f32 %v921_v50, %v900_v45  ;;  %v2748_v41 = vadd.f32 %v921_v50, %v901_v39  ;;  %v2750_v7 = vadd.f32 %v921_v50, %v902_v48 }
 0x132   :  { %v2752_v0 = vadd.f32 %v921_v50, %v903_v8  ;;  %v2754_v52 = vadd.f32 %v921_v50, %v904_v57  ;;  %v2756_v59 = vadd.f32 %v921_v50, %v905_v61  ;;  %v2758_v42 = vadd.f32 %v921_v50, %v906_v10 }
 0x133   :  { %v931_v53 = vsel %vm137_vm0, %v2744_v60, -inf  ;;  %v938_v55 = vsel %vm137_vm0, %v2746_v40, -inf  ;;  %v945_v51 = vsel %vm137_vm0, %v2748_v41, -inf  ;;  %v952_v34 = vsel %vm137_vm0, %v2750_v7, -inf }
 0x134   :  { %v932_v62 = vrot.slane %v931_v53, 4  ;;  %v939_v33 = vrot.slane %v938_v55, 4  ;;  %v946_v23 = vrot.slane %v945_v51, 4  ;;  %v953_v31 = vrot.slane %v952_v34, 4 }
 0x135   :  { %v959_v35 = vsel %vm137_vm0, %v2752_v0, -inf  ;;  %v966_v20 = vsel %vm137_vm0, %v2754_v52, -inf  ;;  %v973_v9 = vsel %vm137_vm0, %v2756_v59, -inf  ;;  %v980_v15 = vsel %vm137_vm0, %v2758_v42, -inf }
 0x136   :  { %v933_v47 = vmax.f32 %v931_v53, %v932_v62  ;;  %v940_v25 = vmax.f32 %v938_v55, %v939_v33  ;;  %v947_v16 = vmax.f32 %v945_v51, %v946_v23  ;;  %v954_v5 = vmax.f32 %v952_v34, %v953_v31 }
 0x137   :  { %v960_v19 = vrot.slane %v959_v35, 4  ;;  %v967_v22 = vrot.slane %v966_v20, 4  ;;  %v974_v6 = vrot.slane %v973_v9, 4  ;;  %v981_v26 = vrot.slane %v980_v15, 4 }
 0x138   :  { %v934_v45 = vrot.slane %v933_v47, 2  ;;  %v941_v21 = vrot.slane %v940_v25, 2  ;;  %v948_v38 = vrot.slane %v947_v16, 2  ;;  %v955_v39 = vrot.slane %v954_v5, 2 }
 0x139   :  { %v961_v48 = vmax.f32 %v959_v35, %v960_v19  ;;  %v968_v43 = vmax.f32 %v966_v20, %v967_v22  ;;  %v975_v14 = vmax.f32 %v973_v9, %v974_v6  ;;  %v982_v8 = vmax.f32 %v980_v15, %v981_v26 }
 0x13a   :  { %v935_v57 = vmax.f32 %v933_v47, %v934_v45  ;;  %v942_v4 = vmax.f32 %v940_v25, %v941_v21  ;;  %v949_v61 = vmax.f32 %v947_v16, %v948_v38  ;;  %v956_v10 = vmax.f32 %v954_v5, %v955_v39 }
 0x13b   :  { %v962_v32 = vrot.slane %v961_v48, 2  ;;  %v969_v54 = vrot.slane %v968_v43, 2  ;;  %v976_v50 = vrot.slane %v975_v14, 2  ;;  %v983_v53 = vrot.slane %v982_v8, 2 }
 0x13c   :  { %v936_v55 = vrot.slane %v935_v57, 1  ;;  %v943_v51 = vrot.slane %v942_v4, 1  ;;  %v950_v34 = vrot.slane %v949_v61, 1  ;;  %v957_v62 = vrot.slane %v956_v10, 1 }
 0x13d   :  { %v963_v33 = vmax.f32 %v961_v48, %v962_v32  ;;  %v970_v23 = vmax.f32 %v968_v43, %v969_v54  ;;  %v977_v31 = vmax.f32 %v975_v14, %v976_v50  ;;  %v984_v30 = vmax.f32 %v982_v8, %v983_v53 }
 0x13e   :  { %v2776_v35 = vmax.f32 %v935_v57, %v936_v55  ;;  %v2778_v20 = vmax.f32 %v942_v4, %v943_v51  ;;  %v2780_v9 = vmax.f32 %v949_v61, %v950_v34  ;;  %v2782_v15 = vmax.f32 %v956_v10, %v957_v62 }
 0x13f   :  { %v964_v47 = vrot.slane %v963_v33, 1  ;;  %v971_v25 = vrot.slane %v970_v23, 1  ;;  %v978_v16 = vrot.slane %v977_v31, 1  ;;  %v985_v5 = vrot.slane %v984_v30, 1 }
 0x140   :  { %vm987_vm1 = vcmp.ge.f32.partialorder %v2744_v60, %v2776_v35  ;;  %vm988_vm12 = vcmp.ge.f32.partialorder %v2746_v40, %v2778_v20  ;;  %vm989_vm9 = vcmp.ge.f32.partialorder %v2748_v41, %v2780_v9  ;;  %vm990_vm15 = vcmp.ge.f32.partialorder %v2750_v7, %v2782_v15 }
 0x141   :  { %v2792_v19 = vmax.f32 %v963_v33, %v964_v47  ;;  %v2794_v22 = vmax.f32 %v970_v23, %v971_v25  ;;  %v2796_v6 = vmax.f32 %v977_v31, %v978_v16  ;;  %v2798_v26 = vmax.f32 %v984_v30, %v985_v5 }
 0x142   :  { %v995_v45 = vsel %vm987_vm1, %v2112_v3, 8  ;;  %v996_v60 = vsel %vm988_vm12, %v2112_v3, 8  ;;  %v997_v40 = vsel %vm989_vm9, %v2112_v3, 8  ;;  %v1144_v21 = vrot.slane %v2720_v12, 7 }
 0x143   :  { %vm991_vm7 = vcmp.ge.f32.partialorder %v2752_v0, %v2792_v19  ;;  %vm992_vm5 = vcmp.ge.f32.partialorder %v2754_v52, %v2794_v22  ;;  %vm993_vm14 = vcmp.ge.f32.partialorder %v2756_v59, %v2796_v6  ;;  %v998_v30 = vsel %vm990_vm15, %v2112_v3, 8 }
 0x144   :  { %vm994_vm2 = vcmp.ge.f32.partialorder %v2758_v42, %v2798_v26  ;;  %v999_v41 = vsel %vm991_vm7, %v2112_v3, 8  ;;  %v1000_v7 = vsel %vm992_vm5, %v2112_v3, 8  ;;  %v1001_v38 = vsel %vm993_vm14, %v2112_v3, 8 }
 0x145   :  { %v1003_v39 = vsel %vm137_vm0, %v995_v45, 2147483647  ;;  %v1013_v0 = vsel %vm137_vm0, %v996_v60, 2147483647  ;;  %v1023_v52 = vsel %vm137_vm0, %v997_v40, 2147483647 }
 0x146   :  { %v1004_v48 = vrot.slane %v1003_v39, 4  ;;  %v1014_v43 = vrot.slane %v1013_v0, 4  ;;  %v1024_v59 = vrot.slane %v1023_v52, 4  ;;  %v1033_v14 = vsel %vm137_vm0, %v998_v30, 2147483647 }
 0x147   :  { %v1002_v8 = vsel %vm994_vm2, %v2112_v3, 8  ;;  %v1034_v42 = vrot.slane %v1033_v14, 4  ;;  %v1043_v57 = vsel %vm137_vm0, %v999_v41, 2147483647  ;;  %v1053_v4 = vsel %vm137_vm0, %v1000_v7, 2147483647 }
 0x148   :  { %vm1005_vm6 = vcmp.lt.s32.totalorder %v1003_v39, %v1004_v48  ;;  %vm1015_vm1 = vcmp.lt.s32.totalorder %v1013_v0, %v1014_v43  ;;  %vm1025_vm12 = vcmp.lt.s32.totalorder %v1023_v52, %v1024_v59  ;;  %v1044_v61 = vrot.slane %v1043_v57, 4 }
 0x149   :  { %v1006_v10 = vsel %vm1005_vm6, %v1003_v39, %v1004_v48  ;;  %v1016_v32 = vsel %vm1015_vm1, %v1013_v0, %v1014_v43  ;;  %v1026_v54 = vsel %vm1025_vm12, %v1023_v52, %v1024_v59  ;;  %vm1035_vm9 = vcmp.lt.s32.totalorder %v1033_v14, %v1034_v42 }
 0x14a   :  { %v1007_v50 = vrot.slane %v1006_v10, 2  ;;  %v1017_v53 = vrot.slane %v1016_v32, 2  ;;  %v1027_v55 = vrot.slane %v1026_v54, 2  ;;  %v1036_v51 = vsel %vm1035_vm9, %v1033_v14, %v1034_v42 }
 0x14b   :  { %v1037_v34 = vrot.slane %v1036_v51, 2  ;;  %vm1045_vm15 = vcmp.lt.s32.totalorder %v1043_v57, %v1044_v61  ;;  %v1054_v62 = vrot.slane %v1053_v4, 4  ;;  %v1063_v33 = vsel %vm137_vm0, %v1001_v38, 2147483647 }
 0x14c   :  { %vm1008_vm7 = vcmp.lt.s32.totalorder %v1006_v10, %v1007_v50  ;;  %vm1018_vm5 = vcmp.lt.s32.totalorder %v1016_v32, %v1017_v53  ;;  %vm1028_vm14 = vcmp.lt.s32.totalorder %v1026_v54, %v1027_v55  ;;  %v1046_v23 = vsel %vm1045_vm15, %v1043_v57, %v1044_v61 }
 0x14d   :  { %v1009_v31 = vsel %vm1008_vm7, %v1006_v10, %v1007_v50  ;;  %v1019_v47 = vsel %vm1018_vm5, %v1016_v32, %v1017_v53  ;;  %v1029_v25 = vsel %vm1028_vm14, %v1026_v54, %v1027_v55  ;;  %vm1038_vm2 = vcmp.lt.s32.totalorder %v1036_v51, %v1037_v34 }
 0x14e   :  { %v1010_v16 = vrot.slane %v1009_v31, 1  ;;  %v1020_v5 = vrot.slane %v1019_v47, 1  ;;  %v1030_v45 = vrot.slane %v1029_v25, 1  ;;  %v1039_v60 = vsel %vm1038_vm2, %v1036_v51, %v1037_v34 }
 0x14f   :  { %v1040_v40 = vrot.slane %v1039_v60, 1  ;;  %v1047_v30 = vrot.slane %v1046_v23, 2  ;;  %vm1055_vm6 = vcmp.lt.s32.totalorder %v1053_v4, %v1054_v62  ;;  %v1064_v41 = vrot.slane %v1063_v33, 4 }
 0x150   :  { %vm1011_vm1 = vcmp.lt.s32.totalorder %v1009_v31, %v1010_v16  ;;  %vm1021_vm12 = vcmp.lt.s32.totalorder %v1019_v47, %v1020_v5  ;;  %v1056_v7 = vsel %vm1055_vm6, %v1053_v4, %v1054_v62  ;;  %vm1083_vm9 = vcmp.le.s32.totalorder %v2644_v24, 4 }
 0x151   :  { %v1012_v38 = vsel %vm1011_vm1, %v1009_v31, %v1010_v16  ;;  %v1022_v39 = vsel %vm1021_vm12, %v1019_v47, %v1020_v5  ;;  %vm1031_vm15 = vcmp.lt.s32.totalorder %v1029_v25, %v1030_v45  ;;  %v1145_v0 = vperm.slane %v2720_v12, 0 }
 0x152   :  { %vm2826_vm7 = vcmp.lt.s32.totalorder %v1039_v60, %v1040_v40  ;;  %vm1048_vm5 = vcmp.lt.s32.totalorder %v1046_v23, %v1047_v30  ;;  %v1057_v48 = vrot.slane %v1056_v7, 2  ;;  %vm1065_vm14 = vcmp.lt.s32.totalorder %v1063_v33, %v1064_v41 }
 0x153   :  { %v1049_v43 = vsel %vm1048_vm5, %v1046_v23, %v1047_v30  ;;  %v1066_v59 = vsel %vm1065_vm14, %v1063_v33, %v1064_v41  ;;  %v1073_v14 = vsel %vm137_vm0, %v1002_v8, 2147483647  ;;  %v1084_v42 = vsel %vm1083_vm9, 1, %v2076_v1 }
 0x154   :  { %v1050_v57 = vrot.slane %v1049_v43, 1  ;;  %vm1058_vm2 = vcmp.lt.s32.totalorder %v1056_v7, %v1057_v48  ;;  %v1067_v4 = vrot.slane %v1066_v59, 2  ;;  %v1074_v61 = vrot.slane %v1073_v14, 4 }
 0x155   :  { %v1032_v10 = vsel %vm1031_vm15, %v1029_v25, %v1030_v45  ;;  %v1059_v32 = vsel %vm1058_vm2, %v1056_v7, %v1057_v48  ;;  %v1087_v54 = vsel %vm294_vm8, %v1022_v39, %v1012_v38  ;;  %vm3473_vm6 = vcmp.eq.s32.totalorder %v2172_v58, 4 }
 0x156   :  { %vm1051_vm1 = vcmp.lt.s32.totalorder %v1049_v43, %v1050_v57  ;;  %v1060_v50 = vrot.slane %v1059_v32, 1  ;;  %vm1068_vm12 = vcmp.lt.s32.totalorder %v1066_v59, %v1067_v4  ;;  %vm1075_vm3 = vcmp.lt.s32.totalorder %v1073_v14, %v1074_v61 }
 0x157   :  { %v1042_v53 = vsel %vm2826_vm7, %v1039_v60, %v1040_v40  ;;  %v1069_v8 = vsel %vm1068_vm12, %v1066_v59, %v1067_v4  ;;  %v1076_v55 = vsel %vm1075_vm3, %v1073_v14, %v1074_v61  ;;  %v1085_v51 = vperm.slane %v1084_v42, 0 }
 0x158   :  { %vm1061_vm9 = vcmp.lt.s32.totalorder %v1059_v32, %v1060_v50  ;;  %v1070_v34 = vrot.slane %v1069_v8, 1  ;;  %v1077_v62 = vrot.slane %v1076_v55, 2  ;;  %v1088_v33 = vsel %vm296_vm10, %v1032_v10, %v1087_v54 }
 0x159   :  { %v1052_v23 = vsel %vm1051_vm1, %v1049_v43, %v1050_v57  ;;  %v1062_v31 = vsel %vm1061_vm9, %v1059_v32, %v1060_v50  ;;  %v1089_v47 = vsel %vm298_vm13, %v1042_v53, %v1088_v33  ;;  %v2060_v25 = vsel %vm3473_vm6, 1.0, %v3488_v18 }
 0x15a   :  { %vm1071_vm15 = vcmp.lt.s32.totalorder %v1069_v8, %v1070_v34  ;;  %vm1078_vm5 = vcmp.lt.s32.totalorder %v1076_v55, %v1077_v62  ;;  %v1090_v16 = vsel %vm300_vm4, %v1052_v23, %v1089_v47  ;;  %v1101_v5 = vperm.slane %v2060_v25, 0 }
 0x15b   :  { %v1079_v45 = vsel %vm1078_vm5, %v1076_v55, %v1077_v62  ;;  %v1091_v60 = vsel %vm302_vm11, %v1062_v31, %v1090_v16  ;;  %v1146_v40 = vperm.slane %v1138_v56, 0  ;;  %v1147_v30 = vperm.slane %v1139_v27, 0 }
 0x15c   :  { %v1072_v41 = vsel %vm1071_vm15, %v1069_v8, %v1070_v34  ;;  %v1080_v7 = vrot.slane %v1079_v45, 1  ;;  %vm2847_vm3 = vcmp.eq.s32.totalorder %v1085_v51, 1  ;;  %v1104_v39 = vmul.f32 %v1101_v5, %v2778_v20 }
 0x15d   :  { %vm3514_vm7 = vcmask 1046534   ;;  %v1105_v48 = vmul.f32 %v1101_v5, %v2780_v9  ;;  %v1106_v43 = vmul.f32 %v1101_v5, %v2782_v15  ;;  %v1107_v59 = vmul.f32 %v1101_v5, %v2792_v19 }
 0x15e   :  { %v1092_v52 = vsel %vm3514_vm7, %v1072_v41, %v1091_v60  ;;  %vm1081_vm14 = vcmp.lt.s32.totalorder %v1079_v45, %v1080_v7  ;;  %v1103_v56 = vmul.f32 %v1101_v5, %v2776_v35  ;;  %v1108_v27 = vmul.f32 %v1101_v5, %v2794_v22  ;;  %vm3517_vm1 = vmmov %vm3514_vm7 }
 0x15f   :  { %v1119_v14 = vrot.slane %v1104_v39, 7  ;;  %v1082_v42 = vsel %vm1081_vm14, %v1079_v45, %v1080_v7  ;;  %v1109_v57 = vmul.f32 %v1101_v5, %v2796_v6  ;;  %v1121_v4 = vrot.slane %v1105_v48, 6  ;;  %vm3519_vm9 = vmmov %vm3517_vm1 }
 0x160   :  { %v1148_v61 = vperm.slane %v1140_v63, 0  ;;  %vm3515_vm2 = vcmask 1047559   ;;  %v1110_v32 = vmul.f32 %v1101_v5, %v2798_v26  ;;  %v1123_v50 = vrot.slane %v1106_v43, 5 }
 0x161   :  { %v1093_v10 = vsel %vm3515_vm2, %v1082_v42, %v1092_v52  ;;  %v1120_v54 = vsel %vm294_vm8, %v1119_v14, %v1103_v56  ;;  %v1125_v55 = vrot.slane %v1107_v59, 4  ;;  %v1149_v51 = vperm.slane %v1141_v36, 0  ;;  %vm3518_vm12 = vmmov %vm3515_vm2 }
 0x162   :  { %v1094_v53 = vsel %vm2847_vm3, 0, %v1093_v10  ;;  %v1122_v8 = vsel %vm296_vm10, %v1121_v4, %v1120_v54  ;;  %v1127_v34 = vrot.slane %v1108_v27, 3  ;;  %v1150_v62 = vperm.slane %v1142_v29, 0  ;;  %vm3520_vm15 = vmmov %vm3515_vm2 }
 0x163   :  { %1096 = vst.msk [vmem:[#allocation2 + $0x18] sm:$0xff] %vm137_vm0, %v1094_v53  ;;  %v1124_v63 = vsel %vm298_vm13, %v1123_v50, %v1122_v8  ;;  %v3516_v33 = vrot.slane %v2720_v12, 6  ;;  %v1129_v47 = vrot.slane %v1109_v57, 2  ;;  %v1152_v25 = vperm.slane %v1144_v21, 0 }
 0x164   :  { %v1126_v31 = vsel %vm300_vm4, %v1125_v55, %v1124_v63  ;;  %v1177_v36 = vsel %vm294_vm8, %v2778_v20, %v2776_v35  ;;  %v1131_v5 = vrot.slane %v1110_v32, 1  ;;  %v1161_v29 = vadd.f32 %v1145_v0, %v2160_v44 }
 0x165   :  { %v1151_v23 = vperm.slane %v3516_v33, 0  ;;  %v1128_v16 = vsel %vm302_vm11, %v1127_v34, %v1126_v31  ;;  %v1178_v45 = vsel %vm296_vm10, %v2780_v9, %v1177_v36  ;;  %v1162_v41 = vadd.f32 %v1146_v40, %v2186_v11  ;;  %v2900_v9 = vld [vmem:[%s3462_s0 + $0x30] sm:$0xff] }
 0x166   :  { %v1130_v60 = vsel %vm3517_vm1, %v1129_v47, %v1128_v16  ;;  %v1163_v21 = vadd.f32 %v1147_v30, %v2177_v2  ;;  %v1179_v7 = vsel %vm298_vm13, %v2782_v15, %v1178_v45  ;;  %v1164_v20 = vadd.f32 %v1148_v61, %v2121_v13 }
 0x167   :  { %v1132_v35 = vsel %vm3518_vm12, %v1131_v5, %v1130_v60  ;;  %v1165_v38 = vadd.f32 %v1149_v51, %v2130_v17  ;;  %v1180_v12 = vsel %vm300_vm4, %v2792_v19, %v1179_v7  ;;  %v1166_v40 = vadd.f32 %v1150_v62, %v2216_v46 }
 0x168   :  { %v2903_v0 = vadd.f32 %v1132_v35, %v2728_v49  ;;  %v1167_v15 = vadd.f32 %v1151_v23, %v2213_v37  ;;  %v1181_v30 = vsel %vm302_vm11, %v2794_v22, %v1180_v12  ;;  %v1168_v39 = vadd.f32 %v1152_v25, %v2143_v28 }
 0x169   :  { %v1182_v19 = vsel %vm3519_vm9, %v2796_v6, %v1181_v30  ;;  %v1400_v52 = vrot.slane %v2900_v9, 1  ;;  %v1401_v48 = vrot.slane %v2900_v9, 2  ;;  %v1402_v43 = vrot.slane %v2900_v9, 3 }
 0x16a   :  { %v1183_v49 = vsel %vm3520_vm15, %v2798_v26, %v1182_v19  ;;  %v1403_v59 = vrot.slane %v2900_v9, 4  ;;  %v1404_v56 = vrot.slane %v2900_v9, 5 }
 0x16b   :  { %v2919_v27 = vadd.f32 %v1183_v49, %v1161_v29  ;;  %v2921_v22 = vadd.f32 %v1183_v49, %v1162_v41  ;;  %v2923_v14 = vadd.f32 %v1183_v49, %v1163_v21  ;;  %v2925_v6 = vadd.f32 %v1183_v49, %v1164_v20 }
 0x16c   :  { %v2927_v42 = vadd.f32 %v1183_v49, %v1165_v38  ;;  %v2929_v57 = vadd.f32 %v1183_v49, %v1166_v40  ;;  %v2931_v4 = vadd.f32 %v1183_v49, %v1167_v15  ;;  %v2933_v26 = vadd.f32 %v1183_v49, %v1168_v39 }
 0x16d   :  { %v1193_v61 = vsel %vm137_vm0, %v2919_v27, -inf  ;;  %v1200_v10 = vsel %vm137_vm0, %v2921_v22, -inf  ;;  %v1207_v32 = vsel %vm137_vm0, %v2923_v14, -inf  ;;  %v1214_v54 = vsel %vm137_vm0, %v2925_v6, -inf }
 0x16e   :  { %v1194_v50 = vrot.slane %v1193_v61, 4  ;;  %v1201_v53 = vrot.slane %v1200_v10, 4  ;;  %v1208_v8 = vrot.slane %v1207_v32, 4  ;;  %v1215_v55 = vrot.slane %v1214_v54, 4 }
 0x16f   :  { %v1221_v51 = vsel %vm137_vm0, %v2927_v42, -inf  ;;  %v1228_v63 = vsel %vm137_vm0, %v2929_v57, -inf  ;;  %v1235_v34 = vsel %vm137_vm0, %v2931_v4, -inf  ;;  %v1242_v62 = vsel %vm137_vm0, %v2933_v26, -inf }
 0x170   :  { %v1195_v33 = vmax.f32 %v1193_v61, %v1194_v50  ;;  %v1202_v23 = vmax.f32 %v1200_v10, %v1201_v53  ;;  %v1209_v31 = vmax.f32 %v1207_v32, %v1208_v8  ;;  %v1216_v47 = vmax.f32 %v1214_v54, %v1215_v55 }
 0x171   :  { %v1222_v25 = vrot.slane %v1221_v51, 4  ;;  %v1229_v36 = vrot.slane %v1228_v63, 4  ;;  %v1236_v16 = vrot.slane %v1235_v34, 4  ;;  %v1243_v5 = vrot.slane %v1242_v62, 4 }
 0x172   :  { %v1196_v29 = vrot.slane %v1195_v33, 2  ;;  %v1203_v45 = vrot.slane %v1202_v23, 2  ;;  %v1210_v60 = vrot.slane %v1209_v31, 2  ;;  %v1217_v41 = vrot.slane %v1216_v47, 2 }
 0x173   :  { %v1223_v21 = vmax.f32 %v1221_v51, %v1222_v25  ;;  %v1230_v7 = vmax.f32 %v1228_v63, %v1229_v36  ;;  %v1237_v35 = vmax.f32 %v1235_v34, %v1236_v16  ;;  %v1244_v20 = vmax.f32 %v1242_v62, %v1243_v5 }
 0x174   :  { %v1197_v38 = vmax.f32 %v1195_v33, %v1196_v29  ;;  %v1204_v12 = vmax.f32 %v1202_v23, %v1203_v45  ;;  %v1211_v40 = vmax.f32 %v1209_v31, %v1210_v60  ;;  %v1218_v15 = vmax.f32 %v1216_v47, %v1217_v41 }
 0x175   :  { %v1224_v30 = vrot.slane %v1223_v21, 2  ;;  %v1231_v39 = vrot.slane %v1230_v7, 2  ;;  %v1238_v19 = vrot.slane %v1237_v35, 2  ;;  %v1245_v49 = vrot.slane %v1244_v20, 2 }
 0x176   :  { %v1198_v61 = vrot.slane %v1197_v38, 1  ;;  %v1205_v10 = vrot.slane %v1204_v12, 1  ;;  %v1212_v32 = vrot.slane %v1211_v40, 1  ;;  %v1219_v54 = vrot.slane %v1218_v15, 1 }
 0x177   :  { %v1225_v50 = vmax.f32 %v1223_v21, %v1224_v30  ;;  %v1232_v53 = vmax.f32 %v1230_v7, %v1231_v39  ;;  %v1239_v8 = vmax.f32 %v1237_v35, %v1238_v19  ;;  %v1246_v55 = vmax.f32 %v1244_v20, %v1245_v49 }
 0x178   :  { %v2951_v51 = vmax.f32 %v1197_v38, %v1198_v61  ;;  %v2953_v63 = vmax.f32 %v1204_v12, %v1205_v10  ;;  %v2955_v34 = vmax.f32 %v1211_v40, %v1212_v32  ;;  %v2957_v62 = vmax.f32 %v1218_v15, %v1219_v54 }
 0x179   :  { %v1226_v33 = vrot.slane %v1225_v50, 1  ;;  %v1233_v23 = vrot.slane %v1232_v53, 1  ;;  %v1240_v31 = vrot.slane %v1239_v8, 1  ;;  %v1247_v47 = vrot.slane %v1246_v55, 1 }
 0x17a   :  { %vm1249_vm5 = vcmp.ge.f32.partialorder %v2919_v27, %v2951_v51  ;;  %vm1250_vm3 = vcmp.ge.f32.partialorder %v2921_v22, %v2953_v63  ;;  %vm1251_vm7 = vcmp.ge.f32.partialorder %v2923_v14, %v2955_v34  ;;  %vm1252_vm14 = vcmp.ge.f32.partialorder %v2925_v6, %v2957_v62 }
 0x17b   :  { %v2967_v25 = vmax.f32 %v1225_v50, %v1226_v33  ;;  %v2969_v36 = vmax.f32 %v1232_v53, %v1233_v23  ;;  %v2971_v16 = vmax.f32 %v1239_v8, %v1240_v31  ;;  %v2973_v5 = vmax.f32 %v1246_v55, %v1247_v47 }
 0x17c   :  { %v1257_v29 = vsel %vm1249_vm5, %v2112_v3, 8  ;;  %v1258_v27 = vsel %vm1250_vm3, %v2112_v3, 8  ;;  %v1259_v22 = vsel %vm1251_vm7, %v2112_v3, 8  ;;  %v1405_v45 = vrot.slane %v2900_v9, 6 }
 0x17d   :  { %vm1253_vm2 = vcmp.ge.f32.partialorder %v2927_v42, %v2967_v25  ;;  %vm1254_vm1 = vcmp.ge.f32.partialorder %v2929_v57, %v2969_v36  ;;  %vm1255_vm12 = vcmp.ge.f32.partialorder %v2931_v4, %v2971_v16  ;;  %v1260_v14 = vsel %vm1252_vm14, %v2112_v3, 8 }
 0x17e   :  { %vm1256_vm9 = vcmp.ge.f32.partialorder %v2933_v26, %v2973_v5  ;;  %v1261_v6 = vsel %vm1253_vm2, %v2112_v3, 8  ;;  %v1262_v60 = vsel %vm1254_vm1, %v2112_v3, 8  ;;  %v1263_v41 = vsel %vm1255_vm12, %v2112_v3, 8 }
 0x17f   :  { %v1265_v21 = vsel %vm137_vm0, %v1257_v29, 2147483647  ;;  %v1275_v42 = vsel %vm137_vm0, %v1258_v27, 2147483647  ;;  %v1285_v57 = vsel %vm137_vm0, %v1259_v22, 2147483647 }
 0x180   :  { %v1266_v7 = vrot.slane %v1265_v21, 4  ;;  %v1276_v35 = vrot.slane %v1275_v42, 4  ;;  %v1286_v4 = vrot.slane %v1285_v57, 4  ;;  %v1295_v20 = vsel %vm137_vm0, %v1260_v14, 2147483647 }
 0x181   :  { %v1264_v38 = vsel %vm1256_vm9, %v2112_v3, 8  ;;  %v1296_v26 = vrot.slane %v1295_v20, 4  ;;  %v1305_v12 = vsel %vm137_vm0, %v1261_v6, 2147483647  ;;  %v1315_v40 = vsel %vm137_vm0, %v1262_v60, 2147483647 }
 0x182   :  { %vm1267_vm15 = vcmp.lt.s32.totalorder %v1265_v21, %v1266_v7  ;;  %vm1277_vm5 = vcmp.lt.s32.totalorder %v1275_v42, %v1276_v35  ;;  %vm1287_vm3 = vcmp.lt.s32.totalorder %v1285_v57, %v1286_v4  ;;  %v1306_v15 = vrot.slane %v1305_v12, 4 }
 0x183   :  { %v1268_v30 = vsel %vm1267_vm15, %v1265_v21, %v1266_v7  ;;  %v1278_v39 = vsel %vm1277_vm5, %v1275_v42, %v1276_v35  ;;  %v1288_v19 = vsel %vm1287_vm3, %v1285_v57, %v1286_v4  ;;  %vm1297_vm7 = vcmp.lt.s32.totalorder %v1295_v20, %v1296_v26 }
 0x184   :  { %v1269_v49 = vrot.slane %v1268_v30, 2  ;;  %v1279_v61 = vrot.slane %v1278_v39, 2  ;;  %v1289_v10 = vrot.slane %v1288_v19, 2  ;;  %v1298_v32 = vsel %vm1297_vm7, %v1295_v20, %v1296_v26 }
 0x185   :  { %v1299_v54 = vrot.slane %v1298_v32, 2  ;;  %vm1307_vm14 = vcmp.lt.s32.totalorder %v1305_v12, %v1306_v15  ;;  %v1316_v50 = vrot.slane %v1315_v40, 4  ;;  %v1325_v53 = vsel %vm137_vm0, %v1263_v41, 2147483647 }
 0x186   :  { %vm1270_vm2 = vcmp.lt.s32.totalorder %v1268_v30, %v1269_v49  ;;  %vm1280_vm1 = vcmp.lt.s32.totalorder %v1278_v39, %v1279_v61  ;;  %vm1290_vm12 = vcmp.lt.s32.totalorder %v1288_v19, %v1289_v10  ;;  %v1308_v8 = vsel %vm1307_vm14, %v1305_v12, %v1306_v15 }
 0x187   :  { %v1271_v55 = vsel %vm1270_vm2, %v1268_v30, %v1269_v49  ;;  %v1281_v33 = vsel %vm1280_vm1, %v1278_v39, %v1279_v61  ;;  %v1291_v23 = vsel %vm1290_vm12, %v1288_v19, %v1289_v10  ;;  %vm1300_vm9 = vcmp.lt.s32.totalorder %v1298_v32, %v1299_v54 }
 0x188   :  { %v1272_v31 = vrot.slane %v1271_v55, 1  ;;  %v1282_v47 = vrot.slane %v1281_v33, 1  ;;  %v1292_v29 = vrot.slane %v1291_v23, 1  ;;  %v1301_v27 = vsel %vm1300_vm9, %v1298_v32, %v1299_v54 }
 0x189   :  { %v1302_v22 = vrot.slane %v1301_v27, 1  ;;  %v1309_v14 = vrot.slane %v1308_v8, 2  ;;  %vm1317_vm15 = vcmp.lt.s32.totalorder %v1315_v40, %v1316_v50  ;;  %v1326_v6 = vrot.slane %v1325_v53, 4 }
 0x18a   :  { %vm1273_vm5 = vcmp.lt.s32.totalorder %v1271_v55, %v1272_v31  ;;  %vm1283_vm3 = vcmp.lt.s32.totalorder %v1281_v33, %v1282_v47  ;;  %v1318_v60 = vsel %vm1317_vm15, %v1315_v40, %v1316_v50  ;;  %vm1345_vm7 = vcmp.le.s32.totalorder %v2644_v24, 5 }
 0x18b   :  { %v1274_v41 = vsel %vm1273_vm5, %v1271_v55, %v1272_v31  ;;  %v1284_v21 = vsel %vm1283_vm3, %v1281_v33, %v1282_v47  ;;  %vm1293_vm14 = vcmp.lt.s32.totalorder %v1291_v23, %v1292_v29  ;;  %v1406_v42 = vrot.slane %v2900_v9, 7 }
 0x18c   :  { %vm3001_vm2 = vcmp.lt.s32.totalorder %v1301_v27, %v1302_v22  ;;  %vm1310_vm1 = vcmp.lt.s32.totalorder %v1308_v8, %v1309_v14  ;;  %v1319_v7 = vrot.slane %v1318_v60, 2  ;;  %vm1327_vm12 = vcmp.lt.s32.totalorder %v1325_v53, %v1326_v6 }
 0x18d   :  { %v1311_v35 = vsel %vm1310_vm1, %v1308_v8, %v1309_v14  ;;  %v1328_v4 = vsel %vm1327_vm12, %v1325_v53, %v1326_v6  ;;  %v1335_v20 = vsel %vm137_vm0, %v1264_v38, 2147483647  ;;  %v1346_v26 = vsel %vm1345_vm7, 1, %v2076_v1 }
 0x18e   :  { %v1312_v12 = vrot.slane %v1311_v35, 1  ;;  %vm1320_vm9 = vcmp.lt.s32.totalorder %v1318_v60, %v1319_v7  ;;  %v1329_v24 = vrot.slane %v1328_v4, 2  ;;  %v1336_v40 = vrot.slane %v1335_v20, 4 }
 0x18f   :  { %v1294_v15 = vsel %vm1293_vm14, %v1291_v23, %v1292_v29  ;;  %v1321_v30 = vsel %vm1320_vm9, %v1318_v60, %v1319_v7  ;;  %v1349_v39 = vsel %vm294_vm8, %v1284_v21, %v1274_v41  ;;  %vm3474_vm15 = vcmp.eq.s32.totalorder %v2172_v58, 5 }
 0x190   :  { %vm1313_vm5 = vcmp.lt.s32.totalorder %v1311_v35, %v1312_v12  ;;  %v1322_v19 = vrot.slane %v1321_v30, 1  ;;  %vm1330_vm3 = vcmp.lt.s32.totalorder %v1328_v4, %v1329_v24  ;;  %vm1337_vm6 = vcmp.lt.s32.totalorder %v1335_v20, %v1336_v40 }
 0x191   :  { %v1304_v49 = vsel %vm3001_vm2, %v1301_v27, %v1302_v22  ;;  %v1331_v38 = vsel %vm1330_vm3, %v1328_v4, %v1329_v24  ;;  %v1338_v61 = vsel %vm1337_vm6, %v1335_v20, %v1336_v40  ;;  %v1347_v10 = vperm.slane %v1346_v26, 0 }
 0x192   :  { %vm1323_vm7 = vcmp.lt.s32.totalorder %v1321_v30, %v1322_v19  ;;  %v1332_v32 = vrot.slane %v1331_v38, 1  ;;  %v1339_v54 = vrot.slane %v1338_v61, 2  ;;  %v1350_v50 = vsel %vm296_vm10, %v1294_v15, %v1349_v39 }
 0x193   :  { %v1314_v53 = vsel %vm1313_vm5, %v1311_v35, %v1312_v12  ;;  %v1324_v8 = vsel %vm1323_vm7, %v1321_v30, %v1322_v19  ;;  %v1351_v55 = vsel %vm298_vm13, %v1304_v49, %v1350_v50  ;;  %v2062_v33 = vsel %vm3474_vm15, 1.0, %v3488_v18 }
 0x194   :  { %vm1333_vm14 = vcmp.lt.s32.totalorder %v1331_v38, %v1332_v32  ;;  %vm1340_vm1 = vcmp.lt.s32.totalorder %v1338_v61, %v1339_v54  ;;  %v1352_v23 = vsel %vm300_vm4, %v1314_v53, %v1351_v55  ;;  %v1363_v31 = vperm.slane %v2062_v33, 0 }
 0x195   :  { %v1341_v47 = vsel %vm1340_vm1, %v1338_v61, %v1339_v54  ;;  %v1353_v29 = vsel %vm302_vm11, %v1324_v8, %v1352_v23  ;;  %v1407_v27 = vperm.slane %v2900_v9, 0  ;;  %v1408_v22 = vperm.slane %v1400_v52, 0 }
 0x196   :  { %v1334_v14 = vsel %vm1333_vm14, %v1331_v38, %v1332_v32  ;;  %v1342_v6 = vrot.slane %v1341_v47, 1  ;;  %vm3021_vm6 = vcmp.eq.s32.totalorder %v1347_v10, 1  ;;  %v1366_v41 = vmul.f32 %v1363_v31, %v2953_v63 }
 0x197   :  { %vm3525_vm2 = vcmask 1046534   ;;  %v1367_v57 = vmul.f32 %v1363_v31, %v2955_v34  ;;  %v1368_v7 = vmul.f32 %v1363_v31, %v2957_v62  ;;  %v1369_v35 = vmul.f32 %v1363_v31, %v2967_v25 }
 0x198   :  { %v1354_v21 = vsel %vm3525_vm2, %v1334_v14, %v1353_v29  ;;  %vm1343_vm12 = vcmp.lt.s32.totalorder %v1341_v47, %v1342_v6  ;;  %v1365_v4 = vmul.f32 %v1363_v31, %v2951_v51  ;;  %v1370_v52 = vmul.f32 %v1363_v31, %v2969_v36  ;;  %vm3527_vm5 = vmmov %vm3525_vm2 }
 0x199   :  { %v1381_v20 = vrot.slane %v1366_v41, 7  ;;  %v1344_v26 = vsel %vm1343_vm12, %v1341_v47, %v1342_v6  ;;  %v1371_v12 = vmul.f32 %v1363_v31, %v2971_v16  ;;  %v1383_v24 = vrot.slane %v1367_v57, 6  ;;  %vm3529_vm7 = vmmov %vm3525_vm2 }
 0x19a   :  { %v1409_v40 = vperm.slane %v1401_v48, 0  ;;  %vm3526_vm9 = vcmask 1047559   ;;  %v1372_v30 = vmul.f32 %v1363_v31, %v2973_v5  ;;  %v1385_v19 = vrot.slane %v1368_v7, 5 }
 0x19b   :  { %v1355_v15 = vsel %vm3526_vm9, %v1344_v26, %v1354_v21  ;;  %v1382_v39 = vsel %vm294_vm8, %v1381_v20, %v1365_v4  ;;  %v1387_v61 = vrot.slane %v1369_v35, 4  ;;  %v1410_v10 = vperm.slane %v1402_v43, 0  ;;  %vm3528_vm3 = vmmov %vm3526_vm9 }
 0x19c   :  { %v1356_v49 = vsel %vm3021_vm6, 0, %v1355_v15  ;;  %v1384_v38 = vsel %vm296_vm10, %v1383_v24, %v1382_v39  ;;  %v1389_v32 = vrot.slane %v1370_v52, 3  ;;  %v1411_v54 = vperm.slane %v1403_v59, 0  ;;  %vm3530_vm14 = vmmov %vm3528_vm3 }
 0x19d   :  { %1358 = vst.msk [vmem:[#allocation2 + $0x20] sm:$0xff] %vm137_vm0, %v1356_v49  ;;  %v1386_v48 = vsel %vm298_vm13, %v1385_v19, %v1384_v38  ;;  %v1412_v50 = vperm.slane %v1404_v56, 0  ;;  %v1391_v8 = vrot.slane %v1371_v12, 2  ;;  %v1413_v55 = vperm.slane %v1405_v45, 0 }
 0x19e   :  { %v1388_v53 = vsel %vm300_vm4, %v1387_v61, %v1386_v48  ;;  %v1439_v43 = vsel %vm294_vm8, %v2953_v63, %v2951_v51  ;;  %v1393_v23 = vrot.slane %v1372_v30, 1  ;;  %v1414_v31 = vperm.slane %v1406_v42, 0 }
 0x19f   :  { %v1390_v33 = vsel %vm302_vm11, %v1389_v32, %v1388_v53  ;;  %v1440_v59 = vsel %vm296_vm10, %v2955_v34, %v1439_v43  ;;  %v1423_v47 = vadd.f32 %v1407_v27, %v2160_v44  ;;  %v1424_v51 = vadd.f32 %v1408_v22, %v2186_v11  ;;  %v3072_v34 = vld [vmem:[%s3462_s0 + $0x38] sm:$0xff] }
 0x1a0   :  { %v1392_v56 = vsel %vm3527_vm5, %v1391_v8, %v1390_v33  ;;  %v1441_v45 = vsel %vm298_vm13, %v2957_v62, %v1440_v59  ;;  %v1425_v63 = vadd.f32 %v1409_v40, %v2177_v2  ;;  %v1426_v27 = vadd.f32 %v1410_v10, %v2121_v13 }
 0x1a1   :  { %v1394_v29 = vsel %vm3528_vm3, %v1393_v23, %v1392_v56  ;;  %v1442_v9 = vsel %vm300_vm4, %v2967_v25, %v1441_v45  ;;  %v1427_v62 = vadd.f32 %v1411_v54, %v2130_v17  ;;  %v1428_v14 = vadd.f32 %v1412_v50, %v2216_v46 }
 0x1a2   :  { %v3075_v42 = vadd.f32 %v1394_v29, %v2903_v0  ;;  %v1443_v22 = vsel %vm302_vm11, %v2969_v36, %v1442_v9  ;;  %v1429_v6 = vadd.f32 %v1413_v55, %v2213_v37  ;;  %v1430_v25 = vadd.f32 %v1414_v31, %v2143_v28 }
 0x1a3   :  { %v1444_v60 = vsel %vm3529_vm7, %v2971_v16, %v1443_v22  ;;  %v1662_v41 = vrot.slane %v3072_v34, 1  ;;  %v1663_v21 = vrot.slane %v3072_v34, 2  ;;  %v1664_v57 = vrot.slane %v3072_v34, 3 }
 0x1a4   :  { %v1445_v0 = vsel %vm3530_vm14, %v2973_v5, %v1444_v60 }
 0x1a5   :  { %v3091_v7 = vadd.f32 %v1445_v0, %v1423_v47  ;;  %v3093_v36 = vadd.f32 %v1445_v0, %v1424_v51  ;;  %v3095_v35 = vadd.f32 %v1445_v0, %v1425_v63  ;;  %v3097_v4 = vadd.f32 %v1445_v0, %v1426_v27 }
 0x1a6   :  { %v3099_v52 = vadd.f32 %v1445_v0, %v1427_v62  ;;  %v3101_v16 = vadd.f32 %v1445_v0, %v1428_v14  ;;  %v3103_v20 = vadd.f32 %v1445_v0, %v1429_v6  ;;  %v3105_v5 = vadd.f32 %v1445_v0, %v1430_v25 }
 0x1a7   :  { %v1455_v26 = vsel %vm137_vm0, %v3091_v7, -inf  ;;  %v1462_v12 = vsel %vm137_vm0, %v3093_v36, -inf  ;;  %v1469_v24 = vsel %vm137_vm0, %v3095_v35, -inf  ;;  %v1476_v40 = vsel %vm137_vm0, %v3097_v4, -inf }
 0x1a8   :  { %v1456_v15 = vrot.slane %v1455_v26, 4  ;;  %v1463_v30 = vrot.slane %v1462_v12, 4  ;;  %v1470_v39 = vrot.slane %v1469_v24, 4  ;;  %v1477_v19 = vrot.slane %v1476_v40, 4 }
 0x1a9   :  { %v1483_v49 = vsel %vm137_vm0, %v3099_v52, -inf  ;;  %v1490_v38 = vsel %vm137_vm0, %v3101_v16, -inf  ;;  %v1497_v61 = vsel %vm137_vm0, %v3103_v20, -inf  ;;  %v1504_v10 = vsel %vm137_vm0, %v3105_v5, -inf }
 0x1aa   :  { %v1457_v48 = vmax.f32 %v1455_v26, %v1456_v15  ;;  %v1464_v32 = vmax.f32 %v1462_v12, %v1463_v30  ;;  %v1471_v54 = vmax.f32 %v1469_v24, %v1470_v39  ;;  %v1478_v50 = vmax.f32 %v1476_v40, %v1477_v19 }
 0x1ab   :  { %v1484_v53 = vrot.slane %v1483_v49, 4  ;;  %v1491_v8 = vrot.slane %v1490_v38, 4  ;;  %v1498_v55 = vrot.slane %v1497_v61, 4  ;;  %v1505_v43 = vrot.slane %v1504_v10, 4 }
 0x1ac   :  { %v1458_v33 = vrot.slane %v1457_v48, 2  ;;  %v1465_v23 = vrot.slane %v1464_v32, 2  ;;  %v1472_v31 = vrot.slane %v1471_v54, 2  ;;  %v1479_v59 = vrot.slane %v1478_v50, 2 }
 0x1ad   :  { %v1485_v56 = vmax.f32 %v1483_v49, %v1484_v53  ;;  %v1492_v47 = vmax.f32 %v1490_v38, %v1491_v8  ;;  %v1499_v45 = vmax.f32 %v1497_v61, %v1498_v55  ;;  %v1506_v29 = vmax.f32 %v1504_v10, %v1505_v43 }
 0x1ae   :  { %v1459_v51 = vmax.f32 %v1457_v48, %v1458_v33  ;;  %v1466_v63 = vmax.f32 %v1464_v32, %v1465_v23  ;;  %v1473_v9 = vmax.f32 %v1471_v54, %v1472_v31  ;;  %v1480_v27 = vmax.f32 %v1478_v50, %v1479_v59 }
 0x1af   :  { %v1486_v62 = vrot.slane %v1485_v56, 2  ;;  %v1493_v22 = vrot.slane %v1492_v47, 2  ;;  %v1500_v14 = vrot.slane %v1499_v45, 2  ;;  %v1507_v6 = vrot.slane %v1506_v29, 2 }
 0x1b0   :  { %v1460_v25 = vrot.slane %v1459_v51, 1  ;;  %v1467_v60 = vrot.slane %v1466_v63, 1  ;;  %v1474_v0 = vrot.slane %v1473_v9, 1  ;;  %v1481_v26 = vrot.slane %v1480_v27, 1 }
 0x1b1   :  { %v1487_v12 = vmax.f32 %v1485_v56, %v1486_v62  ;;  %v1494_v24 = vmax.f32 %v1492_v47, %v1493_v22  ;;  %v1501_v40 = vmax.f32 %v1499_v45, %v1500_v14  ;;  %v1508_v15 = vmax.f32 %v1506_v29, %v1507_v6 }
 0x1b2   :  { %v3123_v30 = vmax.f32 %v1459_v51, %v1460_v25  ;;  %v3125_v39 = vmax.f32 %v1466_v63, %v1467_v60  ;;  %v3127_v19 = vmax.f32 %v1473_v9, %v1474_v0  ;;  %v3129_v49 = vmax.f32 %v1480_v27, %v1481_v26 }
 0x1b3   :  { %v1488_v38 = vrot.slane %v1487_v12, 1  ;;  %v1495_v61 = vrot.slane %v1494_v24, 1  ;;  %v1502_v10 = vrot.slane %v1501_v40, 1  ;;  %v1509_v48 = vrot.slane %v1508_v15, 1 }
 0x1b4   :  { %vm1511_vm1 = vcmp.ge.f32.partialorder %v3091_v7, %v3123_v30  ;;  %vm1512_vm6 = vcmp.ge.f32.partialorder %v3093_v36, %v3125_v39  ;;  %vm1513_vm2 = vcmp.ge.f32.partialorder %v3095_v35, %v3127_v19  ;;  %vm1514_vm12 = vcmp.ge.f32.partialorder %v3097_v4, %v3129_v49 }
 0x1b5   :  { %v3139_v32 = vmax.f32 %v1487_v12, %v1488_v38  ;;  %v3141_v54 = vmax.f32 %v1494_v24, %v1495_v61  ;;  %v3143_v50 = vmax.f32 %v1501_v40, %v1502_v10  ;;  %v3145_v53 = vmax.f32 %v1508_v15, %v1509_v48 }
 0x1b6   :  { %v1519_v8 = vsel %vm1511_vm1, %v2112_v3, 8  ;;  %v1520_v7 = vsel %vm1512_vm6, %v2112_v3, 8  ;;  %v1521_v36 = vsel %vm1513_vm2, %v2112_v3, 8  ;;  %v1665_v55 = vrot.slane %v3072_v34, 4 }
 0x1b7   :  { %vm1515_vm9 = vcmp.ge.f32.partialorder %v3099_v52, %v3139_v32  ;;  %vm1516_vm5 = vcmp.ge.f32.partialorder %v3101_v16, %v3141_v54  ;;  %vm1517_vm3 = vcmp.ge.f32.partialorder %v3103_v20, %v3143_v50  ;;  %v1522_v35 = vsel %vm1514_vm12, %v2112_v3, 8 }
 0x1b8   :  { %vm1518_vm7 = vcmp.ge.f32.partialorder %v3105_v5, %v3145_v53  ;;  %v1523_v4 = vsel %vm1515_vm9, %v2112_v3, 8  ;;  %v1524_v43 = vsel %vm1516_vm5, %v2112_v3, 8  ;;  %v1525_v33 = vsel %vm1517_vm3, %v2112_v3, 8 }
 0x1b9   :  { %v1527_v23 = vsel %vm137_vm0, %v1519_v8, 2147483647  ;;  %v1537_v52 = vsel %vm137_vm0, %v1520_v7, 2147483647  ;;  %v1547_v16 = vsel %vm137_vm0, %v1521_v36, 2147483647 }
 0x1ba   :  { %v1528_v31 = vrot.slane %v1527_v23, 4  ;;  %v1538_v59 = vrot.slane %v1537_v52, 4  ;;  %v1548_v20 = vrot.slane %v1547_v16, 4  ;;  %v1557_v56 = vsel %vm137_vm0, %v1522_v35, 2147483647 }
 0x1bb   :  { %v1526_v47 = vsel %vm1518_vm7, %v2112_v3, 8  ;;  %v1558_v5 = vrot.slane %v1557_v56, 4  ;;  %v1567_v45 = vsel %vm137_vm0, %v1523_v4, 2147483647  ;;  %v1577_v29 = vsel %vm137_vm0, %v1524_v43, 2147483647 }
 0x1bc   :  { %vm1529_vm14 = vcmp.lt.s32.totalorder %v1527_v23, %v1528_v31  ;;  %vm1539_vm1 = vcmp.lt.s32.totalorder %v1537_v52, %v1538_v59  ;;  %vm1549_vm6 = vcmp.lt.s32.totalorder %v1547_v16, %v1548_v20  ;;  %v1568_v51 = vrot.slane %v1567_v45, 4  ;;  %v3174_v35 = vld [vmem:[%s3464_s1] sm:$0x1] }
 0x1bd   :  { %v1530_v63 = vsel %vm1529_vm14, %v1527_v23, %v1528_v31  ;;  %v1540_v9 = vsel %vm1539_vm1, %v1537_v52, %v1538_v59  ;;  %v1550_v27 = vsel %vm1549_vm6, %v1547_v16, %v1548_v20  ;;  %vm1559_vm2 = vcmp.lt.s32.totalorder %v1557_v56, %v1558_v5 }
 0x1be   :  { %v1531_v62 = vrot.slane %v1530_v63, 2  ;;  %v1541_v22 = vrot.slane %v1540_v9, 2  ;;  %v1551_v14 = vrot.slane %v1550_v27, 2  ;;  %v1560_v6 = vsel %vm1559_vm2, %v1557_v56, %v1558_v5 }
 0x1bf   :  { %v1561_v25 = vrot.slane %v1560_v6, 2  ;;  %vm1569_vm12 = vcmp.lt.s32.totalorder %v1567_v45, %v1568_v51  ;;  %v1578_v60 = vrot.slane %v1577_v29, 4  ;;  %v1587_v0 = vsel %vm137_vm0, %v1525_v33, 2147483647 }
 0x1c0   :  { %vm1532_vm9 = vcmp.lt.s32.totalorder %v1530_v63, %v1531_v62  ;;  %vm1542_vm5 = vcmp.lt.s32.totalorder %v1540_v9, %v1541_v22  ;;  %vm1552_vm3 = vcmp.lt.s32.totalorder %v1550_v27, %v1551_v14  ;;  %v1570_v26 = vsel %vm1569_vm12, %v1567_v45, %v1568_v51 }
 0x1c1   :  { %v1533_v12 = vsel %vm1532_vm9, %v1530_v63, %v1531_v62  ;;  %v1543_v24 = vsel %vm1542_vm5, %v1540_v9, %v1541_v22  ;;  %v1553_v40 = vsel %vm1552_vm3, %v1550_v27, %v1551_v14  ;;  %vm1562_vm7 = vcmp.lt.s32.totalorder %v1560_v6, %v1561_v25 }
 0x1c2   :  { %v1534_v15 = vrot.slane %v1533_v12, 1  ;;  %v1544_v38 = vrot.slane %v1543_v24, 1  ;;  %v1554_v61 = vrot.slane %v1553_v40, 1  ;;  %v1563_v10 = vsel %vm1562_vm7, %v1560_v6, %v1561_v25 }
 0x1c3   :  { %v1564_v48 = vrot.slane %v1563_v10, 1  ;;  %v1571_v8 = vrot.slane %v1570_v26, 2  ;;  %vm1579_vm14 = vcmp.lt.s32.totalorder %v1577_v29, %v1578_v60  ;;  %v1588_v7 = vrot.slane %v1587_v0, 4 }
 0x1c4   :  { %vm1535_vm1 = vcmp.lt.s32.totalorder %v1533_v12, %v1534_v15  ;;  %vm1545_vm6 = vcmp.lt.s32.totalorder %v1543_v24, %v1544_v38  ;;  %v1580_v36 = vsel %vm1579_vm14, %v1577_v29, %v1578_v60  ;;  %vm1607_vm2 = vcmp.le.s32.totalorder %v3174_v35, 6 }
 0x1c5   :  { %v1536_v4 = vsel %vm1535_vm1, %v1533_v12, %v1534_v15  ;;  %v1546_v43 = vsel %vm1545_vm6, %v1543_v24, %v1544_v38  ;;  %vm1555_vm12 = vcmp.lt.s32.totalorder %v1553_v40, %v1554_v61  ;;  %v1666_v33 = vrot.slane %v3072_v34, 5 }
 0x1c6   :  { %vm3178_vm9 = vcmp.lt.s32.totalorder %v1563_v10, %v1564_v48  ;;  %vm1572_vm5 = vcmp.lt.s32.totalorder %v1570_v26, %v1571_v8  ;;  %v1581_v52 = vrot.slane %v1580_v36, 2  ;;  %vm1589_vm3 = vcmp.lt.s32.totalorder %v1587_v0, %v1588_v7 }
 0x1c7   :  { %v1573_v16 = vsel %vm1572_vm5, %v1570_v26, %v1571_v8  ;;  %v1590_v31 = vsel %vm1589_vm3, %v1587_v0, %v1588_v7  ;;  %v1597_v59 = vsel %vm137_vm0, %v1526_v47, 2147483647  ;;  %v1608_v20 = vsel %vm1607_vm2, 1, %v2076_v1 }
 0x1c8   :  { %v1574_v56 = vrot.slane %v1573_v16, 1  ;;  %vm1582_vm7 = vcmp.lt.s32.totalorder %v1580_v36, %v1581_v52  ;;  %v1591_v5 = vrot.slane %v1590_v31, 2  ;;  %v1598_v45 = vrot.slane %v1597_v59, 4 }
 0x1c9   :  { %v1556_v29 = vsel %vm1555_vm12, %v1553_v40, %v1554_v61  ;;  %v1583_v51 = vsel %vm1582_vm7, %v1580_v36, %v1581_v52  ;;  %v1611_v63 = vsel %vm294_vm8, %v1546_v43, %v1536_v4  ;;  %vm3475_vm14 = vcmp.eq.s32.totalorder %v2172_v58, 6 }
 0x1ca   :  { %vm1575_vm1 = vcmp.lt.s32.totalorder %v1573_v16, %v1574_v56  ;;  %v1584_v9 = vrot.slane %v1583_v51, 1  ;;  %vm1592_vm6 = vcmp.lt.s32.totalorder %v1590_v31, %v1591_v5  ;;  %vm1599_vm15 = vcmp.lt.s32.totalorder %v1597_v59, %v1598_v45 }
 0x1cb   :  { %v1566_v27 = vsel %vm3178_vm9, %v1563_v10, %v1564_v48  ;;  %v1593_v47 = vsel %vm1592_vm6, %v1590_v31, %v1591_v5  ;;  %v1600_v62 = vsel %vm1599_vm15, %v1597_v59, %v1598_v45  ;;  %v1609_v22 = vperm.slane %v1608_v20, 0 }
 0x1cc   :  { %vm1585_vm2 = vcmp.lt.s32.totalorder %v1583_v51, %v1584_v9  ;;  %v1594_v14 = vrot.slane %v1593_v47, 1  ;;  %v1601_v6 = vrot.slane %v1600_v62, 2  ;;  %v1612_v25 = vsel %vm296_vm10, %v1556_v29, %v1611_v63 }
 0x1cd   :  { %v1576_v60 = vsel %vm1575_vm1, %v1573_v16, %v1574_v56  ;;  %v1586_v0 = vsel %vm1585_vm2, %v1583_v51, %v1584_v9  ;;  %v1613_v26 = vsel %vm298_vm13, %v1566_v27, %v1612_v25  ;;  %v2064_v12 = vsel %vm3475_vm14, 1.0, %v3488_v18 }
 0x1ce   :  { %vm1595_vm12 = vcmp.lt.s32.totalorder %v1593_v47, %v1594_v14  ;;  %vm1602_vm5 = vcmp.lt.s32.totalorder %v1600_v62, %v1601_v6  ;;  %v1614_v24 = vsel %vm300_vm4, %v1576_v60, %v1613_v26  ;;  %v1625_v40 = vperm.slane %v2064_v12, 0 }
 0x1cf   :  { %v1603_v15 = vsel %vm1602_vm5, %v1600_v62, %v1601_v6  ;;  %v1615_v38 = vsel %vm302_vm11, %v1586_v0, %v1614_v24  ;;  %v1667_v61 = vrot.slane %v3072_v34, 6  ;;  %v1668_v10 = vrot.slane %v3072_v34, 7 }
 0x1d0   :  { %v1596_v48 = vsel %vm1595_vm12, %v1593_v47, %v1594_v14  ;;  %v1604_v8 = vrot.slane %v1603_v15, 1  ;;  %vm3197_vm15 = vcmp.eq.s32.totalorder %v1609_v22, 1  ;;  %v1628_v36 = vmul.f32 %v1625_v40, %v3125_v39 }
 0x1d1   :  { %vm3535_vm9 = vcmask 1046534   ;;  %v1629_v43 = vmul.f32 %v1625_v40, %v3127_v19  ;;  %v1630_v23 = vmul.f32 %v1625_v40, %v3129_v49  ;;  %v1631_v52 = vmul.f32 %v1625_v40, %v3139_v32 }
 0x1d2   :  { %v1616_v4 = vsel %vm3535_vm9, %v1596_v48, %v1615_v38  ;;  %vm1605_vm3 = vcmp.lt.s32.totalorder %v1603_v15, %v1604_v8  ;;  %v1627_v16 = vmul.f32 %v1625_v40, %v3123_v30  ;;  %v1632_v31 = vmul.f32 %v1625_v40, %v3141_v54  ;;  %vm3537_vm1 = vmmov %vm3535_vm9 }
 0x1d3   :  { %v1643_v59 = vrot.slane %v1628_v36, 7  ;;  %v1606_v20 = vsel %vm1605_vm3, %v1603_v15, %v1604_v8  ;;  %v1633_v56 = vmul.f32 %v1625_v40, %v3143_v50  ;;  %v1645_v5 = vrot.slane %v1629_v43, 6  ;;  %vm3539_vm2 = vmmov %vm3537_vm1 }
 0x1d4   :  { %v1669_v45 = vperm.slane %v3072_v34, 0  ;;  %vm3536_vm7 = vcmask 1047559   ;;  %v1634_v51 = vmul.f32 %v1625_v40, %v3145_v53  ;;  %v1647_v9 = vrot.slane %v1630_v23, 5 }
 0x1d5   :  { %v1617_v29 = vsel %vm3536_vm7, %v1606_v20, %v1616_v4  ;;  %v1644_v63 = vsel %vm294_vm8, %v1643_v59, %v1627_v16  ;;  %v1649_v62 = vrot.slane %v1631_v52, 4  ;;  %v1670_v22 = vperm.slane %v1662_v41, 0  ;;  %vm3538_vm6 = vmmov %vm3536_vm7 }
 0x1d6   :  { %v1618_v27 = vsel %vm3197_vm15, 0, %v1617_v29  ;;  %v1646_v47 = vsel %vm296_vm10, %v1645_v5, %v1644_v63  ;;  %v1651_v6 = vrot.slane %v1632_v31, 3  ;;  %v1671_v25 = vperm.slane %v1663_v21, 0  ;;  %vm3540_vm12 = vmmov %vm3538_vm6 }
 0x1d7   :  { %1620 = vst.msk [vmem:[#allocation2 + $0x28] sm:$0xff] %vm137_vm0, %v1618_v27  ;;  %v1648_v14 = vsel %vm298_vm13, %v1647_v9, %v1646_v47  ;;  %v1672_v60 = vperm.slane %v1664_v57, 0  ;;  %v1653_v26 = vrot.slane %v1633_v56, 2  ;;  %v1673_v12 = vperm.slane %v1665_v55, 0 }
 0x1d8   :  { %v1650_v0 = vsel %vm300_vm4, %v1649_v62, %v1648_v14  ;;  %v1701_v41 = vsel %vm294_vm8, %v3125_v39, %v3123_v30  ;;  %v1655_v40 = vrot.slane %v1634_v51, 1  ;;  %v1674_v15 = vperm.slane %v1666_v33, 0 }
 0x1d9   :  { %v1652_v24 = vsel %vm302_vm11, %v1651_v6, %v1650_v0  ;;  %v1702_v21 = vsel %vm296_vm10, %v3127_v19, %v1701_v41  ;;  %v1675_v38 = vperm.slane %v1667_v61, 0  ;;  %v1676_v48 = vperm.slane %v1668_v10, 0 }
 0x1da   :  { %v1654_v57 = vsel %vm3537_vm1, %v1653_v26, %v1652_v24  ;;  %v1703_v55 = vsel %vm298_vm13, %v3129_v49, %v1702_v21  ;;  %v1685_v34 = vadd.f32 %v1669_v45, %v2160_v44  ;;  %v1686_v33 = vadd.f32 %v1670_v22, %v2186_v11 }
 0x1db   :  { %v1656_v8 = vsel %vm3538_vm6, %v1655_v40, %v1654_v57  ;;  %v1704_v30 = vsel %vm300_vm4, %v3139_v32, %v1703_v55  ;;  %v1687_v61 = vadd.f32 %v1671_v25, %v2177_v2  ;;  %v1688_v10 = vadd.f32 %v1672_v60, %v2121_v13 }
 0x1dc   :  { %v3242_v39 = vadd.f32 %v1656_v8, %v3075_v42  ;;  %v1705_v19 = vsel %vm302_vm11, %v3141_v54, %v1704_v30  ;;  %v1689_v49 = vadd.f32 %v1673_v12, %v2130_v17  ;;  %v1690_v32 = vadd.f32 %v1674_v15, %v2216_v46 }
 0x1dd   :  { %v1706_v7 = vsel %vm3539_vm2, %v3143_v50, %v1705_v19  ;;  %v1691_v42 = vadd.f32 %v1675_v38, %v2213_v37  ;;  %v1692_v44 = vadd.f32 %v1676_v48, %v2143_v28 }
 0x1de   :  { %v1707_v11 = vsel %vm3540_vm12, %v3145_v53, %v1706_v7 }
 0x1df   :  { %v3258_v36 = vadd.f32 %v1707_v11, %v1685_v34  ;;  %v3260_v54 = vadd.f32 %v1707_v11, %v1686_v33  ;;  %v3262_v2 = vadd.f32 %v1707_v11, %v1687_v61  ;;  %v3264_v13 = vadd.f32 %v1707_v11, %v1688_v10 }
 0x1e0   :  { %v3266_v17 = vadd.f32 %v1707_v11, %v1689_v49  ;;  %v3268_v50 = vadd.f32 %v1707_v11, %v1690_v32  ;;  %v3270_v46 = vadd.f32 %v1707_v11, %v1691_v42  ;;  %v3272_v37 = vadd.f32 %v1707_v11, %v1692_v44 }
 0x1e1   :  { %v1717_v28 = vsel %vm137_vm0, %v3258_v36, -inf  ;;  %v1724_v53 = vsel %vm137_vm0, %v3260_v54, -inf  ;;  %v1731_v4 = vsel %vm137_vm0, %v3262_v2, -inf  ;;  %v1738_v43 = vsel %vm137_vm0, %v3264_v13, -inf }
 0x1e2   :  { %v1718_v23 = vrot.slane %v1717_v28, 4  ;;  %v1725_v52 = vrot.slane %v1724_v53, 4  ;;  %v1732_v16 = vrot.slane %v1731_v4, 4  ;;  %v1739_v31 = vrot.slane %v1738_v43, 4 }
 0x1e3   :  { %v1745_v59 = vsel %vm137_vm0, %v3266_v17, -inf  ;;  %v1752_v20 = vsel %vm137_vm0, %v3268_v50, -inf  ;;  %v1759_v56 = vsel %vm137_vm0, %v3270_v46, -inf  ;;  %v1766_v5 = vsel %vm137_vm0, %v3272_v37, -inf }
 0x1e4   :  { %v1719_v45 = vmax.f32 %v1717_v28, %v1718_v23  ;;  %v1726_v29 = vmax.f32 %v1724_v53, %v1725_v52  ;;  %v1733_v51 = vmax.f32 %v1731_v4, %v1732_v16  ;;  %v1740_v63 = vmax.f32 %v1738_v43, %v1739_v31 }
 0x1e5   :  { %v1746_v9 = vrot.slane %v1745_v59, 4  ;;  %v1753_v27 = vrot.slane %v1752_v20, 4  ;;  %v1760_v47 = vrot.slane %v1759_v56, 4  ;;  %v1767_v62 = vrot.slane %v1766_v5, 4 }
 0x1e6   :  { %v1720_v22 = vrot.slane %v1719_v45, 2  ;;  %v1727_v14 = vrot.slane %v1726_v29, 2  ;;  %v1734_v6 = vrot.slane %v1733_v51, 2  ;;  %v1741_v25 = vrot.slane %v1740_v63, 2 }
 0x1e7   :  { %v1747_v60 = vmax.f32 %v1745_v59, %v1746_v9  ;;  %v1754_v0 = vmax.f32 %v1752_v20, %v1753_v27  ;;  %v1761_v26 = vmax.f32 %v1759_v56, %v1760_v47  ;;  %v1768_v12 = vmax.f32 %v1766_v5, %v1767_v62 }
 0x1e8   :  { %v1721_v41 = vmax.f32 %v1719_v45, %v1720_v22  ;;  %v1728_v24 = vmax.f32 %v1726_v29, %v1727_v14  ;;  %v1735_v40 = vmax.f32 %v1733_v51, %v1734_v6  ;;  %v1742_v15 = vmax.f32 %v1740_v63, %v1741_v25 }
 0x1e9   :  { %v1748_v21 = vrot.slane %v1747_v60, 2  ;;  %v1755_v57 = vrot.slane %v1754_v0, 2  ;;  %v1762_v38 = vrot.slane %v1761_v26, 2  ;;  %v1769_v48 = vrot.slane %v1768_v12, 2 }
 0x1ea   :  { %v1722_v55 = vrot.slane %v1721_v41, 1  ;;  %v1729_v8 = vrot.slane %v1728_v24, 1  ;;  %v1736_v30 = vrot.slane %v1735_v40, 1  ;;  %v1743_v34 = vrot.slane %v1742_v15, 1 }
 0x1eb   :  { %v1749_v33 = vmax.f32 %v1747_v60, %v1748_v21  ;;  %v1756_v19 = vmax.f32 %v1754_v0, %v1755_v57  ;;  %v1763_v61 = vmax.f32 %v1761_v26, %v1762_v38  ;;  %v1770_v10 = vmax.f32 %v1768_v12, %v1769_v48 }
 0x1ec   :  { %v3290_v49 = vmax.f32 %v1721_v41, %v1722_v55  ;;  %v3292_v7 = vmax.f32 %v1728_v24, %v1729_v8  ;;  %v3294_v32 = vmax.f32 %v1735_v40, %v1736_v30  ;;  %v3296_v42 = vmax.f32 %v1742_v15, %v1743_v34 }
 0x1ed   :  { %v1750_v44 = vrot.slane %v1749_v33, 1  ;;  %v1757_v11 = vrot.slane %v1756_v19, 1  ;;  %v1764_v28 = vrot.slane %v1763_v61, 1  ;;  %v1771_v53 = vrot.slane %v1770_v10, 1 }
 0x1ee   :  { %vm1773_vm5 = vcmp.ge.f32.partialorder %v3258_v36, %v3290_v49  ;;  %vm1774_vm15 = vcmp.ge.f32.partialorder %v3260_v54, %v3292_v7  ;;  %vm1775_vm9 = vcmp.ge.f32.partialorder %v3262_v2, %v3294_v32  ;;  %vm1776_vm3 = vcmp.ge.f32.partialorder %v3264_v13, %v3296_v42 }
 0x1ef   :  { %v3306_v4 = vmax.f32 %v1749_v33, %v1750_v44  ;;  %v3308_v43 = vmax.f32 %v1756_v19, %v1757_v11  ;;  %v3310_v23 = vmax.f32 %v1763_v61, %v1764_v28  ;;  %v3312_v52 = vmax.f32 %v1770_v10, %v1771_v53 }
 0x1f0   :  { %v1781_v16 = vsel %vm1773_vm5, %v2112_v3, 8  ;;  %v1782_v36 = vsel %vm1774_vm15, %v2112_v3, 8  ;;  %v1783_v54 = vsel %vm1775_vm9, %v2112_v3, 8  ;;  %v1784_v2 = vsel %vm1776_vm3, %v2112_v3, 8 }
 0x1f1   :  { %vm1777_vm7 = vcmp.ge.f32.partialorder %v3266_v17, %v3306_v4  ;;  %vm1778_vm1 = vcmp.ge.f32.partialorder %v3268_v50, %v3308_v43  ;;  %vm1779_vm6 = vcmp.ge.f32.partialorder %v3270_v46, %v3310_v23  ;;  %vm1780_vm2 = vcmp.ge.f32.partialorder %v3272_v37, %v3312_v52 }
 0x1f2   :  { %v1785_v13 = vsel %vm1777_vm7, %v2112_v3, 8  ;;  %v1786_v31 = vsel %vm1778_vm1, %v2112_v3, 8  ;;  %v1787_v59 = vsel %vm1779_vm6, %v2112_v3, 8  ;;  %v1789_v20 = vsel %vm137_vm0, %v1781_v16, 2147483647 }
 0x1f3   :  { %v1799_v17 = vsel %vm137_vm0, %v1782_v36, 2147483647  ;;  %v1809_v50 = vsel %vm137_vm0, %v1783_v54, 2147483647  ;;  %v1790_v56 = vrot.slane %v1789_v20, 4  ;;  %v1788_v29 = vsel %vm1780_vm2, %v2112_v3, 8 }
 0x1f4   :  { %v1800_v5 = vrot.slane %v1799_v17, 4  ;;  %v1810_v46 = vrot.slane %v1809_v50, 4  ;;  %v1819_v45 = vsel %vm137_vm0, %v1784_v2, 2147483647  ;;  %v1829_v51 = vsel %vm137_vm0, %v1785_v13, 2147483647 }
 0x1f5   :  { %v1820_v37 = vrot.slane %v1819_v45, 4  ;;  %v1839_v63 = vsel %vm137_vm0, %v1786_v31, 2147483647  ;;  %vm1791_vm12 = vcmp.lt.s32.totalorder %v1789_v20, %v1790_v56  ;;  %v1830_v9 = vrot.slane %v1829_v51, 4 }
 0x1f6   :  { %vm1801_vm5 = vcmp.lt.s32.totalorder %v1799_v17, %v1800_v5  ;;  %vm1811_vm15 = vcmp.lt.s32.totalorder %v1809_v50, %v1810_v46  ;;  %v1792_v27 = vsel %vm1791_vm12, %v1789_v20, %v1790_v56  ;;  %v1840_v0 = vrot.slane %v1839_v63, 4 }
 0x1f7   :  { %v1802_v47 = vsel %vm1801_vm5, %v1799_v17, %v1800_v5  ;;  %v1812_v62 = vsel %vm1811_vm15, %v1809_v50, %v1810_v46  ;;  %vm1821_vm9 = vcmp.lt.s32.totalorder %v1819_v45, %v1820_v37  ;;  %v1793_v22 = vrot.slane %v1792_v27, 2 }
 0x1f8   :  { %v1803_v14 = vrot.slane %v1802_v47, 2  ;;  %v1813_v6 = vrot.slane %v1812_v62, 2  ;;  %v1822_v25 = vsel %vm1821_vm9, %v1819_v45, %v1820_v37  ;;  %vm1831_vm3 = vcmp.lt.s32.totalorder %v1829_v51, %v1830_v9 }
 0x1f9   :  { %v1823_v60 = vrot.slane %v1822_v25, 2  ;;  %v1849_v26 = vsel %vm137_vm0, %v1787_v59, 2147483647  ;;  %vm1794_vm7 = vcmp.lt.s32.totalorder %v1792_v27, %v1793_v22  ;;  %v1832_v12 = vsel %vm1831_vm3, %v1829_v51, %v1830_v9 }
 0x1fa   :  { %vm1804_vm1 = vcmp.lt.s32.totalorder %v1802_v47, %v1803_v14  ;;  %vm1814_vm6 = vcmp.lt.s32.totalorder %v1812_v62, %v1813_v6  ;;  %v1795_v41 = vsel %vm1794_vm7, %v1792_v27, %v1793_v22  ;;  %v1833_v55 = vrot.slane %v1832_v12, 2 }
 0x1fb   :  { %v1805_v24 = vsel %vm1804_vm1, %v1802_v47, %v1803_v14  ;;  %v1815_v40 = vsel %vm1814_vm6, %v1812_v62, %v1813_v6  ;;  %vm1824_vm2 = vcmp.lt.s32.totalorder %v1822_v25, %v1823_v60  ;;  %v1796_v15 = vrot.slane %v1795_v41, 1 }
 0x1fc   :  { %v1806_v21 = vrot.slane %v1805_v24, 1  ;;  %v1816_v57 = vrot.slane %v1815_v40, 1  ;;  %v1825_v38 = vsel %vm1824_vm2, %v1822_v25, %v1823_v60  ;;  %vm1841_vm12 = vcmp.lt.s32.totalorder %v1839_v63, %v1840_v0 }
 0x1fd   :  { %v1826_v48 = vrot.slane %v1825_v38, 1  ;;  %v1850_v8 = vrot.slane %v1849_v26, 4  ;;  %vm1797_vm5 = vcmp.lt.s32.totalorder %v1795_v41, %v1796_v15  ;;  %v1842_v30 = vsel %vm1841_vm12, %v1839_v63, %v1840_v0 }
 0x1fe   :  { %vm1807_vm15 = vcmp.lt.s32.totalorder %v1805_v24, %v1806_v21  ;;  %vm1869_vm9 = vcmp.le.s32.totalorder %v3174_v35, 7  ;;  %v1798_v34 = vsel %vm1797_vm5, %v1795_v41, %v1796_v15  ;;  %vm1817_vm3 = vcmp.lt.s32.totalorder %v1815_v40, %v1816_v57 }
 0x1ff   :  { %v1808_v33 = vsel %vm1807_vm15, %v1805_v24, %v1806_v21  ;;  %vm3338_vm7 = vcmp.lt.s32.totalorder %v1825_v38, %v1826_v48  ;;  %vm1834_vm1 = vcmp.lt.s32.totalorder %v1832_v12, %v1833_v55  ;;  %v1843_v61 = vrot.slane %v1842_v30, 2 }
 0x200   :  { %vm1851_vm6 = vcmp.lt.s32.totalorder %v1849_v26, %v1850_v8  ;;  %v1835_v10 = vsel %vm1834_vm1, %v1832_v12, %v1833_v55  ;;  %v1859_v11 = vsel %vm137_vm0, %v1788_v29, 2147483647  ;;  %v1870_v28 = vsel %vm1869_vm9, 1, %v2076_v1 }
 0x201   :  { %v1852_v44 = vsel %vm1851_vm6, %v1849_v26, %v1850_v8  ;;  %v1836_v53 = vrot.slane %v1835_v10, 1  ;;  %vm1844_vm2 = vcmp.lt.s32.totalorder %v1842_v30, %v1843_v61  ;;  %v1860_v35 = vrot.slane %v1859_v11, 4  ;;  %v1925_v8 = vpop.permute.xlu0 %1924 }
 0x202   :  { %v1853_v16 = vrot.slane %v1852_v44, 2  ;;  %v1818_v36 = vsel %vm1817_vm3, %v1815_v40, %v1816_v57  ;;  %v1845_v54 = vsel %vm1844_vm2, %v1842_v30, %v1843_v61  ;;  %v1873_v2 = vsel %vm294_vm8, %v1808_v33, %v1798_v34 }
 0x203   :  { %vm1883_vm12 = vcmp.eq.s32.totalorder %v2172_v58, 7  ;;  %vm1837_vm5 = vcmp.lt.s32.totalorder %v1835_v10, %v1836_v53  ;;  %v1846_v13 = vrot.slane %v1845_v54, 1  ;;  %vm1861_vm14 = vcmp.lt.s32.totalorder %v1859_v11, %v1860_v35 }
 0x204   :  { %vm1854_vm15 = vcmp.lt.s32.totalorder %v1852_v44, %v1853_v16  ;;  %v1828_v31 = vsel %vm3338_vm7, %v1825_v38, %v1826_v48  ;;  %v1862_v20 = vsel %vm1861_vm14, %v1859_v11, %v1860_v35  ;;  %v1871_v17 = vperm.slane %v1870_v28, 0 }
 0x205   :  { %v1855_v59 = vsel %vm1854_vm15, %v1852_v44, %v1853_v16  ;;  %vm1847_vm9 = vcmp.lt.s32.totalorder %v1845_v54, %v1846_v13  ;;  %v1863_v56 = vrot.slane %v1862_v20, 2  ;;  %v1874_v5 = vsel %vm296_vm10, %v1818_v36, %v1873_v2 }
 0x206   :  { %v1856_v50 = vrot.slane %v1855_v59, 1  ;;  %v1838_v46 = vsel %vm1837_vm5, %v1835_v10, %v1836_v53  ;;  %v1848_v45 = vsel %vm1847_vm9, %v1845_v54, %v1846_v13  ;;  %v1875_v29 = vsel %vm298_vm13, %v1828_v31, %v1874_v5 }
 0x207   :  { %v2066_v37 = vsel %vm1883_vm12, 1.0, %v3488_v18  ;;  %vm1864_vm1 = vcmp.lt.s32.totalorder %v1862_v20, %v1863_v56  ;;  %v1876_v51 = vsel %vm300_vm4, %v1838_v46, %v1875_v29  ;;  %vm3355_vm14 = vcmp.eq.s32.totalorder %v1871_v17, 1 }
 0x208   :  { %vm1857_vm3 = vcmp.lt.s32.totalorder %v1855_v59, %v1856_v50  ;;  %v1887_v63 = vperm.slane %v2066_v37, 0  ;;  %v1865_v9 = vsel %vm1864_vm1, %v1862_v20, %v1863_v56  ;;  %v1877_v27 = vsel %vm302_vm11, %v1848_v45, %v1876_v51 }
 0x209   :  { %v1858_v47 = vsel %vm1857_vm3, %v1855_v59, %v1856_v50  ;;  %v1866_v62 = vrot.slane %v1865_v9, 1  ;;  %vm3545_vm7 = vcmask 1046534   ;;  %vm3546_vm2 = vcmask 1047559  }
 0x20a   :  { %v1890_v14 = vmul.f32 %v1887_v63, %v3292_v7  ;;  %v1878_v6 = vsel %vm3545_vm7, %v1858_v47, %v1877_v27  ;;  %v1891_v18 = vmul.f32 %v1887_v63, %v3294_v32  ;;  %v1892_v25 = vmul.f32 %v1887_v63, %v3296_v42  ;;  %vm3547_vm12 = vmmov %vm3545_vm7 }
 0x20b   :  { %v1893_v60 = vmul.f32 %v1887_v63, %v3306_v4  ;;  %vm1867_vm6 = vcmp.lt.s32.totalorder %v1865_v9, %v1866_v62  ;;  %v1889_v0 = vmul.f32 %v1887_v63, %v3290_v49  ;;  %v1894_v26 = vmul.f32 %v1887_v63, %v3308_v43 }
 0x20c   :  { %v1905_v12 = vrot.slane %v1890_v14, 7  ;;  %v1868_v41 = vsel %vm1867_vm6, %v1865_v9, %v1866_v62  ;;  %v1895_v24 = vmul.f32 %v1887_v63, %v3310_v23  ;;  %v1907_v40 = vrot.slane %v1891_v18, 6  ;;  %v1962_v9 = vld [vmem:[#allocation2 + $0x28] sm:$0xff] }
 0x20d   :  { %v1879_v7 = vsel %vm3546_vm2, %v1868_v41, %v1878_v6  ;;  %v1896_v15 = vmul.f32 %v1887_v63, %v3312_v52  ;;  %v1909_v21 = vrot.slane %v1892_v25, 5  ;;  %v1911_v49 = vrot.slane %v1893_v60, 4 }
 0x20e   :  { %v1906_v32 = vsel %vm294_vm8, %v1905_v12, %v1889_v0  ;;  %v1880_v42 = vsel %vm3355_vm14, 0, %v1879_v7  ;;  %v1913_v57 = vrot.slane %v1894_v26, 3  ;;  %v1915_v38 = vrot.slane %v1895_v24, 2  ;;  %vm3548_vm8 = vmmov %vm3546_vm2  ;;  %v1976_v12 = vld [vmem:[#allocation2 + $0x20] sm:$0xff] }
 0x20f   :  { %v1908_v4 = vsel %vm296_vm10, %v1907_v40, %v1906_v32  ;;  %1882 = vst.msk [vmem:[#allocation2 + $0x30] sm:$0xff] %vm137_vm0, %v1880_v42  ;;  %v1917_v52 = vrot.slane %v1896_v15, 1  ;;  %vm3549_vm9 = vcmp.eq.s32.totalorder %v2172_v58, 6  ;;  %vm3550_vm1 = vcmp.eq.s32.totalorder %v2172_v58, 5 }
 0x210   :  { %v1910_v43 = vsel %vm298_vm13, %v1909_v21, %v1908_v4  ;;  %vm3551_vm7 = vcmp.eq.s32.totalorder %v2172_v58, 4  ;;  %vm3552_vm2 = vcmp.eq.s32.totalorder %v2172_v58, 3 }
 0x211   :  { %v1912_v23 = vsel %vm300_vm4, %v1911_v49, %v1910_v43 }
 0x212   :  { %v1914_v48 = vsel %vm302_vm11, %v1913_v57, %v1912_v23  ;;  %vm1947_vm11 = vcmask 8192   ;;  %v1990_v57 = vld [vmem:[#allocation2 + $0x18] sm:$0xff] }
 0x213   :  { %v1916_v55 = vsel %vm3547_vm12, %v1915_v38, %v1914_v48 }
 0x214   :  { %v1918_v30 = vsel %vm3548_vm8, %v1917_v52, %v1916_v55  ;;  %vm3553_vm8 = vcmp.eq.s32.totalorder %v2172_v58, 2 }
 0x215   :  { %v1920_v34 = vadd.f32 %v1918_v30, %v3242_v39 }
 0x216   :  { %v1949_v59 = vld [vmem:[#allocation2 + $0x30] sm:$0xff] }
 0x217   :  { %v1927_v33 = vadd.f32 %v1925_v8, %v1920_v34 }
 0x219   :  { %v1928_v19 = vsel %vm137_vm0, %v1927_v33, -inf }
 0x21a   :  { %v1929_v61 = vrot.slane %v1928_v19, 4 }
 0x21c   :  { %v1930_v10 = vmax.f32 %v1928_v19, %v1929_v61 }
 0x21e   :  { %v1931_v44 = vrot.slane %v1930_v10, 2 }
 0x220   :  { %v1932_v11 = vmax.f32 %v1930_v10, %v1931_v44  ;;  %v2004_v10 = vld [vmem:[#allocation2 + $0x10] sm:$0xff] }
 0x222   :  { %v1933_v28 = vrot.slane %v1932_v11, 1 }
 0x224   :  { %v1934_v53 = vmax.f32 %v1932_v11, %v1933_v28 }
 0x226   :  { %vm1935_vm10 = vcmp.ge.f32.partialorder %v1927_v33, %v1934_v53 }
 0x227   :  { %v1936_v16 = vsel %vm1935_vm10, %v2112_v3, 8 }
 0x228   :  { %v1937_v35 = vsel %vm137_vm0, %v1936_v16, 2147483647 }
 0x229   :  { %v1938_v36 = vrot.slane %v1937_v35, 4 }
 0x22b   :  { %vm1939_vm13 = vcmp.lt.s32.totalorder %v1937_v35, %v1938_v36 }
 0x22c   :  { %v1940_v54 = vsel %vm1939_vm13, %v1937_v35, %v1938_v36  ;;  %vm3554_vm13 = vcmp.eq.s32.totalorder %v2172_v58, 1 }
 0x22d   :  { %v1941_v2 = vrot.slane %v1940_v54, 2 }
 0x22f   :  { %vm1942_vm4 = vcmp.lt.s32.totalorder %v1940_v54, %v1941_v2 }
 0x230   :  { %v1943_v39 = vsel %vm1942_vm4, %v1940_v54, %v1941_v2 }
 0x231   :  { %v1944_v13 = vrot.slane %v1943_v39, 1 }
 0x233   :  { %vm1945_vm5 = vcmp.lt.s32.totalorder %v1943_v39, %v1944_v13 }
 0x234   :  { %v3383_v31 = vsel %vm1945_vm5, %v1943_v39, %v1944_v13  ;;  %vm2044_vm5 = vcmp.eq.s32.totalorder %v2172_v58, 0 }
 0x235   :  { %1948 = vst.msk [vmem:[%s3465_s5 + $0x7] sm:$0x1] %vm1947_vm11, %v3383_v31  ;;  %vm1950_vm15 = vcmp.eq.s32.totalorder %v2112_v3, %v3383_v31 }
 0x236   :  { %v1951_v20 = vsel %vm1950_vm15, 1, %v2076_v1 }
 0x237   :  { %v1952_v17 = vmul.u32 %v1951_v20, %v1949_v59  ;;  %v2018_v59 = vld [vmem:[#allocation2 + $0x8] sm:$0xff] }
 0x239   :  { %v1953_v50 = vsel %vm137_vm0, %v1952_v17, 0 }
 0x23a   :  { %v1954_v56 = vrot.slane %v1953_v50, 4 }
 0x23c   :  { %v1955_v5 = vadd.s32 %v1954_v56, %v1953_v50 }
 0x23e   :  { %v1956_v46 = vrot.slane %v1955_v5, 2 }
 0x240   :  { %v1957_v45 = vadd.s32 %v1956_v46, %v1955_v5 }
 0x242   :  { %v1958_v29 = vrot.slane %v1957_v45, 1 }
 0x244   :  { %v1959_v37 = vadd.s32 %v1958_v29, %v1957_v45 }
 0x246   :  { %v1960_v51 = vsel %vm3549_vm9, %v3383_v31, %v1959_v37 }
 0x247   :  { %1961 = vst.msk [vmem:[%s3465_s5 + $0x6] sm:$0x1] %vm1947_vm11, %v1960_v51  ;;  %v1963_v63 = vperm.slane %v1960_v51, 0 }
 0x249   :  { %vm1964_vm3 = vcmp.eq.s32.totalorder %v2112_v3, %v1963_v63 }
 0x24a   :  { %v1965_v27 = vsel %vm1964_vm3, 1, %v2076_v1 }
 0x24b   :  { %v1966_v47 = vmul.u32 %v1965_v27, %v1962_v9  ;;  %v2032_v9 = vld [vmem:[#allocation2] sm:$0xff] }
 0x24d   :  { %v1967_v62 = vsel %vm137_vm0, %v1966_v47, 0 }
 0x24e   :  { %v1968_v22 = vrot.slane %v1967_v62, 4 }
 0x250   :  { %v1969_v14 = vadd.s32 %v1968_v22, %v1967_v62 }
 0x252   :  { %v1970_v6 = vrot.slane %v1969_v14, 2 }
 0x254   :  { %v1971_v18 = vadd.s32 %v1970_v6, %v1969_v14 }
 0x256   :  { %v1972_v25 = vrot.slane %v1971_v18, 1 }
 0x258   :  { %v1973_v60 = vadd.s32 %v1972_v25, %v1971_v18 }
 0x25a   :  { %v1974_v0 = vsel %vm3550_vm1, %v3383_v31, %v1973_v60 }
 0x25b   :  { %1975 = vst.msk [vmem:[%s3465_s5 + $0x5] sm:$0x1] %vm1947_vm11, %v1974_v0  ;;  %v1977_v26 = vperm.slane %v1974_v0, 0 }
 0x25d   :  { %vm1978_vm14 = vcmp.eq.s32.totalorder %v2112_v3, %v1977_v26 }
 0x25e   :  { %v1979_v41 = vsel %vm1978_vm14, 1, %v2076_v1 }
 0x25f   :  { %v1980_v24 = vmul.u32 %v1979_v41, %v1976_v12 }
 0x261   :  { %v1981_v40 = vsel %vm137_vm0, %v1980_v24, 0 }
 0x262   :  { %v1982_v7 = vrot.slane %v1981_v40, 4 }
 0x264   :  { %v1983_v15 = vadd.s32 %v1982_v7, %v1981_v40 }
 0x266   :  { %v1984_v32 = vrot.slane %v1983_v15, 2 }
 0x268   :  { %v1985_v21 = vadd.s32 %v1984_v32, %v1983_v15 }
 0x26a   :  { %v1986_v42 = vrot.slane %v1985_v21, 1 }
 0x26c   :  { %v1987_v4 = vadd.s32 %v1986_v42, %v1985_v21 }
 0x26e   :  { %v1988_v49 = vsel %vm3551_vm7, %v3383_v31, %v1987_v4 }
 0x26f   :  { %1989 = vst.msk [vmem:[%s3465_s5 + $0x4] sm:$0x1] %vm1947_vm11, %v1988_v49  ;;  %v1991_v43 = vperm.slane %v1988_v49, 0 }
 0x271   :  { %vm1992_vm6 = vcmp.eq.s32.totalorder %v2112_v3, %v1991_v43 }
 0x272   :  { %v1993_v23 = vsel %vm1992_vm6, 1, %v2076_v1 }
 0x273   :  { %v1994_v38 = vmul.u32 %v1993_v23, %v1990_v57 }
 0x275   :  { %v1995_v48 = vsel %vm137_vm0, %v1994_v38, 0 }
 0x276   :  { %v1996_v52 = vrot.slane %v1995_v48, 4 }
 0x278   :  { %v1997_v55 = vadd.s32 %v1996_v52, %v1995_v48 }
 0x27a   :  { %v1998_v8 = vrot.slane %v1997_v55, 2 }
 0x27c   :  { %v1999_v30 = vadd.s32 %v1998_v8, %v1997_v55 }
 0x27e   :  { %v2000_v34 = vrot.slane %v1999_v30, 1 }
 0x280   :  { %v2001_v33 = vadd.s32 %v2000_v34, %v1999_v30 }
 0x282   :  { %v2002_v19 = vsel %vm3552_vm2, %v3383_v31, %v2001_v33 }
 0x283   :  { %2003 = vst.msk [vmem:[%s3465_s5 + $0x3] sm:$0x1] %vm1947_vm11, %v2002_v19  ;;  %v2005_v61 = vperm.slane %v2002_v19, 0 }
 0x285   :  { %vm2006_vm12 = vcmp.eq.s32.totalorder %v2112_v3, %v2005_v61 }
 0x286   :  { %v2007_v44 = vsel %vm2006_vm12, 1, %v2076_v1 }
 0x287   :  { %v2008_v11 = vmul.u32 %v2007_v44, %v2004_v10 }
 0x289   :  { %v2009_v28 = vsel %vm137_vm0, %v2008_v11, 0 }
 0x28a   :  { %v2010_v53 = vrot.slane %v2009_v28, 4 }
 0x28c   :  { %v2011_v16 = vadd.s32 %v2010_v53, %v2009_v28 }
 0x28e   :  { %v2012_v35 = vrot.slane %v2011_v16, 2 }
 0x290   :  { %v2013_v36 = vadd.s32 %v2012_v35, %v2011_v16 }
 0x292   :  { %v2014_v54 = vrot.slane %v2013_v36, 1 }
 0x294   :  { %v2015_v2 = vadd.s32 %v2014_v54, %v2013_v36 }
 0x296   :  { %v2016_v39 = vsel %vm3553_vm8, %v3383_v31, %v2015_v2 }
 0x297   :  { %2017 = vst.msk [vmem:[%s3465_s5 + $0x2] sm:$0x1] %vm1947_vm11, %v2016_v39  ;;  %v2019_v13 = vperm.slane %v2016_v39, 0 }
 0x299   :  { %vm2020_vm10 = vcmp.eq.s32.totalorder %v2112_v3, %v2019_v13 }
 0x29a   :  { %v2021_v20 = vsel %vm2020_vm10, 1, %v2076_v1 }
 0x29b   :  { %v2022_v17 = vmul.u32 %v2021_v20, %v2018_v59 }
 0x29d   :  { %v2023_v50 = vsel %vm137_vm0, %v2022_v17, 0 }
 0x29e   :  { %v2024_v56 = vrot.slane %v2023_v50, 4 }
 0x2a0   :  { %v2025_v5 = vadd.s32 %v2024_v56, %v2023_v50 }
 0x2a2   :  { %v2026_v46 = vrot.slane %v2025_v5, 2 }
 0x2a4   :  { %v2027_v45 = vadd.s32 %v2026_v46, %v2025_v5 }
 0x2a6   :  { %v2028_v29 = vrot.slane %v2027_v45, 1 }
 0x2a8   :  { %v2029_v37 = vadd.s32 %v2028_v29, %v2027_v45 }
 0x2aa   :  { %v2030_v51 = vsel %vm3554_vm13, %v3383_v31, %v2029_v37 }
 0x2ab   :  { %2031 = vst.msk [vmem:[%s3465_s5 + $0x1] sm:$0x1] %vm1947_vm11, %v2030_v51  ;;  %v2033_v63 = vperm.slane %v2030_v51, 0 }
 0x2ad   :  { %vm2034_vm4 = vcmp.eq.s32.totalorder %v2112_v3, %v2033_v63 }
 0x2ae   :  { %v2035_v27 = vsel %vm2034_vm4, 1, %v2076_v1 }
 0x2af   :  { %v2036_v47 = vmul.u32 %v2035_v27, %v2032_v9 }
 0x2b1   :  { %v2037_v62 = vsel %vm137_vm0, %v2036_v47, 0 }
 0x2b2   :  { %v2038_v22 = vrot.slane %v2037_v62, 4 }
 0x2b4   :  { %v2039_v14 = vadd.s32 %v2038_v22, %v2037_v62 }
 0x2b6   :  { %v2040_v6 = vrot.slane %v2039_v14, 2 }
 0x2b8   :  { %v2041_v18 = vadd.s32 %v2040_v6, %v2039_v14 }
 0x2ba   :  { %v2042_v25 = vrot.slane %v2041_v18, 1 }
 0x2bc   :  { %v2043_v60 = vadd.s32 %v2042_v25, %v2041_v18 }
 0x2be   :  { %v2045_v0 = vsel %vm2044_vm5, %v3383_v31, %v2043_v60 }
 0x2bf   :  { %2046 = vst.msk [vmem:[%s3465_s5] sm:$0x1] %vm1947_vm11, %v2045_v0 }

// kernel: cnn_lstm_crf_forward.4
= control target key start
LH: loop header
LB: loop body
LE: loop exit
PB: predicated region body
PF: predicated region fallthrough
CT: control target
= control target key end

     0   :  { %vm335_vm0 = vcmask 1041408   ;;  %vm337_vm1 = vcmask 1045508   ;;  %vm341_vm2 = vcmask 1043458   ;;  %vm343_vm3 = vcmask 1045504   ;;  %s3463_s2 = inlined_call_operand.vmem [shape: bf16[128,512], index: 2, kind: input, shape index: {}]   ;;  %s3464_s0 = inlined_call_operand.vmem [shape: bf16[8,2,128], index: 0, kind: input, shape index: {}]   ;;  %s3465_s4 = inlined_call_operand.vmem [shape: bf16[64,256], index: 4, kind: input, shape index: {}]   ;;  %s3466_s3 = inlined_call_operand.vmem [shape: bf16[64,256], index: 3, kind: input, shape index: {}]   ;;  %s3467_s5 = inlined_call_operand.vmem [shape: f32[1,512], index: 5, kind: input, shape index: {}]   ;;  %s3468_s1 = inlined_call_operand.vmem [shape: s32[2,1], index: 1, kind: input, shape index: {}]   ;;  %s3469_s6 = inlined_call_operand.vmem [shape: bf16[8,128], index: 6, kind: input, shape index: {}]   ;;  %s3470_s7 = inlined_call_operand.vmem [shape: f32[8,1], index: 7, kind: input, shape index: {}]   ;;  %s3471_s8 = inlined_call_operand.vmem [shape: f32[8,8,2], index: 8, kind: output, shape index: {}]  }
   0x1   :  { %v2137_v0 = vld [vmem:[%s3463_s2 + $0xe0] sm:$0xf]  ;;  %v2280_v1 = vld [vmem:[%s3463_s2 + $0xec] sm:$0xf0]  ;;  %v2278_v2 = vld [vmem:[%s3463_s2 + $0xe4] sm:$0xf] }
   0x2   :  { %v2138_v3 = vor.u32 %v2280_v1, %v2137_v0  ;;  %v2139_v4 = vld [vmem:[%s3463_s2 + $0xf0] sm:$0xf0]  ;;  %v2145_v5 = vld [vmem:[%s3463_s2 + $0xe8] sm:$0xf]  ;;  %v2281_v6 = vld [vmem:[%s3463_s2 + $0xf4] sm:$0xf0] }
   0x3   :  { %v2142_v7 = vor.u32 %v2278_v2, %v2139_v4  ;;  %v2146_v8 = vor.u32 %v2281_v6, %v2145_v5  ;;  %v2279_v9 = vld [vmem:[%s3463_s2 + $0xec] sm:$0xf]  ;;  %v2147_v10 = vld [vmem:[%s3463_s2 + $0xf8] sm:$0xf0]  ;;  %v2121_v11 = vld [vmem:[%s3463_s2 + $0xc0] sm:$0xf] }
   0x4   :  { %265 = vmatpush.bf16.msra.mxu0 %v2138_v3  ;;  %v2150_v12 = vor.u32 %v2279_v9, %v2147_v10  ;;  %v2276_v13 = vld [vmem:[%s3463_s2 + $0xcc] sm:$0xf0]  ;;  %v2274_v14 = vld [vmem:[%s3463_s2 + $0xc4] sm:$0xf]  ;;  %v2123_v15 = vld [vmem:[%s3463_s2 + $0xd0] sm:$0xf0] }
   0x5   :  { %279 = vmatpush.bf16.msra.mxu1 %v2142_v7  ;;  %293 = vmatpush.bf16.msra.mxu2 %v2146_v8  ;;  %v2122_v16 = vor.u32 %v2276_v13, %v2121_v11  ;;  %v2126_v17 = vor.u32 %v2274_v14, %v2123_v15  ;;  %v2129_v18 = vld [vmem:[%s3463_s2 + $0xc8] sm:$0xf]  ;;  %v2277_v19 = vld [vmem:[%s3463_s2 + $0xd4] sm:$0xf0]  ;;  %v2275_v20 = vld [vmem:[%s3463_s2 + $0xcc] sm:$0xf] }
   0x6   :  { %307 = vmatpush.bf16.msra.mxu3 %v2150_v12  ;;  %v2130_v21 = vor.u32 %v2277_v19, %v2129_v18  ;;  %v2131_v22 = vld [vmem:[%s3463_s2 + $0xd8] sm:$0xf0]  ;;  %v2105_v23 = vld [vmem:[%s3463_s2 + $0xa0] sm:$0xf]  ;;  %v2272_v24 = vld [vmem:[%s3463_s2 + $0xac] sm:$0xf0] }
   0x7   :  { %v2134_v25 = vor.u32 %v2275_v20, %v2131_v22  ;;  %v2270_v26 = vld [vmem:[%s3463_s2 + $0xa4] sm:$0xf]  ;;  %v2107_v27 = vld [vmem:[%s3463_s2 + $0xb0] sm:$0xf0]  ;;  %v2113_v28 = vld [vmem:[%s3463_s2 + $0xa8] sm:$0xf]  ;;  %v2106_v29 = vor.u32 %v2272_v24, %v2105_v23 }
   0x8   :  { %266 = vmatpush.bf16.msra.mxu0 %v2122_v16  ;;  %v2273_v30 = vld [vmem:[%s3463_s2 + $0xb4] sm:$0xf0]  ;;  %v2271_v31 = vld [vmem:[%s3463_s2 + $0xac] sm:$0xf]  ;;  %v2115_v32 = vld [vmem:[%s3463_s2 + $0xb8] sm:$0xf0]  ;;  %v2110_v33 = vor.u32 %v2270_v26, %v2107_v27 }
   0x9   :  { %280 = vmatpush.bf16.msra.mxu1 %v2126_v17  ;;  %294 = vmatpush.bf16.msra.mxu2 %v2130_v21  ;;  %v2114_v34 = vor.u32 %v2273_v30, %v2113_v28  ;;  %v2089_v35 = vld [vmem:[%s3463_s2 + $0x80] sm:$0xf]  ;;  %v2268_v36 = vld [vmem:[%s3463_s2 + $0x8c] sm:$0xf0]  ;;  %v2266_v37 = vld [vmem:[%s3463_s2 + $0x84] sm:$0xf]  ;;  %v2118_v38 = vor.u32 %v2271_v31, %v2115_v32 }
   0xa   :  { %308 = vmatpush.bf16.msra.mxu3 %v2134_v25  ;;  %v2091_v39 = vld [vmem:[%s3463_s2 + $0x90] sm:$0xf0]  ;;  %v2097_v40 = vld [vmem:[%s3463_s2 + $0x88] sm:$0xf]  ;;  %v2269_v41 = vld [vmem:[%s3463_s2 + $0x94] sm:$0xf0]  ;;  %v2090_v44 = vor.u32 %v2268_v36, %v2089_v35 }
   0xb   :  { %v2267_v42 = vld [vmem:[%s3463_s2 + $0x8c] sm:$0xf]  ;;  %v2099_v43 = vld [vmem:[%s3463_s2 + $0x98] sm:$0xf0]  ;;  %v2094_v45 = vor.u32 %v2266_v37, %v2091_v39  ;;  %v2098_v46 = vor.u32 %v2269_v41, %v2097_v40  ;;  %v2073_v47 = vld [vmem:[%s3463_s2 + $0x60] sm:$0xf] }
   0xc   :  { %267 = vmatpush.bf16.msra.mxu0 %v2106_v29  ;;  %v2264_v48 = vld [vmem:[%s3463_s2 + $0x6c] sm:$0xf0]  ;;  %v2262_v49 = vld [vmem:[%s3463_s2 + $0x64] sm:$0xf]  ;;  %v2102_v50 = vor.u32 %v2267_v42, %v2099_v43  ;;  %v2075_v51 = vld [vmem:[%s3463_s2 + $0x70] sm:$0xf0] }
   0xd   :  { %281 = vmatpush.bf16.msra.mxu1 %v2110_v33  ;;  %295 = vmatpush.bf16.msra.mxu2 %v2114_v34  ;;  %v2081_v52 = vld [vmem:[%s3463_s2 + $0x68] sm:$0xf]  ;;  %v2265_v53 = vld [vmem:[%s3463_s2 + $0x74] sm:$0xf0]  ;;  %v2263_v54 = vld [vmem:[%s3463_s2 + $0x6c] sm:$0xf]  ;;  %v2074_v56 = vor.u32 %v2264_v48, %v2073_v47  ;;  %v2078_v57 = vor.u32 %v2262_v49, %v2075_v51 }
   0xe   :  { %309 = vmatpush.bf16.msra.mxu3 %v2118_v38  ;;  %v2083_v55 = vld [vmem:[%s3463_s2 + $0x78] sm:$0xf0]  ;;  %v2082_v58 = vor.u32 %v2265_v53, %v2081_v52  ;;  %v2057_v59 = vld [vmem:[%s3463_s2 + $0x40] sm:$0xf]  ;;  %v2260_v60 = vld [vmem:[%s3463_s2 + $0x4c] sm:$0xf0] }
   0xf   :  { %v2258_v61 = vld [vmem:[%s3463_s2 + $0x44] sm:$0xf]  ;;  %v2086_v62 = vor.u32 %v2263_v54, %v2083_v55  ;;  %v2059_v63 = vld [vmem:[%s3463_s2 + $0x50] sm:$0xf0]  ;;  %v2065_v0 = vld [vmem:[%s3463_s2 + $0x48] sm:$0xf]  ;;  %v2058_v4 = vor.u32 %v2260_v60, %v2057_v59 }
  0x10   :  { %268 = vmatpush.bf16.msra.mxu0 %v2090_v44  ;;  %v2261_v1 = vld [vmem:[%s3463_s2 + $0x54] sm:$0xf0]  ;;  %v2259_v2 = vld [vmem:[%s3463_s2 + $0x4c] sm:$0xf]  ;;  %v2067_v3 = vld [vmem:[%s3463_s2 + $0x58] sm:$0xf0]  ;;  %v2062_v8 = vor.u32 %v2258_v61, %v2059_v63 }
  0x11   :  { %282 = vmatpush.bf16.msra.mxu1 %v2094_v45  ;;  %296 = vmatpush.bf16.msra.mxu2 %v2098_v46  ;;  %v2041_v5 = vld [vmem:[%s3463_s2 + $0x20] sm:$0xf]  ;;  %v2256_v6 = vld [vmem:[%s3463_s2 + $0x2c] sm:$0xf0]  ;;  %v2254_v7 = vld [vmem:[%s3463_s2 + $0x24] sm:$0xf]  ;;  %v2066_v9 = vor.u32 %v2261_v1, %v2065_v0  ;;  %v2070_v13 = vor.u32 %v2259_v2, %v2067_v3 }
  0x12   :  { %310 = vmatpush.bf16.msra.mxu3 %v2102_v50  ;;  %v2043_v10 = vld [vmem:[%s3463_s2 + $0x30] sm:$0xf0]  ;;  %v2049_v11 = vld [vmem:[%s3463_s2 + $0x28] sm:$0xf]  ;;  %v2257_v12 = vld [vmem:[%s3463_s2 + $0x34] sm:$0xf0]  ;;  %v2042_v20 = vor.u32 %v2256_v6, %v2041_v5 }
  0x13   :  { %v2255_v14 = vld [vmem:[%s3463_s2 + $0x2c] sm:$0xf]  ;;  %v2051_v15 = vld [vmem:[%s3463_s2 + $0x38] sm:$0xf0]  ;;  %v30_v16 = vld [vmem:[%s3464_s0] sm:$0x1]  ;;  %v2046_v27 = vor.u32 %v2254_v7, %v2043_v10  ;;  %v2050_v28 = vor.u32 %v2257_v12, %v2049_v11 }
  0x14   :  { %269 = vmatpush.bf16.msra.mxu0 %v2074_v56  ;;  %v2025_v17 = vld [vmem:[%s3463_s2] sm:$0xf]  ;;  %v2252_v18 = vld [vmem:[%s3463_s2 + $0xc] sm:$0xf0]  ;;  %v2250_v21 = vld [vmem:[%s3463_s2 + $0x4] sm:$0xf]  ;;  %v2054_v33 = vor.u32 %v2255_v14, %v2051_v15 }
  0x15   :  { %283 = vmatpush.bf16.msra.mxu1 %v2078_v57  ;;  %297 = vmatpush.bf16.msra.mxu2 %v2082_v58  ;;  %v31_v19 = vld [vmem:[%s3464_s0 + $0x1] sm:$0x1]  ;;  %v2027_v22 = vld [vmem:[%s3463_s2 + $0x10] sm:$0xf0]  ;;  %v2033_v23 = vld [vmem:[%s3463_s2 + $0x8] sm:$0xf]  ;;  %v2026_v40 = vor.u32 %v2252_v18, %v2025_v17 }
  0x16   :  { %311 = vmatpush.bf16.msra.mxu3 %v2086_v62  ;;  %v2253_v24 = vld [vmem:[%s3463_s2 + $0x14] sm:$0xf0]  ;;  %v32_v25 = vld [vmem:[%s3464_s0 + $0x2] sm:$0x1]  ;;  %v33_v26 = vld [vmem:[%s3464_s0 + $0x3] sm:$0x1]  ;;  %v2030_v43 = vor.u32 %v2250_v21, %v2027_v22 }
  0x17   :  { %v2251_v29 = vld [vmem:[%s3463_s2 + $0xc] sm:$0xf]  ;;  %v2035_v30 = vld [vmem:[%s3463_s2 + $0x18] sm:$0xf0]  ;;  %v34_v31 = vld [vmem:[%s3464_s0 + $0x4] sm:$0x1]  ;;  %v2034_v44 = vor.u32 %v2253_v24, %v2033_v23 }
  0x18   :  { %270 = vmatpush.bf16.msra.mxu0 %v2058_v4  ;;  %v35_v32 = vld [vmem:[%s3464_s0 + $0x5] sm:$0x1]  ;;  %81 = vst [vmem:[#allocation1] ss:$9 sm:$0xff] %v30_v16  ;;  %v36_v34 = vld [vmem:[%s3464_s0 + $0x6] sm:$0x1]  ;;  %v2038_v47 = vor.u32 %v2251_v29, %v2035_v30 }
  0x19   :  { %284 = vmatpush.bf16.msra.mxu1 %v2062_v8  ;;  %298 = vmatpush.bf16.msra.mxu2 %v2066_v9  ;;  %84 = vst [vmem:[#allocation1 + $0x1] ss:$9 sm:$0xff] %v31_v19  ;;  %v2209_v35 = vld [vmem:[%s3465_s4 + $0x30] sm:$0xf]  ;;  %v2297_v36 = vld [vmem:[%s3465_s4 + $0x34] sm:$0xf0] }
  0x1a   :  { %312 = vmatpush.bf16.msra.mxu3 %v2070_v13  ;;  %v37_v37 = vld [vmem:[%s3464_s0 + $0x7] sm:$0x1]  ;;  %87 = vst [vmem:[#allocation1 + $0x2] ss:$9 sm:$0xff] %v32_v25  ;;  %v2296_v38 = vld [vmem:[%s3465_s4 + $0x34] sm:$0xf]  ;;  %v2718_v48 = vor.u32 %v2297_v36, %v2209_v35 }
  0x1b   :  { %v2211_v39 = vld [vmem:[%s3465_s4 + $0x38] sm:$0xf0]  ;;  %90 = vst [vmem:[#allocation1 + $0x3] ss:$9 sm:$0xff] %v33_v26  ;;  %v2288_v41 = vld [vmem:[%s3466_s3 + $0x34] sm:$0xf] }
  0x1c   :  { %271 = vmatpush.bf16.msra.mxu0 %v2042_v20  ;;  %v2179_v42 = vld [vmem:[%s3466_s3 + $0x38] sm:$0xf0]  ;;  %93 = vst [vmem:[#allocation1 + $0x4] ss:$9 sm:$0xff] %v34_v31  ;;  %v2177_v45 = vld [vmem:[%s3466_s3 + $0x30] sm:$0xf]  ;;  %v2726_v51 = vor.u32 %v2296_v38, %v2211_v39 }
  0x1d   :  { %285 = vmatpush.bf16.msra.mxu1 %v2046_v27  ;;  %299 = vmatpush.bf16.msra.mxu2 %v2050_v28  ;;  %v2289_v46 = vld [vmem:[%s3466_s3 + $0x34] sm:$0xf0]  ;;  %96 = vst [vmem:[#allocation1 + $0x5] ss:$9 sm:$0xff] %v35_v32  ;;  %v2201_v49 = vld [vmem:[%s3465_s4 + $0x20] sm:$0xf]  ;;  %v2728_v52 = vor.u32 %v2288_v41, %v2179_v42 }
  0x1e   :  { %313 = vmatpush.bf16.msra.mxu3 %v2054_v33  ;;  %v2295_v50 = vld [vmem:[%s3465_s4 + $0x24] sm:$0xf0]  ;;  %99 = vst [vmem:[#allocation1 + $0x6] ss:$9 sm:$0xff] %v36_v34  ;;  %v2294_v53 = vld [vmem:[%s3465_s4 + $0x24] sm:$0xf]  ;;  %v2736_v55 = vor.u32 %v2289_v46, %v2177_v45 }
  0x1f   :  { %v2203_v54 = vld [vmem:[%s3465_s4 + $0x28] sm:$0xf0]  ;;  %102 = vst [vmem:[#allocation1 + $0x7] ss:$9 sm:$0xff] %v37_v37  ;;  %v2286_v56 = vld [vmem:[%s3466_s3 + $0x24] sm:$0xf]  ;;  %v2745_v58 = vor.u32 %v2295_v50, %v2201_v49 }
  0x20   :  { %272 = vmatpush.bf16.msra.mxu0 %v2026_v40  ;;  %v2171_v57 = vld [vmem:[%s3466_s3 + $0x28] sm:$0xf0]  ;;  %v2169_v59 = vld [vmem:[%s3466_s3 + $0x20] sm:$0xf]  ;;  %v2287_v60 = vld [vmem:[%s3466_s3 + $0x24] sm:$0xf0]  ;;  %v2755_v61 = vor.u32 %v2294_v53, %v2203_v54 }
  0x21   :  { %286 = vmatpush.bf16.msra.mxu1 %v2030_v43  ;;  %300 = vmatpush.bf16.msra.mxu2 %v2034_v44  ;;  %v2757_v62 = vor.u32 %v2286_v56, %v2171_v57  ;;  %v2193_v63 = vld [vmem:[%s3465_s4 + $0x10] sm:$0xf]  ;;  %v2293_v0 = vld [vmem:[%s3465_s4 + $0x14] sm:$0xf0]  ;;  %v2292_v1 = vld [vmem:[%s3465_s4 + $0x14] sm:$0xf]  ;;  %v2779_v5 = vor.u32 %v2287_v60, %v2169_v59 }
  0x22   :  { %314 = vmatpush.bf16.msra.mxu3 %v2038_v47  ;;  %v2195_v2 = vld [vmem:[%s3465_s4 + $0x18] sm:$0xf0]  ;;  %v2284_v3 = vld [vmem:[%s3466_s3 + $0x14] sm:$0xf]  ;;  %v2781_v6 = vor.u32 %v2293_v0, %v2193_v63  ;;  %v2161_v7 = vld [vmem:[%s3466_s3 + $0x10] sm:$0xf] }
  0x23   :  { %v2163_v4 = vld [vmem:[%s3466_s3 + $0x18] sm:$0xf0]  ;;  %v2285_v8 = vld [vmem:[%s3466_s3 + $0x14] sm:$0xf0]  ;;  %v2185_v9 = vld [vmem:[%s3465_s4] sm:$0xf]  ;;  %v2794_v11 = vor.u32 %v2292_v1, %v2195_v2 }
  0x24   :  { %454 = vmatpush.bf16.msrb.mxu0 %v2736_v55  ;;  %v2796_v12 = vor.u32 %v2284_v3, %v2163_v4  ;;  %v2291_v13 = vld [vmem:[%s3465_s4 + $0x4] sm:$0xf0]  ;;  %v2290_v14 = vld [vmem:[%s3465_s4 + $0x4] sm:$0xf]  ;;  %v2187_v15 = vld [vmem:[%s3465_s4 + $0x8] sm:$0xf0]  ;;  %v2815_v18 = vor.u32 %v2285_v8, %v2161_v7 }
  0x25   :  { %520 = vmatpush.bf16.msrb.mxu2 %v2718_v48  ;;  %467 = vmatpush.bf16.msrb.mxu1 %v2728_v52  ;;  %v2282_v16 = vld [vmem:[%s3466_s3 + $0x4] sm:$0xf]  ;;  %v2155_v17 = vld [vmem:[%s3466_s3 + $0x8] sm:$0xf0]  ;;  %v2817_v19 = vor.u32 %v2291_v13, %v2185_v9  ;;  %v2821_v20 = vor.u32 %v2290_v14, %v2187_v15  ;;  %v2153_v22 = vld [vmem:[%s3466_s3] sm:$0xf] }
  0x26   :  { %533 = vmatpush.bf16.msrb.mxu3 %v2726_v51  ;;  %v103_v10 = vld [vmem:[#allocation1] sm:$0xff]  ;;  %v2823_v21 = vor.u32 %v2282_v16, %v2155_v17  ;;  %v2283_v23 = vld [vmem:[%s3466_s3 + $0x4] sm:$0xf0]  ;;  %v2431_v24 = vmov 0   ;;  %vm339_vm4 = vcmask 1043456   ;;  %vm345_vm5 = vcmask 1045506  }
  0x27   :  { %273 = vmatmul.bf16.vlgmr.msra.gmra.mxu0 %v103_v10  ;;  %287 = vmatmul.bf16.vlgmr.msra.gmra.mxu1 %v103_v10  ;;  %v2836_v25 = vor.u32 %v2283_v23, %v2153_v22  ;;  %v70_v26 = vld [vmem:[%s3467_s5] sm:$0xf]  ;;  %s2432_s5 = smov 64   ;;  %vm446_vm9 = vcmask 523264   ;;  %vm622_vm11 = vcmask 516096  }
  0x28   :  { %301 = vmatmul.bf16.vlgmr.msra.gmra.mxu2 %v103_v10  ;;  %315 = vmatmul.bf16.vlgmr.msra.gmra.mxu3 %v103_v10  ;;  %v73_v27 = vperm.slane %v70_v26, 1  ;;  %v72_v30 = vperm.slane %v70_v26, 0  ;;  %v74_v32 = vperm.slane %v70_v26, 2  ;;  %v75_v33 = vperm.slane %v70_v26, 3 }
  0x29   :  { %521 = vmatpush.bf16.msrb.mxu2 %v2745_v58  ;;  %468 = vmatpush.bf16.msrb.mxu1 %v2757_v62 }
  0x2a   :  { %534 = vmatpush.bf16.msrb.mxu3 %v2755_v61  ;;  %455 = vmatpush.bf16.msrb.mxu0 %v2779_v5 }
  0x2b   :  { %2300 = vset.pattern.permute.xlu1 %v2431_v24  ;;  %2301 = vset.pattern.permute.xlu2 %v2431_v24 }
  0x2c   :  { %2302 = vset.pattern.permute.xlu0 %v2431_v24 }
  0x2d   :  { %522 = vmatpush.bf16.msrb.mxu2 %v2781_v6  ;;  %469 = vmatpush.bf16.msrb.mxu1 %v2796_v12 }
  0x2e   :  { %535 = vmatpush.bf16.msrb.mxu3 %v2794_v11  ;;  %456 = vmatpush.bf16.msrb.mxu0 %v2815_v18 }
  0x31   :  { %523 = vmatpush.bf16.msrb.mxu2 %v2817_v19  ;;  %470 = vmatpush.bf16.msrb.mxu1 %v2823_v21 }
  0x32   :  { %536 = vmatpush.bf16.msrb.mxu3 %v2821_v20  ;;  %457 = vmatpush.bf16.msrb.mxu0 %v2836_v25 }
  0x35   :  { %695 = vmatpush.bf16.msra.mxu2 %v2718_v48  ;;  %680 = vmatpush.bf16.msra.mxu1 %v2728_v52 }
  0x36   :  { %708 = vmatpush.bf16.msra.mxu3 %v2726_v51  ;;  %667 = vmatpush.bf16.msra.mxu0 %v2736_v55 }
  0x37   :  { %471 = vmatmul.bf16.vlgmr.msrb.gmra.mxu1 %v2431_v24  ;;  %458 = vmatmul.bf16.vlgmr.msrb.gmra.mxu0 %v2431_v24 }
  0x38   :  { %524 = vmatmul.bf16.vlgmr.msrb.gmra.mxu2 %v2431_v24  ;;  %537 = vmatmul.bf16.vlgmr.msrb.gmra.mxu3 %v2431_v24 }
  0x39   :  { %696 = vmatpush.bf16.msra.mxu2 %v2745_v58  ;;  %681 = vmatpush.bf16.msra.mxu1 %v2757_v62 }
  0x3a   :  { %709 = vmatpush.bf16.msra.mxu3 %v2755_v61  ;;  %668 = vmatpush.bf16.msra.mxu0 %v2779_v5 }
  0x3d   :  { %697 = vmatpush.bf16.msra.mxu2 %v2781_v6  ;;  %682 = vmatpush.bf16.msra.mxu1 %v2796_v12 }
  0x3e   :  { %710 = vmatpush.bf16.msra.mxu3 %v2794_v11  ;;  %669 = vmatpush.bf16.msra.mxu0 %v2815_v18 }
  0x41   :  { %698 = vmatpush.bf16.msra.mxu2 %v2817_v19  ;;  %683 = vmatpush.bf16.msra.mxu1 %v2823_v21 }
  0x42   :  { %711 = vmatpush.bf16.msra.mxu3 %v2821_v20  ;;  %670 = vmatpush.bf16.msra.mxu0 %v2836_v25 }
  0x45   :  { %882 = vmatpush.bf16.msrb.mxu2 %v2718_v48  ;;  %865 = vmatpush.bf16.msrb.mxu1 %v2728_v52 }
  0x46   :  { %895 = vmatpush.bf16.msrb.mxu3 %v2726_v51  ;;  %852 = vmatpush.bf16.msrb.mxu0 %v2736_v55 }
  0x49   :  { %883 = vmatpush.bf16.msrb.mxu2 %v2745_v58  ;;  %866 = vmatpush.bf16.msrb.mxu1 %v2757_v62 }
  0x4a   :  { %896 = vmatpush.bf16.msrb.mxu3 %v2755_v61  ;;  %853 = vmatpush.bf16.msrb.mxu0 %v2779_v5 }
  0x4d   :  { %884 = vmatpush.bf16.msrb.mxu2 %v2781_v6  ;;  %867 = vmatpush.bf16.msrb.mxu1 %v2796_v12 }
  0x4e   :  { %897 = vmatpush.bf16.msrb.mxu3 %v2794_v11  ;;  %854 = vmatpush.bf16.msrb.mxu0 %v2815_v18 }
  0x51   :  { %885 = vmatpush.bf16.msrb.mxu2 %v2817_v19  ;;  %868 = vmatpush.bf16.msrb.mxu1 %v2823_v21 }
  0x52   :  { %898 = vmatpush.bf16.msrb.mxu3 %v2821_v20  ;;  %855 = vmatpush.bf16.msrb.mxu0 %v2836_v25 }
  0xa4   :  { %v274_v28 = vpop.f32.mrf.mxu0  ;;  %v288_v29 = vpop.f32.mrf.mxu1 }
  0xa5   :  { %v289_v31 = vadd.f32 %v288_v29, %v73_v27  ;;  %v275_v34 = vadd.f32 %v274_v28, %v72_v30 }
  0xa7   :  { %v329_v35 = vrot.slane %v289_v31, 6 }
  0xa9   :  { %v336_v42 = vsel %vm335_vm0, %v275_v34, %v329_v35  ;;  %v342_v43 = vsel %vm341_vm2, %v275_v34, %v329_v35  ;;  %v348_v44 = vsel %vm337_vm1, %v275_v34, %v329_v35  ;;  %v352_v45 = vsel %vm343_vm3, %v329_v35, %v275_v34 }
  0xab   :  { %v302_v36 = vpop.f32.mrf.mxu2  ;;  %v316_v37 = vpop.f32.mrf.mxu3 }
  0xac   :  { %v303_v38 = vadd.f32 %v302_v36, %v74_v32  ;;  %v317_v39 = vadd.f32 %v316_v37, %v75_v33  ;;  %v276_v40 = vpop.f32.mrf.mxu0  ;;  %v290_v41 = vpop.f32.mrf.mxu1 }
  0xad   :  { %v291_v49 = vadd.f32 %v290_v41, %v73_v27  ;;  %v277_v8 = vadd.f32 %v276_v40, %v72_v30 }
  0xae   :  { %v330_v46 = vrot.slane %v303_v38, 4  ;;  %v331_v47 = vrot.slane %v317_v39, 2 }
  0xaf   :  { %v332_v3 = vrot.slane %v291_v49, 6 }
  0xb0   :  { %v338_v50 = vsel %vm337_vm1, %v330_v46, %v331_v47  ;;  %v344_v53 = vsel %vm343_vm3, %v331_v47, %v330_v46  ;;  %v349_v54 = vsel %vm335_vm0, %v330_v46, %v331_v47  ;;  %v353_v56 = vsel %vm341_vm2, %v330_v46, %v331_v47 }
  0xb1   :  { %v340_v57 = vsel %vm339_vm4, %v336_v42, %v338_v50  ;;  %v346_v59 = vsel %vm345_vm5, %v342_v43, %v344_v53  ;;  %v350_v60 = vsel %vm339_vm4, %v349_v54, %v348_v44  ;;  %v354_v63 = vsel %vm345_vm5, %v353_v56, %v352_v45 }
  0xb2   :  { %v347_v0 = vrot.slane %v346_v59, 2  ;;  %v351_v1 = vrot.slane %v350_v60, 4  ;;  %v355_v2 = vrot.slane %v354_v63, 6  ;;  %379 = vst [vmem:[#allocation2] sm:$0xff] %v340_v57  ;;  %v356_v16 = vsel %vm335_vm0, %v277_v8, %v332_v3 }
  0xb3   :  { %v304_v4 = vpop.f32.mrf.mxu2  ;;  %v318_v7 = vpop.f32.mrf.mxu3  ;;  %v359_v23 = vsel %vm341_vm2, %v277_v8, %v332_v3  ;;  %v363_v26 = vsel %vm337_vm1, %v277_v8, %v332_v3  ;;  %v367_v27 = vsel %vm343_vm3, %v332_v3, %v277_v8 }
  0xb4   :  { %380 = vst [vmem:[#allocation2 + $0x8] sm:$0xff] %v347_v0  ;;  %v305_v9 = vadd.f32 %v304_v4, %v74_v32  ;;  %v319_v10 = vadd.f32 %v318_v7, %v75_v33  ;;  %v472_v13 = vpop.f32.mrf.mxu1  ;;  %v459_v14 = vpop.f32.mrf.mxu0 }
  0xb5   :  { %381 = vst [vmem:[#allocation2 + $0x10] sm:$0xff] %v351_v1  ;;  %v545_v15 = vrot.slane %v472_v13, 6 }
  0xb6   :  { %382 = vst [vmem:[#allocation2 + $0x18] sm:$0xff] %v355_v2  ;;  %v333_v17 = vrot.slane %v305_v9, 4  ;;  %v334_v22 = vrot.slane %v319_v10, 2 }
  0xb7   :  { %v546_v28 = vsel %vm335_vm0, %v459_v14, %v545_v15 }
  0xb8   :  { %v357_v29 = vsel %vm337_vm1, %v333_v17, %v334_v22  ;;  %v360_v30 = vsel %vm343_vm3, %v334_v22, %v333_v17  ;;  %v364_v31 = vsel %vm335_vm0, %v333_v17, %v334_v22  ;;  %v368_v32 = vsel %vm341_vm2, %v333_v17, %v334_v22 }
  0xb9   :  { %v358_v33 = vsel %vm339_vm4, %v356_v16, %v357_v29  ;;  %v361_v34 = vsel %vm345_vm5, %v359_v23, %v360_v30  ;;  %v365_v35 = vsel %vm339_vm4, %v364_v31, %v363_v26  ;;  %v369_v36 = vsel %vm345_vm5, %v368_v32, %v367_v27  ;;  %v542_v37 = vld [vmem:[#allocation2] sm:$0xf] }
  0xba   :  { %v362_v38 = vrot.slane %v361_v34, 2  ;;  %v366_v39 = vrot.slane %v365_v35, 4  ;;  %v370_v40 = vrot.slane %v369_v36, 6  ;;  %383 = vst [vmem:[#allocation2 + $0x20] sm:$0xff] %v358_v33  ;;  %v548_v41 = vadd.f32 %v546_v28, %v542_v37  ;;  %v2914_v28 = vld [vmem:[%s3468_s1] sm:$0x3] }
  0xbb   :  { %v525_v42 = vpop.f32.mrf.mxu2  ;;  %v538_v43 = vpop.f32.mrf.mxu3  ;;  %vm405_vm6 = vcmp.gt.s32.totalorder %v2914_v28, 7  ;;  %vm404_vm7 = vcmp.gt.s32.totalorder %v2914_v28, 0  ;;  %vm659_vm12 = vcmp.gt.s32.totalorder %v2914_v28, 6  ;;  %vm658_vm13 = vcmp.gt.s32.totalorder %v2914_v28, 1 }
  0xbc   :  { %384 = vst [vmem:[#allocation2 + $0x28] sm:$0xff] %v362_v38  ;;  %v557_v44 = vmul.f32 0.5, %v548_v41  ;;  %v474_v45 = vpop.f32.mrf.mxu1  ;;  %v461_v46 = vpop.f32.mrf.mxu0  ;;  %v562_v47 = vrot.slane %v548_v41, 2  ;;  %v553_v49 = vrot.slane %v538_v43, 6  ;;  %v624_v30 = vsel %vm405_vm6, 1, %v2431_v24 }
  0xbd   :  { %385 = vst [vmem:[#allocation2 + $0x30] sm:$0xff] %v366_v39  ;;  %v615_v31 = vsel %vm404_vm7, 1, %v2431_v24  ;;  %vm843_vm1 = vcmp.gt.s32.totalorder %v2914_v28, 5  ;;  %vm842_vm2 = vcmp.gt.s32.totalorder %v2914_v28, 2  ;;  %vm1030_vm5 = vcmp.gt.s32.totalorder %v2914_v28, 4 }
  0xbe   :  { %386 = vst [vmem:[#allocation2 + $0x38] sm:$0xff] %v370_v40  ;;  %2303 = vtanh.f32 %v557_v44  ;;  %v554_v50 = vsel %vm335_vm0, %v525_v42, %v553_v49  ;;  %vm1029_vm6 = vcmp.gt.s32.totalorder %v2914_v28, 3 }
  0xbf   :  { %2305 = vtanh.f32 %v562_v47 }
  0xc3   :  { %v527_v53 = vpop.f32.mrf.mxu2  ;;  %v540_v54 = vpop.f32.mrf.mxu3 }
  0xc4   :  { %v2304_v56 = vpop.eup %2303 }
  0xc5   :  { %v550_v57 = vld [vmem:[#allocation2 + $0x3c] sm:$0xf]  ;;  %v559_v60 = vadd.f32 1.0, %v2304_v56  ;;  %v2306_v1 = vpop.eup %2305 }
  0xc6   :  { %v556_v59 = vadd.f32 %v554_v50, %v550_v57 }
  0xc7   :  { %v560_v63 = vmul.f32 0.5, %v559_v60 }
  0xc8   :  { %v586_v0 = vmul.f32 0.5, %v556_v59  ;;  %v591_v3 = vrot.slane %v556_v59, 2 }
  0xc9   :  { %v574_v2 = vmul.f32 %v2306_v1, %v560_v63  ;;  %v573_v13 = vmul.f32 0.0, %v560_v63 }
  0xca   :  { %2307 = vtanh.f32 %v586_v0 }
  0xcb   :  { %576 = vrot.lane.b32.xlu2 %v574_v2, %s2432_s5  ;;  %2309 = vtanh.f32 %v591_v3 }
  0xd0   :  { %v2308_v4 = vpop.eup %2307 }
  0xd1   :  { %v588_v7 = vadd.f32 1.0, %v2308_v4  ;;  %v2310_v9 = vpop.eup %2309 }
  0xd3   :  { %v589_v8 = vmul.f32 0.5, %v588_v7  ;;  %565 = vrot.lane.b32.xlu2 %v548_v41, %s2432_s5 }
  0xd5   :  { %v603_v10 = vmul.f32 %v2310_v9, %v589_v8  ;;  %v602_v17 = vmul.f32 0.0, %v589_v8  ;;  %v726_v9 = vld [vmem:[#allocation2 + $0x34] sm:$0xf] }
  0xd7   :  { %605 = vrot.lane.b32.xlu0 %v603_v10, %s2432_s5 }
  0xdf   :  { %594 = vrot.lane.b32.xlu0 %v556_v59, %s2432_s5 }
 0x125   :  { %v577_v14 = vpop.permute.xlu2 %576 }
 0x126   :  { %v579_v15 = vadd.f32 %v577_v14, %v573_v13 }
 0x128   :  { %2311 = vtanh.f32 %v579_v15  ;;  %645 = vst [vmem:[#allocation1] ss:$4 sm:$0xff] %v579_v15 }
 0x12d   :  { %v566_v35 = vpop.permute.xlu2 %565 }
 0x12e   :  { %v2312_v16 = vpop.eup %2311  ;;  %v567_v36 = vrot.slane %v566_v35, 2 }
 0x12f   :  { %582 = vrot.lane.b32.xlu0 %v2312_v16, %s2432_s5  ;;  %v646_v26 = vld.sshfl [vmem:[#allocation1] sm:$0xff pattern:$0x73625140] }
 0x130   :  { %v569_v37 = vmul.f32 0.5, %v567_v36 }
 0x149   :  { %v606_v22 = vpop.permute.xlu0 %605 }
 0x14a   :  { %v608_v23 = vadd.f32 %v606_v22, %v602_v17 }
 0x14c   :  { %2313 = vtanh.f32 %v608_v23  ;;  %652 = vst [vmem:[#allocation1] ss:$4 sm:$0xff] %v608_v23 }
 0x151   :  { %v595_v32 = vpop.permute.xlu0 %594 }
 0x152   :  { %v2314_v27 = vpop.eup %2313  ;;  %v596_v33 = vrot.slane %v595_v32, 2 }
 0x153   :  { %v653_v29 = vld.sshfl [vmem:[#allocation1] sm:$0xff pattern:$0x73625140]  ;;  %611 = vrot.lane.b32.xlu1 %v2314_v27, %s2432_s5 }
 0x154   :  { %654 = vrot.lane.b32.xlu2 %v653_v29, %s2432_s5  ;;  %v598_v34 = vmul.f32 0.5, %v596_v33 }
 0x156   :  { %2315 = vtanh.f32 %v598_v34  ;;  %v718_v34 = vld [vmem:[#allocation2 + $0x8] sm:$0xf] }
 0x157   :  { %2317 = vtanh.f32 %v569_v37 }
 0x15b   :  { %626 = vperm.xlu1 %2300, %v624_v30  }
 0x15c   :  { %v2316_v38 = vpop.eup %2315 }
 0x15d   :  { %v600_v40 = vadd.f32 1.0, %v2316_v38  ;;  %v2318_v42 = vpop.eup %2317 }
 0x15e   :  { %v571_v46 = vadd.f32 1.0, %v2318_v42 }
 0x15f   :  { %v601_v41 = vmul.f32 0.5, %v600_v40 }
 0x160   :  { %v572_v54 = vmul.f32 0.5, %v571_v46 }
 0x163   :  { %617 = vperm.xlu1 %2300, %v615_v31  }
 0x1a1   :  { %v583_v53 = vpop.permute.xlu0 %582 }
 0x1a2   :  { %v585_v56 = vmul.f32 %v583_v53, %v572_v54 }
 0x1ae   :  { %v655_v45 = vpop.permute.xlu2 %654 }
 0x1c5   :  { %v612_v39 = vpop.permute.xlu1 %611 }
 0x1c6   :  { %v614_v43 = vmul.f32 %v612_v39, %v601_v41 }
 0x1cd   :  { %v2922_v44 = vpop.permute.xlu1 %626 }
 0x1ce   :  { %vm628_vm8 = vcmp.eq.s32.totalorder %v2922_v44, 1 }
 0x1cf   :  { %v2927_v47 = vsel %vm628_vm8, %v614_v43, 0.0  ;;  %v2931_v49 = vsel %vm628_vm8, %v655_v45, 0.0 }
 0x1d0   :  { %v2935_v50 = vpack.c.bf16 %v2927_v47, %v2927_v47  ;;  %783 = vrot.lane.b32.xlu0 %v2931_v49, %s2432_s5 }
 0x1d2   :  { %2217 = vmatmul.msk.bf16.vlgmr.msra.gmra.mxu2 %vm446_vm9, %v2935_v50  ;;  %2218 = vmatmul.msk.bf16.vlgmr.msra.gmra.mxu3 %vm446_vm9, %v2935_v50 }
 0x1d3   :  { %1069 = vmatpush.bf16.msra.mxu2 %v2718_v48  ;;  %1082 = vmatpush.bf16.msra.mxu3 %v2726_v51 }
 0x1d5   :  { %v2945_v57 = vpop.permute.xlu1 %617 }
 0x1d6   :  { %vm619_vm10 = vcmp.eq.s32.totalorder %v2945_v57, 1  ;;  %v1885_v57 = vld [vmem:[%s3470_s7] sm:$0xff] }
 0x1d7   :  { %v2950_v59 = vsel %vm619_vm10, %v585_v56, 0.0  ;;  %1070 = vmatpush.bf16.msra.mxu2 %v2745_v58  ;;  %1083 = vmatpush.bf16.msra.mxu3 %v2755_v61  ;;  %v799_v56 = vsel %vm658_vm13, 1, %v2431_v24  ;;  %vm633_vm13 = vcmask 1040384  }
 0x1d8   :  { %v621_v60 = vpack.c.bf16 %v2950_v59, %v2950_v59  ;;  %647 = vrot.lane.b32.xlu0 %v646_v26, %s2432_s5  ;;  %v808_v26 = vsel %vm659_vm12, 1, %v2431_v24 }
 0x1da   :  { %2215 = vmatmul.msk.bf16.vlgmr.msra.gmra.mxu0 %vm446_vm9, %v621_v60  ;;  %2216 = vmatmul.msk.bf16.vlgmr.msra.gmra.mxu1 %vm446_vm9, %v621_v60  ;;  %623 = vst.msk [vmem:[#allocation3] sm:$0x1] %vm622_vm11, %v621_v60 }
 0x1db   :  { %1071 = vmatpush.bf16.msra.mxu2 %v2781_v6  ;;  %1084 = vmatpush.bf16.msra.mxu3 %v2794_v11 }
 0x1dc   :  { %1039 = vmatpush.bf16.msra.mxu0 %v2736_v55  ;;  %1052 = vmatpush.bf16.msra.mxu1 %v2728_v52 }
 0x1df   :  { %1072 = vmatpush.bf16.msra.mxu2 %v2817_v19  ;;  %1085 = vmatpush.bf16.msra.mxu3 %v2821_v20 }
 0x1e0   :  { %1040 = vmatpush.bf16.msra.mxu0 %v2779_v5  ;;  %1053 = vmatpush.bf16.msra.mxu1 %v2757_v62 }
 0x1e4   :  { %1041 = vmatpush.bf16.msra.mxu0 %v2815_v18  ;;  %1054 = vmatpush.bf16.msra.mxu1 %v2796_v12 }
 0x1e8   :  { %1042 = vmatpush.bf16.msra.mxu0 %v2836_v25  ;;  %1055 = vmatpush.bf16.msra.mxu1 %v2823_v21 }
 0x242   :  { %v784_v63 = vpop.permute.xlu0 %783 }
 0x24a   :  { %v648_v0 = vpop.permute.xlu0 %647 }
 0x24b   :  { %v2974_v1 = vsel %vm619_vm10, %v648_v0, 0.0 }
 0x24c   :  { %750 = vrot.lane.b32.xlu0 %v2974_v1, %s2432_s5 }
 0x255   :  { %v700_v2 = vpop.f32.mrf.mxu2  ;;  %v713_v3 = vpop.f32.mrf.mxu3 }
 0x256   :  { %v729_v4 = vrot.slane %v713_v3, 6 }
 0x257   :  { %v672_v7 = vpop.f32.mrf.mxu0  ;;  %v685_v8 = vpop.f32.mrf.mxu1 }
 0x258   :  { %v730_v10 = vsel %vm335_vm0, %v700_v2, %v729_v4  ;;  %v721_v27 = vrot.slane %v685_v8, 6 }
 0x259   :  { %v732_v13 = vadd.f32 %v730_v10, %v726_v9 }
 0x25a   :  { %v722_v31 = vsel %vm335_vm0, %v672_v7, %v721_v27 }
 0x25b   :  { %v766_v14 = vmul.f32 0.5, %v732_v13  ;;  %774 = vrot.lane.b32.xlu2 %v732_v13, %s2432_s5  ;;  %v771_v17 = vrot.slane %v732_v13, 2  ;;  %v724_v36 = vadd.f32 %v722_v31, %v718_v34 }
 0x25d   :  { %v702_v15 = vpop.f32.mrf.mxu2  ;;  %v715_v16 = vpop.f32.mrf.mxu3  ;;  %2319 = vtanh.f32 %v766_v14  ;;  %v733_v38 = vmul.f32 0.5, %v724_v36  ;;  %v738_v42 = vrot.slane %v724_v36, 2 }
 0x25e   :  { %2321 = vtanh.f32 %v771_v17 }
 0x25f   :  { %v674_v22 = vpop.f32.mrf.mxu0  ;;  %v687_v23 = vpop.f32.mrf.mxu1  ;;  %2323 = vtanh.f32 %v733_v38 }
 0x263   :  { %810 = vperm.xlu2 %2301, %v808_v26   ;;  %v2320_v29 = vpop.eup %2319 }
 0x264   :  { %v768_v30 = vadd.f32 1.0, %v2320_v29  ;;  %v2322_v33 = vpop.eup %2321 }
 0x265   :  { %v2324_v41 = vpop.eup %2323 }
 0x266   :  { %v769_v32 = vmul.f32 0.5, %v768_v30  ;;  %v735_v43 = vadd.f32 1.0, %v2324_v41 }
 0x268   :  { %v787_v35 = vmul.f32 %v2322_v33, %v769_v32  ;;  %v786_v37 = vmul.f32 %v784_v63, %v769_v32  ;;  %v736_v46 = vmul.f32 0.5, %v735_v43 }
 0x26a   :  { %789 = vrot.lane.b32.xlu1 %v787_v35, %s2432_s5 }
 0x26b   :  { %741 = vrot.lane.b32.xlu2 %v724_v36, %s2432_s5 }
 0x2b5   :  { %v775_v60 = vpop.permute.xlu2 %774 }
 0x2b6   :  { %v776_v63 = vrot.slane %v775_v60, 2 }
 0x2b8   :  { %v778_v0 = vmul.f32 0.5, %v776_v63  ;;  %v995_v63 = vsel %vm843_vm1, 1, %v2431_v24 }
 0x2bd   :  { %v2989_v4 = vpop.permute.xlu2 %810 }
 0x2be   :  { %vm812_vm14 = vcmp.eq.s32.totalorder %v2989_v4, 1  ;;  %v751_v13 = vpop.permute.xlu0 %750 }
 0x2bf   :  { %v753_v15 = vmul.f32 %v751_v13, %v736_v46 }
 0x2c5   :  { %v742_v26 = vpop.permute.xlu2 %741 }
 0x2c6   :  { %v743_v27 = vrot.slane %v742_v26, 2 }
 0x2c8   :  { %v745_v29 = vmul.f32 0.5, %v743_v27 }
 0x2dc   :  { %v790_v39 = vpop.permute.xlu1 %789 }
 0x2dd   :  { %v792_v40 = vadd.f32 %v790_v39, %v786_v37 }
 0x2df   :  { %2325 = vtanh.f32 %v792_v40 }
 0x2e0   :  { %2327 = vtanh.f32 %v738_v42 }
 0x2e1   :  { %2329 = vtanh.f32 %v778_v0 }
 0x2e5   :  { %v2326_v45 = vpop.eup %2325 }
 0x2e6   :  { %795 = vrot.lane.b32.xlu1 %v2326_v45, %s2432_s5  ;;  %v2328_v53 = vpop.eup %2327  ;;  %v913_v45 = vld [vmem:[#allocation2 + $0x2c] sm:$0xf] }
 0x2e7   :  { %v754_v54 = vmul.f32 %v2328_v53, %v736_v46  ;;  %v2330_v2 = vpop.eup %2329 }
 0x2e8   :  { %v780_v3 = vadd.f32 1.0, %v2330_v2 }
 0x2ea   :  { %v781_v7 = vmul.f32 0.5, %v780_v3 }
 0x2ee   :  { %756 = vrot.lane.b32.xlu1 %v754_v54, %s2432_s5 }
 0x2f6   :  { %801 = vperm.xlu1 %2300, %v799_v56  }
 0x358   :  { %v796_v8 = vpop.permute.xlu1 %795 }
 0x359   :  { %v2992_v9 = vmul.f32 %v796_v8, %v781_v7 }
 0x35b   :  { %v2998_v10 = vsel %vm812_vm14, %v2992_v9, %v2927_v47 }
 0x35c   :  { %v874_v14 = vpack.c.bf16 %v2998_v10, %v2998_v10 }
 0x35e   :  { %2221 = vmatmul.msk.bf16.vlgmr.msrb.gmra.mxu2 %vm446_vm9, %v874_v14  ;;  %2222 = vmatmul.msk.bf16.vlgmr.msrb.gmra.mxu3 %vm446_vm9, %v874_v14 }
 0x35f   :  { %1254 = vmatpush.bf16.msrb.mxu2 %v2718_v48  ;;  %1267 = vmatpush.bf16.msrb.mxu3 %v2726_v51 }
 0x360   :  { %v757_v16 = vpop.permute.xlu1 %756 }
 0x361   :  { %v759_v17 = vadd.f32 %v757_v16, %v753_v15 }
 0x363   :  { %2331 = vtanh.f32 %v759_v17  ;;  %828 = vst [vmem:[#allocation1] ss:$4 sm:$0xff] %v759_v17  ;;  %1255 = vmatpush.bf16.msrb.mxu2 %v2745_v58  ;;  %1268 = vmatpush.bf16.msrb.mxu3 %v2755_v61 }
 0x364   :  { %2333 = vtanh.f32 %v745_v29 }
 0x367   :  { %1256 = vmatpush.bf16.msrb.mxu2 %v2781_v6  ;;  %1269 = vmatpush.bf16.msrb.mxu3 %v2794_v11 }
 0x368   :  { %v3022_v34 = vpop.permute.xlu1 %801 }
 0x369   :  { %v2332_v47 = vpop.eup %2331  ;;  %vm803_vm15 = vcmp.eq.s32.totalorder %v3022_v34, 1 }
 0x36a   :  { %v829_v22 = vld.sshfl [vmem:[#allocation1] sm:$0xff pattern:$0x73625140]  ;;  %762 = vrot.lane.b32.xlu0 %v2332_v47, %s2432_s5  ;;  %v2334_v32 = vpop.eup %2333 }
 0x36b   :  { %836 = vst [vmem:[#allocation1] ss:$4 sm:$0xff] %v792_v40  ;;  %1257 = vmatpush.bf16.msrb.mxu2 %v2817_v19  ;;  %1270 = vmatpush.bf16.msrb.mxu3 %v2821_v20  ;;  %v747_v33 = vadd.f32 1.0, %v2334_v32 }
 0x36d   :  { %v748_v35 = vmul.f32 0.5, %v747_v33 }
 0x372   :  { %v837_v23 = vld.sshfl [vmem:[#allocation1] sm:$0xff pattern:$0x73625140] }
 0x373   :  { %838 = vrot.lane.b32.xlu2 %v837_v23, %s2432_s5 }
 0x3cd   :  { %v839_v30 = vpop.permute.xlu2 %838 }
 0x3ce   :  { %v3017_v31 = vsel %vm812_vm14, %v839_v30, %v2931_v49 }
 0x3cf   :  { %970 = vrot.lane.b32.xlu0 %v3017_v31, %s2432_s5 }
 0x3d7   :  { %830 = vrot.lane.b32.xlu0 %v829_v22, %s2432_s5  ;;  %v905_v22 = vld [vmem:[#allocation2 + $0x10] sm:$0xf] }
 0x3dc   :  { %v763_v36 = vpop.permute.xlu0 %762 }
 0x3dd   :  { %v765_v37 = vmul.f32 %v763_v36, %v748_v35 }
 0x3df   :  { %v804_v38 = vsel %vm803_vm15, %v765_v37, 0.0  ;;  %v3030_v49 = vsel %vm803_vm15, %v765_v37, %v2950_v59 }
 0x3e0   :  { %v805_v39 = vpack.c.bf16 %v804_v38, %v804_v38  ;;  %v844_v40 = vpack.c.bf16 %v3030_v49, %v3030_v49 }
 0x3e1   :  { %v887_v41 = vpop.f32.mrf.mxu2  ;;  %v900_v42 = vpop.f32.mrf.mxu3 }
 0x3e2   :  { %v916_v43 = vrot.slane %v900_v42, 6  ;;  %2219 = vmatmul.msk.bf16.vlgmr.msrb.gmra.mxu0 %vm446_vm9, %v844_v40  ;;  %2220 = vmatmul.msk.bf16.vlgmr.msrb.gmra.mxu1 %vm446_vm9, %v844_v40  ;;  %807 = vst.msk [vmem:[#allocation3 + $0x1] sm:$0x1] %vm622_vm11, %v805_v39  ;;  %v986_v42 = vsel %vm842_vm2, 1, %v2431_v24 }
 0x3e3   :  { %1224 = vmatpush.bf16.msrb.mxu0 %v2736_v55  ;;  %1237 = vmatpush.bf16.msrb.mxu1 %v2728_v52 }
 0x3e4   :  { %v917_v59 = vsel %vm335_vm0, %v887_v41, %v916_v43 }
 0x3e5   :  { %v919_v46 = vadd.f32 %v917_v59, %v913_v45 }
 0x3e7   :  { %v953_v53 = vmul.f32 0.5, %v919_v46  ;;  %961 = vrot.lane.b32.xlu2 %v919_v46, %s2432_s5  ;;  %1225 = vmatpush.bf16.msrb.mxu0 %v2779_v5  ;;  %v958_v60 = vrot.slane %v919_v46, 2 }
 0x3e8   :  { %1238 = vmatpush.bf16.msrb.mxu1 %v2757_v62 }
 0x3e9   :  { %v889_v54 = vpop.f32.mrf.mxu2  ;;  %v902_v56 = vpop.f32.mrf.mxu3  ;;  %2335 = vtanh.f32 %v953_v53 }
 0x3ea   :  { %2337 = vtanh.f32 %v958_v60 }
 0x3eb   :  { %1226 = vmatpush.bf16.msrb.mxu0 %v2815_v18 }
 0x3ec   :  { %1239 = vmatpush.bf16.msrb.mxu1 %v2796_v12 }
 0x3ef   :  { %997 = vperm.xlu2 %2301, %v995_v63   ;;  %1227 = vmatpush.bf16.msrb.mxu0 %v2836_v25  ;;  %v2336_v0 = vpop.eup %2335 }
 0x3f0   :  { %1240 = vmatpush.bf16.msrb.mxu1 %v2823_v21  ;;  %v955_v2 = vadd.f32 1.0, %v2336_v0  ;;  %v2338_v7 = vpop.eup %2337 }
 0x3f2   :  { %v956_v3 = vmul.f32 0.5, %v955_v2 }
 0x3f4   :  { %v974_v8 = vmul.f32 %v2338_v7, %v956_v3 }
 0x3f6   :  { %976 = vrot.lane.b32.xlu1 %v974_v8, %s2432_s5 }
 0x441   :  { %v971_v13 = vpop.permute.xlu0 %970  ;;  %v962_v43 = vpop.permute.xlu2 %961 }
 0x442   :  { %v973_v32 = vmul.f32 %v971_v13, %v956_v3  ;;  %v963_v45 = vrot.slane %v962_v43, 2 }
 0x444   :  { %v965_v59 = vmul.f32 0.5, %v963_v45 }
 0x449   :  { %v831_v14 = vpop.permute.xlu0 %830  ;;  %v3063_v54 = vpop.permute.xlu2 %997 }
 0x44a   :  { %v3053_v15 = vsel %vm803_vm15, %v831_v14, %v2974_v1  ;;  %vm999_vm3 = vcmp.eq.s32.totalorder %v3063_v54, 1 }
 0x44b   :  { %937 = vrot.lane.b32.xlu0 %v3053_v15, %s2432_s5 }
 0x45f   :  { %v857_v16 = vpop.f32.mrf.mxu0  ;;  %v870_v17 = vpop.f32.mrf.mxu1 }
 0x460   :  { %v908_v47 = vrot.slane %v870_v17, 6 }
 0x462   :  { %v909_v23 = vsel %vm335_vm0, %v857_v16, %v908_v47 }
 0x463   :  { %v911_v26 = vadd.f32 %v909_v23, %v905_v22 }
 0x465   :  { %928 = vrot.lane.b32.xlu2 %v911_v26, %s2432_s5  ;;  %v920_v27 = vmul.f32 0.5, %v911_v26  ;;  %v925_v36 = vrot.slane %v911_v26, 2 }
 0x467   :  { %v859_v29 = vpop.f32.mrf.mxu0  ;;  %v872_v30 = vpop.f32.mrf.mxu1  ;;  %2339 = vtanh.f32 %v920_v27 }
 0x468   :  { %v977_v33 = vpop.permute.xlu1 %976 }
 0x469   :  { %v979_v1 = vadd.f32 %v977_v33, %v973_v32 }
 0x46b   :  { %2341 = vtanh.f32 %v979_v1 }
 0x46c   :  { %2343 = vtanh.f32 %v925_v36 }
 0x46d   :  { %v2340_v35 = vpop.eup %2339  ;;  %2345 = vtanh.f32 %v965_v59 }
 0x46e   :  { %v922_v37 = vadd.f32 1.0, %v2340_v35 }
 0x470   :  { %v923_v39 = vmul.f32 0.5, %v922_v37 }
 0x471   :  { %v2342_v38 = vpop.eup %2341 }
 0x472   :  { %982 = vrot.lane.b32.xlu1 %v2342_v38, %s2432_s5  ;;  %v2344_v40 = vpop.eup %2343 }
 0x473   :  { %v941_v41 = vmul.f32 %v2344_v40, %v923_v39  ;;  %v2346_v46 = vpop.eup %2345 }
 0x474   :  { %v967_v53 = vadd.f32 1.0, %v2346_v46 }
 0x476   :  { %v968_v56 = vmul.f32 0.5, %v967_v53  ;;  %v1182_v53 = vsel %vm1030_vm5, 1, %v2431_v24 }
 0x47a   :  { %943 = vrot.lane.b32.xlu1 %v941_v41, %s2432_s5  ;;  %v1100_v41 = vld [vmem:[#allocation2 + $0x24] sm:$0xf] }
 0x482   :  { %988 = vperm.xlu1 %2300, %v986_v42  }
 0x4bd   :  { %v938_v2 = vpop.permute.xlu0 %937 }
 0x4be   :  { %v940_v7 = vmul.f32 %v938_v2, %v923_v39 }
 0x4bf   :  { %v929_v17 = vpop.permute.xlu2 %928 }
 0x4c0   :  { %v930_v47 = vrot.slane %v929_v17, 2 }
 0x4c2   :  { %v932_v22 = vmul.f32 0.5, %v930_v47  ;;  %v1092_v47 = vld [vmem:[#allocation2 + $0x18] sm:$0xf] }
 0x4e4   :  { %v983_v60 = vpop.permute.xlu1 %982 }
 0x4e5   :  { %v3065_v63 = vmul.f32 %v983_v60, %v968_v56 }
 0x4e7   :  { %v3072_v0 = vsel %vm999_vm3, %v3065_v63, %v2998_v10 }
 0x4e8   :  { %v1061_v3 = vpack.c.bf16 %v3072_v0, %v3072_v0 }
 0x4ea   :  { %2225 = vmatmul.msk.bf16.vlgmr.msra.gmra.mxu2 %vm446_vm9, %v1061_v3  ;;  %2226 = vmatmul.msk.bf16.vlgmr.msra.gmra.mxu3 %vm446_vm9, %v1061_v3 }
 0x4eb   :  { %1425 = vmatpush.bf16.msra.mxu2 %v2718_v48  ;;  %1438 = vmatpush.bf16.msra.mxu3 %v2726_v51 }
 0x4ec   :  { %v944_v8 = vpop.permute.xlu1 %943 }
 0x4ed   :  { %v946_v13 = vadd.f32 %v944_v8, %v940_v7 }
 0x4ef   :  { %2347 = vtanh.f32 %v946_v13  ;;  %1015 = vst [vmem:[#allocation1] ss:$4 sm:$0xff] %v946_v13  ;;  %1426 = vmatpush.bf16.msra.mxu2 %v2745_v58  ;;  %1439 = vmatpush.bf16.msra.mxu3 %v2755_v61 }
 0x4f0   :  { %2349 = vtanh.f32 %v932_v22 }
 0x4f3   :  { %1427 = vmatpush.bf16.msra.mxu2 %v2781_v6  ;;  %1440 = vmatpush.bf16.msra.mxu3 %v2794_v11 }
 0x4f4   :  { %v3096_v30 = vpop.permute.xlu1 %988 }
 0x4f5   :  { %v2348_v10 = vpop.eup %2347  ;;  %vm990_vm4 = vcmp.eq.s32.totalorder %v3096_v30, 1 }
 0x4f6   :  { %v1016_v14 = vld.sshfl [vmem:[#allocation1] sm:$0xff pattern:$0x73625140]  ;;  %949 = vrot.lane.b32.xlu0 %v2348_v10, %s2432_s5  ;;  %v2350_v27 = vpop.eup %2349 }
 0x4f7   :  { %1023 = vst [vmem:[#allocation1] ss:$4 sm:$0xff] %v979_v1  ;;  %1428 = vmatpush.bf16.msra.mxu2 %v2817_v19  ;;  %1441 = vmatpush.bf16.msra.mxu3 %v2821_v20  ;;  %v934_v29 = vadd.f32 1.0, %v2350_v27 }
 0x4f9   :  { %v935_v32 = vmul.f32 0.5, %v934_v29 }
 0x4fe   :  { %v1024_v16 = vld.sshfl [vmem:[#allocation1] sm:$0xff pattern:$0x73625140] }
 0x4ff   :  { %1025 = vrot.lane.b32.xlu2 %v1024_v16, %s2432_s5 }
 0x559   :  { %v1026_v23 = vpop.permute.xlu2 %1025 }
 0x55a   :  { %v3091_v26 = vsel %vm999_vm3, %v1026_v23, %v3017_v31 }
 0x55b   :  { %1157 = vrot.lane.b32.xlu0 %v3091_v26, %s2432_s5 }
 0x563   :  { %1017 = vrot.lane.b32.xlu0 %v1016_v14, %s2432_s5 }
 0x568   :  { %v950_v33 = vpop.permute.xlu0 %949 }
 0x569   :  { %v952_v1 = vmul.f32 %v950_v33, %v935_v32 }
 0x56b   :  { %v991_v35 = vsel %vm990_vm4, %v952_v1, 0.0  ;;  %v3104_v31 = vsel %vm990_vm4, %v952_v1, %v3030_v49 }
 0x56c   :  { %v992_v36 = vpack.c.bf16 %v991_v35, %v991_v35  ;;  %v1031_v37 = vpack.c.bf16 %v3104_v31, %v3104_v31 }
 0x56d   :  { %v1074_v38 = vpop.f32.mrf.mxu2  ;;  %v1087_v39 = vpop.f32.mrf.mxu3 }
 0x56e   :  { %v1103_v40 = vrot.slane %v1087_v39, 6  ;;  %2223 = vmatmul.msk.bf16.vlgmr.msra.gmra.mxu0 %vm446_vm9, %v1031_v37  ;;  %2224 = vmatmul.msk.bf16.vlgmr.msra.gmra.mxu1 %vm446_vm9, %v1031_v37  ;;  %994 = vst.msk [vmem:[#allocation3 + $0x2] sm:$0x1] %vm622_vm11, %v992_v36 }
 0x56f   :  { %1395 = vmatpush.bf16.msra.mxu0 %v2736_v55  ;;  %1408 = vmatpush.bf16.msra.mxu1 %v2728_v52 }
 0x570   :  { %v1104_v49 = vsel %vm335_vm0, %v1074_v38, %v1103_v40 }
 0x571   :  { %v1106_v42 = vadd.f32 %v1104_v49, %v1100_v41  ;;  %v1173_v49 = vsel %vm1029_vm6, 1, %v2431_v24 }
 0x573   :  { %v1140_v43 = vmul.f32 0.5, %v1106_v42  ;;  %1148 = vrot.lane.b32.xlu2 %v1106_v42, %s2432_s5  ;;  %1396 = vmatpush.bf16.msra.mxu0 %v2779_v5  ;;  %v1145_v46 = vrot.slane %v1106_v42, 2 }
 0x574   :  { %1409 = vmatpush.bf16.msra.mxu1 %v2757_v62 }
 0x575   :  { %v1076_v45 = vpop.f32.mrf.mxu2  ;;  %v1089_v59 = vpop.f32.mrf.mxu3  ;;  %2351 = vtanh.f32 %v1140_v43 }
 0x576   :  { %2353 = vtanh.f32 %v1145_v46 }
 0x577   :  { %1397 = vmatpush.bf16.msra.mxu0 %v2815_v18 }
 0x578   :  { %1410 = vmatpush.bf16.msra.mxu1 %v2796_v12 }
 0x57b   :  { %1184 = vperm.xlu2 %2301, %v1182_v53   ;;  %1398 = vmatpush.bf16.msra.mxu0 %v2836_v25  ;;  %v2352_v56 = vpop.eup %2351 }
 0x57c   :  { %1411 = vmatpush.bf16.msra.mxu1 %v2823_v21  ;;  %v1142_v60 = vadd.f32 1.0, %v2352_v56  ;;  %v2354_v3 = vpop.eup %2353 }
 0x57e   :  { %v1143_v2 = vmul.f32 0.5, %v1142_v60 }
 0x580   :  { %v1161_v7 = vmul.f32 %v2354_v3, %v1143_v2 }
 0x582   :  { %1163 = vrot.lane.b32.xlu1 %v1161_v7, %s2432_s5 }
 0x5cd   :  { %v1158_v8 = vpop.permute.xlu0 %1157  ;;  %v1149_v42 = vpop.permute.xlu2 %1148 }
 0x5ce   :  { %v1160_v33 = vmul.f32 %v1158_v8, %v1143_v2  ;;  %v1150_v43 = vrot.slane %v1149_v42, 2  ;;  %v1283_v42 = vld [vmem:[#allocation2 + $0x1c] sm:$0xf] }
 0x5d0   :  { %v1152_v45 = vmul.f32 0.5, %v1150_v43 }
 0x5d5   :  { %v1018_v13 = vpop.permute.xlu0 %1017  ;;  %v3137_v53 = vpop.permute.xlu2 %1184 }
 0x5d6   :  { %v3127_v10 = vsel %vm990_vm4, %v1018_v13, %v3053_v15  ;;  %vm1186_vm7 = vcmp.eq.s32.totalorder %v3137_v53, 1 }
 0x5d7   :  { %1124 = vrot.lane.b32.xlu0 %v3127_v10, %s2432_s5 }
 0x5eb   :  { %v1044_v14 = vpop.f32.mrf.mxu0  ;;  %v1057_v16 = vpop.f32.mrf.mxu1 }
 0x5ec   :  { %v1095_v17 = vrot.slane %v1057_v16, 6 }
 0x5ee   :  { %v1096_v22 = vsel %vm335_vm0, %v1044_v14, %v1095_v17 }
 0x5ef   :  { %v1098_v23 = vadd.f32 %v1096_v22, %v1092_v47 }
 0x5f1   :  { %1115 = vrot.lane.b32.xlu2 %v1098_v23, %s2432_s5  ;;  %v1107_v27 = vmul.f32 0.5, %v1098_v23  ;;  %v1112_v36 = vrot.slane %v1098_v23, 2 }
 0x5f3   :  { %v1046_v29 = vpop.f32.mrf.mxu0  ;;  %v1059_v32 = vpop.f32.mrf.mxu1  ;;  %2355 = vtanh.f32 %v1107_v27 }
 0x5f4   :  { %v1164_v1 = vpop.permute.xlu1 %1163 }
 0x5f5   :  { %v1166_v15 = vadd.f32 %v1164_v1, %v1160_v33 }
 0x5f7   :  { %2357 = vtanh.f32 %v1166_v15 }
 0x5f8   :  { %2359 = vtanh.f32 %v1112_v36 }
 0x5f9   :  { %v2356_v35 = vpop.eup %2355  ;;  %2361 = vtanh.f32 %v1152_v45 }
 0x5fa   :  { %v1109_v37 = vadd.f32 1.0, %v2356_v35 }
 0x5fc   :  { %v1110_v39 = vmul.f32 0.5, %v1109_v37 }
 0x5fd   :  { %v2358_v38 = vpop.eup %2357 }
 0x5fe   :  { %1169 = vrot.lane.b32.xlu1 %v2358_v38, %s2432_s5  ;;  %v2360_v40 = vpop.eup %2359 }
 0x5ff   :  { %v1128_v41 = vmul.f32 %v2360_v40, %v1110_v39  ;;  %v2362_v59 = vpop.eup %2361 }
 0x600   :  { %v1154_v46 = vadd.f32 1.0, %v2362_v59 }
 0x602   :  { %v1155_v56 = vmul.f32 0.5, %v1154_v46 }
 0x606   :  { %1130 = vrot.lane.b32.xlu1 %v1128_v41, %s2432_s5 }
 0x60e   :  { %1175 = vperm.xlu1 %2300, %v1173_v49  }
 0x649   :  { %v1125_v28 = vpop.permute.xlu0 %1124 }
 0x64a   :  { %v1127_v7 = vmul.f32 %v1125_v28, %v1110_v39 }
 0x64b   :  { %v1116_v17 = vpop.permute.xlu2 %1115 }
 0x64c   :  { %v1117_v47 = vrot.slane %v1116_v17, 2 }
 0x64e   :  { %v1119_v22 = vmul.f32 0.5, %v1117_v47 }
 0x670   :  { %v1170_v60 = vpop.permute.xlu1 %1169 }
 0x671   :  { %v3139_v2 = vmul.f32 %v1170_v60, %v1155_v56 }
 0x673   :  { %v3146_v24 = vsel %vm1186_vm7, %v3139_v2, %v3072_v0 }
 0x674   :  { %v1246_v3 = vpack.c.bf16 %v3146_v24, %v3146_v24 }
 0x676   :  { %2229 = vmatmul.msk.bf16.vlgmr.msrb.gmra.mxu2 %vm446_vm9, %v1246_v3  ;;  %2230 = vmatmul.msk.bf16.vlgmr.msrb.gmra.mxu3 %vm446_vm9, %v1246_v3 }
 0x677   :  { %1596 = vmatpush.bf16.msrb.mxu2 %v2718_v48  ;;  %1609 = vmatpush.bf16.msrb.mxu3 %v2726_v51 }
 0x678   :  { %v1131_v8 = vpop.permute.xlu1 %1130 }
 0x679   :  { %v1133_v13 = vadd.f32 %v1131_v8, %v1127_v7 }
 0x67b   :  { %2363 = vtanh.f32 %v1133_v13  ;;  %1202 = vst [vmem:[#allocation1] ss:$4 sm:$0xff] %v1133_v13  ;;  %1597 = vmatpush.bf16.msrb.mxu2 %v2745_v58  ;;  %1610 = vmatpush.bf16.msrb.mxu3 %v2755_v61 }
 0x67c   :  { %2365 = vtanh.f32 %v1119_v22 }
 0x67f   :  { %1598 = vmatpush.bf16.msrb.mxu2 %v2781_v6  ;;  %1611 = vmatpush.bf16.msrb.mxu3 %v2794_v11 }
 0x680   :  { %v3170_v29 = vpop.permute.xlu1 %1175 }
 0x681   :  { %v2364_v0 = vpop.eup %2363  ;;  %vm1177_vm12 = vcmp.eq.s32.totalorder %v3170_v29, 1 }
 0x682   :  { %1136 = vrot.lane.b32.xlu0 %v2364_v0, %s2432_s5  ;;  %v1203_v14 = vld.sshfl [vmem:[#allocation1] sm:$0xff pattern:$0x73625140]  ;;  %v2366_v32 = vpop.eup %2365 }
 0x683   :  { %1210 = vst [vmem:[#allocation1] ss:$4 sm:$0xff] %v1166_v15  ;;  %1599 = vmatpush.bf16.msrb.mxu2 %v2817_v19  ;;  %1612 = vmatpush.bf16.msrb.mxu3 %v2821_v20  ;;  %v1121_v15 = vadd.f32 1.0, %v2366_v32 }
 0x68a   :  { %v1211_v16 = vld.sshfl [vmem:[#allocation1] sm:$0xff pattern:$0x73625140] }
 0x68b   :  { %1212 = vrot.lane.b32.xlu2 %v1211_v16, %s2432_s5  ;;  %v1276_v16 = vld [vmem:[#allocation2 + $0x20] sm:$0xf] }
 0x693   :  { %1204 = vrot.lane.b32.xlu2 %v1203_v14, %s2432_s5 }
 0x6e5   :  { %v1213_v23 = vpop.permute.xlu2 %1212 }
 0x6e6   :  { %v3166_v27 = vsel %vm1186_vm7, %v1213_v23, %v3091_v26  ;;  %v1122_v26 = vmul.f32 0.5, %v1121_v15 }
 0x6e7   :  { %1340 = vrot.lane.b32.xlu0 %v3166_v27, %s2432_s5 }
 0x6ed   :  { %v1205_v33 = vpop.permute.xlu2 %1204 }
 0x6ee   :  { %v3176_v1 = vsel %vm1177_vm12, %v1205_v33, %v3127_v10 }
 0x6ef   :  { %1307 = vrot.lane.b32.xlu2 %v3176_v1, %s2432_s5 }
 0x6f4   :  { %v1137_v35 = vpop.permute.xlu0 %1136 }
 0x6f5   :  { %v1139_v36 = vmul.f32 %v1137_v35, %v1122_v26 }
 0x6f7   :  { %v1178_v37 = vsel %vm1177_vm12, %v1139_v36, 0.0  ;;  %v3185_v38 = vsel %vm1177_vm12, %v1139_v36, %v3104_v31 }
 0x6f8   :  { %v1179_v39 = vpack.c.bf16 %v1178_v37, %v1178_v37  ;;  %v1216_v10 = vpack.c.bf16 %v3185_v38, %v3185_v38 }
 0x6f9   :  { %v1259_v40 = vpop.f32.mrf.mxu2  ;;  %v1272_v41 = vpop.f32.mrf.mxu3 }
 0x6fa   :  { %v1286_v49 = vrot.slane %v1272_v41, 6  ;;  %2227 = vmatmul.msk.bf16.vlgmr.msrb.gmra.mxu0 %vm446_vm9, %v1216_v10  ;;  %2228 = vmatmul.msk.bf16.vlgmr.msrb.gmra.mxu1 %vm446_vm9, %v1216_v10  ;;  %1181 = vst.msk [vmem:[#allocation3 + $0x3] sm:$0x1] %vm622_vm11, %v1179_v39 }
 0x6fb   :  { %1566 = vmatpush.bf16.msrb.mxu0 %v2736_v55  ;;  %1579 = vmatpush.bf16.msrb.mxu1 %v2728_v52 }
 0x6fc   :  { %v1287_v31 = vsel %vm335_vm0, %v1259_v40, %v1286_v49 }
 0x6fd   :  { %v1289_v43 = vadd.f32 %v1287_v31, %v1283_v42 }
 0x6ff   :  { %v1323_v45 = vmul.f32 0.5, %v1289_v43  ;;  %1331 = vrot.lane.b32.xlu0 %v1289_v43, %s2432_s5  ;;  %1567 = vmatpush.bf16.msrb.mxu0 %v2779_v5  ;;  %v1328_v56 = vrot.slane %v1289_v43, 2 }
 0x700   :  { %1580 = vmatpush.bf16.msrb.mxu1 %v2757_v62 }
 0x701   :  { %v1261_v59 = vpop.f32.mrf.mxu2  ;;  %v1274_v46 = vpop.f32.mrf.mxu3  ;;  %2367 = vtanh.f32 %v1323_v45 }
 0x702   :  { %2369 = vtanh.f32 %v1328_v56 }
 0x703   :  { %1568 = vmatpush.bf16.msrb.mxu0 %v2815_v18 }
 0x704   :  { %1581 = vmatpush.bf16.msrb.mxu1 %v2796_v12 }
 0x707   :  { %1569 = vmatpush.bf16.msrb.mxu0 %v2836_v25  ;;  %v2368_v60 = vpop.eup %2367 }
 0x708   :  { %1582 = vmatpush.bf16.msrb.mxu1 %v2823_v21  ;;  %v1325_v28 = vadd.f32 1.0, %v2368_v60  ;;  %v2370_v7 = vpop.eup %2369 }
 0x70a   :  { %v1326_v3 = vmul.f32 0.5, %v1325_v28 }
 0x70c   :  { %v1344_v8 = vmul.f32 %v2370_v7, %v1326_v3 }
 0x70e   :  { %1346 = vrot.lane.b32.xlu1 %v1344_v8, %s2432_s5 }
 0x749   :  { %v1308_v46 = vpop.permute.xlu2 %1307 }
 0x759   :  { %v1341_v22 = vpop.permute.xlu0 %1340 }
 0x75a   :  { %v1343_v26 = vmul.f32 %v1341_v22, %v1326_v3 }
 0x771   :  { %v1332_v42 = vpop.permute.xlu0 %1331 }
 0x772   :  { %v1333_v31 = vrot.slane %v1332_v42, 2 }
 0x774   :  { %v1335_v43 = vmul.f32 0.5, %v1333_v31 }
 0x777   :  { %v1229_v13 = vpop.f32.mrf.mxu0  ;;  %v1242_v0 = vpop.f32.mrf.mxu1 }
 0x778   :  { %v1279_v14 = vrot.slane %v1242_v0, 6 }
 0x77a   :  { %v1280_v17 = vsel %vm335_vm0, %v1229_v13, %v1279_v14 }
 0x77b   :  { %v1282_v47 = vadd.f32 %v1280_v17, %v1276_v16 }
 0x77d   :  { %v1290_v23 = vmul.f32 0.5, %v1282_v47  ;;  %v1295_v32 = vrot.slane %v1282_v47, 2 }
 0x77f   :  { %v1231_v33 = vpop.f32.mrf.mxu0  ;;  %v1244_v15 = vpop.f32.mrf.mxu1  ;;  %2371 = vtanh.f32 %v1290_v23 }
 0x780   :  { %v1347_v35 = vpop.permute.xlu1 %1346  ;;  %2373 = vtanh.f32 %v1295_v32 }
 0x781   :  { %v1349_v36 = vadd.f32 %v1347_v35, %v1343_v26 }
 0x783   :  { %2375 = vtanh.f32 %v1349_v36 }
 0x784   :  { %2377 = vtanh.f32 %v1335_v43 }
 0x785   :  { %v2372_v37 = vpop.eup %2371 }
 0x786   :  { %v1292_v39 = vadd.f32 1.0, %v2372_v37  ;;  %v2374_v40 = vpop.eup %2373 }
 0x788   :  { %v1293_v10 = vmul.f32 0.5, %v1292_v39 }
 0x789   :  { %v2376_v41 = vpop.eup %2375 }
 0x78a   :  { %v1311_v49 = vmul.f32 %v2374_v40, %v1293_v10  ;;  %1352 = vrot.lane.b32.xlu1 %v2376_v41, %s2432_s5  ;;  %v2378_v45 = vpop.eup %2377  ;;  %v1310_v28 = vmul.f32 %v1308_v46, %v1293_v10  ;;  %v1447_v40 = vld [vmem:[#allocation2 + $0x28] sm:$0xf] }
 0x78b   :  { %v1337_v59 = vadd.f32 1.0, %v2378_v45 }
 0x78c   :  { %1313 = vrot.lane.b32.xlu0 %v1311_v49, %s2432_s5 }
 0x78d   :  { %v1338_v56 = vmul.f32 0.5, %v1337_v59 }
 0x792   :  { %1298 = vrot.lane.b32.xlu1 %v1282_v47, %s2432_s5 }
 0x7fc   :  { %v1353_v60 = vpop.permute.xlu1 %1352 }
 0x7fd   :  { %v3207_v3 = vmul.f32 %v1353_v60, %v1338_v56 }
 0x7fe   :  { %v1314_v7 = vpop.permute.xlu0 %1313 }
 0x7ff   :  { %v1316_v8 = vadd.f32 %v1314_v7, %v1310_v28  ;;  %v3213_v13 = vsel %vm1177_vm12, %v3207_v3, %v3146_v24 }
 0x800   :  { %v1417_v0 = vpack.c.bf16 %v3213_v13, %v3213_v13 }
 0x801   :  { %2379 = vtanh.f32 %v1316_v8  ;;  %1373 = vst [vmem:[#allocation1] ss:$4 sm:$0xff] %v1316_v8 }
 0x802   :  { %2233 = vmatmul.msk.bf16.vlgmr.msra.gmra.mxu2 %vm446_vm9, %v1417_v0  ;;  %2234 = vmatmul.msk.bf16.vlgmr.msra.gmra.mxu3 %vm446_vm9, %v1417_v0 }
 0x803   :  { %1767 = vmatpush.bf16.msra.mxu2 %v2718_v48  ;;  %1780 = vmatpush.bf16.msra.mxu3 %v2726_v51 }
 0x804   :  { %v1299_v48 = vpop.permute.xlu1 %1298 }
 0x805   :  { %v1300_v51 = vrot.slane %v1299_v48, 2 }
 0x807   :  { %v2380_v14 = vpop.eup %2379  ;;  %1768 = vmatpush.bf16.msra.mxu2 %v2745_v58  ;;  %1781 = vmatpush.bf16.msra.mxu3 %v2755_v61  ;;  %v1302_v17 = vmul.f32 0.5, %v1300_v51 }
 0x808   :  { %1319 = vrot.lane.b32.xlu2 %v2380_v14, %s2432_s5  ;;  %v1374_v16 = vld.sshfl [vmem:[#allocation1] sm:$0xff pattern:$0x73625140] }
 0x809   :  { %1381 = vst [vmem:[#allocation1] ss:$4 sm:$0xff] %v1349_v36  ;;  %2381 = vtanh.f32 %v1302_v17 }
 0x80b   :  { %1769 = vmatpush.bf16.msra.mxu2 %v2781_v6  ;;  %1782 = vmatpush.bf16.msra.mxu3 %v2794_v11 }
 0x80f   :  { %1770 = vmatpush.bf16.msra.mxu2 %v2817_v19  ;;  %1783 = vmatpush.bf16.msra.mxu3 %v2821_v20  ;;  %v2382_v58 = vpop.eup %2381 }
 0x810   :  { %v1382_v24 = vld.sshfl [vmem:[#allocation1] sm:$0xff pattern:$0x73625140]  ;;  %v1304_v47 = vadd.f32 1.0, %v2382_v58 }
 0x811   :  { %1383 = vrot.lane.b32.xlu0 %v1382_v24, %s2432_s5 }
 0x812   :  { %v1305_v61 = vmul.f32 0.5, %v1304_v47 }
 0x819   :  { %1375 = vrot.lane.b32.xlu0 %v1374_v16, %s2432_s5 }
 0x862   :  { %v1320_v22 = vpop.permute.xlu2 %1319 }
 0x863   :  { %v3230_v6 = vmul.f32 %v1320_v22, %v1305_v61 }
 0x865   :  { %v3236_v11 = vsel %vm1186_vm7, %v3230_v6, %v3185_v38 }
 0x866   :  { %v1387_v19 = vpack.c.bf16 %v3236_v11, %v3236_v11 }
 0x868   :  { %2231 = vmatmul.msk.bf16.vlgmr.msra.gmra.mxu0 %vm446_vm9, %v1387_v19  ;;  %2232 = vmatmul.msk.bf16.vlgmr.msra.gmra.mxu1 %vm446_vm9, %v1387_v19 }
 0x869   :  { %1737 = vmatpush.bf16.msra.mxu0 %v2736_v55  ;;  %1750 = vmatpush.bf16.msra.mxu1 %v2728_v52 }
 0x86d   :  { %1738 = vmatpush.bf16.msra.mxu0 %v2779_v5  ;;  %1751 = vmatpush.bf16.msra.mxu1 %v2757_v62  ;;  %v1454_v5 = vld [vmem:[#allocation2 + $0x14] sm:$0xf] }
 0x871   :  { %1739 = vmatpush.bf16.msra.mxu0 %v2815_v18  ;;  %1752 = vmatpush.bf16.msra.mxu1 %v2796_v12 }
 0x875   :  { %1740 = vmatpush.bf16.msra.mxu0 %v2836_v25  ;;  %1753 = vmatpush.bf16.msra.mxu1 %v2823_v21 }
 0x883   :  { %v1384_v20 = vpop.permute.xlu0 %1383 }
 0x884   :  { %v3253_v38 = vsel %vm1177_vm12, %v1384_v20, %v3166_v27 }
 0x885   :  { %1511 = vrot.lane.b32.xlu1 %v3253_v38, %s2432_s5  ;;  %v1430_v52 = vpop.f32.mrf.mxu2  ;;  %v1443_v55 = vpop.f32.mrf.mxu3 }
 0x886   :  { %v1457_v62 = vrot.slane %v1443_v55, 6 }
 0x888   :  { %v1458_v18 = vsel %vm335_vm0, %v1430_v52, %v1457_v62 }
 0x889   :  { %v1460_v12 = vadd.f32 %v1458_v18, %v1454_v5 }
 0x88b   :  { %v1376_v23 = vpop.permute.xlu0 %1375  ;;  %v1494_v25 = vmul.f32 0.5, %v1460_v12  ;;  %v1499_v33 = vrot.slane %v1460_v12, 2 }
 0x88c   :  { %v3261_v21 = vsel %vm1186_vm7, %v1376_v23, %v3176_v1 }
 0x88d   :  { %1502 = vrot.lane.b32.xlu1 %v1460_v12, %s2432_s5  ;;  %1478 = vrot.lane.b32.xlu0 %v3261_v21, %s2432_s5  ;;  %v1432_v27 = vpop.f32.mrf.mxu2  ;;  %v1445_v32 = vpop.f32.mrf.mxu3  ;;  %2383 = vtanh.f32 %v1494_v25 }
 0x88e   :  { %2385 = vtanh.f32 %v1499_v33 }
 0x893   :  { %v2384_v15 = vpop.eup %2383 }
 0x894   :  { %v1496_v26 = vadd.f32 1.0, %v2384_v15  ;;  %v2386_v36 = vpop.eup %2385 }
 0x896   :  { %v1497_v35 = vmul.f32 0.5, %v1496_v26 }
 0x898   :  { %v1515_v37 = vmul.f32 %v2386_v36, %v1497_v35 }
 0x89a   :  { %1517 = vrot.lane.b32.xlu2 %v1515_v37, %s2432_s5 }
 0x8e5   :  { %v1400_v39 = vpop.f32.mrf.mxu0  ;;  %v1413_v1 = vpop.f32.mrf.mxu1 }
 0x8e6   :  { %v1450_v10 = vrot.slane %v1413_v1, 6  ;;  %v1625_v1 = vld [vmem:[#allocation2 + $0xc] sm:$0xf] }
 0x8e8   :  { %v1451_v41 = vsel %vm335_vm0, %v1400_v39, %v1450_v10 }
 0x8e9   :  { %v1453_v49 = vadd.f32 %v1451_v41, %v1447_v40 }
 0x8eb   :  { %v1461_v42 = vmul.f32 0.5, %v1453_v49  ;;  %v1466_v31 = vrot.slane %v1453_v49, 2 }
 0x8ed   :  { %v1402_v43 = vpop.f32.mrf.mxu0  ;;  %v1415_v45 = vpop.f32.mrf.mxu1  ;;  %2387 = vtanh.f32 %v1461_v42 }
 0x8ee   :  { %2389 = vtanh.f32 %v1466_v31 }
 0x8f3   :  { %v2388_v59 = vpop.eup %2387 }
 0x8f4   :  { %v1463_v46 = vadd.f32 1.0, %v2388_v59  ;;  %v2390_v60 = vpop.eup %2389  ;;  %v1518_v0 = vpop.permute.xlu2 %1517 }
 0x8f6   :  { %v1464_v56 = vmul.f32 0.5, %v1463_v46 }
 0x8f7   :  { %v1512_v28 = vpop.permute.xlu1 %1511 }
 0x8f8   :  { %v1514_v7 = vmul.f32 %v1512_v28, %v1497_v35  ;;  %v1482_v8 = vmul.f32 %v2390_v60, %v1464_v56 }
 0x8fa   :  { %v1520_v14 = vadd.f32 %v1518_v0, %v1514_v7  ;;  %1484 = vrot.lane.b32.xlu1 %v1482_v8, %s2432_s5 }
 0x8fc   :  { %2391 = vtanh.f32 %v1520_v14 }
 0x8ff   :  { %v1503_v24 = vpop.permute.xlu1 %1502  ;;  %v1479_v52 = vpop.permute.xlu0 %1478 }
 0x900   :  { %v1504_v48 = vrot.slane %v1503_v24, 2  ;;  %v1481_v55 = vmul.f32 %v1479_v52, %v1464_v56 }
 0x902   :  { %v2392_v16 = vpop.eup %2391  ;;  %v1506_v51 = vmul.f32 0.5, %v1504_v48 }
 0x903   :  { %1523 = vrot.lane.b32.xlu2 %v2392_v16, %s2432_s5 }
 0x904   :  { %2393 = vtanh.f32 %v1506_v51  ;;  %v1618_v51 = vld [vmem:[#allocation2 + $0x30] sm:$0xf] }
 0x90a   :  { %v2394_v17 = vpop.eup %2393 }
 0x90b   :  { %1469 = vrot.lane.b32.xlu2 %v1453_v49, %s2432_s5  ;;  %v1508_v58 = vadd.f32 1.0, %v2394_v17 }
 0x90d   :  { %v1509_v47 = vmul.f32 0.5, %v1508_v58 }
 0x95d   :  { %v1524_v61 = vpop.permute.xlu2 %1523 }
 0x95e   :  { %v3271_v22 = vmul.f32 %v1524_v61, %v1509_v47 }
 0x960   :  { %v3277_v19 = vsel %vm990_vm4, %v3271_v22, %v3213_v13 }
 0x961   :  { %v1588_v20 = vpack.c.bf16 %v3277_v19, %v3277_v19 }
 0x963   :  { %2237 = vmatmul.msk.bf16.vlgmr.msrb.gmra.mxu2 %vm446_vm9, %v1588_v20  ;;  %2238 = vmatmul.msk.bf16.vlgmr.msrb.gmra.mxu3 %vm446_vm9, %v1588_v20 }
 0x965   :  { %v1470_v23 = vpop.permute.xlu2 %1469 }
 0x966   :  { %v1471_v25 = vrot.slane %v1470_v23, 2 }
 0x968   :  { %v1473_v27 = vmul.f32 0.5, %v1471_v25 }
 0x96c   :  { %v1485_v62 = vpop.permute.xlu1 %1484 }
 0x96d   :  { %v1487_v5 = vadd.f32 %v1485_v62, %v1481_v55 }
 0x96f   :  { %2395 = vtanh.f32 %v1487_v5  ;;  %1544 = vst [vmem:[#allocation1] ss:$4 sm:$0xff] %v1487_v5 }
 0x970   :  { %2397 = vtanh.f32 %v1473_v27 }
 0x975   :  { %v2396_v18 = vpop.eup %2395 }
 0x976   :  { %1490 = vrot.lane.b32.xlu0 %v2396_v18, %s2432_s5  ;;  %v1545_v12 = vld.sshfl [vmem:[#allocation1] sm:$0xff pattern:$0x73625140]  ;;  %v2398_v32 = vpop.eup %2397 }
 0x977   :  { %1552 = vst [vmem:[#allocation1] ss:$4 sm:$0xff] %v1520_v14  ;;  %v1475_v33 = vadd.f32 1.0, %v2398_v32 }
 0x979   :  { %v1476_v36 = vmul.f32 0.5, %v1475_v33 }
 0x97e   :  { %v1553_v13 = vld.sshfl [vmem:[#allocation1] sm:$0xff pattern:$0x73625140] }
 0x97f   :  { %1554 = vrot.lane.b32.xlu1 %v1553_v13, %s2432_s5 }
 0x987   :  { %1546 = vrot.lane.b32.xlu1 %v1545_v12, %s2432_s5 }
 0x9e6   :  { %v1601_v15 = vpop.f32.mrf.mxu2  ;;  %v1614_v26 = vpop.f32.mrf.mxu3 }
 0x9e7   :  { %v1628_v35 = vrot.slane %v1614_v26, 6 }
 0x9e8   :  { %v1491_v37 = vpop.permute.xlu0 %1490 }
 0x9e9   :  { %v3286_v39 = vmul.f32 %v1491_v37, %v1476_v36  ;;  %v1629_v10 = vsel %vm335_vm0, %v1601_v15, %v1628_v35 }
 0x9ea   :  { %v1631_v40 = vadd.f32 %v1629_v10, %v1625_v1 }
 0x9eb   :  { %v3293_v41 = vsel %vm999_vm3, %v3286_v39, %v3236_v11 }
 0x9ec   :  { %v1558_v49 = vpack.c.bf16 %v3293_v41, %v3293_v41  ;;  %v1665_v42 = vmul.f32 0.5, %v1631_v40  ;;  %v1670_v45 = vrot.slane %v1631_v40, 2 }
 0x9ee   :  { %2235 = vmatmul.msk.bf16.vlgmr.msrb.gmra.mxu0 %vm446_vm9, %v1558_v49  ;;  %2236 = vmatmul.msk.bf16.vlgmr.msrb.gmra.mxu1 %vm446_vm9, %v1558_v49  ;;  %v1603_v31 = vpop.f32.mrf.mxu2  ;;  %v1616_v43 = vpop.f32.mrf.mxu3  ;;  %2399 = vtanh.f32 %v1665_v42 }
 0x9ef   :  { %2401 = vtanh.f32 %v1670_v45 }
 0x9f1   :  { %v1555_v59 = vpop.permute.xlu1 %1554 }
 0x9f2   :  { %v3302_v46 = vsel %vm990_vm4, %v1555_v59, %v3253_v38 }
 0x9f3   :  { %1682 = vrot.lane.b32.xlu2 %v3302_v46, %s2432_s5 }
 0x9f4   :  { %v2400_v11 = vpop.eup %2399 }
 0x9f5   :  { %v1667_v56 = vadd.f32 1.0, %v2400_v11  ;;  %v2402_v28 = vpop.eup %2401 }
 0x9f7   :  { %v1668_v60 = vmul.f32 0.5, %v1667_v56 }
 0x9f9   :  { %v1547_v7 = vpop.permute.xlu1 %1546  ;;  %v1686_v0 = vmul.f32 %v2402_v28, %v1668_v60 }
 0x9fa   :  { %v3309_v8 = vsel %vm999_vm3, %v1547_v7, %v3261_v21 }
 0x9fb   :  { %1649 = vrot.lane.b32.xlu1 %v3309_v8, %s2432_s5  ;;  %1673 = vrot.lane.b32.xlu2 %v1631_v40, %s2432_s5 }
 0x9fc   :  { %1688 = vrot.lane.b32.xlu0 %v1686_v0, %s2432_s5 }
 0xa4d   :  { %v1683_v38 = vpop.permute.xlu2 %1682 }
 0xa4e   :  { %v1685_v48 = vmul.f32 %v1683_v38, %v1668_v60 }
 0xa55   :  { %v1674_v25 = vpop.permute.xlu2 %1673 }
 0xa56   :  { %v1675_v27 = vrot.slane %v1674_v25, 2 }
 0xa58   :  { %v1677_v32 = vmul.f32 0.5, %v1675_v27 }
 0xa6b   :  { %v1571_v14 = vpop.f32.mrf.mxu0  ;;  %v1584_v16 = vpop.f32.mrf.mxu1 }
 0xa6c   :  { %v1621_v24 = vrot.slane %v1584_v16, 6 }
 0xa6d   :  { %v1650_v33 = vpop.permute.xlu1 %1649 }
 0xa6e   :  { %v1622_v17 = vsel %vm335_vm0, %v1571_v14, %v1621_v24  ;;  %v1689_v58 = vpop.permute.xlu0 %1688 }
 0xa6f   :  { %v1624_v47 = vadd.f32 %v1622_v17, %v1618_v51  ;;  %v1691_v21 = vadd.f32 %v1689_v58, %v1685_v48 }
 0xa71   :  { %v1632_v61 = vmul.f32 0.5, %v1624_v47  ;;  %2403 = vtanh.f32 %v1691_v21  ;;  %v1637_v20 = vrot.slane %v1624_v47, 2 }
 0xa73   :  { %2405 = vtanh.f32 %v1632_v61  ;;  %v1573_v52 = vpop.f32.mrf.mxu0  ;;  %v1586_v55 = vpop.f32.mrf.mxu1 }
 0xa74   :  { %2407 = vtanh.f32 %v1637_v20 }
 0xa75   :  { %2409 = vtanh.f32 %v1677_v32 }
 0xa77   :  { %v2404_v62 = vpop.eup %2403 }
 0xa78   :  { %1694 = vrot.lane.b32.xlu0 %v2404_v62, %s2432_s5 }
 0xa79   :  { %v2406_v5 = vpop.eup %2405 }
 0xa7a   :  { %v1634_v18 = vadd.f32 1.0, %v2406_v5  ;;  %v2408_v13 = vpop.eup %2407 }
 0xa7b   :  { %v2410_v36 = vpop.eup %2409 }
 0xa7c   :  { %v1635_v12 = vmul.f32 0.5, %v1634_v18  ;;  %v1679_v10 = vadd.f32 1.0, %v2410_v36 }
 0xa7e   :  { %v1653_v23 = vmul.f32 %v2408_v13, %v1635_v12  ;;  %v1652_v15 = vmul.f32 %v1650_v33, %v1635_v12  ;;  %v1680_v40 = vmul.f32 0.5, %v1679_v10 }
 0xa80   :  { %1640 = vrot.lane.b32.xlu0 %v1624_v47, %s2432_s5  ;;  %1655 = vrot.lane.b32.xlu2 %v1653_v23, %s2432_s5 }
 0xada   :  { %v1656_v26 = vpop.permute.xlu2 %1655 }
 0xadb   :  { %v1658_v35 = vadd.f32 %v1656_v26, %v1652_v15 }
 0xadd   :  { %2411 = vtanh.f32 %v1658_v35  ;;  %1715 = vst [vmem:[#allocation1] ss:$4 sm:$0xff] %v1658_v35  ;;  %v1789_v35 = vld [vmem:[#allocation2 + $0x38] sm:$0xf] }
 0xae3   :  { %v2412_v37 = vpop.eup %2411 }
 0xae4   :  { %1661 = vrot.lane.b32.xlu1 %v2412_v37, %s2432_s5  ;;  %v1716_v1 = vld.sshfl [vmem:[#allocation1] sm:$0xff pattern:$0x73625140] }
 0xae5   :  { %1723 = vst [vmem:[#allocation1] ss:$4 sm:$0xff] %v1691_v21  ;;  %v1796_v21 = vld [vmem:[#allocation2 + $0x4] sm:$0xf] }
 0xaea   :  { %v1695_v49 = vpop.permute.xlu0 %1694 }
 0xaeb   :  { %v3320_v42 = vmul.f32 %v1695_v49, %v1680_v40 }
 0xaec   :  { %v1724_v31 = vld.sshfl [vmem:[#allocation1] sm:$0xff pattern:$0x73625140] }
 0xaed   :  { %v1721_v43 = vsel %vm803_vm15, %v3320_v42, %v3277_v19  ;;  %1725 = vrot.lane.b32.xlu2 %v1724_v31, %s2432_s5  ;;  %v1359_v19 = vsel %vm1177_vm12, %v3207_v3, 0.0  ;;  %v1701_v30 = vsel %vm803_vm15, %v3320_v42, 0.0 }
 0xaee   :  { %v1759_v45 = vpack.c.bf16 %v1721_v43, %v1721_v43  ;;  %v1360_v38 = vpack.c.bf16 %v1359_v19, %v1359_v19 }
 0xaf0   :  { %2241 = vmatmul.msk.bf16.vlgmr.msra.gmra.mxu2 %vm446_vm9, %v1759_v45  ;;  %2242 = vmatmul.msk.bf16.vlgmr.msra.gmra.mxu3 %vm446_vm9, %v1759_v45  ;;  %v1362_v24 = vrot.slane %v1360_v38, 3  ;;  %v1530_v45 = vsel %vm990_vm4, %v3271_v22, 0.0  ;;  %v1702_v22 = vpack.c.bf16 %v1701_v30, %v1701_v30 }
 0xaf2   :  { %v1641_v59 = vpop.permute.xlu0 %1640  ;;  %v1365_v17 = vsel %vm633_vm13, %v1360_v38, %v1362_v24 }
 0xaf3   :  { %v1642_v11 = vrot.slane %v1641_v59, 2 }
 0xaf5   :  { %1717 = vrot.lane.b32.xlu2 %v1716_v1, %s2432_s5  ;;  %v1644_v56 = vmul.f32 0.5, %v1642_v11 }
 0xaf7   :  { %2413 = vtanh.f32 %v1644_v56 }
 0xafd   :  { %v2414_v7 = vpop.eup %2413 }
 0xafe   :  { %v1646_v16 = vadd.f32 1.0, %v2414_v7 }
 0xb00   :  { %v1647_v48 = vmul.f32 0.5, %v1646_v16 }
 0xb47   :  { %v1726_v60 = vpop.permute.xlu2 %1725 }
 0xb48   :  { %v1728_v28 = vsel %vm803_vm15, %v1726_v60, %v3302_v46 }
 0xb49   :  { %1853 = vrot.lane.b32.xlu0 %v1728_v28, %s2432_s5  ;;  %v1531_v28 = vpack.c.bf16 %v1530_v45, %v1530_v45 }
 0xb4b   :  { %v1533_v19 = vrot.slane %v1531_v28, 3 }
 0xb4d   :  { %v1536_v7 = vsel %vm633_vm13, %v1531_v28, %v1533_v19 }
 0xb4f   :  { %v1718_v0 = vpop.permute.xlu2 %1717 }
 0xb50   :  { %v1720_v14 = vsel %vm812_vm14, %v1718_v0, %v3309_v8 }
 0xb51   :  { %1820 = vrot.lane.b32.xlu2 %v1720_v14, %s2432_s5 }
 0xb56   :  { %v1662_v51 = vpop.permute.xlu1 %1661 }
 0xb57   :  { %v3341_v46 = vmul.f32 %v1662_v51, %v1647_v48  ;;  %v1704_v48 = vrot.slane %v1702_v22, 3 }
 0xb59   :  { %v1713_v29 = vsel %vm812_vm14, %v3341_v46, %v3293_v41  ;;  %1367 = vrot.lane.b32.xlu2 %v1365_v17, %s2432_s5  ;;  %v1707_v51 = vsel %vm633_vm13, %v1702_v22, %v1704_v48  ;;  %v632_v17 = vrot.slane %v2935_v50, 3 }
 0xb5a   :  { %v1729_v3 = vpack.c.bf16 %v1713_v29, %v1713_v29  ;;  %v1187_v29 = vsel %vm1186_vm7, %v3139_v2, 0.0 }
 0xb5c   :  { %2239 = vmatmul.msk.bf16.vlgmr.msra.gmra.mxu0 %vm446_vm9, %v1729_v3  ;;  %2240 = vmatmul.msk.bf16.vlgmr.msra.gmra.mxu1 %vm446_vm9, %v1729_v3  ;;  %vm642_vm9 = vcmask 1040896   ;;  %v1188_v3 = vpack.c.bf16 %v1187_v29, %v1187_v29 }
 0xb5e   :  { %v1190_v34 = vrot.slane %v1188_v3, 3 }
 0xb60   :  { %v1193_v42 = vsel %vm633_vm13, %v1188_v3, %v1190_v34 }
 0xb73   :  { %v1772_v8 = vpop.f32.mrf.mxu2  ;;  %v1785_v58 = vpop.f32.mrf.mxu3 }
 0xb74   :  { %v1799_v47 = vrot.slane %v1785_v58, 6  ;;  %v3381_v58 = vld [vmem:[%s3469_s6] sm:$0xf] }
 0xb76   :  { %v1800_v61 = vsel %vm335_vm0, %v1772_v8, %v1799_v47  ;;  %v636_v8 = vsel %vm633_vm13, %v2935_v50, %v632_v17 }
 0xb77   :  { %v1802_v20 = vadd.f32 %v1800_v61, %v1796_v21 }
 0xb79   :  { %v1836_v52 = vmul.f32 0.5, %v1802_v20  ;;  %1844 = vrot.lane.b32.xlu0 %v1802_v20, %s2432_s5  ;;  %v1841_v41 = vrot.slane %v1802_v20, 2  ;;  %v1000_v20 = vsel %vm999_vm3, %v3065_v63, 0.0 }
 0xb7b   :  { %v1774_v55 = vpop.f32.mrf.mxu2  ;;  %v1787_v62 = vpop.f32.mrf.mxu3  ;;  %2415 = vtanh.f32 %v1836_v52 }
 0xb7c   :  { %2417 = vtanh.f32 %v1841_v41  ;;  %v1001_v62 = vpack.c.bf16 %v1000_v20, %v1000_v20 }
 0xb7e   :  { %v1003_v41 = vrot.slane %v1001_v62, 3 }
 0xb81   :  { %v2416_v5 = vpop.eup %2415 }
 0xb82   :  { %v1838_v18 = vadd.f32 1.0, %v2416_v5  ;;  %v2418_v13 = vpop.eup %2417 }
 0xb84   :  { %v1839_v12 = vmul.f32 0.5, %v1838_v18 }
 0xb86   :  { %v1857_v23 = vmul.f32 %v2418_v13, %v1839_v12 }
 0xb88   :  { %1859 = vrot.lane.b32.xlu1 %v1857_v23, %s2432_s5 }
 0xbab   :  { %v1821_v25 = vpop.permute.xlu2 %1820 }
 0xbb3   :  { %v1368_v27 = vpop.permute.xlu2 %1367 }
 0xbb4   :  { %1370 = vst.msk [vmem:[#allocation3 + $0x3] sm:$0x1] %vm642_vm9, %v1368_v27 }
 0xbbb   :  { %v1939_v32 = vld [vmem:[#allocation3 + $0x3] sm:$0x1]  ;;  %v1854_v0 = vpop.permute.xlu0 %1853 }
 0xbbc   :  { %1947 = vmatpush.bf16.xpose.msrb.mxu3 %v1939_v32  ;;  %v1856_v38 = vmul.f32 %v1854_v0, %v1839_v12  ;;  %v1006_v12 = vsel %vm633_vm13, %v1001_v62, %v1003_v41  ;;  %v1698_v0 = vsel %vm812_vm14, %v3341_v46, 0.0 }
 0xbc3   :  { %1948 = vmatmul.bf16.vlgmr.msrb.gmra.mxu3 %v3381_v58 }
 0xbd9   :  { %v1742_v33 = vpop.f32.mrf.mxu0  ;;  %v1755_v15 = vpop.f32.mrf.mxu1 }
 0xbda   :  { %v1792_v26 = vrot.slane %v1755_v15, 6 }
 0xbdc   :  { %v1793_v36 = vsel %vm335_vm0, %v1742_v33, %v1792_v26  ;;  %v813_v33 = vsel %vm812_vm14, %v2992_v9, 0.0  ;;  %vm1905_vm0 = vcmask 15360  }
 0xbdd   :  { %v1795_v37 = vadd.f32 %v1793_v36, %v1789_v35  ;;  %v814_v26 = vpack.c.bf16 %v813_v33, %v813_v33 }
 0xbdf   :  { %v1803_v1 = vmul.f32 0.5, %v1795_v37  ;;  %v1808_v10 = vrot.slane %v1795_v37, 2 }
 0xbe1   :  { %v1744_v40 = vpop.f32.mrf.mxu0  ;;  %v1757_v49 = vpop.f32.mrf.mxu1  ;;  %2419 = vtanh.f32 %v1803_v1 }
 0xbe2   :  { %2421 = vtanh.f32 %v1808_v10  ;;  %v1356_v49 = vsel %vm1186_vm7, %v3230_v6, 0.0 }
 0xbe7   :  { %v2420_v31 = vpop.eup %2419 }
 0xbe8   :  { %v1805_v43 = vadd.f32 1.0, %v2420_v31  ;;  %v2422_v11 = vpop.eup %2421  ;;  %v1357_v31 = vpack.c.bf16 %v1356_v49, %v1356_v49 }
 0xbea   :  { %v1806_v59 = vmul.f32 0.5, %v1805_v43 }
 0xbeb   :  { %v1845_v47 = vpop.permute.xlu0 %1844 }
 0xbec   :  { %v1824_v56 = vmul.f32 %v2422_v11, %v1806_v59  ;;  %v1823_v60 = vmul.f32 %v1821_v25, %v1806_v59  ;;  %v1846_v21 = vrot.slane %v1845_v47, 2 }
 0xbee   :  { %1826 = vrot.lane.b32.xlu0 %v1824_v56, %s2432_s5  ;;  %v1848_v50 = vmul.f32 0.5, %v1846_v21 }
 0xbf6   :  { %1538 = vrot.lane.b32.xlu0 %v1536_v7, %s2432_s5 }
 0xbfa   :  { %v1860_v14 = vpop.permute.xlu1 %1859 }
 0xbfb   :  { %v1862_v16 = vadd.f32 %v1860_v14, %v1856_v38 }
 0xbfd   :  { %2423 = vtanh.f32 %v1862_v16  ;;  %v1527_v16 = vsel %vm999_vm3, %v3286_v39, 0.0 }
 0xc03   :  { %v2424_v24 = vpop.eup %2423 }
 0xc04   :  { %1865 = vrot.lane.b32.xlu1 %v2424_v24, %s2432_s5  ;;  %v1699_v24 = vpack.c.bf16 %v1698_v0, %v1698_v0 }
 0xc0c   :  { %1811 = vrot.lane.b32.xlu1 %v1795_v37, %s2432_s5  ;;  %v816_v37 = vrot.slane %v814_v26, 3 }
 0xc0e   :  { %v819_v10 = vsel %vm633_vm13, %v814_v26, %v816_v37 }
 0xc14   :  { %1709 = vrot.lane.b32.xlu1 %v1707_v51, %s2432_s5  ;;  %v1528_v51 = vpack.c.bf16 %v1527_v16, %v1527_v16 }
 0xc1c   :  { %638 = vrot.lane.b32.xlu1 %v636_v8, %s2432_s5 }
 0xc24   :  { %1195 = vrot.lane.b32.xlu1 %v1193_v42, %s2432_s5 }
 0xc46   :  { %v1949_v11 = vpop.f32.mrf.mxu3 }
 0xc4e   :  { %v1951_v56 = vpop.f32.mrf.mxu3 }
 0xc60   :  { %v1827_v2 = vpop.permute.xlu0 %1826 }
 0xc61   :  { %v1829_v61 = vadd.f32 %v1827_v2, %v1823_v60 }
 0xc63   :  { %2425 = vtanh.f32 %v1829_v61 }
 0xc64   :  { %2427 = vtanh.f32 %v1848_v50 }
 0xc68   :  { %v1539_v52 = vpop.permute.xlu0 %1538 }
 0xc69   :  { %v2426_v55 = vpop.eup %2425  ;;  %1541 = vst.msk [vmem:[#allocation3 + $0x2] sm:$0x1] %vm642_vm9, %v1539_v52 }
 0xc6a   :  { %1832 = vrot.lane.b32.xlu0 %v2426_v55, %s2432_s5  ;;  %v2428_v5 = vpop.eup %2427 }
 0xc6b   :  { %v1850_v13 = vadd.f32 1.0, %v2428_v5 }
 0xc6d   :  { %v1851_v23 = vmul.f32 0.5, %v1850_v13 }
 0xc70   :  { %v1923_v18 = vld [vmem:[#allocation3 + $0x2] sm:$0x1] }
 0xc71   :  { %1931 = vmatpush.bf16.xpose.msrb.mxu2 %v1923_v18 }
 0xc72   :  { %1008 = vrot.lane.b32.xlu0 %v1006_v12, %s2432_s5 }
 0xc76   :  { %v1866_v25 = vpop.permute.xlu1 %1865 }
 0xc77   :  { %v1868_v63 = vmul.f32 %v1866_v25, %v1851_v23 }
 0xc78   :  { %1932 = vmatmul.bf16.vlgmr.msrb.gmra.mxu2 %v3381_v58 }
 0xc79   :  { %v1872_v27 = vsel %vm619_vm10, %v1868_v63, 0.0 }
 0xc7a   :  { %v1873_v32 = vpack.c.bf16 %v1872_v27, %v1872_v27 }
 0xc7c   :  { %v1875_v15 = vrot.slane %v1873_v32, 3 }
 0xc7e   :  { %v1812_v35 = vpop.permute.xlu1 %1811  ;;  %v1878_v36 = vsel %vm633_vm13, %v1873_v32, %v1875_v15 }
 0xc7f   :  { %1880 = vrot.lane.b32.xlu2 %v1878_v36, %s2432_s5  ;;  %v1813_v45 = vrot.slane %v1812_v35, 2 }
 0xc81   :  { %v1815_v59 = vmul.f32 0.5, %v1813_v45 }
 0xc83   :  { %2429 = vtanh.f32 %v1815_v59 }
 0xc86   :  { %v1710_v1 = vpop.permute.xlu1 %1709 }
 0xc87   :  { %1712 = vst.msk [vmem:[#allocation3 + $0x1] sm:$0x1] %vm642_vm9, %v1710_v1  ;;  %821 = vrot.lane.b32.xlu2 %v819_v10, %s2432_s5 }
 0xc89   :  { %v2430_v60 = vpop.eup %2429 }
 0xc8a   :  { %v1817_v28 = vadd.f32 1.0, %v2430_v60 }
 0xc8c   :  { %v1818_v53 = vmul.f32 0.5, %v1817_v28 }
 0xc8e   :  { %v639_v9 = vpop.permute.xlu1 %638  ;;  %v1907_v40 = vld [vmem:[#allocation3 + $0x1] sm:$0x1] }
 0xc8f   :  { %643 = vst.msk [vmem:[#allocation3 + $0x7] sm:$0x1] %vm642_vm9, %v639_v9  ;;  %1889 = vperm.xlu2 %2301, %v1885_v57   ;;  %1915 = vmatpush.bf16.xpose.msrb.mxu1 %v1907_v40 }
 0xc96   :  { %1916 = vmatmul.bf16.vlgmr.msrb.gmra.mxu1 %v3381_v58  ;;  %v1196_v43 = vpop.permute.xlu1 %1195 }
 0xc97   :  { %1199 = vst.msk [vmem:[#allocation3 + $0x4] sm:$0x1] %vm642_vm9, %v1196_v43 }
 0xc98   :  { %1358 = vst.msk [vmem:[#allocation3 + $0x4] sm:$0x1] %vm622_vm11, %v1357_v31 }
 0xc9f   :  { %v1955_v48 = vld [vmem:[#allocation3 + $0x4] sm:$0x1] }
 0xcd9   :  { %v1881_v19 = vpop.permute.xlu2 %1880 }
 0xcda   :  { %1883 = vst.msk [vmem:[#allocation3] sm:$0x1] %vm642_vm9, %v1881_v19 }
 0xcdc   :  { %v1833_v6 = vpop.permute.xlu0 %1832 }
 0xcdd   :  { %v1835_v7 = vmul.f32 %v1833_v6, %v1818_v53 }
 0xcdf   :  { %v1869_v38 = vsel %vm628_vm8, %v1835_v7, 0.0 }
 0xce0   :  { %v1870_v14 = vpack.c.bf16 %v1869_v38, %v1869_v38 }
 0xce1   :  { %v822_v30 = vpop.permute.xlu2 %821  ;;  %v1886_v22 = vld [vmem:[#allocation3] sm:$0x1] }
 0xce2   :  { %1871 = vst.msk [vmem:[#allocation3 + $0x7] sm:$0x1] %vm622_vm11, %v1870_v14  ;;  %1899 = vmatpush.bf16.xpose.msrb.mxu0 %v1886_v22 }
 0xce3   :  { %825 = vst.msk [vmem:[#allocation3 + $0x6] sm:$0x1] %vm642_vm9, %v822_v30 }
 0xce4   :  { %1700 = vst.msk [vmem:[#allocation3 + $0x6] sm:$0x1] %vm622_vm11, %v1699_v24  ;;  %v1009_v44 = vpop.permute.xlu0 %1008 }
 0xce5   :  { %1012 = vst.msk [vmem:[#allocation3 + $0x5] sm:$0x1] %vm642_vm9, %v1009_v44 }
 0xce6   :  { %1529 = vst.msk [vmem:[#allocation3 + $0x5] sm:$0x1] %vm622_vm11, %v1528_v51 }
 0xce9   :  { %v2003_v4 = vld [vmem:[#allocation3 + $0x7] sm:$0x1]  ;;  %1900 = vmatmul.bf16.vlgmr.msrb.gmra.mxu0 %v3381_v58  ;;  %v1890_v54 = vpop.permute.xlu2 %1889 }
 0xcea   :  { %1963 = vmatpush.bf16.xpose.msra.mxu0 %v1955_v48  ;;  %2011 = vmatpush.bf16.xpose.msra.mxu3 %v2003_v4  ;;  %v1950_v39 = vadd.f32 %v1949_v11, %v1890_v54 }
 0xceb   :  { %v1987_v46 = vld [vmem:[#allocation3 + $0x6] sm:$0x1] }
 0xcec   :  { %1995 = vmatpush.bf16.xpose.msra.mxu2 %v1987_v46  ;;  %2245 = vst.msk [vmem:[%s3471_s8 + $0x18] sm:$0xff] %vm1905_vm0, %v1950_v39 }
 0xced   :  { %v1971_v17 = vld [vmem:[#allocation3 + $0x5] sm:$0x1] }
 0xcee   :  { %1979 = vmatpush.bf16.xpose.msra.mxu1 %v1971_v17 }
 0xcf1   :  { %2012 = vmatmul.bf16.vlgmr.msra.gmra.mxu3 %v3381_v58 }
 0xcf3   :  { %1996 = vmatmul.bf16.vlgmr.msra.gmra.mxu2 %v3381_v58 }
 0xcf5   :  { %1980 = vmatmul.bf16.vlgmr.msra.gmra.mxu1 %v3381_v58 }
 0xcf9   :  { %1964 = vmatmul.bf16.vlgmr.msra.gmra.mxu0 %v3381_v58 }
 0xcfb   :  { %v1933_v29 = vpop.f32.mrf.mxu2 }
 0xcfc   :  { %v1934_v3 = vadd.f32 %v1933_v29, %v1890_v54 }
 0xcfe   :  { %2244 = vst.msk [vmem:[%s3471_s8 + $0x10] sm:$0xff] %vm1905_vm0, %v1934_v3 }
 0xd03   :  { %v1935_v8 = vpop.f32.mrf.mxu2 }
 0xd13   :  { %v1917_v34 = vpop.f32.mrf.mxu1 }
 0xd14   :  { %v1918_v42 = vadd.f32 %v1917_v34, %v1890_v54 }
 0xd16   :  { %2243 = vst.msk [vmem:[%s3471_s8 + $0x8] sm:$0xff] %vm1905_vm0, %v1918_v42 }
 0xd1b   :  { %v1919_v47 = vpop.f32.mrf.mxu1 }
 0xd66   :  { %v1901_v2 = vpop.f32.mrf.mxu0 }
 0xd67   :  { %v1902_v21 = vadd.f32 %v1901_v2, %v1890_v54 }
 0xd69   :  { %1906 = vst.msk [vmem:[%s3471_s8] sm:$0xff] %vm1905_vm0, %v1902_v21 }
 0xd6e   :  { %v1903_v58 = vpop.f32.mrf.mxu0 }
 0xd72   :  { %v1981_v61 = vpop.f32.mrf.mxu1 }
 0xd73   :  { %v1982_v50 = vadd.f32 %v1981_v61, %v1890_v54 }
 0xd74   :  { %v2013_v20 = vpop.f32.mrf.mxu3 }
 0xd75   :  { %2247 = vst.msk [vmem:[%s3471_s8 + $0x28] sm:$0xff] %vm1905_vm0, %v1982_v50  ;;  %v2014_v52 = vadd.f32 %v2013_v20, %v1890_v54 }
 0xd76   :  { %v1997_v55 = vpop.f32.mrf.mxu2  ;;  %v1965_v41 = vpop.f32.mrf.mxu0 }
 0xd77   :  { %v1998_v62 = vadd.f32 %v1997_v55, %v1890_v54  ;;  %2249 = vst.msk [vmem:[%s3471_s8 + $0x38] sm:$0xff] %vm1905_vm0, %v2014_v52  ;;  %v1966_v5 = vadd.f32 %v1965_v41, %v1890_v54 }
 0xd79   :  { %2248 = vst.msk [vmem:[%s3471_s8 + $0x30] sm:$0xff] %vm1905_vm0, %v1998_v62 }
 0xd7a   :  { %2246 = vst.msk [vmem:[%s3471_s8 + $0x20] sm:$0xff] %vm1905_vm0, %v1966_v5  ;;  %v1983_v18 = vpop.f32.mrf.mxu1 }
 0xd7c   :  { %v2015_v12 = vpop.f32.mrf.mxu3 }
 0xd7e   :  { %v1999_v13 = vpop.f32.mrf.mxu2  ;;  %v1967_v23 = vpop.f32.mrf.mxu0 }

</bundles_post_ra>
